<compile_context>
chip_gen: v7x
topology: tpu7x:2x2x1
jax: 0.10.0
libtpu: 0.0.40
codegen_flags: <defaults>
</compile_context>

<pallas_src>
import numpy as np
import jax
import jax.numpy as jnp
from jax import lax
from jax.experimental import pallas as pl
from jax.experimental.pallas import tpu as pltpu


def _sigmoid(z):
    return 1.0 / (1.0 + jnp.exp(-z))


def _sigmoid_eup(z):
    # logistic(z) == 0.5*(tanh(z/2)+1): keeps the transcendental on the EUP slot
    # and avoids a VPU divide.
    return 0.5 * (jnp.tanh(0.5 * z) + 1.0)


# ----------------------------------------------------------------------------
# Offline weight fusion (pure layout plumbing; mathematically exact).
# ----------------------------------------------------------------------------
def build_fused_weights(params, nbr_idx, A, H, n_fc, n_a):
    p = {k: np.asarray(v, dtype=np.float64) for k, v in params.items()}
    AH, AF, AA = A * H, A * n_fc, A * n_a
    G4 = 4 * AH

    w_msg = np.zeros((AH, AF), np.float64)          # h_flat -> sm_flat
    b_msg = np.zeros((1, AF), np.float64)
    w_gm = np.zeros((AF, G4), np.float64)           # sm_flat -> gates (gate-major)
    w_gh = np.zeros((AH, G4), np.float64)           # h_masked_flat -> gates
    w_head = np.zeros((AH, AH + AA), np.float64)    # h_lstm -> [h_att | logits]
    b_head = np.zeros((1, AH + AA), np.float64)

    for a in range(A):
        # fc_m fused with the (static) neighbor gather of hidden states.
        for s, j in enumerate(nbr_idx[a]):
            w_msg[j * H:(j + 1) * H, a * n_fc:(a + 1) * n_fc] += \
                p["wm"][a, s * H:(s + 1) * H, :]
        b_msg[0, a * n_fc:(a + 1) * n_fc] = p["bm"][a]

        # LSTM gate contributions, scattered to gate-major columns
        # (column = g*(A*H) + a*H + k, PyTorch gate order i,f,g,o).
        for g in range(4):
            cols = slice(g * AH + a * H, g * AH + (a + 1) * H)
            w_gm[a * n_fc:(a + 1) * n_fc, cols] = \
                p["wih"][a, 2 * n_fc:3 * n_fc, g * H:(g + 1) * H]
            w_gh[a * H:(a + 1) * H, cols] = p["whh"][a, :, g * H:(g + 1) * H]

        # len-1 self-attention == out_proj(v_proj(.)), fused with the actor head.
        w_vo = p["wv"][a] @ p["wo"][a]
        b_vo = p["bv"][a] @ p["wo"][a] + p["bo"][a]
        w_head[a * H:(a + 1) * H, a * H:(a + 1) * H] = w_vo
        b_head[0, a * H:(a + 1) * H] = b_vo
        w_head[a * H:(a + 1) * H, AH + a * n_a:AH + (a + 1) * n_a] = \
            w_vo @ p["wa"][a]
        b_head[0, AH + a * n_a:AH + (a + 1) * n_a] = b_vo @ p["wa"][a] + p["ba"][a]

    f32 = lambda x: jnp.asarray(x, jnp.float32)
    return dict(w_msg=f32(w_msg), b_msg=f32(b_msg), w_gm=f32(w_gm),
                w_gh=f32(w_gh), w_head=f32(w_head), b_head=f32(b_head))


# ----------------------------------------------------------------------------
# Pallas kernel: the whole recurrence in one program (grid=()).
# ----------------------------------------------------------------------------
def make_kernel(T, A, H, n_fc, n_a):
    AH = A * H

    def kernel(dones_ref, gxp_ref, h0_ref, c0_ref,
               wmsg_ref, bmsg_ref, wgm_ref, wgh_ref, whead_ref, bhead_ref,
               hs_ref, probs_ref, state_ref):

        def step(t, carry):
            h_flat, c_flat = carry                       # (1, A*H) agent-major
            keep = 1.0 - dones_ref[t]                    # scalar from SMEM

            # Message path (fc_m over neighbor hidden states), one 128x128
            # matmul across all agents; uses the UNMASKED previous h.
            sm = jnp.maximum(
                jnp.dot(h_flat, wmsg_ref[...],
                        preferred_element_type=jnp.float32) + bmsg_ref[...],
                0.0)                                     # (1, A*n_fc)

            h_m = h_flat * keep
            c_m = c_flat * keep

            # Gates = precomputed obs/fps contribution (+ biases) + message
            # term + recurrent term.  Columns are gate-major: [i|f|g|o],
            # each A*H wide -> 128-lane-aligned slices below.
            gates = (gxp_ref[pl.ds(t, 1), :]
                     + jnp.dot(sm, wgm_ref[...],
                               preferred_element_type=jnp.float32)
                     + jnp.dot(h_m, wgh_ref[...],
                               preferred_element_type=jnp.float32))
            ig = _sigmoid_eup(gates[:, 0 * AH:1 * AH])
            fg = _sigmoid_eup(gates[:, 1 * AH:2 * AH])
            gg = jnp.tanh(gates[:, 2 * AH:3 * AH])
            og = _sigmoid_eup(gates[:, 3 * AH:4 * AH])
            c_new = fg * c_m + ig * gg
            h_lstm = og * jnp.tanh(c_new)

            # Fused attention + actor head: [h_att | logits] in one matmul.
            head = (jnp.dot(h_lstm, whead_ref[...],
                            preferred_element_type=jnp.float32)
                    + bhead_ref[...])                    # (1, A*H + A*n_a)
            h_att = head[:, :AH]                         # next-step hidden

            # Per-agent softmax on the tiny (A, n_a) logits.
            logits2 = jnp.concatenate(
                [head[:, AH + a * n_a:AH + (a + 1) * n_a] for a in range(A)],
                axis=0)                                  # (A, n_a)
            logits2 = logits2 - jnp.max(logits2, axis=-1, keepdims=True)
            e = jnp.exp(logits2)
            denom = jnp.sum(e, axis=-1, keepdims=True)
            inv = pl.reciprocal(denom, approx=True)      # EUP slot
            inv = inv * (2.0 - denom * inv)              # Newton step -> ~f32 exact
            probs2 = e * inv

            hs_ref[pl.ds(t, 1), :] = h_att               # lane-dense 128-wide row
            probs_ref[pl.ds(t, 1), :, :] = probs2[None, :, :]
            return (h_att, c_new)

        h_fin, c_fin = lax.fori_loop(0, T, step,
                                     (h0_ref[...], c0_ref[...]), unroll=True)
        state_ref[...] = jnp.concatenate([h_fin, c_fin], axis=1)

    return kernel


# ----------------------------------------------------------------------------
# Wrapper: XLA pre-pass + pallas_call + output re-layout.
# ----------------------------------------------------------------------------
def nc_policy_forward(obs, fps, dones, states, params, nbr_idx):
    T, A, n_s = obs.shape
    n_a = fps.shape[-1]
    H = states.shape[-1] // 2
    n_fc = params["bx"].shape[-1]
    n_n = len(nbr_idx[0])
    assert n_n >= 1 and all(len(js) == n_n for js in nbr_idx)
    AH = A * H

    fused = build_fused_weights(params, nbr_idx, A, H, n_fc, n_a)

    # --- time-parallel pre-pass: state-independent projections and their
    # linear contribution to the LSTM gates, for all T steps at once. ---
    nbr = np.asarray(nbr_idx, dtype=np.int32)            # (A, n_n), static
    x_cat = jnp.concatenate(
        [obs] + [obs[:, nbr[:, s], :] for s in range(n_n)], axis=-1)
    p_cat = jnp.concatenate(
        [fps[:, nbr[:, s], :] for s in range(n_n)], axis=-1)
    hi = lax.Precision.HIGHEST
    sx = jax.nn.relu(
        jnp.einsum("tai,aif->taf", x_cat, params["wx"], precision=hi)
        + params["bx"])
    sp = jax.nn.relu(
        jnp.einsum("tai,aif->taf", p_cat, params["wp"], precision=hi)
        + params["bp"])
    wih = params["wih"]
    gxp_ag = (jnp.einsum("taf,afg->tag", sx, wih[:, :n_fc, :], precision=hi)
              + jnp.einsum("taf,afg->tag", sp, wih[:, n_fc:2 * n_fc, :],
                           precision=hi)
              + params["bih"] + params["bhh"])           # (T, A, 4*H)
    # gate-major flat layout: column = g*(A*H) + a*H + k
    gxp = jnp.transpose(gxp_ag.reshape(T, A, 4, H), (0, 2, 1, 3)).reshape(
        T, 4 * AH)

    h0 = states[:, :H].reshape(1, AH)
    c0 = states[:, H:].reshape(1, AH)

    kernel = make_kernel(T, A, H, n_fc, n_a)
    hs_flat, probs, state_flat = pl.pallas_call(
        kernel,
        out_shape=(
            jax.ShapeDtypeStruct((T, AH), jnp.float32),          # hs (lane-dense)
            jax.ShapeDtypeStruct((T, A, n_a), jnp.float32),      # probs
            jax.ShapeDtypeStruct((1, 2 * AH), jnp.float32),      # [h | c] flat
        ),
        in_specs=[pl.BlockSpec(memory_space=pltpu.MemorySpace.SMEM)]
        + [pl.BlockSpec(memory_space=pltpu.MemorySpace.VMEM)] * 9,
    )(dones.astype(jnp.float32), gxp, h0, c0,
      fused["w_msg"], fused["b_msg"], fused["w_gm"], fused["w_gh"],
      fused["w_head"], fused["b_head"])

    hs = hs_flat.reshape(T, A, H)
    new_states = jnp.concatenate(
        [state_flat[:, :AH].reshape(A, H), state_flat[:, AH:].reshape(A, H)],
        axis=1)
    return hs, probs, new_states


# ----------------------------------------------------------------------------
# Pure-JAX reference (unfused, per-agent loops) for validation.
# ----------------------------------------------------------------------------
def reference_forward(obs, fps, dones, states, params, nbr_idx):
    T, n_agent, _ = obs.shape
    n_h = states.shape[-1] // 2
    h = states[:, :n_h]
    c = states[:, n_h:]
    hs_all, probs_all = [], []
    for t in range(T):
        x, p, keep = obs[t], fps[t], 1.0 - dones[t]
        h_rows, c_rows, p_rows = [], [], []
        for i in range(n_agent):
            js = nbr_idx[i]
            x_cat = jnp.concatenate([x[i:i + 1]] + [x[j:j + 1] for j in js], axis=1)
            p_cat = jnp.concatenate([p[j:j + 1] for j in js], axis=1)
            m_cat = jnp.concatenate([h[j:j + 1] for j in js], axis=1)
            sx = jnp.maximum(x_cat @ params["wx"][i] + params["bx"][i], 0.0)
            sp = jnp.maximum(p_cat @ params["wp"][i] + params["bp"][i], 0.0)
            sm = jnp.maximum(m_cat @ params["wm"][i] + params["bm"][i], 0.0)
            s_i = jnp.concatenate([sx, sp, sm], axis=1)
            h_i = h[i:i + 1] * keep
            c_i = c[i:i + 1] * keep
            gates = (s_i @ params["wih"][i] + params["bih"][i]
                     + h_i @ params["whh"][i] + params["bhh"][i])
            ig = _sigmoid(gates[:, 0:n_h])
            fg = _sigmoid(gates[:, n_h:2 * n_h])
            gg = jnp.tanh(gates[:, 2 * n_h:3 * n_h])
            og = _sigmoid(gates[:, 3 * n_h:4 * n_h])
            c_new = fg * c_i + ig * gg
            h_lstm = og * jnp.tanh(c_new)
            v = h_lstm @ params["wv"][i] + params["bv"][i]
            h_att = v @ params["wo"][i] + params["bo"][i]
            logits = h_att @ params["wa"][i] + params["ba"][i]
            logits = logits - jnp.max(logits, axis=-1, keepdims=True)
            e = jnp.exp(logits)
            p_rows.append(e / jnp.sum(e, axis=-1, keepdims=True))
            h_rows.append(h_att)
            c_rows.append(c_new)
        h = jnp.concatenate(h_rows, axis=0)
        c = jnp.concatenate(c_rows, axis=0)
        hs_all.append(h)
        probs_all.append(jnp.concatenate(p_rows, axis=0))
    return jnp.stack(hs_all), jnp.stack(probs_all), jnp.concatenate([h, c], axis=1)


def init_params(key, n_agent, n_s, n_a, n_fc, n_h, n_n):
    """Deterministic synthetic parameters (shapes follow NCMultiAgentPolicy.__init__)."""
    n_ns = n_s * (n_n + 1)
    n_na = n_a * n_n
    shapes = {
        "wx": (n_agent, n_ns, n_fc), "bx": (n_agent, n_fc),
        "wp": (n_agent, n_na, n_fc), "bp": (n_agent, n_fc),
        "wm": (n_agent, n_n * n_h, n_fc), "bm": (n_agent, n_fc),
        "wih": (n_agent, 3 * n_fc, 4 * n_h), "bih": (n_agent, 4 * n_h),
        "whh": (n_agent, n_h, 4 * n_h), "bhh": (n_agent, 4 * n_h),
        "wv": (n_agent, n_h, n_h), "bv": (n_agent, n_h),       # attention V proj
        "wo": (n_agent, n_h, n_h), "bo": (n_agent, n_h),       # attention out proj
        "wa": (n_agent, n_h, n_a), "ba": (n_agent, n_a),       # actor heads
    }
    params = {}
    names = sorted(shapes)
    keys = jax.random.split(key, len(names))
    for k_, name in zip(keys, names):
        shp = shapes[name]
        fan_in = shp[1] if len(shp) == 3 else shp[-1]
        params[name] = jax.random.normal(k_, shp, jnp.float32) / jnp.sqrt(
            jnp.float32(fan_in))
    return params


if __name__ == "__main__":
    n_agent, n_s, n_a, n_fc, n_h, T = 4, 16, 8, 32, 32, 8

    # Ring neighbor mask: every agent has n_n=2 neighbors (identical=True case).
    neighbor_mask = np.zeros((n_agent, n_agent), dtype=np.int32)
    for i in range(n_agent):
        neighbor_mask[i, (i - 1) % n_agent] = 1
        neighbor_mask[i, (i + 1) % n_agent] = 1
    nbr_idx = tuple(tuple(int(j) for j in np.where(neighbor_mask[i])[0])
                    for i in range(n_agent))
    n_n = len(nbr_idx[0])
    assert all(len(js) == n_n for js in nbr_idx)

    key = jax.random.PRNGKey(0)
    k_obs, k_fp, k_done, k_state, k_param = jax.random.split(key, 5)
    obs = jax.random.normal(k_obs, (T, n_agent, n_s), jnp.float32)
    fps = jax.random.uniform(k_fp, (T, n_agent, n_a), dtype=jnp.float32)
    dones = (jax.random.uniform(k_done, (T,)) < 0.2).astype(jnp.float32)
    states = 0.1 * jax.random.normal(k_state, (n_agent, 2 * n_h), jnp.float32)
    params = init_params(k_param, n_agent, n_s, n_a, n_fc, n_h, n_n)

    hs, probs, new_states = nc_policy_forward(obs, fps, dones, states, params, nbr_idx)
    jax.block_until_ready((hs, probs, new_states))

    with jax.default_matmul_precision("highest"):
        ref_hs, ref_probs, ref_states = reference_forward(
            obs, fps, dones, states, params, nbr_idx)

    np.testing.assert_allclose(np.asarray(hs), np.asarray(ref_hs), rtol=5e-3, atol=5e-3)
    np.testing.assert_allclose(np.asarray(probs), np.asarray(ref_probs), rtol=5e-3, atol=5e-3)
    np.testing.assert_allclose(np.asarray(new_states), np.asarray(ref_states), rtol=5e-3, atol=5e-3)

    print("KERNEL_OK")
</pallas_src>

<mosaic_0001>
module attributes {stable_mosaic.version = 11 : i64} {
  func.func @kernel(%arg0: memref<8xf32, #tpu.memory_space<smem>>, %arg1: memref<8x512xf32, #tpu.memory_space<vmem>>, %arg2: memref<1x128xf32, #tpu.memory_space<vmem>>, %arg3: memref<1x128xf32, #tpu.memory_space<vmem>>, %arg4: memref<128x128xf32, #tpu.memory_space<vmem>>, %arg5: memref<1x128xf32, #tpu.memory_space<vmem>>, %arg6: memref<128x512xf32, #tpu.memory_space<vmem>>, %arg7: memref<128x512xf32, #tpu.memory_space<vmem>>, %arg8: memref<128x160xf32, #tpu.memory_space<vmem>>, %arg9: memref<1x160xf32, #tpu.memory_space<vmem>>, %arg10: memref<8x128xf32, #tpu.memory_space<vmem>>, %arg11: memref<8x4x8xf32, #tpu.memory_space<vmem>>, %arg12: memref<1x256xf32, #tpu.memory_space<vmem>>) attributes {dimension_semantics = [], scalar_prefetch = 0 : i64, scratch_operands = 0 : i64, tpu.core_type = #tpu.core_type<tc>} {
    %c0 = arith.constant 0 : index
    %c0_0 = arith.constant 0 : index
    %0 = vector.load %arg2[%c0, %c0_0] : memref<1x128xf32, #tpu.memory_space<vmem>>, vector<1x128xf32>
    %c0_1 = arith.constant 0 : index
    %c0_2 = arith.constant 0 : index
    %1 = vector.load %arg3[%c0_1, %c0_2] : memref<1x128xf32, #tpu.memory_space<vmem>>, vector<1x128xf32>
    %c0_i32 = arith.constant 0 : i32
    %2 = arith.index_cast %c0_i32 : i32 to index
    %3 = memref.load %arg0[%2] : memref<8xf32, #tpu.memory_space<smem>>
    %cst = arith.constant 1.000000e+00 : f32
    %4 = arith.subf %cst, %3 : f32
    %c0_3 = arith.constant 0 : index
    %c0_4 = arith.constant 0 : index
    %5 = vector.load %arg4[%c0_3, %c0_4] : memref<128x128xf32, #tpu.memory_space<vmem>>, vector<128x128xf32>
    %cst_5 = arith.constant dense<0.000000e+00> : vector<1x128xf32>
    %6 = tpu.matmul %0, %5, %cst_5 {dimension_numbers = #tpu.dot_dimension_numbers<[1], [0], [0], [1], [0, 0, 1, 1], [], []>} : vector<1x128xf32>, vector<128x128xf32>, vector<1x128xf32> -> vector<1x128xf32>
    %c0_6 = arith.constant 0 : index
    %c0_7 = arith.constant 0 : index
    %7 = vector.load %arg5[%c0_6, %c0_7] : memref<1x128xf32, #tpu.memory_space<vmem>>, vector<1x128xf32>
    %8 = arith.addf %6, %7 : vector<1x128xf32>
    %cst_8 = arith.constant 0.000000e+00 : f32
    %9 = vector.broadcast %cst_8 : f32 to vector<1x128xf32>
    %10 = arith.maximumf %8, %9 : vector<1x128xf32>
    %11 = vector.broadcast %4 : f32 to vector<1x128xf32>
    %12 = arith.mulf %0, %11 : vector<1x128xf32>
    %13 = vector.broadcast %4 : f32 to vector<1x128xf32>
    %14 = arith.mulf %1, %13 : vector<1x128xf32>
    %15 = arith.index_cast %c0_i32 : i32 to index
    %c0_9 = arith.constant 0 : index
    %16 = vector.load %arg1[%15, %c0_9] : memref<8x512xf32, #tpu.memory_space<vmem>>, vector<1x512xf32>
    %c0_10 = arith.constant 0 : index
    %c0_11 = arith.constant 0 : index
    %17 = vector.load %arg6[%c0_10, %c0_11] : memref<128x512xf32, #tpu.memory_space<vmem>>, vector<128x512xf32>
    %cst_12 = arith.constant dense<0.000000e+00> : vector<1x512xf32>
    %18 = tpu.matmul %10, %17, %cst_12 {dimension_numbers = #tpu.dot_dimension_numbers<[1], [0], [0], [1], [0, 0, 1, 1], [], []>} : vector<1x128xf32>, vector<128x512xf32>, vector<1x512xf32> -> vector<1x512xf32>
    %19 = arith.addf %16, %18 : vector<1x512xf32>
    %c0_13 = arith.constant 0 : index
    %c0_14 = arith.constant 0 : index
    %20 = vector.load %arg7[%c0_13, %c0_14] : memref<128x512xf32, #tpu.memory_space<vmem>>, vector<128x512xf32>
    %cst_15 = arith.constant dense<0.000000e+00> : vector<1x512xf32>
    %21 = tpu.matmul %12, %20, %cst_15 {dimension_numbers = #tpu.dot_dimension_numbers<[1], [0], [0], [1], [0, 0, 1, 1], [], []>} : vector<1x128xf32>, vector<128x512xf32>, vector<1x512xf32> -> vector<1x512xf32>
    %22 = arith.addf %19, %21 : vector<1x512xf32>
    %23 = vector.extract_strided_slice %22 {offsets = [0, 0], sizes = [1, 128], strides = [1, 1]} : vector<1x512xf32> to vector<1x128xf32>
    %cst_16 = arith.constant 5.000000e-01 : f32
    %24 = vector.broadcast %cst_16 : f32 to vector<1x128xf32>
    %25 = arith.mulf %24, %23 : vector<1x128xf32>
    %26 = math.tanh %25 : vector<1x128xf32>
    %cst_17 = arith.constant 1.000000e+00 : f32
    %27 = vector.broadcast %cst_17 : f32 to vector<1x128xf32>
    %28 = arith.addf %26, %27 : vector<1x128xf32>
    %cst_18 = arith.constant 5.000000e-01 : f32
    %29 = vector.broadcast %cst_18 : f32 to vector<1x128xf32>
    %30 = arith.mulf %29, %28 : vector<1x128xf32>
    %31 = vector.extract_strided_slice %22 {offsets = [0, 128], sizes = [1, 128], strides = [1, 1]} : vector<1x512xf32> to vector<1x128xf32>
    %cst_19 = arith.constant 5.000000e-01 : f32
    %32 = vector.broadcast %cst_19 : f32 to vector<1x128xf32>
    %33 = arith.mulf %32, %31 : vector<1x128xf32>
    %34 = math.tanh %33 : vector<1x128xf32>
    %cst_20 = arith.constant 1.000000e+00 : f32
    %35 = vector.broadcast %cst_20 : f32 to vector<1x128xf32>
    %36 = arith.addf %34, %35 : vector<1x128xf32>
    %cst_21 = arith.constant 5.000000e-01 : f32
    %37 = vector.broadcast %cst_21 : f32 to vector<1x128xf32>
    %38 = arith.mulf %37, %36 : vector<1x128xf32>
    %39 = vector.extract_strided_slice %22 {offsets = [0, 256], sizes = [1, 128], strides = [1, 1]} : vector<1x512xf32> to vector<1x128xf32>
    %40 = math.tanh %39 : vector<1x128xf32>
    %41 = vector.extract_strided_slice %22 {offsets = [0, 384], sizes = [1, 128], strides = [1, 1]} : vector<1x512xf32> to vector<1x128xf32>
    %cst_22 = arith.constant 5.000000e-01 : f32
    %42 = vector.broadcast %cst_22 : f32 to vector<1x128xf32>
    %43 = arith.mulf %42, %41 : vector<1x128xf32>
    %44 = math.tanh %43 : vector<1x128xf32>
    %cst_23 = arith.constant 1.000000e+00 : f32
    %45 = vector.broadcast %cst_23 : f32 to vector<1x128xf32>
    %46 = arith.addf %44, %45 : vector<1x128xf32>
    %cst_24 = arith.constant 5.000000e-01 : f32
    %47 = vector.broadcast %cst_24 : f32 to vector<1x128xf32>
    %48 = arith.mulf %47, %46 : vector<1x128xf32>
    %49 = arith.mulf %38, %14 : vector<1x128xf32>
    %50 = arith.mulf %30, %40 : vector<1x128xf32>
    %51 = arith.addf %49, %50 : vector<1x128xf32>
    %52 = math.tanh %51 : vector<1x128xf32>
    %53 = arith.mulf %48, %52 : vector<1x128xf32>
    %c0_25 = arith.constant 0 : index
    %c0_26 = arith.constant 0 : index
    %54 = vector.load %arg8[%c0_25, %c0_26] : memref<128x160xf32, #tpu.memory_space<vmem>>, vector<128x160xf32>
    %cst_27 = arith.constant dense<0.000000e+00> : vector<1x160xf32>
    %55 = tpu.matmul %53, %54, %cst_27 {dimension_numbers = #tpu.dot_dimension_numbers<[1], [0], [0], [1], [0, 0, 1, 1], [], []>} : vector<1x128xf32>, vector<128x160xf32>, vector<1x160xf32> -> vector<1x160xf32>
    %c0_28 = arith.constant 0 : index
    %c0_29 = arith.constant 0 : index
    %56 = vector.load %arg9[%c0_28, %c0_29] : memref<1x160xf32, #tpu.memory_space<vmem>>, vector<1x160xf32>
    %57 = arith.addf %55, %56 : vector<1x160xf32>
    %58 = vector.extract_strided_slice %57 {offsets = [0, 0], sizes = [1, 128], strides = [1, 1]} : vector<1x160xf32> to vector<1x128xf32>
    %59 = vector.extract_strided_slice %57 {offsets = [0, 128], sizes = [1, 8], strides = [1, 1]} : vector<1x160xf32> to vector<1x8xf32>
    %60 = vector.extract_strided_slice %57 {offsets = [0, 136], sizes = [1, 8], strides = [1, 1]} : vector<1x160xf32> to vector<1x8xf32>
    %61 = vector.extract_strided_slice %57 {offsets = [0, 144], sizes = [1, 8], strides = [1, 1]} : vector<1x160xf32> to vector<1x8xf32>
    %62 = vector.extract_strided_slice %57 {offsets = [0, 152], sizes = [1, 8], strides = [1, 1]} : vector<1x160xf32> to vector<1x8xf32>
    %63 = tpu.concatenate %59, %60, %61, %62 in 0 : vector<1x8xf32>, vector<1x8xf32>, vector<1x8xf32>, vector<1x8xf32> -> vector<4x8xf32>
    %cst_30 = arith.constant dense<0xFF800000> : vector<4xf32>
    %64 = vector.multi_reduction <maximumf>, %63, %cst_30 [1] : vector<4x8xf32> to vector<4xf32>
    %65 = vector.shape_cast %64 : vector<4xf32> to vector<4x1xf32>
    %66 = vector.broadcast %65 : vector<4x1xf32> to vector<4x8xf32>
    %67 = arith.subf %63, %66 : vector<4x8xf32>
    %68 = math.exp %67 : vector<4x8xf32>
    %cst_31 = arith.constant dense<0.000000e+00> : vector<4xf32>
    %69 = vector.multi_reduction <add>, %68, %cst_31 [1] : vector<4x8xf32> to vector<4xf32>
    %70 = vector.shape_cast %69 : vector<4xf32> to vector<4x1xf32>
    %71 = tpu.reciprocal %70 {approx = true} : vector<4x1xf32> -> vector<4x1xf32>
    %72 = arith.mulf %70, %71 : vector<4x1xf32>
    %cst_32 = arith.constant 2.000000e+00 : f32
    %73 = vector.broadcast %cst_32 : f32 to vector<4x1xf32>
    %74 = arith.subf %73, %72 : vector<4x1xf32>
    %75 = arith.mulf %71, %74 : vector<4x1xf32>
    %76 = vector.broadcast %75 : vector<4x1xf32> to vector<4x8xf32>
    %77 = arith.mulf %68, %76 : vector<4x8xf32>
    %78 = arith.index_cast %c0_i32 : i32 to index
    %c0_33 = arith.constant 0 : index
    %79 = vector.load %arg10[%78, %c0_33] : memref<8x128xf32, #tpu.memory_space<vmem>>, vector<1x128xf32>
    tpu.vector_store %arg10[%78, %c0_33], %58 {strides = array<i32>} : memref<8x128xf32, #tpu.memory_space<vmem>>, vector<1x128xf32>,
    %80 = vector.shape_cast %77 : vector<4x8xf32> to vector<1x4x8xf32>
    %81 = arith.index_cast %c0_i32 : i32 to index
    %c0_34 = arith.constant 0 : index
    %c0_35 = arith.constant 0 : index
    %82 = vector.load %arg11[%81, %c0_34, %c0_35] : memref<8x4x8xf32, #tpu.memory_space<vmem>>, vector<1x4x8xf32>
    tpu.vector_store %arg11[%81, %c0_34, %c0_35], %80 {strides = array<i32>} : memref<8x4x8xf32, #tpu.memory_space<vmem>>, vector<1x4x8xf32>,
    %c1_i32 = arith.constant 1 : i32
    %83 = arith.index_cast %c1_i32 : i32 to index
    %84 = memref.load %arg0[%83] : memref<8xf32, #tpu.memory_space<smem>>
    %cst_36 = arith.constant 1.000000e+00 : f32
    %85 = arith.subf %cst_36, %84 : f32
    %c0_37 = arith.constant 0 : index
    %c0_38 = arith.constant 0 : index
    %86 = vector.load %arg4[%c0_37, %c0_38] : memref<128x128xf32, #tpu.memory_space<vmem>>, vector<128x128xf32>
    %cst_39 = arith.constant dense<0.000000e+00> : vector<1x128xf32>
    %87 = tpu.matmul %58, %86, %cst_39 {dimension_numbers = #tpu.dot_dimension_numbers<[1], [0], [0], [1], [0, 0, 1, 1], [], []>} : vector<1x128xf32>, vector<128x128xf32>, vector<1x128xf32> -> vector<1x128xf32>
    %c0_40 = arith.constant 0 : index
    %c0_41 = arith.constant 0 : index
    %88 = vector.load %arg5[%c0_40, %c0_41] : memref<1x128xf32, #tpu.memory_space<vmem>>, vector<1x128xf32>
    %89 = arith.addf %87, %88 : vector<1x128xf32>
    %cst_42 = arith.constant 0.000000e+00 : f32
    %90 = vector.broadcast %cst_42 : f32 to vector<1x128xf32>
    %91 = arith.maximumf %89, %90 : vector<1x128xf32>
    %92 = vector.broadcast %85 : f32 to vector<1x128xf32>
    %93 = arith.mulf %58, %92 : vector<1x128xf32>
    %94 = vector.broadcast %85 : f32 to vector<1x128xf32>
    %95 = arith.mulf %51, %94 : vector<1x128xf32>
    %96 = arith.index_cast %c1_i32 : i32 to index
    %c0_43 = arith.constant 0 : index
    %97 = vector.load %arg1[%96, %c0_43] : memref<8x512xf32, #tpu.memory_space<vmem>>, vector<1x512xf32>
    %c0_44 = arith.constant 0 : index
    %c0_45 = arith.constant 0 : index
    %98 = vector.load %arg6[%c0_44, %c0_45] : memref<128x512xf32, #tpu.memory_space<vmem>>, vector<128x512xf32>
    %cst_46 = arith.constant dense<0.000000e+00> : vector<1x512xf32>
    %99 = tpu.matmul %91, %98, %cst_46 {dimension_numbers = #tpu.dot_dimension_numbers<[1], [0], [0], [1], [0, 0, 1, 1], [], []>} : vector<1x128xf32>, vector<128x512xf32>, vector<1x512xf32> -> vector<1x512xf32>
    %100 = arith.addf %97, %99 : vector<1x512xf32>
    %c0_47 = arith.constant 0 : index
    %c0_48 = arith.constant 0 : index
    %101 = vector.load %arg7[%c0_47, %c0_48] : memref<128x512xf32, #tpu.memory_space<vmem>>, vector<128x512xf32>
    %cst_49 = arith.constant dense<0.000000e+00> : vector<1x512xf32>
    %102 = tpu.matmul %93, %101, %cst_49 {dimension_numbers = #tpu.dot_dimension_numbers<[1], [0], [0], [1], [0, 0, 1, 1], [], []>} : vector<1x128xf32>, vector<128x512xf32>, vector<1x512xf32> -> vector<1x512xf32>
    %103 = arith.addf %100, %102 : vector<1x512xf32>
    %104 = vector.extract_strided_slice %103 {offsets = [0, 0], sizes = [1, 128], strides = [1, 1]} : vector<1x512xf32> to vector<1x128xf32>
    %cst_50 = arith.constant 5.000000e-01 : f32
    %105 = vector.broadcast %cst_50 : f32 to vector<1x128xf32>
    %106 = arith.mulf %105, %104 : vector<1x128xf32>
    %107 = math.tanh %106 : vector<1x128xf32>
    %cst_51 = arith.constant 1.000000e+00 : f32
    %108 = vector.broadcast %cst_51 : f32 to vector<1x128xf32>
    %109 = arith.addf %107, %108 : vector<1x128xf32>
    %cst_52 = arith.constant 5.000000e-01 : f32
    %110 = vector.broadcast %cst_52 : f32 to vector<1x128xf32>
    %111 = arith.mulf %110, %109 : vector<1x128xf32>
    %112 = vector.extract_strided_slice %103 {offsets = [0, 128], sizes = [1, 128], strides = [1, 1]} : vector<1x512xf32> to vector<1x128xf32>
    %cst_53 = arith.constant 5.000000e-01 : f32
    %113 = vector.broadcast %cst_53 : f32 to vector<1x128xf32>
    %114 = arith.mulf %113, %112 : vector<1x128xf32>
    %115 = math.tanh %114 : vector<1x128xf32>
    %cst_54 = arith.constant 1.000000e+00 : f32
    %116 = vector.broadcast %cst_54 : f32 to vector<1x128xf32>
    %117 = arith.addf %115, %116 : vector<1x128xf32>
    %cst_55 = arith.constant 5.000000e-01 : f32
    %118 = vector.broadcast %cst_55 : f32 to vector<1x128xf32>
    %119 = arith.mulf %118, %117 : vector<1x128xf32>
    %120 = vector.extract_strided_slice %103 {offsets = [0, 256], sizes = [1, 128], strides = [1, 1]} : vector<1x512xf32> to vector<1x128xf32>
    %121 = math.tanh %120 : vector<1x128xf32>
    %122 = vector.extract_strided_slice %103 {offsets = [0, 384], sizes = [1, 128], strides = [1, 1]} : vector<1x512xf32> to vector<1x128xf32>
    %cst_56 = arith.constant 5.000000e-01 : f32
    %123 = vector.broadcast %cst_56 : f32 to vector<1x128xf32>
    %124 = arith.mulf %123, %122 : vector<1x128xf32>
    %125 = math.tanh %124 : vector<1x128xf32>
    %cst_57 = arith.constant 1.000000e+00 : f32
    %126 = vector.broadcast %cst_57 : f32 to vector<1x128xf32>
    %127 = arith.addf %125, %126 : vector<1x128xf32>
    %cst_58 = arith.constant 5.000000e-01 : f32
    %128 = vector.broadcast %cst_58 : f32 to vector<1x128xf32>
    %129 = arith.mulf %128, %127 : vector<1x128xf32>
    %130 = arith.mulf %119, %95 : vector<1x128xf32>
    %131 = arith.mulf %111, %121 : vector<1x128xf32>
    %132 = arith.addf %130, %131 : vector<1x128xf32>
    %133 = math.tanh %132 : vector<1x128xf32>
    %134 = arith.mulf %129, %133 : vector<1x128xf32>
    %c0_59 = arith.constant 0 : index
    %c0_60 = arith.constant 0 : index
    %135 = vector.load %arg8[%c0_59, %c0_60] : memref<128x160xf32, #tpu.memory_space<vmem>>, vector<128x160xf32>
    %cst_61 = arith.constant dense<0.000000e+00> : vector<1x160xf32>
    %136 = tpu.matmul %134, %135, %cst_61 {dimension_numbers = #tpu.dot_dimension_numbers<[1], [0], [0], [1], [0, 0, 1, 1], [], []>} : vector<1x128xf32>, vector<128x160xf32>, vector<1x160xf32> -> vector<1x160xf32>
    %c0_62 = arith.constant 0 : index
    %c0_63 = arith.constant 0 : index
    %137 = vector.load %arg9[%c0_62, %c0_63] : memref<1x160xf32, #tpu.memory_space<vmem>>, vector<1x160xf32>
    %138 = arith.addf %136, %137 : vector<1x160xf32>
    %139 = vector.extract_strided_slice %138 {offsets = [0, 0], sizes = [1, 128], strides = [1, 1]} : vector<1x160xf32> to vector<1x128xf32>
    %140 = vector.extract_strided_slice %138 {offsets = [0, 128], sizes = [1, 8], strides = [1, 1]} : vector<1x160xf32> to vector<1x8xf32>
    %141 = vector.extract_strided_slice %138 {offsets = [0, 136], sizes = [1, 8], strides = [1, 1]} : vector<1x160xf32> to vector<1x8xf32>
    %142 = vector.extract_strided_slice %138 {offsets = [0, 144], sizes = [1, 8], strides = [1, 1]} : vector<1x160xf32> to vector<1x8xf32>
    %143 = vector.extract_strided_slice %138 {offsets = [0, 152], sizes = [1, 8], strides = [1, 1]} : vector<1x160xf32> to vector<1x8xf32>
    %144 = tpu.concatenate %140, %141, %142, %143 in 0 : vector<1x8xf32>, vector<1x8xf32>, vector<1x8xf32>, vector<1x8xf32> -> vector<4x8xf32>
    %cst_64 = arith.constant dense<0xFF800000> : vector<4xf32>
    %145 = vector.multi_reduction <maximumf>, %144, %cst_64 [1] : vector<4x8xf32> to vector<4xf32>
    %146 = vector.shape_cast %145 : vector<4xf32> to vector<4x1xf32>
    %147 = vector.broadcast %146 : vector<4x1xf32> to vector<4x8xf32>
    %148 = arith.subf %144, %147 : vector<4x8xf32>
    %149 = math.exp %148 : vector<4x8xf32>
    %cst_65 = arith.constant dense<0.000000e+00> : vector<4xf32>
    %150 = vector.multi_reduction <add>, %149, %cst_65 [1] : vector<4x8xf32> to vector<4xf32>
    %151 = vector.shape_cast %150 : vector<4xf32> to vector<4x1xf32>
    %152 = tpu.reciprocal %151 {approx = true} : vector<4x1xf32> -> vector<4x1xf32>
    %153 = arith.mulf %151, %152 : vector<4x1xf32>
    %cst_66 = arith.constant 2.000000e+00 : f32
    %154 = vector.broadcast %cst_66 : f32 to vector<4x1xf32>
    %155 = arith.subf %154, %153 : vector<4x1xf32>
    %156 = arith.mulf %152, %155 : vector<4x1xf32>
    %157 = vector.broadcast %156 : vector<4x1xf32> to vector<4x8xf32>
    %158 = arith.mulf %149, %157 : vector<4x8xf32>
    %159 = arith.index_cast %c1_i32 : i32 to index
    %c0_67 = arith.constant 0 : index
    %160 = vector.load %arg10[%159, %c0_67] : memref<8x128xf32, #tpu.memory_space<vmem>>, vector<1x128xf32>
    tpu.vector_store %arg10[%159, %c0_67], %139 {strides = array<i32>} : memref<8x128xf32, #tpu.memory_space<vmem>>, vector<1x128xf32>,
    %161 = vector.shape_cast %158 : vector<4x8xf32> to vector<1x4x8xf32>
    %162 = arith.index_cast %c1_i32 : i32 to index
    %c0_68 = arith.constant 0 : index
    %c0_69 = arith.constant 0 : index
    %163 = vector.load %arg11[%162, %c0_68, %c0_69] : memref<8x4x8xf32, #tpu.memory_space<vmem>>, vector<1x4x8xf32>
    tpu.vector_store %arg11[%162, %c0_68, %c0_69], %161 {strides = array<i32>} : memref<8x4x8xf32, #tpu.memory_space<vmem>>, vector<1x4x8xf32>,
    %c2_i32 = arith.constant 2 : i32
    %164 = arith.index_cast %c2_i32 : i32 to index
    %165 = memref.load %arg0[%164] : memref<8xf32, #tpu.memory_space<smem>>
    %cst_70 = arith.constant 1.000000e+00 : f32
    %166 = arith.subf %cst_70, %165 : f32
    %c0_71 = arith.constant 0 : index
    %c0_72 = arith.constant 0 : index
    %167 = vector.load %arg4[%c0_71, %c0_72] : memref<128x128xf32, #tpu.memory_space<vmem>>, vector<128x128xf32>
    %cst_73 = arith.constant dense<0.000000e+00> : vector<1x128xf32>
    %168 = tpu.matmul %139, %167, %cst_73 {dimension_numbers = #tpu.dot_dimension_numbers<[1], [0], [0], [1], [0, 0, 1, 1], [], []>} : vector<1x128xf32>, vector<128x128xf32>, vector<1x128xf32> -> vector<1x128xf32>
    %c0_74 = arith.constant 0 : index
    %c0_75 = arith.constant 0 : index
    %169 = vector.load %arg5[%c0_74, %c0_75] : memref<1x128xf32, #tpu.memory_space<vmem>>, vector<1x128xf32>
    %170 = arith.addf %168, %169 : vector<1x128xf32>
    %cst_76 = arith.constant 0.000000e+00 : f32
    %171 = vector.broadcast %cst_76 : f32 to vector<1x128xf32>
    %172 = arith.maximumf %170, %171 : vector<1x128xf32>
    %173 = vector.broadcast %166 : f32 to vector<1x128xf32>
    %174 = arith.mulf %139, %173 : vector<1x128xf32>
    %175 = vector.broadcast %166 : f32 to vector<1x128xf32>
    %176 = arith.mulf %132, %175 : vector<1x128xf32>
    %177 = arith.index_cast %c2_i32 : i32 to index
    %c0_77 = arith.constant 0 : index
    %178 = vector.load %arg1[%177, %c0_77] : memref<8x512xf32, #tpu.memory_space<vmem>>, vector<1x512xf32>
    %c0_78 = arith.constant 0 : index
    %c0_79 = arith.constant 0 : index
    %179 = vector.load %arg6[%c0_78, %c0_79] : memref<128x512xf32, #tpu.memory_space<vmem>>, vector<128x512xf32>
    %cst_80 = arith.constant dense<0.000000e+00> : vector<1x512xf32>
    %180 = tpu.matmul %172, %179, %cst_80 {dimension_numbers = #tpu.dot_dimension_numbers<[1], [0], [0], [1], [0, 0, 1, 1], [], []>} : vector<1x128xf32>, vector<128x512xf32>, vector<1x512xf32> -> vector<1x512xf32>
    %181 = arith.addf %178, %180 : vector<1x512xf32>
    %c0_81 = arith.constant 0 : index
    %c0_82 = arith.constant 0 : index
    %182 = vector.load %arg7[%c0_81, %c0_82] : memref<128x512xf32, #tpu.memory_space<vmem>>, vector<128x512xf32>
    %cst_83 = arith.constant dense<0.000000e+00> : vector<1x512xf32>
    %183 = tpu.matmul %174, %182, %cst_83 {dimension_numbers = #tpu.dot_dimension_numbers<[1], [0], [0], [1], [0, 0, 1, 1], [], []>} : vector<1x128xf32>, vector<128x512xf32>, vector<1x512xf32> -> vector<1x512xf32>
    %184 = arith.addf %181, %183 : vector<1x512xf32>
    %185 = vector.extract_strided_slice %184 {offsets = [0, 0], sizes = [1, 128], strides = [1, 1]} : vector<1x512xf32> to vector<1x128xf32>
    %cst_84 = arith.constant 5.000000e-01 : f32
    %186 = vector.broadcast %cst_84 : f32 to vector<1x128xf32>
    %187 = arith.mulf %186, %185 : vector<1x128xf32>
    %188 = math.tanh %187 : vector<1x128xf32>
    %cst_85 = arith.constant 1.000000e+00 : f32
    %189 = vector.broadcast %cst_85 : f32 to vector<1x128xf32>
    %190 = arith.addf %188, %189 : vector<1x128xf32>
    %cst_86 = arith.constant 5.000000e-01 : f32
    %191 = vector.broadcast %cst_86 : f32 to vector<1x128xf32>
    %192 = arith.mulf %191, %190 : vector<1x128xf32>
    %193 = vector.extract_strided_slice %184 {offsets = [0, 128], sizes = [1, 128], strides = [1, 1]} : vector<1x512xf32> to vector<1x128xf32>
    %cst_87 = arith.constant 5.000000e-01 : f32
    %194 = vector.broadcast %cst_87 : f32 to vector<1x128xf32>
    %195 = arith.mulf %194, %193 : vector<1x128xf32>
    %196 = math.tanh %195 : vector<1x128xf32>
    %cst_88 = arith.constant 1.000000e+00 : f32
    %197 = vector.broadcast %cst_88 : f32 to vector<1x128xf32>
    %198 = arith.addf %196, %197 : vector<1x128xf32>
    %cst_89 = arith.constant 5.000000e-01 : f32
    %199 = vector.broadcast %cst_89 : f32 to vector<1x128xf32>
    %200 = arith.mulf %199, %198 : vector<1x128xf32>
    %201 = vector.extract_strided_slice %184 {offsets = [0, 256], sizes = [1, 128], strides = [1, 1]} : vector<1x512xf32> to vector<1x128xf32>
    %202 = math.tanh %201 : vector<1x128xf32>
    %203 = vector.extract_strided_slice %184 {offsets = [0, 384], sizes = [1, 128], strides = [1, 1]} : vector<1x512xf32> to vector<1x128xf32>
    %cst_90 = arith.constant 5.000000e-01 : f32
    %204 = vector.broadcast %cst_90 : f32 to vector<1x128xf32>
    %205 = arith.mulf %204, %203 : vector<1x128xf32>
    %206 = math.tanh %205 : vector<1x128xf32>
    %cst_91 = arith.constant 1.000000e+00 : f32
    %207 = vector.broadcast %cst_91 : f32 to vector<1x128xf32>
    %208 = arith.addf %206, %207 : vector<1x128xf32>
    %cst_92 = arith.constant 5.000000e-01 : f32
    %209 = vector.broadcast %cst_92 : f32 to vector<1x128xf32>
    %210 = arith.mulf %209, %208 : vector<1x128xf32>
    %211 = arith.mulf %200, %176 : vector<1x128xf32>
    %212 = arith.mulf %192, %202 : vector<1x128xf32>
    %213 = arith.addf %211, %212 : vector<1x128xf32>
    %214 = math.tanh %213 : vector<1x128xf32>
    %215 = arith.mulf %210, %214 : vector<1x128xf32>
    %c0_93 = arith.constant 0 : index
    %c0_94 = arith.constant 0 : index
    %216 = vector.load %arg8[%c0_93, %c0_94] : memref<128x160xf32, #tpu.memory_space<vmem>>, vector<128x160xf32>
    %cst_95 = arith.constant dense<0.000000e+00> : vector<1x160xf32>
    %217 = tpu.matmul %215, %216, %cst_95 {dimension_numbers = #tpu.dot_dimension_numbers<[1], [0], [0], [1], [0, 0, 1, 1], [], []>} : vector<1x128xf32>, vector<128x160xf32>, vector<1x160xf32> -> vector<1x160xf32>
    %c0_96 = arith.constant 0 : index
    %c0_97 = arith.constant 0 : index
    %218 = vector.load %arg9[%c0_96, %c0_97] : memref<1x160xf32, #tpu.memory_space<vmem>>, vector<1x160xf32>
    %219 = arith.addf %217, %218 : vector<1x160xf32>
    %220 = vector.extract_strided_slice %219 {offsets = [0, 0], sizes = [1, 128], strides = [1, 1]} : vector<1x160xf32> to vector<1x128xf32>
    %221 = vector.extract_strided_slice %219 {offsets = [0, 128], sizes = [1, 8], strides = [1, 1]} : vector<1x160xf32> to vector<1x8xf32>
    %222 = vector.extract_strided_slice %219 {offsets = [0, 136], sizes = [1, 8], strides = [1, 1]} : vector<1x160xf32> to vector<1x8xf32>
    %223 = vector.extract_strided_slice %219 {offsets = [0, 144], sizes = [1, 8], strides = [1, 1]} : vector<1x160xf32> to vector<1x8xf32>
    %224 = vector.extract_strided_slice %219 {offsets = [0, 152], sizes = [1, 8], strides = [1, 1]} : vector<1x160xf32> to vector<1x8xf32>
    %225 = tpu.concatenate %221, %222, %223, %224 in 0 : vector<1x8xf32>, vector<1x8xf32>, vector<1x8xf32>, vector<1x8xf32> -> vector<4x8xf32>
    %cst_98 = arith.constant dense<0xFF800000> : vector<4xf32>
    %226 = vector.multi_reduction <maximumf>, %225, %cst_98 [1] : vector<4x8xf32> to vector<4xf32>
    %227 = vector.shape_cast %226 : vector<4xf32> to vector<4x1xf32>
    %228 = vector.broadcast %227 : vector<4x1xf32> to vector<4x8xf32>
    %229 = arith.subf %225, %228 : vector<4x8xf32>
    %230 = math.exp %229 : vector<4x8xf32>
    %cst_99 = arith.constant dense<0.000000e+00> : vector<4xf32>
    %231 = vector.multi_reduction <add>, %230, %cst_99 [1] : vector<4x8xf32> to vector<4xf32>
    %232 = vector.shape_cast %231 : vector<4xf32> to vector<4x1xf32>
    %233 = tpu.reciprocal %232 {approx = true} : vector<4x1xf32> -> vector<4x1xf32>
    %234 = arith.mulf %232, %233 : vector<4x1xf32>
    %cst_100 = arith.constant 2.000000e+00 : f32
    %235 = vector.broadcast %cst_100 : f32 to vector<4x1xf32>
    %236 = arith.subf %235, %234 : vector<4x1xf32>
    %237 = arith.mulf %233, %236 : vector<4x1xf32>
    %238 = vector.broadcast %237 : vector<4x1xf32> to vector<4x8xf32>
    %239 = arith.mulf %230, %238 : vector<4x8xf32>
    %240 = arith.index_cast %c2_i32 : i32 to index
    %c0_101 = arith.constant 0 : index
    %241 = vector.load %arg10[%240, %c0_101] : memref<8x128xf32, #tpu.memory_space<vmem>>, vector<1x128xf32>
    tpu.vector_store %arg10[%240, %c0_101], %220 {strides = array<i32>} : memref<8x128xf32, #tpu.memory_space<vmem>>, vector<1x128xf32>,
    %242 = vector.shape_cast %239 : vector<4x8xf32> to vector<1x4x8xf32>
    %243 = arith.index_cast %c2_i32 : i32 to index
    %c0_102 = arith.constant 0 : index
    %c0_103 = arith.constant 0 : index
    %244 = vector.load %arg11[%243, %c0_102, %c0_103] : memref<8x4x8xf32, #tpu.memory_space<vmem>>, vector<1x4x8xf32>
    tpu.vector_store %arg11[%243, %c0_102, %c0_103], %242 {strides = array<i32>} : memref<8x4x8xf32, #tpu.memory_space<vmem>>, vector<1x4x8xf32>,
    %c3_i32 = arith.constant 3 : i32
    %245 = arith.index_cast %c3_i32 : i32 to index
    %246 = memref.load %arg0[%245] : memref<8xf32, #tpu.memory_space<smem>>
    %cst_104 = arith.constant 1.000000e+00 : f32
    %247 = arith.subf %cst_104, %246 : f32
    %c0_105 = arith.constant 0 : index
    %c0_106 = arith.constant 0 : index
    %248 = vector.load %arg4[%c0_105, %c0_106] : memref<128x128xf32, #tpu.memory_space<vmem>>, vector<128x128xf32>
    %cst_107 = arith.constant dense<0.000000e+00> : vector<1x128xf32>
    %249 = tpu.matmul %220, %248, %cst_107 {dimension_numbers = #tpu.dot_dimension_numbers<[1], [0], [0], [1], [0, 0, 1, 1], [], []>} : vector<1x128xf32>, vector<128x128xf32>, vector<1x128xf32> -> vector<1x128xf32>
    %c0_108 = arith.constant 0 : index
    %c0_109 = arith.constant 0 : index
    %250 = vector.load %arg5[%c0_108, %c0_109] : memref<1x128xf32, #tpu.memory_space<vmem>>, vector<1x128xf32>
    %251 = arith.addf %249, %250 : vector<1x128xf32>
    %cst_110 = arith.constant 0.000000e+00 : f32
    %252 = vector.broadcast %cst_110 : f32 to vector<1x128xf32>
    %253 = arith.maximumf %251, %252 : vector<1x128xf32>
    %254 = vector.broadcast %247 : f32 to vector<1x128xf32>
    %255 = arith.mulf %220, %254 : vector<1x128xf32>
    %256 = vector.broadcast %247 : f32 to vector<1x128xf32>
    %257 = arith.mulf %213, %256 : vector<1x128xf32>
    %258 = arith.index_cast %c3_i32 : i32 to index
    %c0_111 = arith.constant 0 : index
    %259 = vector.load %arg1[%258, %c0_111] : memref<8x512xf32, #tpu.memory_space<vmem>>, vector<1x512xf32>
    %c0_112 = arith.constant 0 : index
    %c0_113 = arith.constant 0 : index
    %260 = vector.load %arg6[%c0_112, %c0_113] : memref<128x512xf32, #tpu.memory_space<vmem>>, vector<128x512xf32>
    %cst_114 = arith.constant dense<0.000000e+00> : vector<1x512xf32>
    %261 = tpu.matmul %253, %260, %cst_114 {dimension_numbers = #tpu.dot_dimension_numbers<[1], [0], [0], [1], [0, 0, 1, 1], [], []>} : vector<1x128xf32>, vector<128x512xf32>, vector<1x512xf32> -> vector<1x512xf32>
    %262 = arith.addf %259, %261 : vector<1x512xf32>
    %c0_115 = arith.constant 0 : index
    %c0_116 = arith.constant 0 : index
    %263 = vector.load %arg7[%c0_115, %c0_116] : memref<128x512xf32, #tpu.memory_space<vmem>>, vector<128x512xf32>
    %cst_117 = arith.constant dense<0.000000e+00> : vector<1x512xf32>
    %264 = tpu.matmul %255, %263, %cst_117 {dimension_numbers = #tpu.dot_dimension_numbers<[1], [0], [0], [1], [0, 0, 1, 1], [], []>} : vector<1x128xf32>, vector<128x512xf32>, vector<1x512xf32> -> vector<1x512xf32>
    %265 = arith.addf %262, %264 : vector<1x512xf32>
    %266 = vector.extract_strided_slice %265 {offsets = [0, 0], sizes = [1, 128], strides = [1, 1]} : vector<1x512xf32> to vector<1x128xf32>
    %cst_118 = arith.constant 5.000000e-01 : f32
    %267 = vector.broadcast %cst_118 : f32 to vector<1x128xf32>
    %268 = arith.mulf %267, %266 : vector<1x128xf32>
    %269 = math.tanh %268 : vector<1x128xf32>
    %cst_119 = arith.constant 1.000000e+00 : f32
    %270 = vector.broadcast %cst_119 : f32 to vector<1x128xf32>
    %271 = arith.addf %269, %270 : vector<1x128xf32>
    %cst_120 = arith.constant 5.000000e-01 : f32
    %272 = vector.broadcast %cst_120 : f32 to vector<1x128xf32>
    %273 = arith.mulf %272, %271 : vector<1x128xf32>
    %274 = vector.extract_strided_slice %265 {offsets = [0, 128], sizes = [1, 128], strides = [1, 1]} : vector<1x512xf32> to vector<1x128xf32>
    %cst_121 = arith.constant 5.000000e-01 : f32
    %275 = vector.broadcast %cst_121 : f32 to vector<1x128xf32>
    %276 = arith.mulf %275, %274 : vector<1x128xf32>
    %277 = math.tanh %276 : vector<1x128xf32>
    %cst_122 = arith.constant 1.000000e+00 : f32
    %278 = vector.broadcast %cst_122 : f32 to vector<1x128xf32>
    %279 = arith.addf %277, %278 : vector<1x128xf32>
    %cst_123 = arith.constant 5.000000e-01 : f32
    %280 = vector.broadcast %cst_123 : f32 to vector<1x128xf32>
    %281 = arith.mulf %280, %279 : vector<1x128xf32>
    %282 = vector.extract_strided_slice %265 {offsets = [0, 256], sizes = [1, 128], strides = [1, 1]} : vector<1x512xf32> to vector<1x128xf32>
    %283 = math.tanh %282 : vector<1x128xf32>
    %284 = vector.extract_strided_slice %265 {offsets = [0, 384], sizes = [1, 128], strides = [1, 1]} : vector<1x512xf32> to vector<1x128xf32>
    %cst_124 = arith.constant 5.000000e-01 : f32
    %285 = vector.broadcast %cst_124 : f32 to vector<1x128xf32>
    %286 = arith.mulf %285, %284 : vector<1x128xf32>
    %287 = math.tanh %286 : vector<1x128xf32>
    %cst_125 = arith.constant 1.000000e+00 : f32
    %288 = vector.broadcast %cst_125 : f32 to vector<1x128xf32>
    %289 = arith.addf %287, %288 : vector<1x128xf32>
    %cst_126 = arith.constant 5.000000e-01 : f32
    %290 = vector.broadcast %cst_126 : f32 to vector<1x128xf32>
    %291 = arith.mulf %290, %289 : vector<1x128xf32>
    %292 = arith.mulf %281, %257 : vector<1x128xf32>
    %293 = arith.mulf %273, %283 : vector<1x128xf32>
    %294 = arith.addf %292, %293 : vector<1x128xf32>
    %295 = math.tanh %294 : vector<1x128xf32>
    %296 = arith.mulf %291, %295 : vector<1x128xf32>
    %c0_127 = arith.constant 0 : index
    %c0_128 = arith.constant 0 : index
    %297 = vector.load %arg8[%c0_127, %c0_128] : memref<128x160xf32, #tpu.memory_space<vmem>>, vector<128x160xf32>
    %cst_129 = arith.constant dense<0.000000e+00> : vector<1x160xf32>
    %298 = tpu.matmul %296, %297, %cst_129 {dimension_numbers = #tpu.dot_dimension_numbers<[1], [0], [0], [1], [0, 0, 1, 1], [], []>} : vector<1x128xf32>, vector<128x160xf32>, vector<1x160xf32> -> vector<1x160xf32>
    %c0_130 = arith.constant 0 : index
    %c0_131 = arith.constant 0 : index
    %299 = vector.load %arg9[%c0_130, %c0_131] : memref<1x160xf32, #tpu.memory_space<vmem>>, vector<1x160xf32>
    %300 = arith.addf %298, %299 : vector<1x160xf32>
    %301 = vector.extract_strided_slice %300 {offsets = [0, 0], sizes = [1, 128], strides = [1, 1]} : vector<1x160xf32> to vector<1x128xf32>
    %302 = vector.extract_strided_slice %300 {offsets = [0, 128], sizes = [1, 8], strides = [1, 1]} : vector<1x160xf32> to vector<1x8xf32>
    %303 = vector.extract_strided_slice %300 {offsets = [0, 136], sizes = [1, 8], strides = [1, 1]} : vector<1x160xf32> to vector<1x8xf32>
    %304 = vector.extract_strided_slice %300 {offsets = [0, 144], sizes = [1, 8], strides = [1, 1]} : vector<1x160xf32> to vector<1x8xf32>
    %305 = vector.extract_strided_slice %300 {offsets = [0, 152], sizes = [1, 8], strides = [1, 1]} : vector<1x160xf32> to vector<1x8xf32>
    %306 = tpu.concatenate %302, %303, %304, %305 in 0 : vector<1x8xf32>, vector<1x8xf32>, vector<1x8xf32>, vector<1x8xf32> -> vector<4x8xf32>
    %cst_132 = arith.constant dense<0xFF800000> : vector<4xf32>
    %307 = vector.multi_reduction <maximumf>, %306, %cst_132 [1] : vector<4x8xf32> to vector<4xf32>
    %308 = vector.shape_cast %307 : vector<4xf32> to vector<4x1xf32>
    %309 = vector.broadcast %308 : vector<4x1xf32> to vector<4x8xf32>
    %310 = arith.subf %306, %309 : vector<4x8xf32>
    %311 = math.exp %310 : vector<4x8xf32>
    %cst_133 = arith.constant dense<0.000000e+00> : vector<4xf32>
    %312 = vector.multi_reduction <add>, %311, %cst_133 [1] : vector<4x8xf32> to vector<4xf32>
    %313 = vector.shape_cast %312 : vector<4xf32> to vector<4x1xf32>
    %314 = tpu.reciprocal %313 {approx = true} : vector<4x1xf32> -> vector<4x1xf32>
    %315 = arith.mulf %313, %314 : vector<4x1xf32>
    %cst_134 = arith.constant 2.000000e+00 : f32
    %316 = vector.broadcast %cst_134 : f32 to vector<4x1xf32>
    %317 = arith.subf %316, %315 : vector<4x1xf32>
    %318 = arith.mulf %314, %317 : vector<4x1xf32>
    %319 = vector.broadcast %318 : vector<4x1xf32> to vector<4x8xf32>
    %320 = arith.mulf %311, %319 : vector<4x8xf32>
    %321 = arith.index_cast %c3_i32 : i32 to index
    %c0_135 = arith.constant 0 : index
    %322 = vector.load %arg10[%321, %c0_135] : memref<8x128xf32, #tpu.memory_space<vmem>>, vector<1x128xf32>
    tpu.vector_store %arg10[%321, %c0_135], %301 {strides = array<i32>} : memref<8x128xf32, #tpu.memory_space<vmem>>, vector<1x128xf32>,
    %323 = vector.shape_cast %320 : vector<4x8xf32> to vector<1x4x8xf32>
    %324 = arith.index_cast %c3_i32 : i32 to index
    %c0_136 = arith.constant 0 : index
    %c0_137 = arith.constant 0 : index
    %325 = vector.load %arg11[%324, %c0_136, %c0_137] : memref<8x4x8xf32, #tpu.memory_space<vmem>>, vector<1x4x8xf32>
    tpu.vector_store %arg11[%324, %c0_136, %c0_137], %323 {strides = array<i32>} : memref<8x4x8xf32, #tpu.memory_space<vmem>>, vector<1x4x8xf32>,
    %c4_i32 = arith.constant 4 : i32
    %326 = arith.index_cast %c4_i32 : i32 to index
    %327 = memref.load %arg0[%326] : memref<8xf32, #tpu.memory_space<smem>>
    %cst_138 = arith.constant 1.000000e+00 : f32
    %328 = arith.subf %cst_138, %327 : f32
    %c0_139 = arith.constant 0 : index
    %c0_140 = arith.constant 0 : index
    %329 = vector.load %arg4[%c0_139, %c0_140] : memref<128x128xf32, #tpu.memory_space<vmem>>, vector<128x128xf32>
    %cst_141 = arith.constant dense<0.000000e+00> : vector<1x128xf32>
    %330 = tpu.matmul %301, %329, %cst_141 {dimension_numbers = #tpu.dot_dimension_numbers<[1], [0], [0], [1], [0, 0, 1, 1], [], []>} : vector<1x128xf32>, vector<128x128xf32>, vector<1x128xf32> -> vector<1x128xf32>
    %c0_142 = arith.constant 0 : index
    %c0_143 = arith.constant 0 : index
    %331 = vector.load %arg5[%c0_142, %c0_143] : memref<1x128xf32, #tpu.memory_space<vmem>>, vector<1x128xf32>
    %332 = arith.addf %330, %331 : vector<1x128xf32>
    %cst_144 = arith.constant 0.000000e+00 : f32
    %333 = vector.broadcast %cst_144 : f32 to vector<1x128xf32>
    %334 = arith.maximumf %332, %333 : vector<1x128xf32>
    %335 = vector.broadcast %328 : f32 to vector<1x128xf32>
    %336 = arith.mulf %301, %335 : vector<1x128xf32>
    %337 = vector.broadcast %328 : f32 to vector<1x128xf32>
    %338 = arith.mulf %294, %337 : vector<1x128xf32>
    %339 = arith.index_cast %c4_i32 : i32 to index
    %c0_145 = arith.constant 0 : index
    %340 = vector.load %arg1[%339, %c0_145] : memref<8x512xf32, #tpu.memory_space<vmem>>, vector<1x512xf32>
    %c0_146 = arith.constant 0 : index
    %c0_147 = arith.constant 0 : index
    %341 = vector.load %arg6[%c0_146, %c0_147] : memref<128x512xf32, #tpu.memory_space<vmem>>, vector<128x512xf32>
    %cst_148 = arith.constant dense<0.000000e+00> : vector<1x512xf32>
    %342 = tpu.matmul %334, %341, %cst_148 {dimension_numbers = #tpu.dot_dimension_numbers<[1], [0], [0], [1], [0, 0, 1, 1], [], []>} : vector<1x128xf32>, vector<128x512xf32>, vector<1x512xf32> -> vector<1x512xf32>
    %343 = arith.addf %340, %342 : vector<1x512xf32>
    %c0_149 = arith.constant 0 : index
    %c0_150 = arith.constant 0 : index
    %344 = vector.load %arg7[%c0_149, %c0_150] : memref<128x512xf32, #tpu.memory_space<vmem>>, vector<128x512xf32>
    %cst_151 = arith.constant dense<0.000000e+00> : vector<1x512xf32>
    %345 = tpu.matmul %336, %344, %cst_151 {dimension_numbers = #tpu.dot_dimension_numbers<[1], [0], [0], [1], [0, 0, 1, 1], [], []>} : vector<1x128xf32>, vector<128x512xf32>, vector<1x512xf32> -> vector<1x512xf32>
    %346 = arith.addf %343, %345 : vector<1x512xf32>
    %347 = vector.extract_strided_slice %346 {offsets = [0, 0], sizes = [1, 128], strides = [1, 1]} : vector<1x512xf32> to vector<1x128xf32>
    %cst_152 = arith.constant 5.000000e-01 : f32
    %348 = vector.broadcast %cst_152 : f32 to vector<1x128xf32>
    %349 = arith.mulf %348, %347 : vector<1x128xf32>
    %350 = math.tanh %349 : vector<1x128xf32>
    %cst_153 = arith.constant 1.000000e+00 : f32
    %351 = vector.broadcast %cst_153 : f32 to vector<1x128xf32>
    %352 = arith.addf %350, %351 : vector<1x128xf32>
    %cst_154 = arith.constant 5.000000e-01 : f32
    %353 = vector.broadcast %cst_154 : f32 to vector<1x128xf32>
    %354 = arith.mulf %353, %352 : vector<1x128xf32>
    %355 = vector.extract_strided_slice %346 {offsets = [0, 128], sizes = [1, 128], strides = [1, 1]} : vector<1x512xf32> to vector<1x128xf32>
    %cst_155 = arith.constant 5.000000e-01 : f32
    %356 = vector.broadcast %cst_155 : f32 to vector<1x128xf32>
    %357 = arith.mulf %356, %355 : vector<1x128xf32>
    %358 = math.tanh %357 : vector<1x128xf32>
    %cst_156 = arith.constant 1.000000e+00 : f32
    %359 = vector.broadcast %cst_156 : f32 to vector<1x128xf32>
    %360 = arith.addf %358, %359 : vector<1x128xf32>
    %cst_157 = arith.constant 5.000000e-01 : f32
    %361 = vector.broadcast %cst_157 : f32 to vector<1x128xf32>
    %362 = arith.mulf %361, %360 : vector<1x128xf32>
    %363 = vector.extract_strided_slice %346 {offsets = [0, 256], sizes = [1, 128], strides = [1, 1]} : vector<1x512xf32> to vector<1x128xf32>
    %364 = math.tanh %363 : vector<1x128xf32>
    %365 = vector.extract_strided_slice %346 {offsets = [0, 384], sizes = [1, 128], strides = [1, 1]} : vector<1x512xf32> to vector<1x128xf32>
    %cst_158 = arith.constant 5.000000e-01 : f32
    %366 = vector.broadcast %cst_158 : f32 to vector<1x128xf32>
    %367 = arith.mulf %366, %365 : vector<1x128xf32>
    %368 = math.tanh %367 : vector<1x128xf32>
    %cst_159 = arith.constant 1.000000e+00 : f32
    %369 = vector.broadcast %cst_159 : f32 to vector<1x128xf32>
    %370 = arith.addf %368, %369 : vector<1x128xf32>
    %cst_160 = arith.constant 5.000000e-01 : f32
    %371 = vector.broadcast %cst_160 : f32 to vector<1x128xf32>
    %372 = arith.mulf %371, %370 : vector<1x128xf32>
    %373 = arith.mulf %362, %338 : vector<1x128xf32>
    %374 = arith.mulf %354, %364 : vector<1x128xf32>
    %375 = arith.addf %373, %374 : vector<1x128xf32>
    %376 = math.tanh %375 : vector<1x128xf32>
    %377 = arith.mulf %372, %376 : vector<1x128xf32>
    %c0_161 = arith.constant 0 : index
    %c0_162 = arith.constant 0 : index
    %378 = vector.load %arg8[%c0_161, %c0_162] : memref<128x160xf32, #tpu.memory_space<vmem>>, vector<128x160xf32>
    %cst_163 = arith.constant dense<0.000000e+00> : vector<1x160xf32>
    %379 = tpu.matmul %377, %378, %cst_163 {dimension_numbers = #tpu.dot_dimension_numbers<[1], [0], [0], [1], [0, 0, 1, 1], [], []>} : vector<1x128xf32>, vector<128x160xf32>, vector<1x160xf32> -> vector<1x160xf32>
    %c0_164 = arith.constant 0 : index
    %c0_165 = arith.constant 0 : index
    %380 = vector.load %arg9[%c0_164, %c0_165] : memref<1x160xf32, #tpu.memory_space<vmem>>, vector<1x160xf32>
    %381 = arith.addf %379, %380 : vector<1x160xf32>
    %382 = vector.extract_strided_slice %381 {offsets = [0, 0], sizes = [1, 128], strides = [1, 1]} : vector<1x160xf32> to vector<1x128xf32>
    %383 = vector.extract_strided_slice %381 {offsets = [0, 128], sizes = [1, 8], strides = [1, 1]} : vector<1x160xf32> to vector<1x8xf32>
    %384 = vector.extract_strided_slice %381 {offsets = [0, 136], sizes = [1, 8], strides = [1, 1]} : vector<1x160xf32> to vector<1x8xf32>
    %385 = vector.extract_strided_slice %381 {offsets = [0, 144], sizes = [1, 8], strides = [1, 1]} : vector<1x160xf32> to vector<1x8xf32>
    %386 = vector.extract_strided_slice %381 {offsets = [0, 152], sizes = [1, 8], strides = [1, 1]} : vector<1x160xf32> to vector<1x8xf32>
    %387 = tpu.concatenate %383, %384, %385, %386 in 0 : vector<1x8xf32>, vector<1x8xf32>, vector<1x8xf32>, vector<1x8xf32> -> vector<4x8xf32>
    %cst_166 = arith.constant dense<0xFF800000> : vector<4xf32>
    %388 = vector.multi_reduction <maximumf>, %387, %cst_166 [1] : vector<4x8xf32> to vector<4xf32>
    %389 = vector.shape_cast %388 : vector<4xf32> to vector<4x1xf32>
    %390 = vector.broadcast %389 : vector<4x1xf32> to vector<4x8xf32>
    %391 = arith.subf %387, %390 : vector<4x8xf32>
    %392 = math.exp %391 : vector<4x8xf32>
    %cst_167 = arith.constant dense<0.000000e+00> : vector<4xf32>
    %393 = vector.multi_reduction <add>, %392, %cst_167 [1] : vector<4x8xf32> to vector<4xf32>
    %394 = vector.shape_cast %393 : vector<4xf32> to vector<4x1xf32>
    %395 = tpu.reciprocal %394 {approx = true} : vector<4x1xf32> -> vector<4x1xf32>
    %396 = arith.mulf %394, %395 : vector<4x1xf32>
    %cst_168 = arith.constant 2.000000e+00 : f32
    %397 = vector.broadcast %cst_168 : f32 to vector<4x1xf32>
    %398 = arith.subf %397, %396 : vector<4x1xf32>
    %399 = arith.mulf %395, %398 : vector<4x1xf32>
    %400 = vector.broadcast %399 : vector<4x1xf32> to vector<4x8xf32>
    %401 = arith.mulf %392, %400 : vector<4x8xf32>
    %402 = arith.index_cast %c4_i32 : i32 to index
    %c0_169 = arith.constant 0 : index
    %403 = vector.load %arg10[%402, %c0_169] : memref<8x128xf32, #tpu.memory_space<vmem>>, vector<1x128xf32>
    tpu.vector_store %arg10[%402, %c0_169], %382 {strides = array<i32>} : memref<8x128xf32, #tpu.memory_space<vmem>>, vector<1x128xf32>,
    %404 = vector.shape_cast %401 : vector<4x8xf32> to vector<1x4x8xf32>
    %405 = arith.index_cast %c4_i32 : i32 to index
    %c0_170 = arith.constant 0 : index
    %c0_171 = arith.constant 0 : index
    %406 = vector.load %arg11[%405, %c0_170, %c0_171] : memref<8x4x8xf32, #tpu.memory_space<vmem>>, vector<1x4x8xf32>
    tpu.vector_store %arg11[%405, %c0_170, %c0_171], %404 {strides = array<i32>} : memref<8x4x8xf32, #tpu.memory_space<vmem>>, vector<1x4x8xf32>,
    %c5_i32 = arith.constant 5 : i32
    %407 = arith.index_cast %c5_i32 : i32 to index
    %408 = memref.load %arg0[%407] : memref<8xf32, #tpu.memory_space<smem>>
    %cst_172 = arith.constant 1.000000e+00 : f32
    %409 = arith.subf %cst_172, %408 : f32
    %c0_173 = arith.constant 0 : index
    %c0_174 = arith.constant 0 : index
    %410 = vector.load %arg4[%c0_173, %c0_174] : memref<128x128xf32, #tpu.memory_space<vmem>>, vector<128x128xf32>
    %cst_175 = arith.constant dense<0.000000e+00> : vector<1x128xf32>
    %411 = tpu.matmul %382, %410, %cst_175 {dimension_numbers = #tpu.dot_dimension_numbers<[1], [0], [0], [1], [0, 0, 1, 1], [], []>} : vector<1x128xf32>, vector<128x128xf32>, vector<1x128xf32> -> vector<1x128xf32>
    %c0_176 = arith.constant 0 : index
    %c0_177 = arith.constant 0 : index
    %412 = vector.load %arg5[%c0_176, %c0_177] : memref<1x128xf32, #tpu.memory_space<vmem>>, vector<1x128xf32>
    %413 = arith.addf %411, %412 : vector<1x128xf32>
    %cst_178 = arith.constant 0.000000e+00 : f32
    %414 = vector.broadcast %cst_178 : f32 to vector<1x128xf32>
    %415 = arith.maximumf %413, %414 : vector<1x128xf32>
    %416 = vector.broadcast %409 : f32 to vector<1x128xf32>
    %417 = arith.mulf %382, %416 : vector<1x128xf32>
    %418 = vector.broadcast %409 : f32 to vector<1x128xf32>
    %419 = arith.mulf %375, %418 : vector<1x128xf32>
    %420 = arith.index_cast %c5_i32 : i32 to index
    %c0_179 = arith.constant 0 : index
    %421 = vector.load %arg1[%420, %c0_179] : memref<8x512xf32, #tpu.memory_space<vmem>>, vector<1x512xf32>
    %c0_180 = arith.constant 0 : index
    %c0_181 = arith.constant 0 : index
    %422 = vector.load %arg6[%c0_180, %c0_181] : memref<128x512xf32, #tpu.memory_space<vmem>>, vector<128x512xf32>
    %cst_182 = arith.constant dense<0.000000e+00> : vector<1x512xf32>
    %423 = tpu.matmul %415, %422, %cst_182 {dimension_numbers = #tpu.dot_dimension_numbers<[1], [0], [0], [1], [0, 0, 1, 1], [], []>} : vector<1x128xf32>, vector<128x512xf32>, vector<1x512xf32> -> vector<1x512xf32>
    %424 = arith.addf %421, %423 : vector<1x512xf32>
    %c0_183 = arith.constant 0 : index
    %c0_184 = arith.constant 0 : index
    %425 = vector.load %arg7[%c0_183, %c0_184] : memref<128x512xf32, #tpu.memory_space<vmem>>, vector<128x512xf32>
    %cst_185 = arith.constant dense<0.000000e+00> : vector<1x512xf32>
    %426 = tpu.matmul %417, %425, %cst_185 {dimension_numbers = #tpu.dot_dimension_numbers<[1], [0], [0], [1], [0, 0, 1, 1], [], []>} : vector<1x128xf32>, vector<128x512xf32>, vector<1x512xf32> -> vector<1x512xf32>
    %427 = arith.addf %424, %426 : vector<1x512xf32>
    %428 = vector.extract_strided_slice %427 {offsets = [0, 0], sizes = [1, 128], strides = [1, 1]} : vector<1x512xf32> to vector<1x128xf32>
    %cst_186 = arith.constant 5.000000e-01 : f32
    %429 = vector.broadcast %cst_186 : f32 to vector<1x128xf32>
    %430 = arith.mulf %429, %428 : vector<1x128xf32>
    %431 = math.tanh %430 : vector<1x128xf32>
    %cst_187 = arith.constant 1.000000e+00 : f32
    %432 = vector.broadcast %cst_187 : f32 to vector<1x128xf32>
    %433 = arith.addf %431, %432 : vector<1x128xf32>
    %cst_188 = arith.constant 5.000000e-01 : f32
    %434 = vector.broadcast %cst_188 : f32 to vector<1x128xf32>
    %435 = arith.mulf %434, %433 : vector<1x128xf32>
    %436 = vector.extract_strided_slice %427 {offsets = [0, 128], sizes = [1, 128], strides = [1, 1]} : vector<1x512xf32> to vector<1x128xf32>
    %cst_189 = arith.constant 5.000000e-01 : f32
    %437 = vector.broadcast %cst_189 : f32 to vector<1x128xf32>
    %438 = arith.mulf %437, %436 : vector<1x128xf32>
    %439 = math.tanh %438 : vector<1x128xf32>
    %cst_190 = arith.constant 1.000000e+00 : f32
    %440 = vector.broadcast %cst_190 : f32 to vector<1x128xf32>
    %441 = arith.addf %439, %440 : vector<1x128xf32>
    %cst_191 = arith.constant 5.000000e-01 : f32
    %442 = vector.broadcast %cst_191 : f32 to vector<1x128xf32>
    %443 = arith.mulf %442, %441 : vector<1x128xf32>
    %444 = vector.extract_strided_slice %427 {offsets = [0, 256], sizes = [1, 128], strides = [1, 1]} : vector<1x512xf32> to vector<1x128xf32>
    %445 = math.tanh %444 : vector<1x128xf32>
    %446 = vector.extract_strided_slice %427 {offsets = [0, 384], sizes = [1, 128], strides = [1, 1]} : vector<1x512xf32> to vector<1x128xf32>
    %cst_192 = arith.constant 5.000000e-01 : f32
    %447 = vector.broadcast %cst_192 : f32 to vector<1x128xf32>
    %448 = arith.mulf %447, %446 : vector<1x128xf32>
    %449 = math.tanh %448 : vector<1x128xf32>
    %cst_193 = arith.constant 1.000000e+00 : f32
    %450 = vector.broadcast %cst_193 : f32 to vector<1x128xf32>
    %451 = arith.addf %449, %450 : vector<1x128xf32>
    %cst_194 = arith.constant 5.000000e-01 : f32
    %452 = vector.broadcast %cst_194 : f32 to vector<1x128xf32>
    %453 = arith.mulf %452, %451 : vector<1x128xf32>
    %454 = arith.mulf %443, %419 : vector<1x128xf32>
    %455 = arith.mulf %435, %445 : vector<1x128xf32>
    %456 = arith.addf %454, %455 : vector<1x128xf32>
    %457 = math.tanh %456 : vector<1x128xf32>
    %458 = arith.mulf %453, %457 : vector<1x128xf32>
    %c0_195 = arith.constant 0 : index
    %c0_196 = arith.constant 0 : index
    %459 = vector.load %arg8[%c0_195, %c0_196] : memref<128x160xf32, #tpu.memory_space<vmem>>, vector<128x160xf32>
    %cst_197 = arith.constant dense<0.000000e+00> : vector<1x160xf32>
    %460 = tpu.matmul %458, %459, %cst_197 {dimension_numbers = #tpu.dot_dimension_numbers<[1], [0], [0], [1], [0, 0, 1, 1], [], []>} : vector<1x128xf32>, vector<128x160xf32>, vector<1x160xf32> -> vector<1x160xf32>
    %c0_198 = arith.constant 0 : index
    %c0_199 = arith.constant 0 : index
    %461 = vector.load %arg9[%c0_198, %c0_199] : memref<1x160xf32, #tpu.memory_space<vmem>>, vector<1x160xf32>
    %462 = arith.addf %460, %461 : vector<1x160xf32>
    %463 = vector.extract_strided_slice %462 {offsets = [0, 0], sizes = [1, 128], strides = [1, 1]} : vector<1x160xf32> to vector<1x128xf32>
    %464 = vector.extract_strided_slice %462 {offsets = [0, 128], sizes = [1, 8], strides = [1, 1]} : vector<1x160xf32> to vector<1x8xf32>
    %465 = vector.extract_strided_slice %462 {offsets = [0, 136], sizes = [1, 8], strides = [1, 1]} : vector<1x160xf32> to vector<1x8xf32>
    %466 = vector.extract_strided_slice %462 {offsets = [0, 144], sizes = [1, 8], strides = [1, 1]} : vector<1x160xf32> to vector<1x8xf32>
    %467 = vector.extract_strided_slice %462 {offsets = [0, 152], sizes = [1, 8], strides = [1, 1]} : vector<1x160xf32> to vector<1x8xf32>
    %468 = tpu.concatenate %464, %465, %466, %467 in 0 : vector<1x8xf32>, vector<1x8xf32>, vector<1x8xf32>, vector<1x8xf32> -> vector<4x8xf32>
    %cst_200 = arith.constant dense<0xFF800000> : vector<4xf32>
    %469 = vector.multi_reduction <maximumf>, %468, %cst_200 [1] : vector<4x8xf32> to vector<4xf32>
    %470 = vector.shape_cast %469 : vector<4xf32> to vector<4x1xf32>
    %471 = vector.broadcast %470 : vector<4x1xf32> to vector<4x8xf32>
    %472 = arith.subf %468, %471 : vector<4x8xf32>
    %473 = math.exp %472 : vector<4x8xf32>
    %cst_201 = arith.constant dense<0.000000e+00> : vector<4xf32>
    %474 = vector.multi_reduction <add>, %473, %cst_201 [1] : vector<4x8xf32> to vector<4xf32>
    %475 = vector.shape_cast %474 : vector<4xf32> to vector<4x1xf32>
    %476 = tpu.reciprocal %475 {approx = true} : vector<4x1xf32> -> vector<4x1xf32>
    %477 = arith.mulf %475, %476 : vector<4x1xf32>
    %cst_202 = arith.constant 2.000000e+00 : f32
    %478 = vector.broadcast %cst_202 : f32 to vector<4x1xf32>
    %479 = arith.subf %478, %477 : vector<4x1xf32>
    %480 = arith.mulf %476, %479 : vector<4x1xf32>
    %481 = vector.broadcast %480 : vector<4x1xf32> to vector<4x8xf32>
    %482 = arith.mulf %473, %481 : vector<4x8xf32>
    %483 = arith.index_cast %c5_i32 : i32 to index
    %c0_203 = arith.constant 0 : index
    %484 = vector.load %arg10[%483, %c0_203] : memref<8x128xf32, #tpu.memory_space<vmem>>, vector<1x128xf32>
    tpu.vector_store %arg10[%483, %c0_203], %463 {strides = array<i32>} : memref<8x128xf32, #tpu.memory_space<vmem>>, vector<1x128xf32>,
    %485 = vector.shape_cast %482 : vector<4x8xf32> to vector<1x4x8xf32>
    %486 = arith.index_cast %c5_i32 : i32 to index
    %c0_204 = arith.constant 0 : index
    %c0_205 = arith.constant 0 : index
    %487 = vector.load %arg11[%486, %c0_204, %c0_205] : memref<8x4x8xf32, #tpu.memory_space<vmem>>, vector<1x4x8xf32>
    tpu.vector_store %arg11[%486, %c0_204, %c0_205], %485 {strides = array<i32>} : memref<8x4x8xf32, #tpu.memory_space<vmem>>, vector<1x4x8xf32>,
    %c6_i32 = arith.constant 6 : i32
    %488 = arith.index_cast %c6_i32 : i32 to index
    %489 = memref.load %arg0[%488] : memref<8xf32, #tpu.memory_space<smem>>
    %cst_206 = arith.constant 1.000000e+00 : f32
    %490 = arith.subf %cst_206, %489 : f32
    %c0_207 = arith.constant 0 : index
    %c0_208 = arith.constant 0 : index
    %491 = vector.load %arg4[%c0_207, %c0_208] : memref<128x128xf32, #tpu.memory_space<vmem>>, vector<128x128xf32>
    %cst_209 = arith.constant dense<0.000000e+00> : vector<1x128xf32>
    %492 = tpu.matmul %463, %491, %cst_209 {dimension_numbers = #tpu.dot_dimension_numbers<[1], [0], [0], [1], [0, 0, 1, 1], [], []>} : vector<1x128xf32>, vector<128x128xf32>, vector<1x128xf32> -> vector<1x128xf32>
    %c0_210 = arith.constant 0 : index
    %c0_211 = arith.constant 0 : index
    %493 = vector.load %arg5[%c0_210, %c0_211] : memref<1x128xf32, #tpu.memory_space<vmem>>, vector<1x128xf32>
    %494 = arith.addf %492, %493 : vector<1x128xf32>
    %cst_212 = arith.constant 0.000000e+00 : f32
    %495 = vector.broadcast %cst_212 : f32 to vector<1x128xf32>
    %496 = arith.maximumf %494, %495 : vector<1x128xf32>
    %497 = vector.broadcast %490 : f32 to vector<1x128xf32>
    %498 = arith.mulf %463, %497 : vector<1x128xf32>
    %499 = vector.broadcast %490 : f32 to vector<1x128xf32>
    %500 = arith.mulf %456, %499 : vector<1x128xf32>
    %501 = arith.index_cast %c6_i32 : i32 to index
    %c0_213 = arith.constant 0 : index
    %502 = vector.load %arg1[%501, %c0_213] : memref<8x512xf32, #tpu.memory_space<vmem>>, vector<1x512xf32>
    %c0_214 = arith.constant 0 : index
    %c0_215 = arith.constant 0 : index
    %503 = vector.load %arg6[%c0_214, %c0_215] : memref<128x512xf32, #tpu.memory_space<vmem>>, vector<128x512xf32>
    %cst_216 = arith.constant dense<0.000000e+00> : vector<1x512xf32>
    %504 = tpu.matmul %496, %503, %cst_216 {dimension_numbers = #tpu.dot_dimension_numbers<[1], [0], [0], [1], [0, 0, 1, 1], [], []>} : vector<1x128xf32>, vector<128x512xf32>, vector<1x512xf32> -> vector<1x512xf32>
    %505 = arith.addf %502, %504 : vector<1x512xf32>
    %c0_217 = arith.constant 0 : index
    %c0_218 = arith.constant 0 : index
    %506 = vector.load %arg7[%c0_217, %c0_218] : memref<128x512xf32, #tpu.memory_space<vmem>>, vector<128x512xf32>
    %cst_219 = arith.constant dense<0.000000e+00> : vector<1x512xf32>
    %507 = tpu.matmul %498, %506, %cst_219 {dimension_numbers = #tpu.dot_dimension_numbers<[1], [0], [0], [1], [0, 0, 1, 1], [], []>} : vector<1x128xf32>, vector<128x512xf32>, vector<1x512xf32> -> vector<1x512xf32>
    %508 = arith.addf %505, %507 : vector<1x512xf32>
    %509 = vector.extract_strided_slice %508 {offsets = [0, 0], sizes = [1, 128], strides = [1, 1]} : vector<1x512xf32> to vector<1x128xf32>
    %cst_220 = arith.constant 5.000000e-01 : f32
    %510 = vector.broadcast %cst_220 : f32 to vector<1x128xf32>
    %511 = arith.mulf %510, %509 : vector<1x128xf32>
    %512 = math.tanh %511 : vector<1x128xf32>
    %cst_221 = arith.constant 1.000000e+00 : f32
    %513 = vector.broadcast %cst_221 : f32 to vector<1x128xf32>
    %514 = arith.addf %512, %513 : vector<1x128xf32>
    %cst_222 = arith.constant 5.000000e-01 : f32
    %515 = vector.broadcast %cst_222 : f32 to vector<1x128xf32>
    %516 = arith.mulf %515, %514 : vector<1x128xf32>
    %517 = vector.extract_strided_slice %508 {offsets = [0, 128], sizes = [1, 128], strides = [1, 1]} : vector<1x512xf32> to vector<1x128xf32>
    %cst_223 = arith.constant 5.000000e-01 : f32
    %518 = vector.broadcast %cst_223 : f32 to vector<1x128xf32>
    %519 = arith.mulf %518, %517 : vector<1x128xf32>
    %520 = math.tanh %519 : vector<1x128xf32>
    %cst_224 = arith.constant 1.000000e+00 : f32
    %521 = vector.broadcast %cst_224 : f32 to vector<1x128xf32>
    %522 = arith.addf %520, %521 : vector<1x128xf32>
    %cst_225 = arith.constant 5.000000e-01 : f32
    %523 = vector.broadcast %cst_225 : f32 to vector<1x128xf32>
    %524 = arith.mulf %523, %522 : vector<1x128xf32>
    %525 = vector.extract_strided_slice %508 {offsets = [0, 256], sizes = [1, 128], strides = [1, 1]} : vector<1x512xf32> to vector<1x128xf32>
    %526 = math.tanh %525 : vector<1x128xf32>
    %527 = vector.extract_strided_slice %508 {offsets = [0, 384], sizes = [1, 128], strides = [1, 1]} : vector<1x512xf32> to vector<1x128xf32>
    %cst_226 = arith.constant 5.000000e-01 : f32
    %528 = vector.broadcast %cst_226 : f32 to vector<1x128xf32>
    %529 = arith.mulf %528, %527 : vector<1x128xf32>
    %530 = math.tanh %529 : vector<1x128xf32>
    %cst_227 = arith.constant 1.000000e+00 : f32
    %531 = vector.broadcast %cst_227 : f32 to vector<1x128xf32>
    %532 = arith.addf %530, %531 : vector<1x128xf32>
    %cst_228 = arith.constant 5.000000e-01 : f32
    %533 = vector.broadcast %cst_228 : f32 to vector<1x128xf32>
    %534 = arith.mulf %533, %532 : vector<1x128xf32>
    %535 = arith.mulf %524, %500 : vector<1x128xf32>
    %536 = arith.mulf %516, %526 : vector<1x128xf32>
    %537 = arith.addf %535, %536 : vector<1x128xf32>
    %538 = math.tanh %537 : vector<1x128xf32>
    %539 = arith.mulf %534, %538 : vector<1x128xf32>
    %c0_229 = arith.constant 0 : index
    %c0_230 = arith.constant 0 : index
    %540 = vector.load %arg8[%c0_229, %c0_230] : memref<128x160xf32, #tpu.memory_space<vmem>>, vector<128x160xf32>
    %cst_231 = arith.constant dense<0.000000e+00> : vector<1x160xf32>
    %541 = tpu.matmul %539, %540, %cst_231 {dimension_numbers = #tpu.dot_dimension_numbers<[1], [0], [0], [1], [0, 0, 1, 1], [], []>} : vector<1x128xf32>, vector<128x160xf32>, vector<1x160xf32> -> vector<1x160xf32>
    %c0_232 = arith.constant 0 : index
    %c0_233 = arith.constant 0 : index
    %542 = vector.load %arg9[%c0_232, %c0_233] : memref<1x160xf32, #tpu.memory_space<vmem>>, vector<1x160xf32>
    %543 = arith.addf %541, %542 : vector<1x160xf32>
    %544 = vector.extract_strided_slice %543 {offsets = [0, 0], sizes = [1, 128], strides = [1, 1]} : vector<1x160xf32> to vector<1x128xf32>
    %545 = vector.extract_strided_slice %543 {offsets = [0, 128], sizes = [1, 8], strides = [1, 1]} : vector<1x160xf32> to vector<1x8xf32>
    %546 = vector.extract_strided_slice %543 {offsets = [0, 136], sizes = [1, 8], strides = [1, 1]} : vector<1x160xf32> to vector<1x8xf32>
    %547 = vector.extract_strided_slice %543 {offsets = [0, 144], sizes = [1, 8], strides = [1, 1]} : vector<1x160xf32> to vector<1x8xf32>
    %548 = vector.extract_strided_slice %543 {offsets = [0, 152], sizes = [1, 8], strides = [1, 1]} : vector<1x160xf32> to vector<1x8xf32>
    %549 = tpu.concatenate %545, %546, %547, %548 in 0 : vector<1x8xf32>, vector<1x8xf32>, vector<1x8xf32>, vector<1x8xf32> -> vector<4x8xf32>
    %cst_234 = arith.constant dense<0xFF800000> : vector<4xf32>
    %550 = vector.multi_reduction <maximumf>, %549, %cst_234 [1] : vector<4x8xf32> to vector<4xf32>
    %551 = vector.shape_cast %550 : vector<4xf32> to vector<4x1xf32>
    %552 = vector.broadcast %551 : vector<4x1xf32> to vector<4x8xf32>
    %553 = arith.subf %549, %552 : vector<4x8xf32>
    %554 = math.exp %553 : vector<4x8xf32>
    %cst_235 = arith.constant dense<0.000000e+00> : vector<4xf32>
    %555 = vector.multi_reduction <add>, %554, %cst_235 [1] : vector<4x8xf32> to vector<4xf32>
    %556 = vector.shape_cast %555 : vector<4xf32> to vector<4x1xf32>
    %557 = tpu.reciprocal %556 {approx = true} : vector<4x1xf32> -> vector<4x1xf32>
    %558 = arith.mulf %556, %557 : vector<4x1xf32>
    %cst_236 = arith.constant 2.000000e+00 : f32
    %559 = vector.broadcast %cst_236 : f32 to vector<4x1xf32>
    %560 = arith.subf %559, %558 : vector<4x1xf32>
    %561 = arith.mulf %557, %560 : vector<4x1xf32>
    %562 = vector.broadcast %561 : vector<4x1xf32> to vector<4x8xf32>
    %563 = arith.mulf %554, %562 : vector<4x8xf32>
    %564 = arith.index_cast %c6_i32 : i32 to index
    %c0_237 = arith.constant 0 : index
    %565 = vector.load %arg10[%564, %c0_237] : memref<8x128xf32, #tpu.memory_space<vmem>>, vector<1x128xf32>
    tpu.vector_store %arg10[%564, %c0_237], %544 {strides = array<i32>} : memref<8x128xf32, #tpu.memory_space<vmem>>, vector<1x128xf32>,
    %566 = vector.shape_cast %563 : vector<4x8xf32> to vector<1x4x8xf32>
    %567 = arith.index_cast %c6_i32 : i32 to index
    %c0_238 = arith.constant 0 : index
    %c0_239 = arith.constant 0 : index
    %568 = vector.load %arg11[%567, %c0_238, %c0_239] : memref<8x4x8xf32, #tpu.memory_space<vmem>>, vector<1x4x8xf32>
    tpu.vector_store %arg11[%567, %c0_238, %c0_239], %566 {strides = array<i32>} : memref<8x4x8xf32, #tpu.memory_space<vmem>>, vector<1x4x8xf32>,
    %c7_i32 = arith.constant 7 : i32
    %569 = arith.index_cast %c7_i32 : i32 to index
    %570 = memref.load %arg0[%569] : memref<8xf32, #tpu.memory_space<smem>>
    %cst_240 = arith.constant 1.000000e+00 : f32
    %571 = arith.subf %cst_240, %570 : f32
    %c0_241 = arith.constant 0 : index
    %c0_242 = arith.constant 0 : index
    %572 = vector.load %arg4[%c0_241, %c0_242] : memref<128x128xf32, #tpu.memory_space<vmem>>, vector<128x128xf32>
    %cst_243 = arith.constant dense<0.000000e+00> : vector<1x128xf32>
    %573 = tpu.matmul %544, %572, %cst_243 {dimension_numbers = #tpu.dot_dimension_numbers<[1], [0], [0], [1], [0, 0, 1, 1], [], []>} : vector<1x128xf32>, vector<128x128xf32>, vector<1x128xf32> -> vector<1x128xf32>
    %c0_244 = arith.constant 0 : index
    %c0_245 = arith.constant 0 : index
    %574 = vector.load %arg5[%c0_244, %c0_245] : memref<1x128xf32, #tpu.memory_space<vmem>>, vector<1x128xf32>
    %575 = arith.addf %573, %574 : vector<1x128xf32>
    %cst_246 = arith.constant 0.000000e+00 : f32
    %576 = vector.broadcast %cst_246 : f32 to vector<1x128xf32>
    %577 = arith.maximumf %575, %576 : vector<1x128xf32>
    %578 = vector.broadcast %571 : f32 to vector<1x128xf32>
    %579 = arith.mulf %544, %578 : vector<1x128xf32>
    %580 = vector.broadcast %571 : f32 to vector<1x128xf32>
    %581 = arith.mulf %537, %580 : vector<1x128xf32>
    %582 = arith.index_cast %c7_i32 : i32 to index
    %c0_247 = arith.constant 0 : index
    %583 = vector.load %arg1[%582, %c0_247] : memref<8x512xf32, #tpu.memory_space<vmem>>, vector<1x512xf32>
    %c0_248 = arith.constant 0 : index
    %c0_249 = arith.constant 0 : index
    %584 = vector.load %arg6[%c0_248, %c0_249] : memref<128x512xf32, #tpu.memory_space<vmem>>, vector<128x512xf32>
    %cst_250 = arith.constant dense<0.000000e+00> : vector<1x512xf32>
    %585 = tpu.matmul %577, %584, %cst_250 {dimension_numbers = #tpu.dot_dimension_numbers<[1], [0], [0], [1], [0, 0, 1, 1], [], []>} : vector<1x128xf32>, vector<128x512xf32>, vector<1x512xf32> -> vector<1x512xf32>
    %586 = arith.addf %583, %585 : vector<1x512xf32>
    %c0_251 = arith.constant 0 : index
    %c0_252 = arith.constant 0 : index
    %587 = vector.load %arg7[%c0_251, %c0_252] : memref<128x512xf32, #tpu.memory_space<vmem>>, vector<128x512xf32>
    %cst_253 = arith.constant dense<0.000000e+00> : vector<1x512xf32>
    %588 = tpu.matmul %579, %587, %cst_253 {dimension_numbers = #tpu.dot_dimension_numbers<[1], [0], [0], [1], [0, 0, 1, 1], [], []>} : vector<1x128xf32>, vector<128x512xf32>, vector<1x512xf32> -> vector<1x512xf32>
    %589 = arith.addf %586, %588 : vector<1x512xf32>
    %590 = vector.extract_strided_slice %589 {offsets = [0, 0], sizes = [1, 128], strides = [1, 1]} : vector<1x512xf32> to vector<1x128xf32>
    %cst_254 = arith.constant 5.000000e-01 : f32
    %591 = vector.broadcast %cst_254 : f32 to vector<1x128xf32>
    %592 = arith.mulf %591, %590 : vector<1x128xf32>
    %593 = math.tanh %592 : vector<1x128xf32>
    %cst_255 = arith.constant 1.000000e+00 : f32
    %594 = vector.broadcast %cst_255 : f32 to vector<1x128xf32>
    %595 = arith.addf %593, %594 : vector<1x128xf32>
    %cst_256 = arith.constant 5.000000e-01 : f32
    %596 = vector.broadcast %cst_256 : f32 to vector<1x128xf32>
    %597 = arith.mulf %596, %595 : vector<1x128xf32>
    %598 = vector.extract_strided_slice %589 {offsets = [0, 128], sizes = [1, 128], strides = [1, 1]} : vector<1x512xf32> to vector<1x128xf32>
    %cst_257 = arith.constant 5.000000e-01 : f32
    %599 = vector.broadcast %cst_257 : f32 to vector<1x128xf32>
    %600 = arith.mulf %599, %598 : vector<1x128xf32>
    %601 = math.tanh %600 : vector<1x128xf32>
    %cst_258 = arith.constant 1.000000e+00 : f32
    %602 = vector.broadcast %cst_258 : f32 to vector<1x128xf32>
    %603 = arith.addf %601, %602 : vector<1x128xf32>
    %cst_259 = arith.constant 5.000000e-01 : f32
    %604 = vector.broadcast %cst_259 : f32 to vector<1x128xf32>
    %605 = arith.mulf %604, %603 : vector<1x128xf32>
    %606 = vector.extract_strided_slice %589 {offsets = [0, 256], sizes = [1, 128], strides = [1, 1]} : vector<1x512xf32> to vector<1x128xf32>
    %607 = math.tanh %606 : vector<1x128xf32>
    %608 = vector.extract_strided_slice %589 {offsets = [0, 384], sizes = [1, 128], strides = [1, 1]} : vector<1x512xf32> to vector<1x128xf32>
    %cst_260 = arith.constant 5.000000e-01 : f32
    %609 = vector.broadcast %cst_260 : f32 to vector<1x128xf32>
    %610 = arith.mulf %609, %608 : vector<1x128xf32>
    %611 = math.tanh %610 : vector<1x128xf32>
    %cst_261 = arith.constant 1.000000e+00 : f32
    %612 = vector.broadcast %cst_261 : f32 to vector<1x128xf32>
    %613 = arith.addf %611, %612 : vector<1x128xf32>
    %cst_262 = arith.constant 5.000000e-01 : f32
    %614 = vector.broadcast %cst_262 : f32 to vector<1x128xf32>
    %615 = arith.mulf %614, %613 : vector<1x128xf32>
    %616 = arith.mulf %605, %581 : vector<1x128xf32>
    %617 = arith.mulf %597, %607 : vector<1x128xf32>
    %618 = arith.addf %616, %617 : vector<1x128xf32>
    %619 = math.tanh %618 : vector<1x128xf32>
    %620 = arith.mulf %615, %619 : vector<1x128xf32>
    %c0_263 = arith.constant 0 : index
    %c0_264 = arith.constant 0 : index
    %621 = vector.load %arg8[%c0_263, %c0_264] : memref<128x160xf32, #tpu.memory_space<vmem>>, vector<128x160xf32>
    %cst_265 = arith.constant dense<0.000000e+00> : vector<1x160xf32>
    %622 = tpu.matmul %620, %621, %cst_265 {dimension_numbers = #tpu.dot_dimension_numbers<[1], [0], [0], [1], [0, 0, 1, 1], [], []>} : vector<1x128xf32>, vector<128x160xf32>, vector<1x160xf32> -> vector<1x160xf32>
    %c0_266 = arith.constant 0 : index
    %c0_267 = arith.constant 0 : index
    %623 = vector.load %arg9[%c0_266, %c0_267] : memref<1x160xf32, #tpu.memory_space<vmem>>, vector<1x160xf32>
    %624 = arith.addf %622, %623 : vector<1x160xf32>
    %625 = vector.extract_strided_slice %624 {offsets = [0, 0], sizes = [1, 128], strides = [1, 1]} : vector<1x160xf32> to vector<1x128xf32>
    %626 = vector.extract_strided_slice %624 {offsets = [0, 128], sizes = [1, 8], strides = [1, 1]} : vector<1x160xf32> to vector<1x8xf32>
    %627 = vector.extract_strided_slice %624 {offsets = [0, 136], sizes = [1, 8], strides = [1, 1]} : vector<1x160xf32> to vector<1x8xf32>
    %628 = vector.extract_strided_slice %624 {offsets = [0, 144], sizes = [1, 8], strides = [1, 1]} : vector<1x160xf32> to vector<1x8xf32>
    %629 = vector.extract_strided_slice %624 {offsets = [0, 152], sizes = [1, 8], strides = [1, 1]} : vector<1x160xf32> to vector<1x8xf32>
    %630 = tpu.concatenate %626, %627, %628, %629 in 0 : vector<1x8xf32>, vector<1x8xf32>, vector<1x8xf32>, vector<1x8xf32> -> vector<4x8xf32>
    %cst_268 = arith.constant dense<0xFF800000> : vector<4xf32>
    %631 = vector.multi_reduction <maximumf>, %630, %cst_268 [1] : vector<4x8xf32> to vector<4xf32>
    %632 = vector.shape_cast %631 : vector<4xf32> to vector<4x1xf32>
    %633 = vector.broadcast %632 : vector<4x1xf32> to vector<4x8xf32>
    %634 = arith.subf %630, %633 : vector<4x8xf32>
    %635 = math.exp %634 : vector<4x8xf32>
    %cst_269 = arith.constant dense<0.000000e+00> : vector<4xf32>
    %636 = vector.multi_reduction <add>, %635, %cst_269 [1] : vector<4x8xf32> to vector<4xf32>
    %637 = vector.shape_cast %636 : vector<4xf32> to vector<4x1xf32>
    %638 = tpu.reciprocal %637 {approx = true} : vector<4x1xf32> -> vector<4x1xf32>
    %639 = arith.mulf %637, %638 : vector<4x1xf32>
    %cst_270 = arith.constant 2.000000e+00 : f32
    %640 = vector.broadcast %cst_270 : f32 to vector<4x1xf32>
    %641 = arith.subf %640, %639 : vector<4x1xf32>
    %642 = arith.mulf %638, %641 : vector<4x1xf32>
    %643 = vector.broadcast %642 : vector<4x1xf32> to vector<4x8xf32>
    %644 = arith.mulf %635, %643 : vector<4x8xf32>
    %645 = arith.index_cast %c7_i32 : i32 to index
    %c0_271 = arith.constant 0 : index
    %646 = vector.load %arg10[%645, %c0_271] : memref<8x128xf32, #tpu.memory_space<vmem>>, vector<1x128xf32>
    tpu.vector_store %arg10[%645, %c0_271], %625 {strides = array<i32>} : memref<8x128xf32, #tpu.memory_space<vmem>>, vector<1x128xf32>,
    %647 = vector.shape_cast %644 : vector<4x8xf32> to vector<1x4x8xf32>
    %648 = arith.index_cast %c7_i32 : i32 to index
    %c0_272 = arith.constant 0 : index
    %c0_273 = arith.constant 0 : index
    %649 = vector.load %arg11[%648, %c0_272, %c0_273] : memref<8x4x8xf32, #tpu.memory_space<vmem>>, vector<1x4x8xf32>
    tpu.vector_store %arg11[%648, %c0_272, %c0_273], %647 {strides = array<i32>} : memref<8x4x8xf32, #tpu.memory_space<vmem>>, vector<1x4x8xf32>,
    %c8_i32 = arith.constant 8 : i32
    %650 = tpu.concatenate %625, %618 in 1 : vector<1x128xf32>, vector<1x128xf32> -> vector<1x256xf32>
    %c0_274 = arith.constant 0 : index
    %c0_275 = arith.constant 0 : index
    %651 = vector.load %arg12[%c0_274, %c0_275] : memref<1x256xf32, #tpu.memory_space<vmem>>, vector<1x256xf32>
    tpu.vector_store %arg12[%c0_274, %c0_275], %650 {strides = array<i32>} : memref<1x256xf32, #tpu.memory_space<vmem>>, vector<1x256xf32>,
    return
  }
}

</mosaic_0001>

<bundles_post_ra>
// kernel: tpu_custom_call.1
= control target key start
LH: loop header
LB: loop body
LE: loop exit
PB: predicated region body
PF: predicated region fallthrough
CT: control target
= control target key end

     0   :  { %18 = vsyncpa [#allocation5], 0  ;;  %s10907_s0 = inlined_call_operand.vmem [shape: f32[8], index: 0, kind: input, shape index: {}]   ;;  %s10908_s1 = inlined_call_operand.vmem [shape: f32[8,512], index: 1, kind: input, shape index: {}]   ;;  %s10909_s2 = inlined_call_operand.vmem [shape: f32[1,128], index: 2, kind: input, shape index: {}]   ;;  %s10910_s3 = inlined_call_operand.vmem [shape: f32[1,128], index: 3, kind: input, shape index: {}]   ;;  %s10911_s4 = inlined_call_operand.vmem [shape: f32[128,128], index: 4, kind: input, shape index: {}]   ;;  %s10912_s5 = inlined_call_operand.vmem [shape: f32[1,128], index: 5, kind: input, shape index: {}]   ;;  %s10913_s6 = inlined_call_operand.hbm [shape: f32[128,512], index: 6, kind: input, shape index: {}]   ;;  %s10914_s7 = inlined_call_operand.hbm [shape: f32[128,512], index: 7, kind: input, shape index: {}]   ;;  %s10915_s8 = inlined_call_operand.vmem [shape: f32[128,160], index: 8, kind: input, shape index: {}]   ;;  %s10916_s9 = inlined_call_operand.vmem [shape: f32[1,160], index: 9, kind: input, shape index: {}]   ;;  %s10917_s10 = inlined_call_operand.hbm [shape: f32[8,128], index: 10, kind: output, shape index: {0}]   ;;  %s10918_s11 = inlined_call_operand.hbm [shape: f32[8,4,8], index: 11, kind: output, shape index: {1}]   ;;  %s10919_s12 = inlined_call_operand.hbm [shape: f32[1,256], index: 12, kind: output, shape index: {2}]  }
   0x1   :  { %19 = vsyncpa [#allocation3], 0 }
   0x2   :  { %20 = vsyncpa [#allocation8], 0 }
   0x3   :  { %21 = vsyncpa [#allocation4], 0 }
   0x4   :  { %22 = vsyncpa [#allocation11], 0  ;;  %s29_s23 = sshll.u32 %s10907_s0, 4  ;;  %s30_s23 = int_to_ptr.vmem [resolvable:$true] %s29_s23 }
   0x5   :  { %s8105_s24 = scalar_lea.vmem %s30_s23, 16  ;;  %p8110_p1 = scmp.lt.s32.totalorder %s30_s23, %s30_s23 }
   0x6   :  { %p8106_p0 = scmp.ne.s32.totalorder %s30_s23, %s8105_s24  ;;  %p8111_p2 = scmp.lt.s32.totalorder %s8105_s24, %s8105_s24 }
   0x8   :  { %p8112_p3 = por %p8111_p2, %p8110_p1 }
   0xa   :  { %p8113_p4 = pnand %p8112_p3, %p8106_p0 }
   0xc   :  { %8116 = shalt.err (!%p8113_p4)
}
   0xd   :  { %s8237_s25 = smov [#allocation2]   ;;  %s8238_s26 = smov [#allocation6]  }
   0xe   :  { %32 = dma.vmem_to_smem %s30_s23, 16, %s8237_s25, [#allocation5]  }
   0xf   :  { %s48_s27 = sshll.u32 %s8238_s26, 4  ;;  %s8117_s30 = scalar_lea.hbm %s10913_s6, 8192  ;;  %s49_s27 = int_to_ptr.vmem [resolvable:$true] %s48_s27 }
  0x10   :  { %p8118_p5 = scmp.ne.s32.totalorder %s10913_s6, %s8117_s30  ;;  %p8121_p6 = scmp.lt.u32.totalorder %s8117_s30, %s10913_s6 }
  0x12   :  { %p8123_p7 = pnand %p8121_p6, %p8118_p5 }
  0x14   :  { %8126 = shalt.err (!%p8123_p7)
}
  0x15   :  { %s8127_s16 = scalar_lea.vmem %s49_s27, 8192  ;;  %p8132_p9 = scmp.lt.s32.totalorder %s49_s27, %s49_s27 }
  0x16   :  { %p8128_p8 = scmp.ne.s32.totalorder %s49_s27, %s8127_s16  ;;  %p8133_p10 = scmp.lt.s32.totalorder %s8127_s16, %s8127_s16 }
  0x18   :  { %p8134_p11 = por %p8133_p10, %p8132_p9 }
  0x1a   :  { %p8135_p12 = pnand %p8134_p11, %p8128_p8 }
  0x1c   :  { %8138 = shalt.err (!%p8135_p12)
}
  0x1d   :  { %s8239_s17 = smov 512   ;;  %s8240_s18 = smov 32  }
  0x1e   :  { %54 = dma.hbm_to_vmem [thread:$0]  %s10913_s6, 8192, %s49_s27, [#allocation3], %s8239_s17, %s8239_s17, %s8240_s18  }
  0x1f   :  { %s8241_s21 = smov [#allocation7]   ;;  %s8139_s25 = scalar_lea.hbm %s10914_s7, 8192 }
  0x20   :  { %s60_s22 = sshll.u32 %s8241_s21, 4  ;;  %p8140_p13 = scmp.ne.s32.totalorder %s10914_s7, %s8139_s25  ;;  %s61_s22 = int_to_ptr.vmem [resolvable:$true] %s60_s22 }
  0x21   :  { %p8143_p0 = scmp.lt.u32.totalorder %s8139_s25, %s10914_s7 }
  0x23   :  { %p8145_p1 = pnand %p8143_p0, %p8140_p13 }
  0x25   :  { %8148 = shalt.err (!%p8145_p1)
}
  0x26   :  { %s8149_s13 = scalar_lea.vmem %s61_s22, 8192  ;;  %p8154_p3 = scmp.lt.s32.totalorder %s61_s22, %s61_s22 }
  0x27   :  { %p8150_p2 = scmp.ne.s32.totalorder %s61_s22, %s8149_s13  ;;  %p8155_p4 = scmp.lt.s32.totalorder %s8149_s13, %s8149_s13 }
  0x29   :  { %p8156_p5 = por %p8155_p4, %p8154_p3 }
  0x2b   :  { %p8157_p6 = pnand %p8156_p5, %p8150_p2 }
  0x2d   :  { %8160 = shalt.err (!%p8157_p6)
}
  0x2e   :  { %66 = dma.hbm_to_vmem [thread:$0]  %s10914_s7, 8192, %s61_s22, [#allocation8], %s8239_s17, %s8239_s17, %s8240_s18  }
  0x2f   :  { %8227 = dma.done.wait [#allocation5], 16  }
  0x30   :  { %8228 = vsyncadd [#allocation5], 4294967280 }
  0x31   :  { %8229 = dma.done.wait [#allocation3], 8192  }
  0x32   :  { %8230 = vsyncadd [#allocation3], 4294959104 }
  0x33   :  { %8231 = dma.done.wait [#allocation8], 8192  }
  0x34   :  { %8232 = vsyncadd [#allocation8], 4294959104 }
  0x35   :  { %80 = sfence }
  0x36   :  { %v85_v0 = vld [vmem:[%s10911_s4] sm:$0xff]  ;;  %v86_v1 = vld [vmem:[%s10911_s4 + $0x8] sm:$0xff]  ;;  %v87_v2 = vld [vmem:[%s10911_s4 + $0x10] sm:$0xff]  ;;  %v10920_v3 = vmov 0.0|0.0   ;;  %vm8243_vm0 = vmmov 0   ;;  %v10922_v6 = vmov 0.0  }
  0x37   :  { %6504 = vmatprep.subr.bf16.mxu0 %v10920_v3  ;;  %v8356_v4 = vpack.c.bf16 %v86_v1, %v85_v0  ;;  %v88_v5 = vld [vmem:[%s10911_s4 + $0x18] sm:$0xff]  ;;  %6256 = vmatprep.mubr.msk.f32.mxu0 %vm8243_vm0, %v10922_v6  ;;  %v89_v8 = vld [vmem:[%s10911_s4 + $0x20] sm:$0xff]  ;;  %v90_v9 = vld [vmem:[%s10911_s4 + $0x28] sm:$0xff]  ;;  %s8587_s26 = sld [smem:[#allocation2]]  ;;  %s8246_s6 = smov 104   ;;  %vm802_vm1 = vcmask 1040384  }
  0x38   :  { %305 = vmatprep.mubr.f32.mxu1 %v10922_v6  ;;  %v8365_v7 = vpack.c.bf16 %v88_v5, %v87_v2  ;;  %v178_v10 = vld [vmem:[#allocation6 + $0x8] sm:$0xff]  ;;  %v8375_v12 = vpack.c.bf16 %v90_v9, %v89_v8  ;;  %v177_v14 = vld [vmem:[#allocation6] sm:$0xff]  ;;  %v91_v16 = vld [vmem:[%s10911_s4 + $0x30] sm:$0xff]  ;;  %s8247_s27 = smov 120   ;;  %s8248_s14 = smov 112   ;;  %vm804_vm2 = vcmask 1041408  }
  0x39   :  { %6506 = vmatpush3.bf16.msra.mxu0 %v8356_v4  ;;  %v182_v11 = vld [vmem:[#allocation6 + $0x28] sm:$0xff]  ;;  %v181_v15 = vld [vmem:[#allocation6 + $0x20] sm:$0xff]  ;;  %v92_v17 = vld [vmem:[%s10911_s4 + $0x38] sm:$0xff]  ;;  %vm806_vm3 = vcmask 1042432   ;;  %vm808_vm4 = vcmask 60416   ;;  %s6074_s16 = sld [smem:[#allocation2 + $0x1]] }
  0x3a   :  { %6507 = vmatprep.subr.bf16.mxu0 %v10920_v3  ;;  %v8377_v13 = vpack.c.bf16 %v182_v11, %v178_v10  ;;  %v8386_v18 = vpack.c.bf16 %v181_v15, %v177_v14  ;;  %v186_v19 = vld [vmem:[#allocation6 + $0x48] sm:$0xff]  ;;  %v185_v22 = vld [vmem:[#allocation6 + $0x40] sm:$0xff]  ;;  %v8393_v24 = vpack.c.bf16 %v92_v17, %v91_v16  ;;  %v95_v40 = vld [vmem:[%s10911_s4 + $0x50] sm:$0xff]  ;;  %s6082_s17 = sld [smem:[#allocation2 + $0x5]]  ;;  %s10430_s7 = sld [smem:[#allocation2 + $0x6]] }
  0x3b   :  { %v190_v20 = vld [vmem:[#allocation6 + $0x68] sm:$0xff]  ;;  %v189_v23 = vld [vmem:[#allocation6 + $0x60] sm:$0xff]  ;;  %v96_v41 = vld [vmem:[%s10911_s4 + $0x58] sm:$0xff] }
  0x3c   :  { %6529 = vmatprep.subr.bf16.mxu1 %v8377_v13  ;;  %v8390_v21 = vpack.c.bf16 %v190_v20, %v186_v19  ;;  %v8395_v25 = vpack.c.bf16 %v189_v23, %v185_v22  ;;  %v194_v26 = vld [vmem:[#allocation6 + $0x88] sm:$0xff]  ;;  %v93_v28 = vld [vmem:[%s10911_s4 + $0x40] sm:$0xff]  ;;  %v8427_v45 = vpack.c.bf16 %v96_v41, %v95_v40  ;;  %v99_v55 = vld [vmem:[%s10911_s4 + $0x70] sm:$0xff] }
  0x3d   :  { %6509 = vmatpush3.bf16.msra.mxu0 %v8365_v7  ;;  %6531 = vmatpush1.bf16.msra.mxu1 %v8386_v18  ;;  %v198_v27 = vld [vmem:[#allocation6 + $0xa8] sm:$0xff]  ;;  %v193_v31 = vld [vmem:[#allocation6 + $0x80] sm:$0xff]  ;;  %v100_v59 = vld [vmem:[%s10911_s4 + $0x78] sm:$0xff]  ;;  %s84_s28 = ssub.f32 1.0, %s8587_s26  ;;  %s6078_s26 = sld [smem:[#allocation2 + $0x3]] }
  0x3e   :  { %6510 = vmatprep.subr.bf16.mxu0 %v10920_v3  ;;  %v94_v29 = vld [vmem:[%s10911_s4 + $0x48] sm:$0xff]  ;;  %6533 = vmatprep.subr.bf16.mxu1 %v8390_v21  ;;  %v8405_v30 = vpack.c.bf16 %v198_v27, %v194_v26  ;;  %v197_v32 = vld [vmem:[#allocation6 + $0xa0] sm:$0xff]  ;;  %v180_v62 = vld [vmem:[#allocation6 + $0x18] sm:$0xff]  ;;  %v8459_v1 = vpack.c.bf16 %v100_v59, %v99_v55 }
  0x3f   :  { %v8408_v33 = vpack.c.bf16 %v197_v32, %v193_v31  ;;  %v202_v34 = vld [vmem:[#allocation6 + $0xc8] sm:$0xff]  ;;  %v8411_v36 = vpack.c.bf16 %v94_v29, %v93_v28  ;;  %v201_v38 = vld [vmem:[#allocation6 + $0xc0] sm:$0xff]  ;;  %v184_v63 = vld [vmem:[#allocation6 + $0x38] sm:$0xff]  ;;  %s826_s19 = ssub.f32 1.0, %s6074_s16  ;;  %s9220_s16 = sld [smem:[#allocation2 + $0x2]] }
  0x40   :  { %v206_v35 = vld [vmem:[#allocation6 + $0xe8] sm:$0xff]  ;;  %v205_v39 = vld [vmem:[#allocation6 + $0xe0] sm:$0xff]  ;;  %v8465_v9 = vpack.c.bf16 %v184_v63, %v180_v62  ;;  %v179_v10 = vld [vmem:[#allocation6 + $0x10] sm:$0xff]  ;;  %s3786_s18 = ssub.f32 1.0, %s6082_s17 }
  0x41   :  { %6512 = vmatpush3.bf16.msra.mxu0 %v8375_v12  ;;  %6535 = vmatpush1.bf16.msra.mxu1 %v8395_v25  ;;  %v8414_v37 = vpack.c.bf16 %v206_v35, %v202_v34  ;;  %v210_v42 = vld [vmem:[#allocation6 + $0x108] sm:$0xff]  ;;  %v8424_v44 = vpack.c.bf16 %v205_v39, %v201_v38  ;;  %v97_v46 = vld [vmem:[%s10911_s4 + $0x60] sm:$0xff]  ;;  %v183_v11 = vld [vmem:[#allocation6 + $0x30] sm:$0xff]  ;;  %s4526_s17 = ssub.f32 1.0, %s10430_s7 }
  0x42   :  { %6513 = vmatprep.subr.bf16.mxu0 %v10920_v3  ;;  %6537 = vmatprep.subr.bf16.mxu1 %v8405_v30  ;;  %v214_v43 = vld [vmem:[#allocation6 + $0x128] sm:$0xff]  ;;  %v209_v48 = vld [vmem:[#allocation6 + $0x100] sm:$0xff]  ;;  %v188_v14 = vld [vmem:[#allocation6 + $0x58] sm:$0xff]  ;;  %v8476_v19 = vpack.c.bf16 %v183_v11, %v179_v10 }
  0x43   :  { %v8433_v47 = vpack.c.bf16 %v214_v43, %v210_v42  ;;  %v213_v49 = vld [vmem:[#allocation6 + $0x120] sm:$0xff]  ;;  %v98_v50 = vld [vmem:[%s10911_s4 + $0x68] sm:$0xff]  ;;  %v192_v15 = vld [vmem:[#allocation6 + $0x78] sm:$0xff] }
  0x44   :  { %v218_v51 = vld [vmem:[#allocation6 + $0x148] sm:$0xff]  ;;  %v8440_v53 = vpack.c.bf16 %v213_v49, %v209_v48  ;;  %v8443_v54 = vpack.c.bf16 %v98_v50, %v97_v46  ;;  %v217_v57 = vld [vmem:[#allocation6 + $0x140] sm:$0xff]  ;;  %v8480_v20 = vpack.c.bf16 %v192_v15, %v188_v14  ;;  %v187_v22 = vld [vmem:[#allocation6 + $0x50] sm:$0xff] }
  0x45   :  { %6515 = vmatpush3.bf16.msra.mxu0 %v8393_v24  ;;  %6539 = vmatpush1.bf16.msra.mxu1 %v8408_v33  ;;  %v222_v52 = vld [vmem:[#allocation6 + $0x168] sm:$0xff]  ;;  %v221_v58 = vld [vmem:[#allocation6 + $0x160] sm:$0xff]  ;;  %v191_v23 = vld [vmem:[#allocation6 + $0x70] sm:$0xff] }
  0x46   :  { %6516 = vmatprep.subr.bf16.mxu0 %v10920_v3  ;;  %6541 = vmatprep.subr.bf16.mxu1 %v8414_v37  ;;  %v8449_v56 = vpack.c.bf16 %v222_v52, %v218_v51  ;;  %v226_v60 = vld [vmem:[#allocation6 + $0x188] sm:$0xff]  ;;  %v8456_v0 = vpack.c.bf16 %v221_v58, %v217_v57  ;;  %v225_v5 = vld [vmem:[#allocation6 + $0x180] sm:$0xff]  ;;  %v196_v26 = vld [vmem:[#allocation6 + $0x98] sm:$0xff]  ;;  %v8485_v28 = vpack.c.bf16 %v191_v23, %v187_v22 }
  0x47   :  { %v230_v61 = vld [vmem:[#allocation6 + $0x1a8] sm:$0xff]  ;;  %v229_v8 = vld [vmem:[#allocation6 + $0x1a0] sm:$0xff]  ;;  %v200_v27 = vld [vmem:[#allocation6 + $0xb8] sm:$0xff] }
  0x48   :  { %v8462_v2 = vpack.c.bf16 %v230_v61, %v226_v60  ;;  %v8468_v16 = vpack.c.bf16 %v229_v8, %v225_v5  ;;  %v8474_v17 = vld [vmem:[%s10909_s2] sm:$0x1]  ;;  %v8489_v29 = vpack.c.bf16 %v200_v27, %v196_v26  ;;  %v195_v31 = vld [vmem:[#allocation6 + $0x90] sm:$0xff]  ;;  %v204_v34 = vld [vmem:[#allocation6 + $0xd8] sm:$0xff] }
  0x49   :  { %6518 = vmatpush3.bf16.msra.mxu0 %v8411_v36  ;;  %6543 = vmatpush1.bf16.msra.mxu1 %v8424_v44  ;;  %v199_v32 = vld [vmem:[#allocation6 + $0xb0] sm:$0xff]  ;;  %v208_v35 = vld [vmem:[#allocation6 + $0xf8] sm:$0xff]  ;;  %v234_v11 = vld [vmem:[#allocation6 + $0x1c8] sm:$0xff] }
  0x4a   :  { %6519 = vmatprep.subr.bf16.mxu0 %v10920_v3  ;;  %6545 = vmatprep.subr.bf16.mxu1 %v8433_v47  ;;  %v8492_v38 = vpack.c.bf16 %v199_v32, %v195_v31  ;;  %v8495_v39 = vpack.c.bf16 %v208_v35, %v204_v34  ;;  %v203_v40 = vld [vmem:[#allocation6 + $0xd0] sm:$0xff]  ;;  %v212_v42 = vld [vmem:[#allocation6 + $0x118] sm:$0xff]  ;;  %v238_v14 = vld [vmem:[#allocation6 + $0x1e8] sm:$0xff] }
  0x4b   :  { %v207_v41 = vld [vmem:[#allocation6 + $0xf0] sm:$0xff]  ;;  %v216_v43 = vld [vmem:[#allocation6 + $0x138] sm:$0xff]  ;;  %v8520_v22 = vpack.c.bf16 %v238_v14, %v234_v11  ;;  %v233_v26 = vld [vmem:[#allocation6 + $0x1c0] sm:$0xff] }
  0x4c   :  { %v8498_v46 = vpack.c.bf16 %v207_v41, %v203_v40  ;;  %v8501_v48 = vpack.c.bf16 %v216_v43, %v212_v42  ;;  %v211_v49 = vld [vmem:[#allocation6 + $0x110] sm:$0xff]  ;;  %v220_v51 = vld [vmem:[#allocation6 + $0x158] sm:$0xff]  ;;  %v237_v27 = vld [vmem:[#allocation6 + $0x1e0] sm:$0xff] }
  0x4d   :  { %6521 = vmatpush3.bf16.msra.mxu0 %v8427_v45  ;;  %6547 = vmatpush1.bf16.msra.mxu1 %v8440_v53  ;;  %v215_v50 = vld [vmem:[#allocation6 + $0x130] sm:$0xff]  ;;  %v224_v52 = vld [vmem:[#allocation6 + $0x178] sm:$0xff]  ;;  %v8524_v32 = vpack.c.bf16 %v237_v27, %v233_v26  ;;  %v414_v41 = vld [vmem:[#allocation7 + $0x8] sm:$0xff] }
  0x4e   :  { %6522 = vmatprep.subr.bf16.mxu0 %v10920_v3  ;;  %6549 = vmatprep.subr.bf16.mxu1 %v8449_v56  ;;  %v8504_v55 = vpack.c.bf16 %v215_v50, %v211_v49  ;;  %v8507_v57 = vpack.c.bf16 %v224_v52, %v220_v51  ;;  %v219_v58 = vld [vmem:[#allocation6 + $0x150] sm:$0xff]  ;;  %v228_v60 = vld [vmem:[#allocation6 + $0x198] sm:$0xff]  ;;  %v418_v42 = vld [vmem:[#allocation7 + $0x28] sm:$0xff] }
  0x4f   :  { %v223_v59 = vld [vmem:[#allocation6 + $0x170] sm:$0xff]  ;;  %v232_v61 = vld [vmem:[#allocation6 + $0x1b8] sm:$0xff]  ;;  %v8532_v49 = vpack.c.bf16 %v418_v42, %v414_v41  ;;  %v101_v52 = vld [vmem:[%s10912_s5] sm:$0x1] }
  0x50   :  { %v8510_v62 = vpack.c.bf16 %v223_v59, %v219_v58  ;;  %v8513_v63 = vpack.c.bf16 %v232_v61, %v228_v60  ;;  %v227_v5 = vld [vmem:[#allocation6 + $0x190] sm:$0xff]  ;;  %v236_v15 = vld [vmem:[#allocation6 + $0x1d8] sm:$0xff]  ;;  %v413_v58 = vld [vmem:[#allocation7] sm:$0xff] }
  0x51   :  { %6524 = vmatpush3.bf16.msra.mxu0 %v8443_v54  ;;  %6551 = vmatpush1.bf16.msra.mxu1 %v8456_v0  ;;  %v231_v8 = vld [vmem:[#allocation6 + $0x1b0] sm:$0xff]  ;;  %v240_v23 = vld [vmem:[#allocation6 + $0x1f8] sm:$0xff]  ;;  %v417_v59 = vld [vmem:[#allocation7 + $0x20] sm:$0xff] }
  0x52   :  { %6525 = vmatprep.subr.bf16.mxu0 %v10920_v3  ;;  %6553 = vmatprep.subr.bf16.mxu1 %v8462_v2  ;;  %v8516_v10 = vpack.c.bf16 %v231_v8, %v227_v5  ;;  %v8522_v31 = vpack.c.bf16 %v240_v23, %v236_v15  ;;  %v235_v34 = vld [vmem:[#allocation6 + $0x1d0] sm:$0xff]  ;;  %v416_v43 = vld [vmem:[#allocation7 + $0x18] sm:$0xff]  ;;  %v422_v5 = vld [vmem:[#allocation7 + $0x48] sm:$0xff]  ;;  %v8541_v27 = vpack.c.bf16 %v417_v59, %v413_v58 }
  0x53   :  { %v239_v35 = vld [vmem:[#allocation6 + $0x1f0] sm:$0xff]  ;;  %v420_v50 = vld [vmem:[#allocation7 + $0x38] sm:$0xff]  ;;  %v426_v11 = vld [vmem:[#allocation7 + $0x68] sm:$0xff] }
  0x54   :  { %11087 = vst [vmem:[#allocation18_spill] sm:$0xff] %v8516_v10  ;;  %11088 = vst [vmem:[#allocation19_spill] sm:$0xff] %v8522_v31  ;;  %v8527_v40 = vpack.c.bf16 %v239_v35, %v235_v34  ;;  %v8534_v51 = vpack.c.bf16 %v420_v50, %v416_v43  ;;  %v415_v60 = vld [vmem:[#allocation7 + $0x10] sm:$0xff]  ;;  %v424_v14 = vld [vmem:[#allocation7 + $0x58] sm:$0xff]  ;;  %v8545_v43 = vpack.c.bf16 %v426_v11, %v422_v5 }
  0x55   :  { %6527 = vmatpush3.bf16.msra.mxu0 %v8459_v1  ;;  %6555 = vmatpush1.bf16.msra.mxu1 %v8468_v16  ;;  %v419_v61 = vld [vmem:[#allocation7 + $0x30] sm:$0xff]  ;;  %v428_v15 = vld [vmem:[#allocation7 + $0x78] sm:$0xff]  ;;  %v421_v35 = vld [vmem:[#allocation7 + $0x40] sm:$0xff] }
  0x56   :  { %6561 = vmatprep.subr.bf16.mxu0 %v8465_v9  ;;  %6557 = vmatprep.subr.bf16.mxu1 %v8520_v22  ;;  %11089 = vst [vmem:[#allocation20_spill] sm:$0xff] %v8527_v40  ;;  %11090 = vst [vmem:[#allocation21_spill] sm:$0xff] %v8534_v51  ;;  %v8543_v34 = vpack.c.bf16 %v419_v61, %v415_v60  ;;  %v425_v41 = vld [vmem:[#allocation7 + $0x60] sm:$0xff]  ;;  %v8547_v50 = vpack.c.bf16 %v428_v15, %v424_v14  ;;  %v423_v3 = vld [vmem:[#allocation7 + $0x50] sm:$0xff] }
  0x57   :  { %11091 = vst [vmem:[#allocation22_spill] sm:$0xff] %v8545_v43  ;;  %v429_v59 = vld [vmem:[#allocation7 + $0x80] sm:$0xff]  ;;  %v435_v11 = vld [vmem:[#allocation7 + $0xb0] sm:$0xff]  ;;  %v438_v14 = vld [vmem:[#allocation7 + $0xc8] sm:$0xff] }
  0x58   :  { %6257 = vmatmul.mubr.f32.vlgmr.msra.gmra.mrb[0].mxu0 %v8474_v17  ;;  %11092 = vst [vmem:[#allocation23_spill] sm:$0xff] %v8547_v50  ;;  %v433_v60 = vld [vmem:[#allocation7 + $0xa0] sm:$0xff]  ;;  %v442_v15 = vld [vmem:[#allocation7 + $0xe8] sm:$0xff] }
  0x59   :  { %6563 = vmatpush1.bf16.msra.mxu0 %v8476_v19  ;;  %376 = vmatprep.mubr.f32.mxu0 %v10922_v6  ;;  %v427_v6 = vld [vmem:[#allocation7 + $0x70] sm:$0xff] }
  0x5a   :  { %6565 = vmatprep.subr.bf16.mxu0 %v8480_v20  ;;  %6559 = vmatpush1.bf16.msra.mxu1 %v8524_v32  ;;  %v8553_v58 = vpack.c.bf16 %v427_v6, %v423_v3  ;;  %v8565_v3 = vpack.c.bf16 %v433_v60, %v429_v59 }
  0x5b   :  { %6593 = vmatprep.subr.bf16.mxu1 %v8532_v49 }
  0x5c   :  { %11094 = vst [vmem:[#allocation25_spill] sm:$0xff] %v8553_v58  ;;  %11098 = vst [vmem:[#allocation28_spill] sm:$0xff] %v8565_v3 }
  0x5d   :  { %6567 = vmatpush1.bf16.msra.mxu0 %v8485_v28 }
  0x5e   :  { %6569 = vmatprep.subr.bf16.mxu0 %v8489_v29 }
  0x61   :  { %6571 = vmatpush1.bf16.msra.mxu0 %v8492_v38 }
  0x62   :  { %6573 = vmatprep.subr.bf16.mxu0 %v8495_v39 }
  0x65   :  { %6575 = vmatpush1.bf16.msra.mxu0 %v8498_v46 }
  0x66   :  { %6577 = vmatprep.subr.bf16.mxu0 %v8501_v48 }
  0x69   :  { %6579 = vmatpush1.bf16.msra.mxu0 %v8504_v55 }
  0x6a   :  { %6581 = vmatprep.subr.bf16.mxu0 %v8507_v57 }
  0x6d   :  { %6583 = vmatpush1.bf16.msra.mxu0 %v8510_v62 }
  0x6e   :  { %6585 = vmatprep.subr.bf16.mxu0 %v8513_v63 }
  0x71   :  { %6587 = vmatpush1.bf16.msra.mxu0 %v8516_v10  ;;  %v436_v10 = vld [vmem:[#allocation7 + $0xb8] sm:$0xff] }
  0x72   :  { %6589 = vmatprep.subr.bf16.mxu0 %v8522_v31  ;;  %v432_v31 = vld [vmem:[#allocation7 + $0x98] sm:$0xff] }
  0x73   :  { %v8559_v5 = vpack.c.bf16 %v436_v10, %v432_v31  ;;  %v437_v10 = vld [vmem:[#allocation7 + $0xc0] sm:$0xff] }
  0x74   :  { %v441_v31 = vld [vmem:[#allocation7 + $0xe0] sm:$0xff] }
  0x75   :  { %6591 = vmatpush1.bf16.msra.mxu0 %v8527_v40  ;;  %v434_v40 = vld [vmem:[#allocation7 + $0xa8] sm:$0xff]  ;;  %11096 = vst [vmem:[#allocation27_spill] sm:$0xff] %v8559_v5  ;;  %v8577_v59 = vpack.c.bf16 %v441_v31, %v437_v10 }
  0x76   :  { %6625 = vmatprep.subr.bf16.mxu0 %v8534_v51  ;;  %v430_v51 = vld [vmem:[#allocation7 + $0x88] sm:$0xff] }
  0x77   :  { %v8557_v61 = vpack.c.bf16 %v434_v40, %v430_v51  ;;  %v8571_v40 = vpack.c.bf16 %v442_v15, %v438_v14  ;;  %11102 = vst [vmem:[#allocation32_spill] sm:$0xff] %v8577_v59 }
  0x79   :  { %11095 = vst [vmem:[#allocation26_spill] sm:$0xff] %v8557_v61  ;;  %11100 = vst [vmem:[#allocation30_spill] sm:$0xff] %v8571_v40 }
 0x12b   :  { %v168_v8 = vpop.f32.mrb[0].mxu0 }
 0x12c   :  { %v169_v23 = vadd.f32 %v168_v8, %v101_v52  ;;  %v6258_v26 = vpop.f32.mrb[1].mxu0  ;;  %v8551_v52 = vpack.c.bf16 %v425_v41, %v421_v35  ;;  %v431_v8 = vld [vmem:[#allocation7 + $0x90] sm:$0xff]  ;;  %v11097_v35 = vmov 0.0  }
 0x12d   :  { %v444_v26 = vld [vmem:[#allocation7 + $0xf8] sm:$0xff]  ;;  %v8567_v6 = vpack.c.bf16 %v435_v11, %v431_v8  ;;  %v439_v41 = vld [vmem:[#allocation7 + $0xd0] sm:$0xff]  ;;  %v445_v8 = vld [vmem:[#allocation7 + $0x100] sm:$0xff] }
 0x12e   :  { %v172_v42 = vmax.f32 %v169_v23, 0.0  ;;  %11093 = vst [vmem:[#allocation24_spill] sm:$0xff] %v8551_v52  ;;  %v440_v23 = vld [vmem:[#allocation7 + $0xd8] sm:$0xff]  ;;  %v449_v11 = vld [vmem:[#allocation7 + $0x120] sm:$0xff] }
 0x12f   :  { %11099 = vst [vmem:[#allocation29_spill] sm:$0xff] %v8567_v6  ;;  %v8573_v51 = vpack.c.bf16 %v444_v26, %v440_v23  ;;  %v447_v23 = vld [vmem:[#allocation7 + $0x110] sm:$0xff]  ;;  %v8591_v10 = vpack.c.bf16 %v449_v11, %v445_v8 }
 0x130   :  { %306 = vmatmul.mubr.f32.vlgmr.msra.gmra.mrb[0].mxu1 %v172_v42  ;;  %377 = vmatmul.mubr.f32.vlgmr.msra.gmra.mrb[2].mxu0 %v172_v42  ;;  %v443_v42 = vld [vmem:[#allocation7 + $0xf0] sm:$0xff] }
 0x131   :  { %6595 = vmatpush1.bf16.msra.mxu1 %v8541_v27  ;;  %6627 = vmatpush1.bf16.msra.mxu0 %v8543_v34  ;;  %11101 = vst [vmem:[#allocation31_spill] sm:$0xff] %v8573_v51  ;;  %v8579_v60 = vpack.c.bf16 %v443_v42, %v439_v41  ;;  %v451_v26 = vld [vmem:[#allocation7 + $0x130] sm:$0xff]  ;;  %11106 = vst [vmem:[#allocation36_spill] sm:$0xff] %v8591_v10 }
 0x132   :  { %6597 = vmatprep.subr.bf16.mxu1 %v8545_v43  ;;  %6629 = vmatprep.subr.bf16.mxu0 %v8547_v50  ;;  %v446_v50 = vld [vmem:[#allocation7 + $0x108] sm:$0xff]  ;;  %v448_v43 = vld [vmem:[#allocation7 + $0x118] sm:$0xff]  ;;  %v8593_v31 = vpack.c.bf16 %v451_v26, %v447_v23  ;;  %v455_v41 = vld [vmem:[#allocation7 + $0x150] sm:$0xff] }
 0x133   :  { %541 = vmatprep.mubr.f32.mxu1 %v11097_v35  ;;  %612 = vmatprep.mubr.f32.mxu0 %v11097_v35  ;;  %11103 = vst [vmem:[#allocation33_spill] sm:$0xff] %v8579_v60  ;;  %v459_v42 = vld [vmem:[#allocation7 + $0x170] sm:$0xff]  ;;  %v461_v23 = vld [vmem:[#allocation7 + $0x180] sm:$0xff] }
 0x134   :  { %11107 = vst [vmem:[#allocation37_spill] sm:$0xff] %v8593_v31  ;;  %v8605_v11 = vpack.c.bf16 %v459_v42, %v455_v41  ;;  %v467_v26 = vld [vmem:[#allocation7 + $0x1b0] sm:$0xff]  ;;  %v469_v41 = vld [vmem:[#allocation7 + $0x1c0] sm:$0xff] }
 0x135   :  { %6599 = vmatpush1.bf16.msra.mxu1 %v8551_v52  ;;  %6631 = vmatpush1.bf16.msra.mxu0 %v8553_v58  ;;  %v450_v52 = vld [vmem:[#allocation7 + $0x128] sm:$0xff]  ;;  %v452_v58 = vld [vmem:[#allocation7 + $0x138] sm:$0xff]  ;;  %v475_v42 = vld [vmem:[#allocation7 + $0x1f0] sm:$0xff] }
 0x136   :  { %6601 = vmatprep.subr.bf16.mxu1 %v8557_v61  ;;  %6633 = vmatprep.subr.bf16.mxu0 %v8559_v5  ;;  %v8583_v14 = vpack.c.bf16 %v450_v52, %v446_v50  ;;  %v8585_v15 = vpack.c.bf16 %v452_v58, %v448_v43  ;;  %v454_v5 = vld [vmem:[#allocation7 + $0x148] sm:$0xff]  ;;  %v456_v61 = vld [vmem:[#allocation7 + $0x158] sm:$0xff]  ;;  %v453_v50 = vld [vmem:[#allocation7 + $0x140] sm:$0xff] }
 0x137   :  { %v457_v52 = vld [vmem:[#allocation7 + $0x160] sm:$0xff] }
 0x138   :  { %11104 = vst [vmem:[#allocation34_spill] sm:$0xff] %v8583_v14  ;;  %11105 = vst [vmem:[#allocation35_spill] sm:$0xff] %v8585_v15  ;;  %v8603_v8 = vpack.c.bf16 %v457_v52, %v453_v50 }
 0x139   :  { %6603 = vmatpush1.bf16.msra.mxu1 %v8565_v3  ;;  %6635 = vmatpush1.bf16.msra.mxu0 %v8567_v6  ;;  %v458_v3 = vld [vmem:[#allocation7 + $0x168] sm:$0xff]  ;;  %v460_v6 = vld [vmem:[#allocation7 + $0x178] sm:$0xff] }
 0x13a   :  { %6605 = vmatprep.subr.bf16.mxu1 %v8571_v40  ;;  %6637 = vmatprep.subr.bf16.mxu0 %v8573_v51  ;;  %v8597_v43 = vpack.c.bf16 %v458_v3, %v454_v5  ;;  %v8599_v58 = vpack.c.bf16 %v460_v6, %v456_v61  ;;  %v462_v51 = vld [vmem:[#allocation7 + $0x188] sm:$0xff]  ;;  %v464_v40 = vld [vmem:[#allocation7 + $0x198] sm:$0xff]  ;;  %v465_v5 = vld [vmem:[#allocation7 + $0x1a0] sm:$0xff] }
 0x13b   :  { %v463_v6 = vld [vmem:[#allocation7 + $0x190] sm:$0xff]  ;;  %v8616_v50 = vpack.c.bf16 %v465_v5, %v461_v23 }
 0x13c   :  { %11108 = vst [vmem:[#allocation38_spill] sm:$0xff] %v8599_v58  ;;  %v8618_v52 = vpack.c.bf16 %v467_v26, %v463_v6  ;;  %v683_v6 = vld [vmem:[%s10915_s8 + $0x48] sm:$0xff]  ;;  %v685_v26 = vld [vmem:[%s10915_s8 + $0x58] sm:$0xff] }
 0x13d   :  { %6607 = vmatpush1.bf16.msra.mxu1 %v8577_v59  ;;  %6639 = vmatpush1.bf16.msra.mxu0 %v8579_v60  ;;  %v466_v59 = vld [vmem:[#allocation7 + $0x1a8] sm:$0xff]  ;;  %v468_v60 = vld [vmem:[#allocation7 + $0x1b8] sm:$0xff] }
 0x13e   :  { %6609 = vmatprep.subr.bf16.mxu1 %v8583_v14  ;;  %6641 = vmatprep.subr.bf16.mxu0 %v8585_v15  ;;  %v8609_v61 = vpack.c.bf16 %v466_v59, %v462_v51  ;;  %v8611_v3 = vpack.c.bf16 %v468_v60, %v464_v40  ;;  %v474_v15 = vld [vmem:[#allocation7 + $0x1e8] sm:$0xff]  ;;  %v472_v14 = vld [vmem:[#allocation7 + $0x1d8] sm:$0xff]  ;;  %v473_v59 = vld [vmem:[#allocation7 + $0x1e0] sm:$0xff] }
 0x13f   :  { %v471_v60 = vld [vmem:[#allocation7 + $0x1d0] sm:$0xff]  ;;  %v8630_v23 = vpack.c.bf16 %v473_v59, %v469_v41  ;;  %v8702_v41 = vpack.c.bf16 %v685_v26, %v683_v6  ;;  %v682_v59 = vld [vmem:[%s10915_s8 + $0x40] sm:$0xff] }
 0x140   :  { %v8632_v5 = vpack.c.bf16 %v475_v42, %v471_v60  ;;  %v684_v60 = vld [vmem:[%s10915_s8 + $0x50] sm:$0xff] }
 0x141   :  { %6611 = vmatpush1.bf16.msra.mxu1 %v8591_v10  ;;  %6643 = vmatpush1.bf16.msra.mxu0 %v8593_v31  ;;  %v470_v10 = vld [vmem:[#allocation7 + $0x1c8] sm:$0xff]  ;;  %v476_v31 = vld [vmem:[#allocation7 + $0x1f8] sm:$0xff]  ;;  %11113 = vst [vmem:[#allocation42_spill] sm:$0xff] %v8702_v41  ;;  %v8710_v42 = vpack.c.bf16 %v684_v60, %v682_v59  ;;  %v692_v26 = vld [vmem:[%s10915_s8 + $0x90] sm:$0xff] }
 0x142   :  { %6613 = vmatprep.subr.bf16.mxu1 %v8597_v43  ;;  %6645 = vmatprep.subr.bf16.mxu0 %v8599_v58  ;;  %v8622_v40 = vpack.c.bf16 %v474_v15, %v470_v10  ;;  %v8624_v51 = vpack.c.bf16 %v476_v31, %v472_v14  ;;  %v8626_v58 = vstv %s84_s28  ;;  %v11109_v15 = vmov 0.0|0.0   ;;  %v680_v10 = vld [vmem:[%s10915_s8 + $0x30] sm:$0xff]  ;;  %v695_v59 = vld [vmem:[%s10915_s8 + $0xa8] sm:$0xff]  ;;  %v697_v60 = vld [vmem:[%s10915_s8 + $0xb8] sm:$0xff]  ;;  %s2306_s28 = ssub.f32 1.0, %s6078_s26  ;;  %s9825_s26 = sld [smem:[#allocation2 + $0x4]] }
 0x143   :  { %v174_v14 = vmul.f32 %v8626_v58, %v8474_v17  ;;  %v678_v17 = vld [vmem:[%s10915_s8 + $0x20] sm:$0xff]  ;;  %11114 = vst [vmem:[#allocation43_spill] sm:$0xff] %v8710_v42 }
 0x144   :  { %v8692_v31 = vpack.c.bf16 %v680_v10, %v678_v17  ;;  %v693_v17 = vld [vmem:[%s10915_s8 + $0x98] sm:$0xff]  ;;  %v690_v10 = vld [vmem:[%s10915_s8 + $0x80] sm:$0xff] }
 0x145   :  { %6615 = vmatpush1.bf16.msra.mxu1 %v8603_v8  ;;  %6647 = vmatpush1.bf16.msra.mxu0 %v8605_v11 }
 0x146   :  { %6617 = vmatprep.subr.bf16.mxu1 %v8609_v61  ;;  %6649 = vmatprep.subr.bf16.mxu0 %v8611_v3  ;;  %11112 = vst [vmem:[#allocation41_spill] sm:$0xff] %v8692_v31 }
 0x149   :  { %6619 = vmatpush1.bf16.msra.mxu1 %v8616_v50  ;;  %6651 = vmatpush1.bf16.msra.mxu0 %v8618_v52 }
 0x14a   :  { %6621 = vmatprep.subr.bf16.mxu1 %v8622_v40  ;;  %6653 = vmatprep.subr.bf16.mxu0 %v8624_v51 }
 0x14d   :  { %6623 = vmatpush1.bf16.msra.mxu1 %v8630_v23  ;;  %6655 = vmatpush1.bf16.msra.mxu0 %v8632_v5 }
 0x14e   :  { %6688 = vmatprep.subr.bf16.mxu0 %v11109_v15 }
 0x150   :  { %542 = vmatmul.mubr.f32.vlgmr.msra.gmra.mrb[2].mxu1 %v174_v14  ;;  %613 = vmatmul.mubr.f32.vlgmr.msra.gmra.mrb[4].mxu0 %v174_v14  ;;  %v687_v14 = vld [vmem:[%s10915_s8 + $0x68] sm:$0xff] }
 0x151   :  { %782 = vmatprep.mubr.f32.mxu1 %v11097_v35  ;;  %6690 = vmatpush3.bf16.msra.mxu0 %v8356_v4  ;;  %v675_v4 = vld [vmem:[%s10915_s8 + $0x8] sm:$0xff] }
 0x152   :  { %6691 = vmatprep.subr.bf16.mxu0 %v11109_v15  ;;  %6291 = vmatprep.mubr.msk.f32.mxu0 %vm8243_vm0, %v11097_v35 }
 0x155   :  { %6693 = vmatpush3.bf16.msra.mxu0 %v8365_v7  ;;  %v677_v7 = vld [vmem:[%s10915_s8 + $0x18] sm:$0xff] }
 0x156   :  { %6694 = vmatprep.subr.bf16.mxu0 %v11109_v15 }
 0x159   :  { %6696 = vmatpush3.bf16.msra.mxu0 %v8375_v12  ;;  %v8666_v12 = vpack.c.bf16 %v677_v7, %v675_v4  ;;  %v689_v4 = vld [vmem:[%s10915_s8 + $0x78] sm:$0xff] }
 0x15a   :  { %6697 = vmatprep.subr.bf16.mxu0 %v11109_v15  ;;  %v8720_v7 = vpack.c.bf16 %v689_v4, %v687_v14  ;;  %v8752_v14 = vpack.c.bf16 %v692_v26, %v690_v10  ;;  %v8754_v4 = vpack.c.bf16 %v697_v60, %v695_v59  ;;  %v698_v59 = vld [vmem:[%s10915_s8 + $0xc0] sm:$0xff]  ;;  %v700_v60 = vld [vmem:[%s10915_s8 + $0xd0] sm:$0xff] }
 0x15b   :  { %6657 = vmatprep.subr.bf16.mxu1 %v8666_v12 }
 0x15c   :  { %11115 = vst [vmem:[#allocation44_spill] sm:$0xff] %v8720_v7  ;;  %11118 = vst [vmem:[#allocation47_spill] sm:$0xff] %v8752_v14 }
 0x15d   :  { %6699 = vmatpush3.bf16.msra.mxu0 %v8393_v24  ;;  %v674_v24 = vld [vmem:[%s10915_s8] sm:$0xff]  ;;  %11119 = vst [vmem:[#allocation48_spill] sm:$0xff] %v8754_v4 }
 0x15e   :  { %6700 = vmatprep.subr.bf16.mxu0 %v11109_v15 }
 0x161   :  { %6702 = vmatpush3.bf16.msra.mxu0 %v8411_v36  ;;  %v676_v36 = vld [vmem:[%s10915_s8 + $0x10] sm:$0xff] }
 0x162   :  { %6703 = vmatprep.subr.bf16.mxu0 %v11109_v15 }
 0x165   :  { %6705 = vmatpush3.bf16.msra.mxu0 %v8427_v45  ;;  %v8674_v45 = vpack.c.bf16 %v676_v36, %v674_v24  ;;  %v686_v24 = vld [vmem:[%s10915_s8 + $0x60] sm:$0xff]  ;;  %v688_v36 = vld [vmem:[%s10915_s8 + $0x70] sm:$0xff] }
 0x166   :  { %6706 = vmatprep.subr.bf16.mxu0 %v11109_v15 }
 0x167   :  { %11110 = vst [vmem:[#allocation39_spill] sm:$0xff] %v8674_v45  ;;  %6659 = vmatpush1.bf16.msra.mxu1 %v8674_v45 }
 0x169   :  { %6708 = vmatpush3.bf16.msra.mxu0 %v8443_v54  ;;  %v679_v54 = vld [vmem:[%s10915_s8 + $0x28] sm:$0xff] }
 0x16a   :  { %6709 = vmatprep.subr.bf16.mxu0 %v11109_v15 }
 0x16d   :  { %6711 = vmatpush3.bf16.msra.mxu0 %v8459_v1  ;;  %v681_v1 = vld [vmem:[%s10915_s8 + $0x38] sm:$0xff] }
 0x16e   :  { %6745 = vmatprep.subr.bf16.mxu0 %v8465_v9  ;;  %v8684_v9 = vpack.c.bf16 %v681_v1, %v679_v54  ;;  %v8728_v54 = vpack.c.bf16 %v688_v36, %v686_v24  ;;  %v691_v1 = vld [vmem:[%s10915_s8 + $0x88] sm:$0xff]  ;;  %v694_v24 = vld [vmem:[%s10915_s8 + $0xa0] sm:$0xff]  ;;  %v696_v36 = vld [vmem:[%s10915_s8 + $0xb0] sm:$0xff] }
 0x16f   :  { %v8741_v6 = vpack.c.bf16 %v693_v17, %v691_v1  ;;  %v699_v1 = vld [vmem:[%s10915_s8 + $0xc8] sm:$0xff]  ;;  %v701_v17 = vld [vmem:[%s10915_s8 + $0xd8] sm:$0xff]  ;;  %v8770_v10 = vpack.c.bf16 %v696_v36, %v694_v24  ;;  %v8788_v36 = vpack.c.bf16 %v700_v60, %v698_v59  ;;  %v10958_v60 = vlaneseq }
 0x170   :  { %11111 = vst [vmem:[#allocation40_spill] sm:$0xff] %v8684_v9  ;;  %6661 = vmatprep.subr.bf16.mxu1 %v8684_v9  ;;  %11116 = vst [vmem:[#allocation45_spill] sm:$0xff] %v8728_v54  ;;  %v8773_v26 = vpack.c.bf16 %v701_v17, %v699_v1  ;;  %v705_v24 = vld [vmem:[%s10915_s8 + $0xf8] sm:$0xff]  ;;  %v702_v17 = vld [vmem:[%s10915_s8 + $0xe0] sm:$0xff] }
 0x171   :  { %6663 = vmatpush1.bf16.msra.mxu1 %v8692_v31  ;;  %11117 = vst [vmem:[#allocation46_spill] sm:$0xff] %v8741_v6  ;;  %11120 = vst [vmem:[#allocation49_spill] sm:$0xff] %v8770_v10 }
 0x172   :  { %6665 = vmatprep.subr.bf16.mxu1 %v8702_v41  ;;  %11121 = vst [vmem:[#allocation50_spill] sm:$0xff] %v8773_v26  ;;  %11122 = vst [vmem:[#allocation51_spill] sm:$0xff] %v8788_v36 }
 0x175   :  { %6667 = vmatpush1.bf16.msra.mxu1 %v8710_v42 }
 0x176   :  { %6669 = vmatprep.subr.bf16.mxu1 %v8720_v7 }
 0x179   :  { %6671 = vmatpush1.bf16.msra.mxu1 %v8728_v54 }
 0x17a   :  { %6673 = vmatprep.subr.bf16.mxu1 %v8741_v6  ;;  %v703_v6 = vld [vmem:[%s10915_s8 + $0xe8] sm:$0xff] }
 0x17b   :  { %v8791_v1 = vpack.c.bf16 %v705_v24, %v703_v6  ;;  %v8245_v6 = vmov 1966171168  }
 0x17c   :  { %v390_v59 = vunpack.c.l.s4 %v8245_v6 }
 0x17d   :  { %6675 = vmatpush1.bf16.msra.mxu1 %v8752_v14  ;;  %11123 = vst [vmem:[#allocation52_spill] sm:$0xff] %v8791_v1 }
 0x17e   :  { %6677 = vmatprep.subr.bf16.mxu1 %v8754_v4  ;;  %v704_v4 = vld [vmem:[%s10915_s8 + $0xf0] sm:$0xff]  ;;  %v391_v24 = vunpack.c.0.s8 %v390_v59 }
 0x17f   :  { %v8800_v14 = vpack.c.bf16 %v704_v4, %v702_v17 }
 0x181   :  { %6679 = vmatpush1.bf16.msra.mxu1 %v8770_v10  ;;  %11124 = vst [vmem:[#allocation53_spill] sm:$0xff] %v8800_v14 }
 0x182   :  { %6681 = vmatprep.subr.bf16.mxu1 %v8773_v26  ;;  %v8806_v26 = vshrl.u32 %v10958_v60, 7 }
 0x184   :  { %v8809_v7 = vsub.s32 %v391_v24, %v8806_v26 }
 0x185   :  { %6683 = vmatpush1.bf16.msra.mxu1 %v8788_v36 }
 0x186   :  { %6685 = vmatprep.subr.bf16.mxu1 %v8791_v1 }
 0x189   :  { %6687 = vmatpush1.bf16.msra.mxu1 %v8800_v14 }
 0x18a   :  { %6713 = vmatprep.subr.bf16.mxu1 %v8377_v13 }
 0x203   :  { %v307_v10 = vpop.f32.mrb[0].mxu1  ;;  %v378_v54 = vpop.f32.mrb[2].mxu0 }
 0x204   :  { %v309_v4 = vpop.f32.mrb[1].mxu1  ;;  %v380_v17 = vpop.f32.mrb[3].mxu0 }
 0x205   :  { %v387_v36 = vcombine.low %v307_v10, %v309_v4  ;;  %v388_v1 = vcombine.low %v378_v54, %v380_v17  ;;  %v176_v54 = vld [vmem:[%s10908_s1] ss:$8 sm:$0xf] }
 0x207   :  { %v395_v14 = vrot.slane %v387_v36, %v8809_v7  ;;  %v402_v13 = vrot.slane %v388_v1, %v8809_v7 }
 0x209   :  { %v403_v42 = vcombine.low %v395_v14, %v402_v13 }
 0x20b   :  { %v410_v45 = vrot.slane %v403_v42, %v8809_v7 }
 0x20d   :  { %v412_v36 = vadd.f32 %v410_v45, %v176_v54 }
 0x223   :  { %v543_v6 = vpop.f32.mrb[2].mxu1  ;;  %v614_v41 = vpop.f32.mrb[4].mxu0 }
 0x224   :  { %v545_v59 = vpop.f32.mrb[3].mxu1  ;;  %v616_v31 = vpop.f32.mrb[5].mxu0 }
 0x225   :  { %v623_v60 = vcombine.low %v543_v6, %v545_v59  ;;  %v624_v9 = vcombine.low %v614_v41, %v616_v31 }
 0x227   :  { %v631_v24 = vrot.slane %v623_v60, %v8809_v7  ;;  %v638_v15 = vrot.slane %v624_v9, %v8809_v7  ;;  %v82_v9 = vld [vmem:[%s10910_s3] sm:$0x1] }
 0x228   :  { %v175_v45 = vmul.f32 %v8626_v58, %v82_v9  ;;  %v11130_v58 = vld [vmem:[#allocation22_spill] sm:$0xff] }
 0x229   :  { %v639_v10 = vcombine.low %v631_v24, %v638_v15  ;;  %v11134_v9 = vld [vmem:[#allocation26_spill] sm:$0xff] }
 0x22b   :  { %v646_v14 = vrot.slane %v639_v10, %v8809_v7 }
 0x22d   :  { %v648_v1 = vadd.f32 %v646_v14, %v412_v36 }
 0x22f   :  { %v649_v4 = vmul.f32 0.5, %v648_v1  ;;  %v654_v17 = vrot.slane %v648_v1, 1  ;;  %v660_v31 = vrot.slane %v648_v1, 2  ;;  %v663_v41 = vrot.slane %v648_v1, 3 }
 0x231   :  { %7993 = vtanh.f32 %v649_v4  ;;  %v656_v13 = vmul.f32 0.5, %v654_v17  ;;  %v665_v42 = vmul.f32 0.5, %v663_v41 }
 0x233   :  { %7995 = vtanh.f32 %v656_v13 }
 0x234   :  { %7997 = vtanh.f32 %v660_v31 }
 0x235   :  { %7999 = vtanh.f32 %v665_v42  ;;  %v11132_v42 = vld [vmem:[#allocation24_spill] sm:$0xff] }
 0x23b   :  { %v7994_v60 = vpop.eup %7993 }
 0x23c   :  { %v651_v6 = vadd.f32 1.0, %v7994_v60  ;;  %v11133_v60 = vld [vmem:[#allocation25_spill] sm:$0xff] }
 0x23d   :  { %v7996_v15 = vpop.eup %7995 }
 0x23e   :  { %v652_v59 = vmul.f32 0.5, %v651_v6  ;;  %v658_v24 = vadd.f32 1.0, %v7996_v15  ;;  %v7998_v10 = vpop.eup %7997  ;;  %v11135_v6 = vld [vmem:[#allocation27_spill] sm:$0xff]  ;;  %v11136_v15 = vld [vmem:[#allocation28_spill] sm:$0xff] }
 0x23f   :  { %v8000_v1 = vpop.eup %7999 }
 0x240   :  { %v659_v54 = vmul.f32 0.5, %v658_v24  ;;  %v670_v36 = vmul.f32 %v7998_v10, %v652_v59  ;;  %v667_v17 = vadd.f32 1.0, %v8000_v1  ;;  %v11140_v59 = vld [vmem:[#allocation32_spill] sm:$0xff]  ;;  %v11141_v24 = vld [vmem:[#allocation33_spill] sm:$0xff]  ;;  %v11143_v10 = vld [vmem:[#allocation35_spill] sm:$0xff] }
 0x241   :  { %v11146_v1 = vld [vmem:[#allocation38_spill] sm:$0xff] }
 0x242   :  { %v669_v14 = vmul.f32 %v659_v54, %v175_v45  ;;  %v668_v13 = vmul.f32 0.5, %v667_v17  ;;  %v11139_v45 = vld [vmem:[#allocation31_spill] sm:$0xff]  ;;  %v11142_v54 = vld [vmem:[#allocation34_spill] sm:$0xff]  ;;  %v11157_v17 = vld [vmem:[#allocation48_spill] sm:$0xff] }
 0x244   :  { %v8824_v4 = vadd.f32 %v670_v36, %v669_v14  ;;  %v11144_v36 = vld [vmem:[#allocation36_spill] sm:$0xff]  ;;  %v11145_v14 = vld [vmem:[#allocation37_spill] sm:$0xff] }
 0x246   :  { %8001 = vtanh.f32 %v8824_v4 }
 0x250   :  { %v8002_v31 = vpop.eup %8001 }
 0x251   :  { %v673_v41 = vmul.f32 %v8002_v31, %v668_v13  ;;  %v11158_v13 = vld [vmem:[#allocation49_spill] sm:$0xff]  ;;  %v11159_v31 = vld [vmem:[#allocation50_spill] sm:$0xff] }
 0x253   :  { %783 = vmatmul.mubr.f32.vlgmr.msra.gmra.mrb[4].mxu1 %v673_v41  ;;  %v11160_v41 = vld [vmem:[#allocation51_spill] sm:$0xff] }
 0x254   :  { %6715 = vmatpush1.bf16.msra.mxu1 %v8386_v18  ;;  %1048 = vmatprep.mubr.f32.mxu1 %v11097_v35  ;;  %v8845_v18 = vsub.s32 0, %v8806_v26 }
 0x255   :  { %6717 = vmatprep.subr.bf16.mxu1 %v8390_v21  ;;  %v706_v21 = vld [vmem:[%s10916_s9] sm:$0x3] }
 0x258   :  { %6719 = vmatpush1.bf16.msra.mxu1 %v8395_v25  ;;  %v8851_v25 = vsub.s32 1, %v8806_v26  ;;  %v11131_v26 = vld [vmem:[#allocation23_spill] sm:$0xff] }
 0x259   :  { %6721 = vmatprep.subr.bf16.mxu1 %v8405_v30  ;;  %v711_v30 = vrot.slane %v706_v21, %v8845_v18 }
 0x25c   :  { %6723 = vmatpush1.bf16.msra.mxu1 %v8408_v33  ;;  %v715_v33 = vrot.slane %v706_v21, %v8851_v25  ;;  %v11161_v21 = vld [vmem:[#allocation52_spill] sm:$0xff] }
 0x25d   :  { %6725 = vmatprep.subr.bf16.mxu1 %v8414_v37 }
 0x260   :  { %6727 = vmatpush1.bf16.msra.mxu1 %v8424_v44 }
 0x261   :  { %6729 = vmatprep.subr.bf16.mxu1 %v8433_v47 }
 0x264   :  { %6731 = vmatpush1.bf16.msra.mxu1 %v8440_v53 }
 0x265   :  { %6733 = vmatprep.subr.bf16.mxu1 %v8449_v56 }
 0x268   :  { %6735 = vmatpush1.bf16.msra.mxu1 %v8456_v0 }
 0x269   :  { %6737 = vmatprep.subr.bf16.mxu1 %v8462_v2 }
 0x26c   :  { %6739 = vmatpush1.bf16.msra.mxu1 %v8468_v16  ;;  %v11125_v16 = vld [vmem:[#allocation18_spill] sm:$0xff] }
 0x26d   :  { %6741 = vmatprep.subr.bf16.mxu1 %v8520_v22 }
 0x270   :  { %6743 = vmatpush1.bf16.msra.mxu1 %v8524_v32 }
 0x271   :  { %6777 = vmatprep.subr.bf16.mxu1 %v8532_v49 }
 0x326   :  { %v784_v37 = vpop.f32.mrb[4].mxu1 }
 0x327   :  { %v8855_v44 = vadd.f32 %v784_v37, %v711_v30  ;;  %v786_v47 = vpop.f32.mrb[5].mxu1  ;;  %v11162_v30 = vld [vmem:[#allocation53_spill] sm:$0xff] }
 0x328   :  { %v787_v53 = vadd.f32 %v786_v47, %v715_v33  ;;  %v1567_v33 = vld [vmem:[%s10911_s4] sm:$0xff]  ;;  %v1568_v37 = vld [vmem:[%s10911_s4 + $0x8] sm:$0xff] }
 0x329   :  { %823 = vst [vmem:[#allocation9] sm:$0x1] %v8855_v44  ;;  %6292 = vmatmul.mubr.f32.vlgmr.msra.gmra.mrb[6].mxu0 %v8855_v44  ;;  %v8954_v47 = vpack.c.bf16 %v1568_v37, %v1567_v33 }
 0x32a   :  { %v798_v56 = vrot.slane %v787_v53, 5  ;;  %v790_v0 = vrot.slane %v787_v53, 7  ;;  %6747 = vmatpush1.bf16.msra.mxu0 %v8476_v19  ;;  %1119 = vmatprep.mubr.f32.mxu0 %v11097_v35  ;;  %v794_v2 = vrot.slane %v787_v53, 6  ;;  %v11126_v19 = vld [vmem:[#allocation19_spill] sm:$0xff] }
 0x32b   :  { %6749 = vmatprep.subr.bf16.mxu0 %v8480_v20  ;;  %v11127_v20 = vld [vmem:[#allocation20_spill] sm:$0xff] }
 0x32c   :  { %799 = vrot.lane.b32.xlu1 %v798_v56, %s8246_s6  ;;  %791 = vrot.lane.b32.xlu0 %v790_v0, %s8247_s27  ;;  %v1571_v0 = vld [vmem:[%s10911_s4 + $0x20] sm:$0xff] }
 0x32e   :  { %6751 = vmatpush1.bf16.msra.mxu0 %v8485_v28  ;;  %v11128_v28 = vld [vmem:[#allocation21_spill] sm:$0xff] }
 0x32f   :  { %6753 = vmatprep.subr.bf16.mxu0 %v8489_v29 }
 0x330   :  { %795 = vrot.lane.b32.xlu0 %v794_v2, %s8248_s14  ;;  %v1572_v2 = vld [vmem:[%s10911_s4 + $0x28] sm:$0xff] }
 0x332   :  { %6755 = vmatpush1.bf16.msra.mxu0 %v8492_v38 }
 0x333   :  { %6757 = vmatprep.subr.bf16.mxu0 %v8495_v39 }
 0x336   :  { %6759 = vmatpush1.bf16.msra.mxu0 %v8498_v46 }
 0x337   :  { %6761 = vmatprep.subr.bf16.mxu0 %v8501_v48 }
 0x33a   :  { %6763 = vmatpush1.bf16.msra.mxu0 %v8504_v55 }
 0x33b   :  { %6765 = vmatprep.subr.bf16.mxu0 %v8507_v57 }
 0x33e   :  { %6767 = vmatpush1.bf16.msra.mxu0 %v8510_v62  ;;  %v843_v62 = vld [vmem:[%s10912_s5] sm:$0x1] }
 0x33f   :  { %6769 = vmatprep.subr.bf16.mxu0 %v8513_v63 }
 0x342   :  { %6771 = vmatpush1.bf16.msra.mxu0 %v11125_v16  ;;  %v8970_v16 = vpack.c.bf16 %v1572_v2, %v1571_v0 }
 0x343   :  { %6773 = vmatprep.subr.bf16.mxu0 %v11126_v19  ;;  %v1573_v19 = vld [vmem:[%s10911_s4 + $0x30] sm:$0xff] }
 0x346   :  { %6775 = vmatpush1.bf16.msra.mxu0 %v11127_v20  ;;  %v1574_v20 = vld [vmem:[%s10911_s4 + $0x38] sm:$0xff] }
 0x347   :  { %6809 = vmatprep.subr.bf16.mxu0 %v11128_v28  ;;  %v8980_v28 = vpack.c.bf16 %v1574_v20, %v1573_v19 }
 0x39e   :  { %v792_v29 = vpop.permute.xlu0 %791  ;;  %v800_v46 = vpop.permute.xlu1 %799 }
 0x39f   :  { %v803_v38 = vsel %vm802_vm1, %v787_v53, %v792_v29  ;;  %v1570_v53 = vld [vmem:[%s10911_s4 + $0x18] sm:$0xff]  ;;  %v1575_v29 = vld [vmem:[%s10911_s4 + $0x40] sm:$0xff] }
 0x3a2   :  { %v796_v39 = vpop.permute.xlu0 %795 }
 0x3a3   :  { %v805_v48 = vsel %vm804_vm2, %v803_v38, %v796_v39  ;;  %v1576_v38 = vld [vmem:[%s10911_s4 + $0x48] sm:$0xff] }
 0x3a4   :  { %v8882_v55 = vsel %vm806_vm3, %v805_v48, %v800_v46  ;;  %v8990_v39 = vpack.c.bf16 %v1576_v38, %v1575_v29  ;;  %v1577_v46 = vld [vmem:[%s10911_s4 + $0x50] sm:$0xff]  ;;  %v1578_v48 = vld [vmem:[%s10911_s4 + $0x58] sm:$0xff] }
 0x3a5   :  { %11129 = vst [vmem:[#allocation18_spill] sm:$0xff] %v8882_v55  ;;  %v809_v57 = vsel %vm808_vm4, %v8882_v55, -inf  ;;  %v1904_v55 = vld [vmem:[#allocation7 + $0x40] sm:$0xff] }
 0x3a6   :  { %810 = vmax.xlane.f32.xlu1 %v809_v57  ;;  %v9000_v57 = vpack.c.bf16 %v1578_v48, %v1577_v46  ;;  %v1449_v48 = vld [vmem:[%s10916_s9] sm:$0x3] }
 0x3fc   :  { %v910_v63 = vpop.f32.mrb[6].mxu0 }
 0x3fd   :  { %v911_v22 = vadd.f32 %v910_v63, %v843_v62  ;;  %v6293_v32 = vpop.f32.mrb[7].mxu0  ;;  %v1579_v62 = vld [vmem:[%s10911_s4 + $0x60] sm:$0xff]  ;;  %v1580_v63 = vld [vmem:[%s10911_s4 + $0x68] sm:$0xff] }
 0x3ff   :  { %v914_v49 = vmax.f32 %v911_v22, 0.0  ;;  %v9010_v22 = vpack.c.bf16 %v1580_v63, %v1579_v62  ;;  %v1454_v62 = vrot.slane %v1449_v48, %v8845_v18  ;;  %v1661_v63 = vld [vmem:[#allocation6 + $0x8] sm:$0xff] }
 0x401   :  { %1049 = vmatmul.mubr.f32.vlgmr.msra.gmra.mrb[6].mxu1 %v914_v49  ;;  %1120 = vmatmul.mubr.f32.vlgmr.msra.gmra.mrb[8].mxu0 %v914_v49 }
 0x402   :  { %6779 = vmatpush1.bf16.msra.mxu1 %v8541_v27  ;;  %6811 = vmatpush1.bf16.msra.mxu0 %v8543_v34  ;;  %v11137_v27 = vld [vmem:[#allocation29_spill] sm:$0xff]  ;;  %v11138_v34 = vld [vmem:[#allocation30_spill] sm:$0xff] }
 0x403   :  { %6781 = vmatprep.subr.bf16.mxu1 %v11130_v58  ;;  %6813 = vmatprep.subr.bf16.mxu0 %v11131_v26 }
 0x404   :  { %1284 = vmatprep.mubr.f32.mxu1 %v11097_v35  ;;  %1355 = vmatprep.mubr.f32.mxu0 %v11097_v35 }
 0x406   :  { %6783 = vmatpush1.bf16.msra.mxu1 %v11132_v42  ;;  %6815 = vmatpush1.bf16.msra.mxu0 %v11133_v60 }
 0x407   :  { %6785 = vmatprep.subr.bf16.mxu1 %v11134_v9  ;;  %6817 = vmatprep.subr.bf16.mxu0 %v11135_v6 }
 0x40a   :  { %6787 = vmatpush1.bf16.msra.mxu1 %v11136_v15  ;;  %6819 = vmatpush1.bf16.msra.mxu0 %v11137_v27 }
 0x40b   :  { %6789 = vmatprep.subr.bf16.mxu1 %v11138_v34  ;;  %6821 = vmatprep.subr.bf16.mxu0 %v11139_v45 }
 0x40e   :  { %6791 = vmatpush1.bf16.msra.mxu1 %v11140_v59  ;;  %6823 = vmatpush1.bf16.msra.mxu0 %v11141_v24 }
 0x40f   :  { %6793 = vmatprep.subr.bf16.mxu1 %v11142_v54  ;;  %6825 = vmatprep.subr.bf16.mxu0 %v11143_v10 }
 0x412   :  { %6795 = vmatpush1.bf16.msra.mxu1 %v11144_v36  ;;  %6827 = vmatpush1.bf16.msra.mxu0 %v11145_v14 }
 0x413   :  { %6797 = vmatprep.subr.bf16.mxu1 %v8597_v43  ;;  %6829 = vmatprep.subr.bf16.mxu0 %v11146_v1  ;;  %v8919_v43 = vstv %s826_s19  ;;  %v6075_v1 = vld [vmem:[%s10908_s1 + $0x1] ss:$8 sm:$0xf]  ;;  %s1566_s19 = ssub.f32 1.0, %s9220_s16 }
 0x416   :  { %6799 = vmatpush1.bf16.msra.mxu1 %v8603_v8  ;;  %6831 = vmatpush1.bf16.msra.mxu0 %v8605_v11  ;;  %v916_v8 = vmul.f32 %v8919_v43, %v8855_v44  ;;  %v11147_v11 = vmov 0.0|0.0   ;;  %v1569_v44 = vld [vmem:[%s10911_s4 + $0x10] sm:$0xff] }
 0x417   :  { %6801 = vmatprep.subr.bf16.mxu1 %v8609_v61  ;;  %6833 = vmatprep.subr.bf16.mxu0 %v8611_v3  ;;  %v11148_v61 = vld [vmem:[#allocation39_spill] sm:$0xff]  ;;  %v11149_v3 = vld [vmem:[#allocation40_spill] sm:$0xff]  ;;  %v8960_v56 = vpack.c.bf16 %v1570_v53, %v1569_v44 }
 0x41a   :  { %6803 = vmatpush1.bf16.msra.mxu1 %v8616_v50  ;;  %6835 = vmatpush1.bf16.msra.mxu0 %v8618_v52  ;;  %v11150_v50 = vld [vmem:[#allocation41_spill] sm:$0xff]  ;;  %v11151_v52 = vld [vmem:[#allocation42_spill] sm:$0xff] }
 0x41b   :  { %6805 = vmatprep.subr.bf16.mxu1 %v8622_v40  ;;  %6837 = vmatprep.subr.bf16.mxu0 %v8624_v51  ;;  %v11152_v40 = vld [vmem:[#allocation43_spill] sm:$0xff]  ;;  %v11153_v51 = vld [vmem:[#allocation44_spill] sm:$0xff] }
 0x41e   :  { %6807 = vmatpush1.bf16.msra.mxu1 %v8630_v23  ;;  %6839 = vmatpush1.bf16.msra.mxu0 %v8632_v5  ;;  %v11154_v23 = vld [vmem:[#allocation45_spill] sm:$0xff]  ;;  %v11155_v5 = vld [vmem:[#allocation46_spill] sm:$0xff] }
 0x41f   :  { %6841 = vmatprep.subr.bf16.mxu1 %v8666_v12  ;;  %6872 = vmatprep.subr.bf16.mxu0 %v11147_v11  ;;  %v11156_v12 = vld [vmem:[#allocation47_spill] sm:$0xff] }
 0x421   :  { %1285 = vmatmul.mubr.f32.vlgmr.msra.gmra.mrb[8].mxu1 %v916_v8  ;;  %1356 = vmatmul.mubr.f32.vlgmr.msra.gmra.mrb[10].mxu0 %v916_v8 }
 0x422   :  { %6843 = vmatpush1.bf16.msra.mxu1 %v11148_v61  ;;  %1525 = vmatprep.mubr.f32.mxu1 %v11097_v35 }
 0x423   :  { %6845 = vmatprep.subr.bf16.mxu1 %v11149_v3  ;;  %6326 = vmatprep.mubr.msk.f32.mxu0 %vm8243_vm0, %v11097_v35 }
 0x424   :  { %6874 = vmatpush3.bf16.msra.mxu0 %v8954_v47 }
 0x425   :  { %6875 = vmatprep.subr.bf16.mxu0 %v11147_v11 }
 0x426   :  { %6847 = vmatpush1.bf16.msra.mxu1 %v11150_v50 }
 0x427   :  { %6849 = vmatprep.subr.bf16.mxu1 %v11151_v52 }
 0x428   :  { %6877 = vmatpush3.bf16.msra.mxu0 %v8960_v56 }
 0x429   :  { %6878 = vmatprep.subr.bf16.mxu0 %v11147_v11 }
 0x42a   :  { %6851 = vmatpush1.bf16.msra.mxu1 %v11152_v40 }
 0x42b   :  { %6853 = vmatprep.subr.bf16.mxu1 %v11153_v51 }
 0x42c   :  { %6880 = vmatpush3.bf16.msra.mxu0 %v8970_v16 }
 0x42d   :  { %6881 = vmatprep.subr.bf16.mxu0 %v11147_v11 }
 0x42e   :  { %6855 = vmatpush1.bf16.msra.mxu1 %v11154_v23 }
 0x42f   :  { %6857 = vmatprep.subr.bf16.mxu1 %v11155_v5 }
 0x430   :  { %6883 = vmatpush3.bf16.msra.mxu0 %v8980_v28 }
 0x431   :  { %6884 = vmatprep.subr.bf16.mxu0 %v11147_v11 }
 0x432   :  { %6859 = vmatpush1.bf16.msra.mxu1 %v11156_v12 }
 0x433   :  { %6861 = vmatprep.subr.bf16.mxu1 %v11157_v17 }
 0x434   :  { %6886 = vmatpush3.bf16.msra.mxu0 %v8990_v39 }
 0x435   :  { %6887 = vmatprep.subr.bf16.mxu0 %v11147_v11 }
 0x436   :  { %6863 = vmatpush1.bf16.msra.mxu1 %v11158_v13 }
 0x437   :  { %6865 = vmatprep.subr.bf16.mxu1 %v11159_v31 }
 0x438   :  { %6889 = vmatpush3.bf16.msra.mxu0 %v9000_v57 }
 0x439   :  { %6890 = vmatprep.subr.bf16.mxu0 %v11147_v11 }
 0x43a   :  { %6867 = vmatpush1.bf16.msra.mxu1 %v11160_v41 }
 0x43b   :  { %6869 = vmatprep.subr.bf16.mxu1 %v11161_v21 }
 0x43c   :  { %6892 = vmatpush3.bf16.msra.mxu0 %v9010_v22 }
 0x43d   :  { %6893 = vmatprep.subr.bf16.mxu0 %v11147_v11 }
 0x43e   :  { %6871 = vmatpush1.bf16.msra.mxu1 %v11162_v30  ;;  %v917_v30 = vmul.f32 %v8919_v43, %v8824_v4  ;;  %v1581_v4 = vld [vmem:[%s10911_s4 + $0x70] sm:$0xff]  ;;  %v1582_v43 = vld [vmem:[%s10911_s4 + $0x78] sm:$0xff] }
 0x43f   :  { %v9036_v46 = vpack.c.bf16 %v1582_v43, %v1581_v4  ;;  %v1691_v43 = vld [vmem:[#allocation6 + $0xf8] sm:$0xff] }
 0x441   :  { %6895 = vmatpush3.bf16.msra.mxu0 %v9036_v46 }
 0x4d4   :  { %v1050_v32 = vpop.f32.mrb[6].mxu1  ;;  %v1121_v49 = vpop.f32.mrb[8].mxu0 }
 0x4d5   :  { %v1052_v58 = vpop.f32.mrb[7].mxu1  ;;  %v1123_v26 = vpop.f32.mrb[9].mxu0 }
 0x4d6   :  { %v1130_v42 = vcombine.low %v1050_v32, %v1052_v58  ;;  %v1131_v60 = vcombine.low %v1121_v49, %v1123_v26  ;;  %v1665_v32 = vld [vmem:[#allocation6 + $0x28] sm:$0xff]  ;;  %v1663_v49 = vld [vmem:[#allocation6 + $0x18] sm:$0xff]  ;;  %v1458_v58 = vrot.slane %v1449_v48, %v8851_v25  ;;  %v1684_v48 = vld [vmem:[#allocation6 + $0xc0] sm:$0xff] }
 0x4d7   :  { %v9044_v26 = vpack.c.bf16 %v1665_v32, %v1661_v63  ;;  %v1693_v63 = vld [vmem:[#allocation6 + $0x108] sm:$0xff] }
 0x4d8   :  { %v1138_v9 = vrot.slane %v1130_v42, %v8809_v7  ;;  %v1145_v6 = vrot.slane %v1131_v60, %v8809_v7  ;;  %v1667_v42 = vld [vmem:[#allocation6 + $0x38] sm:$0xff]  ;;  %v1660_v60 = vld [vmem:[#allocation6] sm:$0xff] }
 0x4d9   :  { %6897 = vmatprep.subr.bf16.mxu1 %v9044_v26 }
 0x4da   :  { %v1146_v15 = vcombine.low %v1138_v9, %v1145_v6  ;;  %v1664_v9 = vld [vmem:[#allocation6 + $0x20] sm:$0xff]  ;;  %v9046_v6 = vpack.c.bf16 %v1667_v42, %v1663_v49 }
 0x4dc   :  { %v1153_v10 = vrot.slane %v1146_v15, %v8809_v7  ;;  %v9048_v15 = vpack.c.bf16 %v1664_v9, %v1660_v60  ;;  %6929 = vmatprep.subr.bf16.mxu0 %v9046_v6  ;;  %v1686_v9 = vld [vmem:[#allocation6 + $0xd0] sm:$0xff] }
 0x4de   :  { %v1155_v61 = vadd.f32 %v6075_v1, %v1153_v10  ;;  %v1671_v10 = vld [vmem:[#allocation6 + $0x58] sm:$0xff] }
 0x4f4   :  { %v1286_v27 = vpop.f32.mrb[8].mxu1  ;;  %v1357_v34 = vpop.f32.mrb[10].mxu0 }
 0x4f5   :  { %v1288_v45 = vpop.f32.mrb[9].mxu1  ;;  %v1359_v59 = vpop.f32.mrb[11].mxu0 }
 0x4f6   :  { %v1366_v24 = vcombine.low %v1286_v27, %v1288_v45  ;;  %v1367_v54 = vcombine.low %v1357_v34, %v1359_v59  ;;  %v1662_v27 = vld [vmem:[#allocation6 + $0x10] sm:$0xff]  ;;  %v1669_v45 = vld [vmem:[#allocation6 + $0x48] sm:$0xff] }
 0x4f7   :  { %v1666_v34 = vld [vmem:[#allocation6 + $0x30] sm:$0xff] }
 0x4f8   :  { %v1374_v36 = vrot.slane %v1366_v24, %v8809_v7  ;;  %v1381_v14 = vrot.slane %v1367_v54, %v8809_v7  ;;  %v9051_v24 = vpack.c.bf16 %v1666_v34, %v1662_v27  ;;  %v1673_v54 = vld [vmem:[#allocation6 + $0x68] sm:$0xff]  ;;  %v1690_v27 = vld [vmem:[#allocation6 + $0xf0] sm:$0xff]  ;;  %v1695_v34 = vld [vmem:[#allocation6 + $0x118] sm:$0xff] }
 0x4fa   :  { %v1382_v8 = vcombine.low %v1374_v36, %v1381_v14  ;;  %v1675_v36 = vld [vmem:[#allocation6 + $0x78] sm:$0xff] }
 0x4fc   :  { %v1389_v3 = vrot.slane %v1382_v8, %v8809_v7  ;;  %v9057_v8 = vpack.c.bf16 %v1673_v54, %v1669_v45  ;;  %v1692_v54 = vld [vmem:[#allocation6 + $0x100] sm:$0xff] }
 0x4fe   :  { %v1391_v50 = vadd.f32 %v1389_v3, %v1155_v61  ;;  %v9059_v61 = vpack.c.bf16 %v1675_v36, %v1671_v10  ;;  %v1668_v3 = vld [vmem:[#allocation6 + $0x40] sm:$0xff]  ;;  %v1701_v36 = vld [vmem:[#allocation6 + $0x148] sm:$0xff] }
 0x4ff   :  { %v1696_v10 = vld [vmem:[#allocation6 + $0x120] sm:$0xff] }
 0x500   :  { %v1392_v52 = vmul.f32 0.5, %v1391_v50  ;;  %v1397_v40 = vrot.slane %v1391_v50, 1  ;;  %v1403_v23 = vrot.slane %v1391_v50, 2  ;;  %v1406_v5 = vrot.slane %v1391_v50, 3  ;;  %v1672_v50 = vld [vmem:[#allocation6 + $0x60] sm:$0xff] }
 0x502   :  { %8003 = vtanh.f32 %v1392_v52  ;;  %v1399_v51 = vmul.f32 0.5, %v1397_v40  ;;  %v1408_v12 = vmul.f32 0.5, %v1406_v5  ;;  %v1670_v52 = vld [vmem:[#allocation6 + $0x50] sm:$0xff]  ;;  %v1677_v5 = vld [vmem:[#allocation6 + $0x88] sm:$0xff] }
 0x504   :  { %8005 = vtanh.f32 %v1399_v51  ;;  %v9063_v51 = vpack.c.bf16 %v1672_v50, %v1668_v3  ;;  %v9102_v3 = vpack.c.bf16 %v1690_v27, %v1686_v9 }
 0x505   :  { %8007 = vtanh.f32 %v1403_v23  ;;  %v1674_v23 = vld [vmem:[#allocation6 + $0x70] sm:$0xff] }
 0x506   :  { %8009 = vtanh.f32 %v1408_v12  ;;  %v1681_v12 = vld [vmem:[#allocation6 + $0xa8] sm:$0xff]  ;;  %11164 = vst [vmem:[#allocation20_spill] sm:$0xff] %v9102_v3 }
 0x50c   :  { %v8004_v17 = vpop.eup %8003 }
 0x50d   :  { %v1394_v13 = vadd.f32 1.0, %v8004_v17  ;;  %v9068_v17 = vpack.c.bf16 %v1681_v12, %v1677_v5  ;;  %v1698_v5 = vld [vmem:[#allocation6 + $0x130] sm:$0xff]  ;;  %v1703_v12 = vld [vmem:[#allocation6 + $0x158] sm:$0xff] }
 0x50e   :  { %v8006_v31 = vpop.eup %8005 }
 0x50f   :  { %v1395_v41 = vmul.f32 0.5, %v1394_v13  ;;  %v1401_v21 = vadd.f32 1.0, %v8006_v31  ;;  %v8008_v37 = vpop.eup %8007  ;;  %v1679_v13 = vld [vmem:[#allocation6 + $0x98] sm:$0xff] }
 0x510   :  { %v8010_v2 = vpop.eup %8009  ;;  %v1683_v31 = vld [vmem:[#allocation6 + $0xb8] sm:$0xff] }
 0x511   :  { %v1402_v33 = vmul.f32 0.5, %v1401_v21  ;;  %v1413_v44 = vmul.f32 %v8008_v37, %v1395_v41  ;;  %v1410_v19 = vadd.f32 1.0, %v8010_v2  ;;  %v1676_v41 = vld [vmem:[#allocation6 + $0x80] sm:$0xff]  ;;  %v9078_v2 = vpack.c.bf16 %v1683_v31, %v1679_v13  ;;  %v1707_v31 = vld [vmem:[#allocation6 + $0x178] sm:$0xff] }
 0x512   :  { %v1680_v37 = vld [vmem:[#allocation6 + $0xa0] sm:$0xff] }
 0x513   :  { %v1412_v53 = vmul.f32 %v1402_v33, %v917_v30  ;;  %v1411_v20 = vmul.f32 0.5, %v1410_v19  ;;  %v9073_v33 = vpack.c.bf16 %v1674_v23, %v1670_v52  ;;  %v9080_v19 = vpack.c.bf16 %v1680_v37, %v1676_v41  ;;  %v1694_v23 = vld [vmem:[#allocation6 + $0x110] sm:$0xff]  ;;  %v1700_v41 = vld [vmem:[#allocation6 + $0x140] sm:$0xff]  ;;  %v1713_v37 = vld [vmem:[#allocation6 + $0x1a8] sm:$0xff] }
 0x514   :  { %v9108_v52 = vpack.c.bf16 %v1696_v10, %v1692_v54  ;;  %v1717_v10 = vld [vmem:[#allocation6 + $0x1c8] sm:$0xff] }
 0x515   :  { %v9026_v0 = vadd.f32 %v1413_v44, %v1412_v53  ;;  %v1678_v44 = vld [vmem:[#allocation6 + $0x90] sm:$0xff] }
 0x516   :  { %v1682_v53 = vld [vmem:[#allocation6 + $0xb0] sm:$0xff] }
 0x517   :  { %8011 = vtanh.f32 %v9026_v0  ;;  %v9089_v49 = vpack.c.bf16 %v1682_v53, %v1678_v44  ;;  %v9114_v44 = vpack.c.bf16 %v1698_v5, %v1694_v23  ;;  %v9118_v53 = vpack.c.bf16 %v1707_v31, %v1703_v12  ;;  %v1723_v5 = vld [vmem:[#allocation6 + $0x1f8] sm:$0xff]  ;;  %v1716_v12 = vld [vmem:[#allocation6 + $0x1c0] sm:$0xff] }
 0x518   :  { %v1720_v31 = vld [vmem:[#allocation6 + $0x1e0] sm:$0xff] }
 0x519   :  { %11166 = vst [vmem:[#allocation22_spill] sm:$0xff] %v9114_v44  ;;  %11167 = vst [vmem:[#allocation23_spill] sm:$0xff] %v9118_v53 }
 0x521   :  { %v8012_v29 = vpop.eup %8011 }
 0x522   :  { %v1416_v38 = vmul.f32 %v8012_v29, %v1411_v20  ;;  %v1685_v20 = vld [vmem:[#allocation6 + $0xc8] sm:$0xff] }
 0x523   :  { %v1689_v29 = vld [vmem:[#allocation6 + $0xe8] sm:$0xff] }
 0x524   :  { %1526 = vmatmul.mubr.f32.vlgmr.msra.gmra.mrb[10].mxu1 %v1416_v38  ;;  %v1687_v38 = vld [vmem:[#allocation6 + $0xd8] sm:$0xff]  ;;  %v9084_v4 = vpack.c.bf16 %v1689_v29, %v1685_v20  ;;  %v1702_v29 = vld [vmem:[#allocation6 + $0x150] sm:$0xff] }
 0x525   :  { %1788 = vmatprep.mubr.f32.mxu1 %v11097_v35  ;;  %6899 = vmatpush1.bf16.msra.mxu1 %v9048_v15  ;;  %v9093_v42 = vpack.c.bf16 %v1691_v43, %v1687_v38  ;;  %v1706_v38 = vld [vmem:[#allocation6 + $0x170] sm:$0xff]  ;;  %v1711_v43 = vld [vmem:[#allocation6 + $0x198] sm:$0xff] }
 0x526   :  { %6901 = vmatprep.subr.bf16.mxu1 %v9057_v8 }
 0x529   :  { %6903 = vmatpush1.bf16.msra.mxu1 %v9063_v51 }
 0x52a   :  { %6905 = vmatprep.subr.bf16.mxu1 %v9068_v17 }
 0x52d   :  { %6907 = vmatpush1.bf16.msra.mxu1 %v9080_v19 }
 0x52e   :  { %6909 = vmatprep.subr.bf16.mxu1 %v9084_v4 }
 0x5f7   :  { %v1527_v59 = vpop.f32.mrb[10].mxu1 }
 0x5f8   :  { %v9053_v14 = vadd.f32 %v1527_v59, %v1454_v62  ;;  %v1529_v1 = vpop.f32.mrb[11].mxu1  ;;  %v1688_v62 = vld [vmem:[#allocation6 + $0xe0] sm:$0xff]  ;;  %v1699_v59 = vld [vmem:[#allocation6 + $0x138] sm:$0xff] }
 0x5f9   :  { %v9061_v40 = vadd.f32 %v1529_v1, %v1458_v58  ;;  %v1697_v58 = vld [vmem:[#allocation6 + $0x128] sm:$0xff]  ;;  %v9095_v60 = vpack.c.bf16 %v1688_v62, %v1684_v48  ;;  %v9106_v50 = vpack.c.bf16 %v1699_v59, %v1695_v34  ;;  %v1715_v62 = vld [vmem:[#allocation6 + $0x1b8] sm:$0xff]  ;;  %v1710_v34 = vld [vmem:[#allocation6 + $0x190] sm:$0xff] }
 0x5fa   :  { %1562 = vst [vmem:[#allocation9 + $0x1] sm:$0x1] %v9053_v14  ;;  %6327 = vmatmul.mubr.f32.vlgmr.msra.gmra.mrb[12].mxu0 %v9053_v14  ;;  %v9099_v45 = vpack.c.bf16 %v1697_v58, %v1693_v63  ;;  %v1705_v1 = vld [vmem:[#allocation6 + $0x168] sm:$0xff]  ;;  %v1708_v63 = vld [vmem:[#allocation6 + $0x180] sm:$0xff]  ;;  %v9126_v58 = vpack.c.bf16 %v1706_v38, %v1702_v29  ;;  %v9130_v9 = vpack.c.bf16 %v1715_v62, %v1711_v43  ;;  %v1714_v59 = vld [vmem:[#allocation6 + $0x1b0] sm:$0xff] }
 0x5fb   :  { %11163 = vst [vmem:[#allocation19_spill] sm:$0xff] %v9061_v40  ;;  %v1541_v21 = vrot.slane %v9061_v40, 5  ;;  %v1533_v30 = vrot.slane %v9061_v40, 7  ;;  %6931 = vmatpush1.bf16.msra.mxu0 %v9051_v24  ;;  %1859 = vmatprep.mubr.f32.mxu0 %v11097_v35  ;;  %v1537_v32 = vrot.slane %v9061_v40, 6  ;;  %11165 = vst [vmem:[#allocation21_spill] sm:$0xff] %v9106_v50  ;;  %v9111_v13 = vpack.c.bf16 %v1705_v1, %v1701_v36  ;;  %v1721_v36 = vld [vmem:[#allocation6 + $0x1e8] sm:$0xff] }
 0x5fc   :  { %6933 = vmatprep.subr.bf16.mxu0 %v9059_v61  ;;  %6911 = vmatpush1.bf16.msra.mxu1 %v9095_v60  ;;  %11168 = vst [vmem:[#allocation24_spill] sm:$0xff] %v9126_v58  ;;  %11169 = vst [vmem:[#allocation25_spill] sm:$0xff] %v9130_v9  ;;  %v9136_v54 = vpack.c.bf16 %v1714_v59, %v1710_v34  ;;  %v1719_v1 = vld [vmem:[#allocation6 + $0x1d8] sm:$0xff]  ;;  %v9141_v23 = vpack.c.bf16 %v1721_v36, %v1717_v10  ;;  %v1897_v38 = vld [vmem:[#allocation7 + $0x8] sm:$0xff] }
 0x5fd   :  { %1542 = vrot.lane.b32.xlu1 %v1541_v21, %s8246_s6  ;;  %1534 = vrot.lane.b32.xlu0 %v1533_v30, %s8247_s27  ;;  %v1704_v21 = vld [vmem:[#allocation6 + $0x160] sm:$0xff]  ;;  %v1709_v30 = vld [vmem:[#allocation6 + $0x188] sm:$0xff]  ;;  %v1899_v62 = vld [vmem:[#allocation7 + $0x18] sm:$0xff] }
 0x5fe   :  { %6913 = vmatprep.subr.bf16.mxu1 %v9099_v45  ;;  %v9120_v20 = vpack.c.bf16 %v1704_v21, %v1700_v41  ;;  %v9123_v48 = vpack.c.bf16 %v1713_v37, %v1709_v30  ;;  %11170 = vst [vmem:[#allocation26_spill] sm:$0xff] %v9136_v54  ;;  %v9143_v41 = vpack.c.bf16 %v1723_v5, %v1719_v1  ;;  %v1718_v30 = vld [vmem:[#allocation6 + $0x1d0] sm:$0xff]  ;;  %v1901_v43 = vld [vmem:[#allocation7 + $0x28] sm:$0xff]  ;;  %v1583_v59 = vld [vmem:[%s10912_s5] sm:$0x1] }
 0x5ff   :  { %6935 = vmatpush1.bf16.msra.mxu0 %v9073_v33  ;;  %v9145_v21 = vpack.c.bf16 %v1720_v31, %v1716_v12  ;;  %v1722_v37 = vld [vmem:[#allocation6 + $0x1f0] sm:$0xff]  ;;  %v1896_v10 = vld [vmem:[#allocation7] sm:$0xff]  ;;  %v1905_v12 = vld [vmem:[#allocation7 + $0x48] sm:$0xff] }
 0x600   :  { %6937 = vmatprep.subr.bf16.mxu0 %v9078_v2  ;;  %6915 = vmatpush1.bf16.msra.mxu1 %v9108_v52  ;;  %11171 = vst [vmem:[#allocation27_spill] sm:$0xff] %v9143_v41  ;;  %v9148_v29 = vpack.c.bf16 %v1722_v37, %v1718_v30  ;;  %v1900_v36 = vld [vmem:[#allocation7 + $0x20] sm:$0xff]  ;;  %v1898_v1 = vld [vmem:[#allocation7 + $0x10] sm:$0xff]  ;;  %v1909_v30 = vld [vmem:[#allocation7 + $0x68] sm:$0xff] }
 0x601   :  { %1538 = vrot.lane.b32.xlu0 %v1537_v32, %s8248_s14  ;;  %6917 = vmatprep.subr.bf16.mxu1 %v9111_v13  ;;  %v1712_v32 = vld [vmem:[#allocation6 + $0x1a0] sm:$0xff]  ;;  %v1902_v5 = vld [vmem:[#allocation7 + $0x30] sm:$0xff]  ;;  %v1907_v37 = vld [vmem:[#allocation7 + $0x58] sm:$0xff] }
 0x602   :  { %v9132_v27 = vpack.c.bf16 %v1712_v32, %v1708_v63  ;;  %11172 = vst [vmem:[#allocation28_spill] sm:$0xff] %v9148_v29  ;;  %v9153_v63 = vpack.c.bf16 %v1901_v43, %v1897_v38  ;;  %v1903_v32 = vld [vmem:[#allocation7 + $0x38] sm:$0xff]  ;;  %v9164_v40 = vpack.c.bf16 %v1902_v5, %v1898_v1  ;;  %v1916_v1 = vld [vmem:[#allocation7 + $0xa0] sm:$0xff] }
 0x603   :  { %6939 = vmatpush1.bf16.msra.mxu0 %v9089_v49  ;;  %v9155_v34 = vpack.c.bf16 %v1903_v32, %v1899_v62  ;;  %v1911_v38 = vld [vmem:[#allocation7 + $0x78] sm:$0xff]  ;;  %v9162_v32 = vpack.c.bf16 %v1900_v36, %v1896_v10  ;;  %v1912_v36 = vld [vmem:[#allocation7 + $0x80] sm:$0xff] }
 0x604   :  { %6941 = vmatprep.subr.bf16.mxu0 %v9093_v42  ;;  %6919 = vmatpush1.bf16.msra.mxu1 %v9120_v20 }
 0x605   :  { %6921 = vmatprep.subr.bf16.mxu1 %v9123_v48  ;;  %11173 = vst [vmem:[#allocation29_spill] sm:$0xff] %v9155_v34 }
 0x607   :  { %6943 = vmatpush1.bf16.msra.mxu0 %v9102_v3  ;;  %v1919_v3 = vld [vmem:[#allocation7 + $0xb8] sm:$0xff] }
 0x608   :  { %6945 = vmatprep.subr.bf16.mxu0 %v9106_v50  ;;  %6923 = vmatpush1.bf16.msra.mxu1 %v9132_v27  ;;  %v1915_v50 = vld [vmem:[#allocation7 + $0x98] sm:$0xff] }
 0x609   :  { %6925 = vmatprep.subr.bf16.mxu1 %v9141_v23 }
 0x60b   :  { %6947 = vmatpush1.bf16.msra.mxu0 %v9114_v44  ;;  %v1917_v44 = vld [vmem:[#allocation7 + $0xa8] sm:$0xff] }
 0x60c   :  { %6949 = vmatprep.subr.bf16.mxu0 %v9118_v53  ;;  %6927 = vmatpush1.bf16.msra.mxu1 %v9145_v21  ;;  %v1913_v53 = vld [vmem:[#allocation7 + $0x88] sm:$0xff] }
 0x60d   :  { %6961 = vmatprep.subr.bf16.mxu1 %v9153_v63  ;;  %v9178_v5 = vpack.c.bf16 %v1917_v44, %v1913_v53 }
 0x60f   :  { %6951 = vmatpush1.bf16.msra.mxu0 %v9126_v58  ;;  %v1910_v58 = vld [vmem:[#allocation7 + $0x70] sm:$0xff]  ;;  %11177 = vst [vmem:[#allocation33_spill] sm:$0xff] %v9178_v5 }
 0x610   :  { %6953 = vmatprep.subr.bf16.mxu0 %v9130_v9  ;;  %v1906_v9 = vld [vmem:[#allocation7 + $0x50] sm:$0xff] }
 0x611   :  { %v9174_v10 = vpack.c.bf16 %v1910_v58, %v1906_v9  ;;  %v1922_v9 = vld [vmem:[#allocation7 + $0xd0] sm:$0xff] }
 0x613   :  { %6955 = vmatpush1.bf16.msra.mxu0 %v9136_v54  ;;  %v9168_v54 = vpack.c.bf16 %v1911_v38, %v1907_v37  ;;  %11176 = vst [vmem:[#allocation32_spill] sm:$0xff] %v9174_v10  ;;  %v1925_v37 = vld [vmem:[#allocation7 + $0xe8] sm:$0xff]  ;;  %v1923_v38 = vld [vmem:[#allocation7 + $0xd8] sm:$0xff] }
 0x614   :  { %6957 = vmatprep.subr.bf16.mxu0 %v9143_v41  ;;  %v9166_v41 = vpack.c.bf16 %v1909_v30, %v1905_v12  ;;  %v9180_v12 = vpack.c.bf16 %v1919_v3, %v1915_v50  ;;  %v1921_v30 = vld [vmem:[#allocation7 + $0xc8] sm:$0xff]  ;;  %v1920_v3 = vld [vmem:[#allocation7 + $0xc0] sm:$0xff] }
 0x615   :  { %11174 = vst [vmem:[#allocation30_spill] sm:$0xff] %v9168_v54  ;;  %v1924_v50 = vld [vmem:[#allocation7 + $0xe0] sm:$0xff]  ;;  %v9192_v53 = vpack.c.bf16 %v1925_v37, %v1921_v30 }
 0x616   :  { %11178 = vst [vmem:[#allocation34_spill] sm:$0xff] %v9180_v12 }
 0x617   :  { %6959 = vmatpush1.bf16.msra.mxu0 %v9148_v29  ;;  %11181 = vst [vmem:[#allocation37_spill] sm:$0xff] %v9192_v53 }
 0x618   :  { %6993 = vmatprep.subr.bf16.mxu0 %v9155_v34  ;;  %v1908_v34 = vld [vmem:[#allocation7 + $0x60] sm:$0xff] }
 0x6cd   :  { %v1650_v31 = vpop.f32.mrb[12].mxu0 }
 0x6ce   :  { %v1651_v43 = vadd.f32 %v1650_v31, %v1583_v59  ;;  %v6328_v62 = vpop.f32.mrb[13].mxu0  ;;  %v9172_v59 = vpack.c.bf16 %v1908_v34, %v1904_v55  ;;  %v1914_v31 = vld [vmem:[#allocation7 + $0x90] sm:$0xff]  ;;  %v9186_v55 = vpack.c.bf16 %v1916_v1, %v1912_v36  ;;  %v9198_v36 = vpack.c.bf16 %v1924_v50, %v1920_v3 }
 0x6cf   :  { %v1926_v34 = vld [vmem:[#allocation7 + $0xf0] sm:$0xff]  ;;  %v1929_v62 = vld [vmem:[#allocation7 + $0x108] sm:$0xff] }
 0x6d0   :  { %v1654_v29 = vmax.f32 %v1651_v43, 0.0  ;;  %11175 = vst [vmem:[#allocation31_spill] sm:$0xff] %v9172_v59  ;;  %v1927_v43 = vld [vmem:[#allocation7 + $0xf8] sm:$0xff]  ;;  %11179 = vst [vmem:[#allocation35_spill] sm:$0xff] %v9186_v55  ;;  %v9200_v1 = vpack.c.bf16 %v1926_v34, %v1922_v9  ;;  %v1936_v9 = vld [vmem:[#allocation7 + $0x140] sm:$0xff] }
 0x6d1   :  { %v9194_v58 = vpack.c.bf16 %v1927_v43, %v1923_v38  ;;  %11183 = vst [vmem:[#allocation39_spill] sm:$0xff] %v9198_v36  ;;  %v1930_v38 = vld [vmem:[#allocation7 + $0x110] sm:$0xff]  ;;  %v1940_v34 = vld [vmem:[#allocation7 + $0x160] sm:$0xff] }
 0x6d2   :  { %1789 = vmatmul.mubr.f32.vlgmr.msra.gmra.mrb[12].mxu1 %v1654_v29  ;;  %1860 = vmatmul.mubr.f32.vlgmr.msra.gmra.mrb[14].mxu0 %v1654_v29  ;;  %v1918_v29 = vld [vmem:[#allocation7 + $0xb0] sm:$0xff]  ;;  %11184 = vst [vmem:[#allocation40_spill] sm:$0xff] %v9200_v1 }
 0x6d3   :  { %6963 = vmatpush1.bf16.msra.mxu1 %v9162_v32  ;;  %6995 = vmatpush1.bf16.msra.mxu0 %v9164_v40  ;;  %v9188_v44 = vpack.c.bf16 %v1918_v29, %v1914_v31  ;;  %11182 = vst [vmem:[#allocation38_spill] sm:$0xff] %v9194_v58  ;;  %v1928_v31 = vld [vmem:[#allocation7 + $0x100] sm:$0xff]  ;;  %v1934_v43 = vld [vmem:[#allocation7 + $0x130] sm:$0xff] }
 0x6d4   :  { %6965 = vmatprep.subr.bf16.mxu1 %v9166_v41  ;;  %6997 = vmatprep.subr.bf16.mxu0 %v9168_v54  ;;  %v1931_v54 = vld [vmem:[#allocation7 + $0x118] sm:$0xff]  ;;  %v1932_v29 = vld [vmem:[#allocation7 + $0x120] sm:$0xff]  ;;  %v9212_v50 = vpack.c.bf16 %v1934_v43, %v1930_v38  ;;  %v1946_v38 = vld [vmem:[#allocation7 + $0x190] sm:$0xff] }
 0x6d5   :  { %2024 = vmatprep.mubr.f32.mxu1 %v11097_v35  ;;  %2095 = vmatprep.mubr.f32.mxu0 %v11097_v35  ;;  %11180 = vst [vmem:[#allocation36_spill] sm:$0xff] %v9188_v44  ;;  %v9210_v3 = vpack.c.bf16 %v1932_v29, %v1928_v31  ;;  %v9224_v31 = vpack.c.bf16 %v1940_v34, %v1936_v9  ;;  %v1950_v43 = vld [vmem:[#allocation7 + $0x1b0] sm:$0xff]  ;;  %v1959_v9 = vld [vmem:[#allocation7 + $0x1f8] sm:$0xff] }
 0x6d6   :  { %11187 = vst [vmem:[#allocation43_spill] sm:$0xff] %v9212_v50 }
 0x6d7   :  { %6967 = vmatpush1.bf16.msra.mxu1 %v9172_v59  ;;  %6999 = vmatpush1.bf16.msra.mxu0 %v9174_v10  ;;  %v1933_v59 = vld [vmem:[#allocation7 + $0x128] sm:$0xff]  ;;  %v1935_v10 = vld [vmem:[#allocation7 + $0x138] sm:$0xff]  ;;  %11186 = vst [vmem:[#allocation42_spill] sm:$0xff] %v9210_v3 }
 0x6d8   :  { %6969 = vmatprep.subr.bf16.mxu1 %v9178_v5  ;;  %7001 = vmatprep.subr.bf16.mxu0 %v9180_v12  ;;  %v9204_v30 = vpack.c.bf16 %v1933_v59, %v1929_v62  ;;  %v9206_v37 = vpack.c.bf16 %v1935_v10, %v1931_v54  ;;  %v1937_v12 = vld [vmem:[#allocation7 + $0x148] sm:$0xff]  ;;  %v1939_v5 = vld [vmem:[#allocation7 + $0x158] sm:$0xff]  ;;  %v1938_v10 = vld [vmem:[#allocation7 + $0x150] sm:$0xff] }
 0x6d9   :  { %v1942_v62 = vld [vmem:[#allocation7 + $0x170] sm:$0xff] }
 0x6da   :  { %11185 = vst [vmem:[#allocation41_spill] sm:$0xff] %v9206_v37  ;;  %v9226_v29 = vpack.c.bf16 %v1942_v62, %v1938_v10  ;;  %v9238_v10 = vpack.c.bf16 %v1950_v43, %v1946_v38  ;;  %v1952_v62 = vld [vmem:[#allocation7 + $0x1c0] sm:$0xff]  ;;  %v2166_v38 = vld [vmem:[%s10915_s8 + $0x48] sm:$0xff]  ;;  %v2168_v43 = vld [vmem:[%s10915_s8 + $0x58] sm:$0xff] }
 0x6db   :  { %6971 = vmatpush1.bf16.msra.mxu1 %v9186_v55  ;;  %7003 = vmatpush1.bf16.msra.mxu0 %v9188_v44  ;;  %v1941_v55 = vld [vmem:[#allocation7 + $0x168] sm:$0xff]  ;;  %v1943_v44 = vld [vmem:[#allocation7 + $0x178] sm:$0xff] }
 0x6dc   :  { %6973 = vmatprep.subr.bf16.mxu1 %v9192_v53  ;;  %7005 = vmatprep.subr.bf16.mxu0 %v9194_v58  ;;  %v9216_v54 = vpack.c.bf16 %v1941_v55, %v1937_v12  ;;  %v9218_v59 = vpack.c.bf16 %v1943_v44, %v1939_v5  ;;  %v1945_v58 = vld [vmem:[#allocation7 + $0x188] sm:$0xff]  ;;  %v1947_v53 = vld [vmem:[#allocation7 + $0x198] sm:$0xff]  ;;  %v1944_v12 = vld [vmem:[#allocation7 + $0x180] sm:$0xff] }
 0x6dd   :  { %v1948_v55 = vld [vmem:[#allocation7 + $0x1a0] sm:$0xff] }
 0x6de   :  { %11188 = vst [vmem:[#allocation44_spill] sm:$0xff] %v9218_v59  ;;  %v9236_v34 = vpack.c.bf16 %v1948_v55, %v1944_v12 }
 0x6df   :  { %6975 = vmatpush1.bf16.msra.mxu1 %v9198_v36  ;;  %7007 = vmatpush1.bf16.msra.mxu0 %v9200_v1  ;;  %v1949_v36 = vld [vmem:[#allocation7 + $0x1a8] sm:$0xff]  ;;  %v1951_v1 = vld [vmem:[#allocation7 + $0x1b8] sm:$0xff] }
 0x6e0   :  { %6977 = vmatprep.subr.bf16.mxu1 %v9204_v30  ;;  %7009 = vmatprep.subr.bf16.mxu0 %v9206_v37  ;;  %v9230_v5 = vpack.c.bf16 %v1949_v36, %v1945_v58  ;;  %v9232_v44 = vpack.c.bf16 %v1951_v1, %v1947_v53  ;;  %v1953_v37 = vld [vmem:[#allocation7 + $0x1c8] sm:$0xff]  ;;  %v1956_v36 = vld [vmem:[#allocation7 + $0x1e0] sm:$0xff]  ;;  %v1954_v1 = vld [vmem:[#allocation7 + $0x1d0] sm:$0xff] }
 0x6e1   :  { %v9249_v12 = vpack.c.bf16 %v1956_v36, %v1952_v62  ;;  %v2165_v62 = vld [vmem:[%s10915_s8 + $0x40] sm:$0xff]  ;;  %v2167_v36 = vld [vmem:[%s10915_s8 + $0x50] sm:$0xff] }
 0x6e3   :  { %6979 = vmatpush1.bf16.msra.mxu1 %v9210_v3  ;;  %7011 = vmatpush1.bf16.msra.mxu0 %v9212_v50  ;;  %v1957_v3 = vld [vmem:[#allocation7 + $0x1e8] sm:$0xff]  ;;  %v1955_v50 = vld [vmem:[#allocation7 + $0x1d8] sm:$0xff] }
 0x6e4   :  { %6981 = vmatprep.subr.bf16.mxu1 %v9216_v54  ;;  %7013 = vmatprep.subr.bf16.mxu0 %v9218_v59  ;;  %v9242_v53 = vpack.c.bf16 %v1957_v3, %v1953_v37  ;;  %v9244_v58 = vpack.c.bf16 %v1959_v9, %v1955_v50  ;;  %v1958_v59 = vld [vmem:[#allocation7 + $0x1f0] sm:$0xff]  ;;  %v9255_v37 = vstv %s1566_s19  ;;  %v9323_v9 = vpack.c.bf16 %v2168_v43, %v2166_v38 }
 0x6e5   :  { %v9251_v55 = vpack.c.bf16 %v1958_v59, %v1954_v1  ;;  %v1656_v3 = vmul.f32 %v9255_v37, %v9053_v14  ;;  %v2161_v14 = vld [vmem:[%s10915_s8 + $0x20] sm:$0xff]  ;;  %v2163_v50 = vld [vmem:[%s10915_s8 + $0x30] sm:$0xff]  ;;  %v9331_v1 = vpack.c.bf16 %v2167_v36, %v2165_v62  ;;  %v2178_v62 = vld [vmem:[%s10915_s8 + $0xa8] sm:$0xff] }
 0x6e6   :  { %v9313_v59 = vpack.c.bf16 %v2163_v50, %v2161_v14  ;;  %11192 = vst [vmem:[#allocation48_spill] sm:$0xff] %v9323_v9  ;;  %v2176_v14 = vld [vmem:[%s10915_s8 + $0x98] sm:$0xff]  ;;  %v2173_v50 = vld [vmem:[%s10915_s8 + $0x80] sm:$0xff]  ;;  %v2175_v43 = vld [vmem:[%s10915_s8 + $0x90] sm:$0xff] }
 0x6e7   :  { %6983 = vmatpush1.bf16.msra.mxu1 %v9224_v31  ;;  %7015 = vmatpush1.bf16.msra.mxu0 %v9226_v29  ;;  %11193 = vst [vmem:[#allocation49_spill] sm:$0xff] %v9331_v1  ;;  %v2180_v36 = vld [vmem:[%s10915_s8 + $0xb8] sm:$0xff] }
 0x6e8   :  { %6985 = vmatprep.subr.bf16.mxu1 %v9230_v5  ;;  %7017 = vmatprep.subr.bf16.mxu0 %v9232_v44  ;;  %11191 = vst [vmem:[#allocation47_spill] sm:$0xff] %v9313_v59 }
 0x6eb   :  { %6987 = vmatpush1.bf16.msra.mxu1 %v9236_v34  ;;  %7019 = vmatpush1.bf16.msra.mxu0 %v9238_v10 }
 0x6ec   :  { %6989 = vmatprep.subr.bf16.mxu1 %v9242_v53  ;;  %7021 = vmatprep.subr.bf16.mxu0 %v9244_v58 }
 0x6ef   :  { %6991 = vmatpush1.bf16.msra.mxu1 %v9249_v12  ;;  %7023 = vmatpush1.bf16.msra.mxu0 %v9251_v55 }
 0x6f0   :  { %7056 = vmatprep.subr.bf16.mxu0 %v11147_v11 }
 0x6f2   :  { %2025 = vmatmul.mubr.f32.vlgmr.msra.gmra.mrb[14].mxu1 %v1656_v3  ;;  %2096 = vmatmul.mubr.f32.vlgmr.msra.gmra.mrb[16].mxu0 %v1656_v3  ;;  %v2170_v3 = vld [vmem:[%s10915_s8 + $0x68] sm:$0xff] }
 0x6f3   :  { %2265 = vmatprep.mubr.f32.mxu1 %v11097_v35  ;;  %7058 = vmatpush3.bf16.msra.mxu0 %v8954_v47  ;;  %v2158_v47 = vld [vmem:[%s10915_s8 + $0x8] sm:$0xff] }
 0x6f4   :  { %7059 = vmatprep.subr.bf16.mxu0 %v11147_v11  ;;  %6361 = vmatprep.mubr.msk.f32.mxu0 %vm8243_vm0, %v11097_v35 }
 0x6f7   :  { %7061 = vmatpush3.bf16.msra.mxu0 %v8960_v56  ;;  %v2160_v56 = vld [vmem:[%s10915_s8 + $0x18] sm:$0xff] }
 0x6f8   :  { %7062 = vmatprep.subr.bf16.mxu0 %v11147_v11 }
 0x6fb   :  { %7064 = vmatpush3.bf16.msra.mxu0 %v8970_v16  ;;  %v9287_v16 = vpack.c.bf16 %v2160_v56, %v2158_v47  ;;  %v2172_v47 = vld [vmem:[%s10915_s8 + $0x78] sm:$0xff] }
 0x6fc   :  { %7065 = vmatprep.subr.bf16.mxu0 %v11147_v11  ;;  %v9341_v56 = vpack.c.bf16 %v2172_v47, %v2170_v3  ;;  %v9373_v3 = vpack.c.bf16 %v2175_v43, %v2173_v50  ;;  %v9375_v47 = vpack.c.bf16 %v2180_v36, %v2178_v62  ;;  %v2181_v62 = vld [vmem:[%s10915_s8 + $0xc0] sm:$0xff]  ;;  %v2183_v36 = vld [vmem:[%s10915_s8 + $0xd0] sm:$0xff] }
 0x6fd   :  { %7025 = vmatprep.subr.bf16.mxu1 %v9287_v16 }
 0x6fe   :  { %11194 = vst [vmem:[#allocation50_spill] sm:$0xff] %v9341_v56  ;;  %11197 = vst [vmem:[#allocation53_spill] sm:$0xff] %v9373_v3 }
 0x6ff   :  { %7067 = vmatpush3.bf16.msra.mxu0 %v8980_v28  ;;  %v2157_v28 = vld [vmem:[%s10915_s8] sm:$0xff]  ;;  %11198 = vst [vmem:[#allocation54_spill] sm:$0xff] %v9375_v47 }
 0x700   :  { %7068 = vmatprep.subr.bf16.mxu0 %v11147_v11 }
 0x703   :  { %7070 = vmatpush3.bf16.msra.mxu0 %v8990_v39  ;;  %v2159_v39 = vld [vmem:[%s10915_s8 + $0x10] sm:$0xff] }
 0x704   :  { %7071 = vmatprep.subr.bf16.mxu0 %v11147_v11 }
 0x707   :  { %7073 = vmatpush3.bf16.msra.mxu0 %v9000_v57  ;;  %v9295_v57 = vpack.c.bf16 %v2159_v39, %v2157_v28  ;;  %v2169_v28 = vld [vmem:[%s10915_s8 + $0x60] sm:$0xff]  ;;  %v2171_v39 = vld [vmem:[%s10915_s8 + $0x70] sm:$0xff] }
 0x708   :  { %7074 = vmatprep.subr.bf16.mxu0 %v11147_v11 }
 0x709   :  { %11189 = vst [vmem:[#allocation45_spill] sm:$0xff] %v9295_v57  ;;  %7027 = vmatpush1.bf16.msra.mxu1 %v9295_v57 }
 0x70b   :  { %7076 = vmatpush3.bf16.msra.mxu0 %v9010_v22  ;;  %v2162_v22 = vld [vmem:[%s10915_s8 + $0x28] sm:$0xff] }
 0x70c   :  { %7077 = vmatprep.subr.bf16.mxu0 %v11147_v11 }
 0x70f   :  { %7079 = vmatpush3.bf16.msra.mxu0 %v9036_v46  ;;  %v2164_v46 = vld [vmem:[%s10915_s8 + $0x38] sm:$0xff] }
 0x710   :  { %7113 = vmatprep.subr.bf16.mxu0 %v9046_v6  ;;  %v9305_v6 = vpack.c.bf16 %v2164_v46, %v2162_v22  ;;  %v9349_v22 = vpack.c.bf16 %v2171_v39, %v2169_v28  ;;  %v2174_v46 = vld [vmem:[%s10915_s8 + $0x88] sm:$0xff]  ;;  %v2177_v28 = vld [vmem:[%s10915_s8 + $0xa0] sm:$0xff]  ;;  %v2179_v39 = vld [vmem:[%s10915_s8 + $0xb0] sm:$0xff] }
 0x711   :  { %v9362_v38 = vpack.c.bf16 %v2176_v14, %v2174_v46  ;;  %v2182_v46 = vld [vmem:[%s10915_s8 + $0xc8] sm:$0xff]  ;;  %v2184_v14 = vld [vmem:[%s10915_s8 + $0xd8] sm:$0xff]  ;;  %v9391_v50 = vpack.c.bf16 %v2179_v39, %v2177_v28  ;;  %v9409_v39 = vpack.c.bf16 %v2183_v36, %v2181_v62 }
 0x712   :  { %11190 = vst [vmem:[#allocation46_spill] sm:$0xff] %v9305_v6  ;;  %7029 = vmatprep.subr.bf16.mxu1 %v9305_v6  ;;  %11195 = vst [vmem:[#allocation51_spill] sm:$0xff] %v9349_v22  ;;  %v9394_v43 = vpack.c.bf16 %v2184_v14, %v2182_v46  ;;  %v2188_v28 = vld [vmem:[%s10915_s8 + $0xf8] sm:$0xff]  ;;  %v2185_v14 = vld [vmem:[%s10915_s8 + $0xe0] sm:$0xff] }
 0x713   :  { %7031 = vmatpush1.bf16.msra.mxu1 %v9313_v59  ;;  %11196 = vst [vmem:[#allocation52_spill] sm:$0xff] %v9362_v38  ;;  %11199 = vst [vmem:[#allocation55_spill] sm:$0xff] %v9391_v50 }
 0x714   :  { %7033 = vmatprep.subr.bf16.mxu1 %v9323_v9  ;;  %11200 = vst [vmem:[#allocation56_spill] sm:$0xff] %v9394_v43  ;;  %11201 = vst [vmem:[#allocation57_spill] sm:$0xff] %v9409_v39 }
 0x717   :  { %7035 = vmatpush1.bf16.msra.mxu1 %v9331_v1 }
 0x718   :  { %7037 = vmatprep.subr.bf16.mxu1 %v9341_v56 }
 0x71b   :  { %7039 = vmatpush1.bf16.msra.mxu1 %v9349_v22 }
 0x71c   :  { %7041 = vmatprep.subr.bf16.mxu1 %v9362_v38  ;;  %v2186_v38 = vld [vmem:[%s10915_s8 + $0xe8] sm:$0xff] }
 0x71d   :  { %v9412_v46 = vpack.c.bf16 %v2188_v28, %v2186_v38 }
 0x71f   :  { %7043 = vmatpush1.bf16.msra.mxu1 %v9373_v3  ;;  %11202 = vst [vmem:[#allocation58_spill] sm:$0xff] %v9412_v46 }
 0x720   :  { %7045 = vmatprep.subr.bf16.mxu1 %v9375_v47  ;;  %v2187_v47 = vld [vmem:[%s10915_s8 + $0xf0] sm:$0xff] }
 0x721   :  { %v9421_v3 = vpack.c.bf16 %v2187_v47, %v2185_v14 }
 0x723   :  { %7047 = vmatpush1.bf16.msra.mxu1 %v9391_v50  ;;  %11203 = vst [vmem:[#allocation59_spill] sm:$0xff] %v9421_v3 }
 0x724   :  { %7049 = vmatprep.subr.bf16.mxu1 %v9394_v43 }
 0x727   :  { %7051 = vmatpush1.bf16.msra.mxu1 %v9409_v39 }
 0x728   :  { %7053 = vmatprep.subr.bf16.mxu1 %v9412_v46 }
 0x72b   :  { %7055 = vmatpush1.bf16.msra.mxu1 %v9421_v3 }
 0x72c   :  { %7081 = vmatprep.subr.bf16.mxu1 %v9044_v26 }
 0x7a5   :  { %v1790_v38 = vpop.f32.mrb[12].mxu1  ;;  %v1861_v62 = vpop.f32.mrb[14].mxu0 }
 0x7a6   :  { %v1792_v36 = vpop.f32.mrb[13].mxu1  ;;  %v1863_v28 = vpop.f32.mrb[15].mxu0 }
 0x7a7   :  { %v1870_v43 = vcombine.low %v1790_v38, %v1792_v36  ;;  %v1871_v50 = vcombine.low %v1861_v62, %v1863_v28  ;;  %v6077_v38 = vld [vmem:[%s10908_s1 + $0x2] ss:$8 sm:$0xf] }
 0x7a9   :  { %v1878_v22 = vrot.slane %v1870_v43, %v8809_v7  ;;  %v1885_v56 = vrot.slane %v1871_v50, %v8809_v7 }
 0x7ab   :  { %v1886_v1 = vcombine.low %v1878_v22, %v1885_v56 }
 0x7ad   :  { %v1893_v3 = vrot.slane %v1886_v1, %v8809_v7 }
 0x7af   :  { %v1895_v62 = vadd.f32 %v6077_v38, %v1893_v3 }
 0x7c5   :  { %v2026_v39 = vpop.f32.mrb[14].mxu1  ;;  %v2097_v47 = vpop.f32.mrb[16].mxu0 }
 0x7c6   :  { %v2028_v14 = vpop.f32.mrb[15].mxu1  ;;  %v2099_v9 = vpop.f32.mrb[17].mxu0 }
 0x7c7   :  { %v2106_v46 = vcombine.low %v2026_v39, %v2028_v14  ;;  %v2107_v59 = vcombine.low %v2097_v47, %v2099_v9 }
 0x7c9   :  { %v2114_v26 = vrot.slane %v2106_v46, %v8809_v7  ;;  %v2121_v6 = vrot.slane %v2107_v59, %v8809_v7 }
 0x7cb   :  { %v2122_v43 = vcombine.low %v2114_v26, %v2121_v6  ;;  %v1657_v6 = vmul.f32 %v9255_v37, %v9026_v0  ;;  %v2189_v0 = vld [vmem:[%s10916_s9] sm:$0x3] }
 0x7cd   :  { %v2129_v56 = vrot.slane %v2122_v43, %v8809_v7 }
 0x7cf   :  { %v2131_v22 = vadd.f32 %v2129_v56, %v1895_v62 }
 0x7d1   :  { %v2132_v50 = vmul.f32 0.5, %v2131_v22  ;;  %v2137_v36 = vrot.slane %v2131_v22, 1  ;;  %v2143_v9 = vrot.slane %v2131_v22, 2  ;;  %v2146_v1 = vrot.slane %v2131_v22, 3 }
 0x7d3   :  { %8013 = vtanh.f32 %v2132_v50  ;;  %v2139_v39 = vmul.f32 0.5, %v2137_v36  ;;  %v2148_v46 = vmul.f32 0.5, %v2146_v1  ;;  %v11216_v1 = vld [vmem:[#allocation31_spill] sm:$0xff] }
 0x7d5   :  { %8015 = vtanh.f32 %v2139_v39 }
 0x7d6   :  { %8017 = vtanh.f32 %v2143_v9  ;;  %v11215_v9 = vld [vmem:[#allocation30_spill] sm:$0xff] }
 0x7d7   :  { %8019 = vtanh.f32 %v2148_v46  ;;  %v11217_v46 = vld [vmem:[#allocation32_spill] sm:$0xff] }
 0x7dd   :  { %v8014_v28 = vpop.eup %8013 }
 0x7de   :  { %v2134_v59 = vadd.f32 1.0, %v8014_v28  ;;  %v11218_v28 = vld [vmem:[#allocation33_spill] sm:$0xff] }
 0x7df   :  { %v8016_v47 = vpop.eup %8015 }
 0x7e0   :  { %v2135_v14 = vmul.f32 0.5, %v2134_v59  ;;  %v2141_v57 = vadd.f32 1.0, %v8016_v47  ;;  %v8018_v26 = vpop.eup %8017  ;;  %v11219_v59 = vld [vmem:[#allocation34_spill] sm:$0xff]  ;;  %v11220_v47 = vld [vmem:[#allocation35_spill] sm:$0xff] }
 0x7e1   :  { %v8020_v56 = vpop.eup %8019 }
 0x7e2   :  { %v2142_v3 = vmul.f32 0.5, %v2141_v57  ;;  %v2153_v38 = vmul.f32 %v8018_v26, %v2135_v14  ;;  %v2150_v22 = vadd.f32 1.0, %v8020_v56  ;;  %v11224_v14 = vld [vmem:[#allocation39_spill] sm:$0xff]  ;;  %v11227_v26 = vld [vmem:[#allocation42_spill] sm:$0xff]  ;;  %v11241_v56 = vld [vmem:[#allocation56_spill] sm:$0xff] }
 0x7e4   :  { %v2152_v43 = vmul.f32 %v2142_v3, %v1657_v6  ;;  %v2151_v50 = vmul.f32 0.5, %v2150_v22  ;;  %v11225_v6 = vld [vmem:[#allocation40_spill] sm:$0xff]  ;;  %v11226_v3 = vld [vmem:[#allocation41_spill] sm:$0xff] }
 0x7e5   :  { %v11242_v22 = vld [vmem:[#allocation57_spill] sm:$0xff] }
 0x7e6   :  { %v9437_v62 = vadd.f32 %v2153_v38, %v2152_v43  ;;  %v11228_v38 = vld [vmem:[#allocation43_spill] sm:$0xff]  ;;  %v11229_v43 = vld [vmem:[#allocation44_spill] sm:$0xff] }
 0x7e8   :  { %8021 = vtanh.f32 %v9437_v62 }
 0x7f2   :  { %v8022_v36 = vpop.eup %8021 }
 0x7f3   :  { %v2156_v39 = vmul.f32 %v8022_v36, %v2151_v50  ;;  %v11243_v50 = vld [vmem:[#allocation58_spill] sm:$0xff]  ;;  %v11244_v36 = vld [vmem:[#allocation59_spill] sm:$0xff] }
 0x7f5   :  { %2266 = vmatmul.mubr.f32.vlgmr.msra.gmra.mrb[16].mxu1 %v2156_v39  ;;  %v3047_v39 = vld [vmem:[%s10911_s4] sm:$0xff] }
 0x7f6   :  { %7083 = vmatpush1.bf16.msra.mxu1 %v9048_v15  ;;  %2528 = vmatprep.mubr.f32.mxu1 %v11097_v35  ;;  %v2194_v15 = vrot.slane %v2189_v0, %v8845_v18 }
 0x7f7   :  { %7085 = vmatprep.subr.bf16.mxu1 %v9057_v8  ;;  %v2198_v8 = vrot.slane %v2189_v0, %v8851_v25  ;;  %v3048_v0 = vld [vmem:[%s10911_s4 + $0x8] sm:$0xff] }
 0x7fa   :  { %7087 = vmatpush1.bf16.msra.mxu1 %v9063_v51 }
 0x7fb   :  { %7089 = vmatprep.subr.bf16.mxu1 %v9068_v17 }
 0x7fe   :  { %7091 = vmatpush1.bf16.msra.mxu1 %v9080_v19 }
 0x7ff   :  { %7093 = vmatprep.subr.bf16.mxu1 %v9084_v4 }
 0x802   :  { %7095 = vmatpush1.bf16.msra.mxu1 %v9095_v60 }
 0x803   :  { %7097 = vmatprep.subr.bf16.mxu1 %v9099_v45 }
 0x806   :  { %7099 = vmatpush1.bf16.msra.mxu1 %v9108_v52 }
 0x807   :  { %7101 = vmatprep.subr.bf16.mxu1 %v9111_v13  ;;  %v11207_v13 = vld [vmem:[#allocation22_spill] sm:$0xff] }
 0x80a   :  { %7103 = vmatpush1.bf16.msra.mxu1 %v9120_v20  ;;  %v11208_v20 = vld [vmem:[#allocation23_spill] sm:$0xff] }
 0x80b   :  { %7105 = vmatprep.subr.bf16.mxu1 %v9123_v48  ;;  %v11211_v48 = vld [vmem:[#allocation26_spill] sm:$0xff] }
 0x80e   :  { %7107 = vmatpush1.bf16.msra.mxu1 %v9132_v27  ;;  %v11212_v27 = vld [vmem:[#allocation27_spill] sm:$0xff] }
 0x80f   :  { %7109 = vmatprep.subr.bf16.mxu1 %v9141_v23  ;;  %v2323_v23 = vld [vmem:[%s10912_s5] sm:$0x1] }
 0x812   :  { %7111 = vmatpush1.bf16.msra.mxu1 %v9145_v21 }
 0x813   :  { %7145 = vmatprep.subr.bf16.mxu1 %v9153_v63 }
 0x8c8   :  { %v2267_v51 = vpop.f32.mrb[16].mxu1 }
 0x8c9   :  { %v9462_v17 = vadd.f32 %v2267_v51, %v2194_v15  ;;  %v2269_v19 = vpop.f32.mrb[17].mxu1  ;;  %v3049_v15 = vld [vmem:[%s10911_s4 + $0x10] sm:$0xff]  ;;  %v3050_v51 = vld [vmem:[%s10911_s4 + $0x18] sm:$0xff] }
 0x8ca   :  { %v9464_v4 = vadd.f32 %v2269_v19, %v2198_v8  ;;  %v9559_v8 = vpack.c.bf16 %v3048_v0, %v3047_v39  ;;  %v3051_v19 = vld [vmem:[%s10911_s4 + $0x20] sm:$0xff] }
 0x8cb   :  { %2302 = vst [vmem:[#allocation9 + $0x2] sm:$0x1] %v9462_v17  ;;  %6362 = vmatmul.mubr.f32.vlgmr.msra.gmra.mrb[18].mxu0 %v9462_v17 }
 0x8cc   :  { %11204 = vst [vmem:[#allocation60_spill] sm:$0xff] %v9464_v4  ;;  %v2273_v60 = vrot.slane %v9464_v4, 7  ;;  %7115 = vmatpush1.bf16.msra.mxu0 %v9051_v24  ;;  %2599 = vmatprep.mubr.f32.mxu0 %v11097_v35  ;;  %v2277_v45 = vrot.slane %v9464_v4, 6  ;;  %v2281_v52 = vrot.slane %v9464_v4, 5  ;;  %v11205_v24 = vld [vmem:[#allocation20_spill] sm:$0xff] }
 0x8cd   :  { %7117 = vmatprep.subr.bf16.mxu0 %v9059_v61  ;;  %v11206_v61 = vld [vmem:[#allocation21_spill] sm:$0xff] }
 0x8ce   :  { %2274 = vrot.lane.b32.xlu0 %v2273_v60, %s8247_s27  ;;  %v3052_v60 = vld [vmem:[%s10911_s4 + $0x28] sm:$0xff]  ;;  %v3384_v4 = vld [vmem:[#allocation7 + $0x40] sm:$0xff] }
 0x8d0   :  { %7119 = vmatpush1.bf16.msra.mxu0 %v9073_v33  ;;  %v11209_v33 = vld [vmem:[#allocation24_spill] sm:$0xff] }
 0x8d1   :  { %7121 = vmatprep.subr.bf16.mxu0 %v9078_v2  ;;  %v11210_v2 = vld [vmem:[#allocation25_spill] sm:$0xff] }
 0x8d2   :  { %2278 = vrot.lane.b32.xlu0 %v2277_v45, %s8248_s14  ;;  %v9575_v45 = vpack.c.bf16 %v3052_v60, %v3051_v19 }
 0x8d4   :  { %7123 = vmatpush1.bf16.msra.mxu0 %v9089_v49  ;;  %v11213_v49 = vld [vmem:[#allocation28_spill] sm:$0xff] }
 0x8d5   :  { %7125 = vmatprep.subr.bf16.mxu0 %v9093_v42  ;;  %v11214_v42 = vld [vmem:[#allocation29_spill] sm:$0xff] }
 0x8d6   :  { %2282 = vrot.lane.b32.xlu0 %v2281_v52, %s8246_s6  ;;  %v3053_v52 = vld [vmem:[%s10911_s4 + $0x30] sm:$0xff] }
 0x8d8   :  { %7127 = vmatpush1.bf16.msra.mxu0 %v11205_v24  ;;  %v3054_v24 = vld [vmem:[%s10911_s4 + $0x38] sm:$0xff] }
 0x8d9   :  { %7129 = vmatprep.subr.bf16.mxu0 %v11206_v61  ;;  %v9585_v61 = vpack.c.bf16 %v3054_v24, %v3053_v52 }
 0x8dc   :  { %7131 = vmatpush1.bf16.msra.mxu0 %v11207_v13  ;;  %v3055_v13 = vld [vmem:[%s10911_s4 + $0x40] sm:$0xff] }
 0x8dd   :  { %7133 = vmatprep.subr.bf16.mxu0 %v11208_v20  ;;  %v3056_v20 = vld [vmem:[%s10911_s4 + $0x48] sm:$0xff] }
 0x8e0   :  { %7135 = vmatpush1.bf16.msra.mxu0 %v11209_v33  ;;  %v9595_v33 = vpack.c.bf16 %v3056_v20, %v3055_v13 }
 0x8e1   :  { %7137 = vmatprep.subr.bf16.mxu0 %v11210_v2  ;;  %v3057_v2 = vld [vmem:[%s10911_s4 + $0x50] sm:$0xff] }
 0x8e4   :  { %7139 = vmatpush1.bf16.msra.mxu0 %v11211_v48  ;;  %v3058_v48 = vld [vmem:[%s10911_s4 + $0x58] sm:$0xff] }
 0x8e5   :  { %7141 = vmatprep.subr.bf16.mxu0 %v11212_v27  ;;  %v9605_v27 = vpack.c.bf16 %v3058_v48, %v3057_v2  ;;  %v2929_v48 = vld [vmem:[%s10916_s9] sm:$0x3] }
 0x8e8   :  { %7143 = vmatpush1.bf16.msra.mxu0 %v11213_v49  ;;  %v3059_v49 = vld [vmem:[%s10911_s4 + $0x60] sm:$0xff] }
 0x8e9   :  { %7177 = vmatprep.subr.bf16.mxu0 %v11214_v42  ;;  %v3060_v42 = vld [vmem:[%s10911_s4 + $0x68] sm:$0xff] }
 0x99e   :  { %v2390_v21 = vpop.f32.mrb[18].mxu0 }
 0x99f   :  { %v2391_v63 = vadd.f32 %v2390_v21, %v2323_v23  ;;  %v6363_v37 = vpop.f32.mrb[19].mxu0  ;;  %v9615_v23 = vpack.c.bf16 %v3060_v42, %v3059_v49  ;;  %v3141_v49 = vld [vmem:[#allocation6 + $0x8] sm:$0xff] }
 0x9a0   :  { %v3145_v42 = vld [vmem:[#allocation6 + $0x28] sm:$0xff] }
 0x9a1   :  { %v2394_v57 = vmax.f32 %v2391_v63, 0.0 }
 0x9a3   :  { %2529 = vmatmul.mubr.f32.vlgmr.msra.gmra.mrb[18].mxu1 %v2394_v57  ;;  %2600 = vmatmul.mubr.f32.vlgmr.msra.gmra.mrb[20].mxu0 %v2394_v57 }
 0x9a4   :  { %7147 = vmatpush1.bf16.msra.mxu1 %v9162_v32  ;;  %7179 = vmatpush1.bf16.msra.mxu0 %v9164_v40  ;;  %v11221_v32 = vld [vmem:[#allocation36_spill] sm:$0xff]  ;;  %v11222_v40 = vld [vmem:[#allocation37_spill] sm:$0xff] }
 0x9a5   :  { %7149 = vmatprep.subr.bf16.mxu1 %v9166_v41  ;;  %7181 = vmatprep.subr.bf16.mxu0 %v11215_v9  ;;  %v11223_v41 = vld [vmem:[#allocation38_spill] sm:$0xff] }
 0x9a6   :  { %2764 = vmatprep.mubr.f32.mxu1 %v11097_v35  ;;  %2835 = vmatprep.mubr.f32.mxu0 %v11097_v35 }
 0x9a8   :  { %7151 = vmatpush1.bf16.msra.mxu1 %v11216_v1  ;;  %7183 = vmatpush1.bf16.msra.mxu0 %v11217_v46 }
 0x9a9   :  { %7153 = vmatprep.subr.bf16.mxu1 %v11218_v28  ;;  %7185 = vmatprep.subr.bf16.mxu0 %v11219_v59 }
 0x9ac   :  { %7155 = vmatpush1.bf16.msra.mxu1 %v11220_v47  ;;  %7187 = vmatpush1.bf16.msra.mxu0 %v11221_v32 }
 0x9ad   :  { %7157 = vmatprep.subr.bf16.mxu1 %v11222_v40  ;;  %7189 = vmatprep.subr.bf16.mxu0 %v11223_v41 }
 0x9b0   :  { %7159 = vmatpush1.bf16.msra.mxu1 %v11224_v14  ;;  %7191 = vmatpush1.bf16.msra.mxu0 %v11225_v6 }
 0x9b1   :  { %7161 = vmatprep.subr.bf16.mxu1 %v9204_v30  ;;  %7193 = vmatprep.subr.bf16.mxu0 %v11226_v3  ;;  %v9524_v30 = vstv %s2306_s28  ;;  %s3046_s28 = ssub.f32 1.0, %s9825_s26 }
 0x9b4   :  { %7163 = vmatpush1.bf16.msra.mxu1 %v11227_v26  ;;  %7195 = vmatpush1.bf16.msra.mxu0 %v11228_v38 }
 0x9b5   :  { %7165 = vmatprep.subr.bf16.mxu1 %v9216_v54  ;;  %7197 = vmatprep.subr.bf16.mxu0 %v11229_v43  ;;  %v2396_v54 = vmul.f32 %v9524_v30, %v9462_v17  ;;  %v9565_v17 = vpack.c.bf16 %v3050_v51, %v3049_v15  ;;  %v6079_v43 = vld [vmem:[%s10908_s1 + $0x3] ss:$8 sm:$0xf] }
 0x9b8   :  { %7167 = vmatpush1.bf16.msra.mxu1 %v9224_v31  ;;  %7199 = vmatpush1.bf16.msra.mxu0 %v9226_v29  ;;  %v11230_v31 = vld [vmem:[#allocation45_spill] sm:$0xff]  ;;  %v11231_v29 = vld [vmem:[#allocation46_spill] sm:$0xff] }
 0x9b9   :  { %7169 = vmatprep.subr.bf16.mxu1 %v9230_v5  ;;  %7201 = vmatprep.subr.bf16.mxu0 %v9232_v44  ;;  %v11232_v5 = vld [vmem:[#allocation47_spill] sm:$0xff]  ;;  %v11233_v44 = vld [vmem:[#allocation48_spill] sm:$0xff] }
 0x9bc   :  { %7171 = vmatpush1.bf16.msra.mxu1 %v9236_v34  ;;  %7203 = vmatpush1.bf16.msra.mxu0 %v9238_v10  ;;  %v11234_v34 = vld [vmem:[#allocation49_spill] sm:$0xff]  ;;  %v11235_v10 = vld [vmem:[#allocation50_spill] sm:$0xff] }
 0x9bd   :  { %7173 = vmatprep.subr.bf16.mxu1 %v9242_v53  ;;  %7205 = vmatprep.subr.bf16.mxu0 %v9244_v58  ;;  %v11236_v53 = vld [vmem:[#allocation51_spill] sm:$0xff]  ;;  %v11237_v58 = vld [vmem:[#allocation52_spill] sm:$0xff] }
 0x9c0   :  { %7175 = vmatpush1.bf16.msra.mxu1 %v9249_v12  ;;  %7207 = vmatpush1.bf16.msra.mxu0 %v9251_v55  ;;  %v11238_v12 = vld [vmem:[#allocation53_spill] sm:$0xff]  ;;  %v11239_v55 = vld [vmem:[#allocation54_spill] sm:$0xff] }
 0x9c1   :  { %7209 = vmatprep.subr.bf16.mxu1 %v9287_v16  ;;  %7240 = vmatprep.subr.bf16.mxu0 %v11147_v11  ;;  %v11240_v16 = vld [vmem:[#allocation55_spill] sm:$0xff] }
 0x9c3   :  { %2765 = vmatmul.mubr.f32.vlgmr.msra.gmra.mrb[20].mxu1 %v2396_v54  ;;  %2836 = vmatmul.mubr.f32.vlgmr.msra.gmra.mrb[22].mxu0 %v2396_v54 }
 0x9c4   :  { %7211 = vmatpush1.bf16.msra.mxu1 %v11230_v31  ;;  %3005 = vmatprep.mubr.f32.mxu1 %v11097_v35 }
 0x9c5   :  { %7213 = vmatprep.subr.bf16.mxu1 %v11231_v29  ;;  %6396 = vmatprep.mubr.msk.f32.mxu0 %vm8243_vm0, %v11097_v35 }
 0x9c6   :  { %7242 = vmatpush3.bf16.msra.mxu0 %v9559_v8 }
 0x9c7   :  { %7243 = vmatprep.subr.bf16.mxu0 %v11147_v11 }
 0x9c8   :  { %7215 = vmatpush1.bf16.msra.mxu1 %v11232_v5 }
 0x9c9   :  { %7217 = vmatprep.subr.bf16.mxu1 %v11233_v44 }
 0x9ca   :  { %7245 = vmatpush3.bf16.msra.mxu0 %v9565_v17 }
 0x9cb   :  { %7246 = vmatprep.subr.bf16.mxu0 %v11147_v11 }
 0x9cc   :  { %7219 = vmatpush1.bf16.msra.mxu1 %v11234_v34 }
 0x9cd   :  { %7221 = vmatprep.subr.bf16.mxu1 %v11235_v10 }
 0x9ce   :  { %7248 = vmatpush3.bf16.msra.mxu0 %v9575_v45 }
 0x9cf   :  { %7249 = vmatprep.subr.bf16.mxu0 %v11147_v11 }
 0x9d0   :  { %7223 = vmatpush1.bf16.msra.mxu1 %v11236_v53 }
 0x9d1   :  { %7225 = vmatprep.subr.bf16.mxu1 %v11237_v58 }
 0x9d2   :  { %7251 = vmatpush3.bf16.msra.mxu0 %v9585_v61 }
 0x9d3   :  { %7252 = vmatprep.subr.bf16.mxu0 %v11147_v11 }
 0x9d4   :  { %7227 = vmatpush1.bf16.msra.mxu1 %v11238_v12 }
 0x9d5   :  { %7229 = vmatprep.subr.bf16.mxu1 %v11239_v55 }
 0x9d6   :  { %7254 = vmatpush3.bf16.msra.mxu0 %v9595_v33 }
 0x9d7   :  { %7255 = vmatprep.subr.bf16.mxu0 %v11147_v11 }
 0x9d8   :  { %7231 = vmatpush1.bf16.msra.mxu1 %v11240_v16 }
 0x9d9   :  { %7233 = vmatprep.subr.bf16.mxu1 %v11241_v56 }
 0x9da   :  { %7257 = vmatpush3.bf16.msra.mxu0 %v9605_v27 }
 0x9db   :  { %7258 = vmatprep.subr.bf16.mxu0 %v11147_v11 }
 0x9dc   :  { %7235 = vmatpush1.bf16.msra.mxu1 %v11242_v22 }
 0x9dd   :  { %7237 = vmatprep.subr.bf16.mxu1 %v11243_v50 }
 0x9de   :  { %7260 = vmatpush3.bf16.msra.mxu0 %v9615_v23 }
 0x9df   :  { %7261 = vmatprep.subr.bf16.mxu0 %v11147_v11 }
 0x9e0   :  { %7239 = vmatpush1.bf16.msra.mxu1 %v11244_v36  ;;  %v2397_v36 = vmul.f32 %v9524_v30, %v9437_v62  ;;  %v3061_v62 = vld [vmem:[%s10911_s4 + $0x70] sm:$0xff]  ;;  %v3062_v30 = vld [vmem:[%s10911_s4 + $0x78] sm:$0xff] }
 0x9e1   :  { %v9641_v2 = vpack.c.bf16 %v3062_v30, %v3061_v62  ;;  %v3164_v62 = vld [vmem:[#allocation6 + $0xc0] sm:$0xff] }
 0x9e2   :  { %v3168_v30 = vld [vmem:[#allocation6 + $0xe0] sm:$0xff] }
 0x9e3   :  { %7263 = vmatpush3.bf16.msra.mxu0 %v9641_v2 }
 0xa76   :  { %v2530_v21 = vpop.f32.mrb[18].mxu1  ;;  %v2601_v63 = vpop.f32.mrb[20].mxu0 }
 0xa77   :  { %v2532_v37 = vpop.f32.mrb[19].mxu1  ;;  %v2603_v57 = vpop.f32.mrb[21].mxu0 }
 0xa78   :  { %v2610_v9 = vcombine.low %v2530_v21, %v2532_v37  ;;  %v2611_v1 = vcombine.low %v2601_v63, %v2603_v57  ;;  %v3143_v21 = vld [vmem:[#allocation6 + $0x18] sm:$0xff]  ;;  %v2934_v63 = vrot.slane %v2929_v48, %v8845_v18  ;;  %v9648_v37 = vpack.c.bf16 %v3145_v42, %v3141_v49  ;;  %v3173_v42 = vld [vmem:[#allocation6 + $0x108] sm:$0xff] }
 0xa79   :  { %v3147_v57 = vld [vmem:[#allocation6 + $0x38] sm:$0xff] }
 0xa7a   :  { %v2618_v46 = vrot.slane %v2610_v9, %v8809_v7  ;;  %v2625_v28 = vrot.slane %v2611_v1, %v8809_v7  ;;  %v3140_v9 = vld [vmem:[#allocation6] sm:$0xff]  ;;  %7265 = vmatprep.subr.bf16.mxu1 %v9648_v37  ;;  %v3171_v49 = vld [vmem:[#allocation6 + $0xf8] sm:$0xff] }
 0xa7b   :  { %v3144_v1 = vld [vmem:[#allocation6 + $0x20] sm:$0xff] }
 0xa7c   :  { %v2626_v59 = vcombine.low %v2618_v46, %v2625_v28  ;;  %v2938_v46 = vrot.slane %v2929_v48, %v8851_v25  ;;  %v9651_v28 = vpack.c.bf16 %v3147_v57, %v3143_v21  ;;  %v3167_v48 = vld [vmem:[#allocation6 + $0xd8] sm:$0xff]  ;;  %v3177_v21 = vld [vmem:[#allocation6 + $0x128] sm:$0xff] }
 0xa7e   :  { %v2633_v3 = vrot.slane %v2626_v59, %v8809_v7  ;;  %v9653_v59 = vpack.c.bf16 %v3144_v1, %v3140_v9  ;;  %7297 = vmatprep.subr.bf16.mxu0 %v9651_v28  ;;  %v9697_v9 = vpack.c.bf16 %v3168_v30, %v3164_v62  ;;  %v3166_v1 = vld [vmem:[#allocation6 + $0xd0] sm:$0xff] }
 0xa7f   :  { %v3186_v62 = vld [vmem:[#allocation6 + $0x170] sm:$0xff] }
 0xa80   :  { %v2635_v31 = vadd.f32 %v6079_v43, %v2633_v3  ;;  %v3148_v43 = vld [vmem:[#allocation6 + $0x40] sm:$0xff] }
 0xa96   :  { %v2766_v47 = vpop.f32.mrb[20].mxu1  ;;  %v2837_v32 = vpop.f32.mrb[22].mxu0 }
 0xa97   :  { %v2768_v40 = vpop.f32.mrb[21].mxu1  ;;  %v2839_v41 = vpop.f32.mrb[23].mxu0 }
 0xa98   :  { %v2846_v14 = vcombine.low %v2766_v47, %v2768_v40  ;;  %v2847_v6 = vcombine.low %v2837_v32, %v2839_v41  ;;  %v3142_v47 = vld [vmem:[#allocation6 + $0x10] sm:$0xff]  ;;  %v3149_v40 = vld [vmem:[#allocation6 + $0x48] sm:$0xff] }
 0xa99   :  { %v3146_v32 = vld [vmem:[#allocation6 + $0x30] sm:$0xff]  ;;  %v3153_v41 = vld [vmem:[#allocation6 + $0x68] sm:$0xff] }
 0xa9a   :  { %v2854_v26 = vrot.slane %v2846_v14, %v8809_v7  ;;  %v2861_v38 = vrot.slane %v2847_v6, %v8809_v7  ;;  %v3151_v14 = vld [vmem:[#allocation6 + $0x58] sm:$0xff] }
 0xa9b   :  { %v3155_v6 = vld [vmem:[#allocation6 + $0x78] sm:$0xff] }
 0xa9c   :  { %v2862_v54 = vcombine.low %v2854_v26, %v2861_v38  ;;  %v9658_v26 = vpack.c.bf16 %v3146_v32, %v3142_v47  ;;  %v9660_v38 = vpack.c.bf16 %v3153_v41, %v3149_v40  ;;  %v9701_v47 = vpack.c.bf16 %v3171_v49, %v3167_v48  ;;  %v3175_v40 = vld [vmem:[#allocation6 + $0x118] sm:$0xff]  ;;  %v3172_v41 = vld [vmem:[#allocation6 + $0x100] sm:$0xff] }
 0xa9d   :  { %v9703_v32 = vpack.c.bf16 %v3177_v21, %v3173_v42  ;;  %v3188_v48 = vld [vmem:[#allocation6 + $0x180] sm:$0xff]  ;;  %v3191_v42 = vld [vmem:[#allocation6 + $0x198] sm:$0xff] }
 0xa9e   :  { %v2869_v29 = vrot.slane %v2862_v54, %v8809_v7  ;;  %v3152_v54 = vld [vmem:[#allocation6 + $0x60] sm:$0xff]  ;;  %v3195_v21 = vld [vmem:[#allocation6 + $0x1b8] sm:$0xff] }
 0xa9f   :  { %v3192_v49 = vld [vmem:[#allocation6 + $0x1a0] sm:$0xff] }
 0xaa0   :  { %v2871_v5 = vadd.f32 %v2869_v29, %v2635_v31  ;;  %v3150_v31 = vld [vmem:[#allocation6 + $0x50] sm:$0xff] }
 0xaa2   :  { %v2872_v44 = vmul.f32 0.5, %v2871_v5  ;;  %v2877_v34 = vrot.slane %v2871_v5, 1  ;;  %v2883_v53 = vrot.slane %v2871_v5, 2  ;;  %v2886_v58 = vrot.slane %v2871_v5, 3 }
 0xaa4   :  { %8023 = vtanh.f32 %v2872_v44  ;;  %v2879_v10 = vmul.f32 0.5, %v2877_v34  ;;  %v2888_v12 = vmul.f32 0.5, %v2886_v58  ;;  %v9664_v44 = vpack.c.bf16 %v3155_v6, %v3151_v14  ;;  %v3161_v58 = vld [vmem:[#allocation6 + $0xa8] sm:$0xff]  ;;  %v3176_v14 = vld [vmem:[#allocation6 + $0x120] sm:$0xff]  ;;  %v3179_v6 = vld [vmem:[#allocation6 + $0x138] sm:$0xff] }
 0xaa5   :  { %v9666_v34 = vpack.c.bf16 %v3152_v54, %v3148_v43  ;;  %v3185_v43 = vld [vmem:[#allocation6 + $0x168] sm:$0xff] }
 0xaa6   :  { %8025 = vtanh.f32 %v2879_v10  ;;  %v3154_v10 = vld [vmem:[#allocation6 + $0x70] sm:$0xff] }
 0xaa7   :  { %8027 = vtanh.f32 %v2883_v53  ;;  %v3157_v53 = vld [vmem:[#allocation6 + $0x88] sm:$0xff] }
 0xaa8   :  { %8029 = vtanh.f32 %v2888_v12 }
 0xaae   :  { %v8024_v55 = vpop.eup %8023 }
 0xaaf   :  { %v2874_v16 = vadd.f32 1.0, %v8024_v55  ;;  %v9671_v55 = vpack.c.bf16 %v3161_v58, %v3157_v53  ;;  %v9714_v53 = vpack.c.bf16 %v3179_v6, %v3175_v40  ;;  %v3190_v40 = vld [vmem:[#allocation6 + $0x190] sm:$0xff]  ;;  %v3197_v6 = vld [vmem:[#allocation6 + $0x1c8] sm:$0xff] }
 0xab0   :  { %v8026_v56 = vpop.eup %8025 }
 0xab1   :  { %v2875_v22 = vmul.f32 0.5, %v2874_v16  ;;  %v2881_v50 = vadd.f32 1.0, %v8026_v56  ;;  %v8028_v0 = vpop.eup %8027  ;;  %v3159_v16 = vld [vmem:[#allocation6 + $0x98] sm:$0xff]  ;;  %11247 = vst [vmem:[#allocation22_spill] sm:$0xff] %v9714_v53 }
 0xab2   :  { %v8030_v60 = vpop.eup %8029  ;;  %v3163_v56 = vld [vmem:[#allocation6 + $0xb8] sm:$0xff] }
 0xab3   :  { %v2882_v39 = vmul.f32 0.5, %v2881_v50  ;;  %v2893_v15 = vmul.f32 %v8028_v0, %v2875_v22  ;;  %v2890_v52 = vadd.f32 1.0, %v8030_v60  ;;  %v3156_v22 = vld [vmem:[#allocation6 + $0x80] sm:$0xff]  ;;  %v9679_v0 = vpack.c.bf16 %v3154_v10, %v3150_v31  ;;  %v3165_v60 = vld [vmem:[#allocation6 + $0xc8] sm:$0xff]  ;;  %v3178_v10 = vld [vmem:[#allocation6 + $0x130] sm:$0xff] }
 0xab4   :  { %v3160_v50 = vld [vmem:[#allocation6 + $0xa0] sm:$0xff]  ;;  %v9710_v31 = vpack.c.bf16 %v3176_v14, %v3172_v41  ;;  %v3194_v41 = vld [vmem:[#allocation6 + $0x1b0] sm:$0xff] }
 0xab5   :  { %v2892_v51 = vmul.f32 %v2882_v39, %v2397_v36  ;;  %v2891_v24 = vmul.f32 0.5, %v2890_v52  ;;  %v3169_v52 = vld [vmem:[#allocation6 + $0xe8] sm:$0xff]  ;;  %v9742_v14 = vpack.c.bf16 %v3194_v41, %v3190_v40  ;;  %v3063_v41 = vld [vmem:[%s10912_s5] sm:$0x1] }
 0xab7   :  { %v9631_v19 = vadd.f32 %v2893_v15, %v2892_v51  ;;  %v9681_v15 = vpack.c.bf16 %v3160_v50, %v3156_v22  ;;  %v3158_v51 = vld [vmem:[#allocation6 + $0x90] sm:$0xff]  ;;  %v3184_v22 = vld [vmem:[#allocation6 + $0x160] sm:$0xff]  ;;  %v3187_v50 = vld [vmem:[#allocation6 + $0x178] sm:$0xff]  ;;  %11252 = vst [vmem:[#allocation27_spill] sm:$0xff] %v9742_v14 }
 0xab9   :  { %8031 = vtanh.f32 %v9631_v19 }
 0xac3   :  { %v8032_v13 = vpop.eup %8031 }
 0xac4   :  { %v2896_v20 = vmul.f32 %v8032_v13, %v2891_v24  ;;  %v9685_v24 = vpack.c.bf16 %v3163_v56, %v3159_v16  ;;  %v3162_v13 = vld [vmem:[#allocation6 + $0xb0] sm:$0xff]  ;;  %v3183_v16 = vld [vmem:[#allocation6 + $0x158] sm:$0xff]  ;;  %v3180_v56 = vld [vmem:[#allocation6 + $0x140] sm:$0xff] }
 0xac5   :  { %v9695_v57 = vpack.c.bf16 %v3162_v13, %v3158_v51  ;;  %v9726_v13 = vpack.c.bf16 %v3187_v50, %v3183_v16  ;;  %v3196_v16 = vld [vmem:[#allocation6 + $0x1c0] sm:$0xff] }
 0xac6   :  { %3006 = vmatmul.mubr.f32.vlgmr.msra.gmra.mrb[22].mxu1 %v2896_v20  ;;  %v9687_v20 = vpack.c.bf16 %v3169_v52, %v3165_v60  ;;  %v9722_v60 = vpack.c.bf16 %v3184_v22, %v3180_v56  ;;  %v3182_v52 = vld [vmem:[#allocation6 + $0x150] sm:$0xff]  ;;  %v3200_v56 = vld [vmem:[#allocation6 + $0x1e0] sm:$0xff] }
 0xac7   :  { %3268 = vmatprep.mubr.f32.mxu1 %v11097_v35  ;;  %7267 = vmatpush1.bf16.msra.mxu1 %v9653_v59  ;;  %11249 = vst [vmem:[#allocation24_spill] sm:$0xff] %v9726_v13  ;;  %v9750_v50 = vpack.c.bf16 %v3200_v56, %v3196_v16  ;;  %v3385_v16 = vld [vmem:[#allocation7 + $0x48] sm:$0xff] }
 0xac8   :  { %7269 = vmatprep.subr.bf16.mxu1 %v9660_v38 }
 0xacb   :  { %7271 = vmatpush1.bf16.msra.mxu1 %v9666_v34 }
 0xacc   :  { %7273 = vmatprep.subr.bf16.mxu1 %v9671_v55 }
 0xacf   :  { %7275 = vmatpush1.bf16.msra.mxu1 %v9681_v15 }
 0xad0   :  { %7277 = vmatprep.subr.bf16.mxu1 %v9687_v20 }
 0xad3   :  { %7279 = vmatpush1.bf16.msra.mxu1 %v9697_v9 }
 0xad4   :  { %7281 = vmatprep.subr.bf16.mxu1 %v9703_v32 }
 0xad7   :  { %7283 = vmatpush1.bf16.msra.mxu1 %v9710_v31 }
 0xb99   :  { %v3007_v3 = vpop.f32.mrb[22].mxu1 }
 0xb9a   :  { %v9662_v29 = vadd.f32 %v3007_v3, %v2934_v63  ;;  %v3009_v5 = vpop.f32.mrb[23].mxu1  ;;  %v3181_v3 = vld [vmem:[#allocation6 + $0x148] sm:$0xff] }
 0xb9b   :  { %v9668_v12 = vadd.f32 %v3009_v5, %v2938_v46  ;;  %v3170_v46 = vld [vmem:[#allocation6 + $0xf0] sm:$0xff]  ;;  %v9716_v58 = vpack.c.bf16 %v3185_v43, %v3181_v3  ;;  %v3201_v3 = vld [vmem:[#allocation6 + $0x1e8] sm:$0xff]  ;;  %v3199_v43 = vld [vmem:[#allocation6 + $0x1d8] sm:$0xff] }
 0xb9c   :  { %3042 = vst [vmem:[#allocation9 + $0x3] sm:$0x1] %v9662_v29  ;;  %6397 = vmatmul.mubr.f32.vlgmr.msra.gmra.mrb[24].mxu0 %v9662_v29  ;;  %v9708_v54 = vpack.c.bf16 %v3170_v46, %v3166_v1  ;;  %v3174_v5 = vld [vmem:[#allocation6 + $0x110] sm:$0xff]  ;;  %v9734_v1 = vpack.c.bf16 %v3192_v49, %v3188_v48  ;;  %v9738_v46 = vpack.c.bf16 %v3195_v21, %v3191_v42  ;;  %v3381_v48 = vld [vmem:[#allocation7 + $0x28] sm:$0xff]  ;;  %v3379_v49 = vld [vmem:[#allocation7 + $0x18] sm:$0xff] }
 0xb9d   :  { %11245 = vst [vmem:[#allocation20_spill] sm:$0xff] %v9668_v12  ;;  %v3017_v36 = vrot.slane %v9668_v12, 6  ;;  %v3013_v39 = vrot.slane %v9668_v12, 7  ;;  %7299 = vmatpush1.bf16.msra.mxu0 %v9658_v26  ;;  %3339 = vmatprep.mubr.f32.mxu0 %v11097_v35  ;;  %v3021_v63 = vrot.slane %v9668_v12, 5  ;;  %v9720_v51 = vpack.c.bf16 %v3178_v10, %v3174_v5  ;;  %v3203_v10 = vld [vmem:[#allocation6 + $0x1f8] sm:$0xff] }
 0xb9e   :  { %7301 = vmatprep.subr.bf16.mxu0 %v9664_v44  ;;  %11246 = vst [vmem:[#allocation21_spill] sm:$0xff] %v9708_v54  ;;  %7285 = vmatprep.subr.bf16.mxu1 %v9716_v58  ;;  %11251 = vst [vmem:[#allocation26_spill] sm:$0xff] %v9738_v46  ;;  %v9746_v5 = vpack.c.bf16 %v3201_v3, %v3197_v6  ;;  %v9748_v22 = vpack.c.bf16 %v3203_v10, %v3199_v43  ;;  %v3383_v21 = vld [vmem:[#allocation7 + $0x38] sm:$0xff]  ;;  %v3376_v6 = vld [vmem:[#allocation7] sm:$0xff] }
 0xb9f   :  { %3018 = vrot.lane.b32.xlu1 %v3017_v36, %s8248_s14  ;;  %3014 = vrot.lane.b32.xlu0 %v3013_v39, %s8247_s27  ;;  %v3189_v36 = vld [vmem:[#allocation6 + $0x188] sm:$0xff]  ;;  %11248 = vst [vmem:[#allocation23_spill] sm:$0xff] %v9720_v51  ;;  %v9760_v40 = vpack.c.bf16 %v3383_v21, %v3379_v49  ;;  %v3380_v3 = vld [vmem:[#allocation7 + $0x20] sm:$0xff]  ;;  %v3378_v43 = vld [vmem:[#allocation7 + $0x10] sm:$0xff] }
 0xba0   :  { %v3193_v39 = vld [vmem:[#allocation6 + $0x1a8] sm:$0xff]  ;;  %7287 = vmatpush1.bf16.msra.mxu1 %v9722_v60  ;;  %11253 = vst [vmem:[#allocation28_spill] sm:$0xff] %v9748_v22  ;;  %v3382_v10 = vld [vmem:[#allocation7 + $0x30] sm:$0xff]  ;;  %v9767_v21 = vpack.c.bf16 %v3380_v3, %v3376_v6  ;;  %v3392_v3 = vld [vmem:[#allocation7 + $0x80] sm:$0xff] }
 0xba1   :  { %7303 = vmatpush1.bf16.msra.mxu0 %v9679_v0  ;;  %v9728_v30 = vpack.c.bf16 %v3193_v39, %v3189_v36  ;;  %v3198_v36 = vld [vmem:[#allocation6 + $0x1d0] sm:$0xff]  ;;  %11255 = vst [vmem:[#allocation30_spill] sm:$0xff] %v9760_v40  ;;  %v9769_v12 = vpack.c.bf16 %v3382_v10, %v3378_v43  ;;  %v3396_v43 = vld [vmem:[#allocation7 + $0xa0] sm:$0xff] }
 0xba2   :  { %7305 = vmatprep.subr.bf16.mxu0 %v9685_v24  ;;  %v3202_v39 = vld [vmem:[#allocation6 + $0x1f0] sm:$0xff] }
 0xba3   :  { %3022 = vrot.lane.b32.xlu1 %v3021_v63, %s8246_s6  ;;  %v9732_v63 = vpack.c.bf16 %v3186_v62, %v3182_v52  ;;  %7289 = vmatprep.subr.bf16.mxu1 %v9728_v30  ;;  %v9753_v52 = vpack.c.bf16 %v3202_v39, %v3198_v36  ;;  %v3377_v62 = vld [vmem:[#allocation7 + $0x8] sm:$0xff]  ;;  %v3387_v39 = vld [vmem:[#allocation7 + $0x58] sm:$0xff] }
 0xba4   :  { %7291 = vmatpush1.bf16.msra.mxu1 %v9734_v1  ;;  %v9758_v42 = vpack.c.bf16 %v3381_v48, %v3377_v62  ;;  %v3389_v36 = vld [vmem:[#allocation7 + $0x68] sm:$0xff]  ;;  %v3391_v62 = vld [vmem:[#allocation7 + $0x78] sm:$0xff] }
 0xba5   :  { %7307 = vmatpush1.bf16.msra.mxu0 %v9695_v57  ;;  %11250 = vst [vmem:[#allocation25_spill] sm:$0xff] %v9732_v63  ;;  %7293 = vmatprep.subr.bf16.mxu1 %v9746_v5  ;;  %11254 = vst [vmem:[#allocation29_spill] sm:$0xff] %v9753_v52 }
 0xba6   :  { %7309 = vmatprep.subr.bf16.mxu0 %v9701_v47 }
 0xba8   :  { %7295 = vmatpush1.bf16.msra.mxu1 %v9750_v50 }
 0xba9   :  { %7311 = vmatpush1.bf16.msra.mxu0 %v9708_v54  ;;  %7329 = vmatprep.subr.bf16.mxu1 %v9758_v42  ;;  %v3399_v54 = vld [vmem:[#allocation7 + $0xb8] sm:$0xff] }
 0xbaa   :  { %7313 = vmatprep.subr.bf16.mxu0 %v9714_v53  ;;  %v3395_v53 = vld [vmem:[#allocation7 + $0x98] sm:$0xff] }
 0xbad   :  { %7315 = vmatpush1.bf16.msra.mxu0 %v9720_v51  ;;  %v3397_v51 = vld [vmem:[#allocation7 + $0xa8] sm:$0xff] }
 0xbae   :  { %7317 = vmatprep.subr.bf16.mxu0 %v9726_v13  ;;  %v3393_v13 = vld [vmem:[#allocation7 + $0x88] sm:$0xff] }
 0xbaf   :  { %v9783_v10 = vpack.c.bf16 %v3397_v51, %v3393_v13 }
 0xbb1   :  { %7319 = vmatpush1.bf16.msra.mxu0 %v9732_v63  ;;  %v3390_v63 = vld [vmem:[#allocation7 + $0x70] sm:$0xff]  ;;  %11259 = vst [vmem:[#allocation34_spill] sm:$0xff] %v9783_v10 }
 0xbb2   :  { %7321 = vmatprep.subr.bf16.mxu0 %v9738_v46  ;;  %v3386_v46 = vld [vmem:[#allocation7 + $0x50] sm:$0xff] }
 0xbb3   :  { %v9779_v6 = vpack.c.bf16 %v3390_v63, %v3386_v46  ;;  %v3402_v46 = vld [vmem:[#allocation7 + $0xd0] sm:$0xff] }
 0xbb5   :  { %7323 = vmatpush1.bf16.msra.mxu0 %v9742_v14  ;;  %v9773_v14 = vpack.c.bf16 %v3391_v62, %v3387_v39  ;;  %11258 = vst [vmem:[#allocation33_spill] sm:$0xff] %v9779_v6  ;;  %v3405_v39 = vld [vmem:[#allocation7 + $0xe8] sm:$0xff]  ;;  %v3403_v62 = vld [vmem:[#allocation7 + $0xd8] sm:$0xff] }
 0xbb6   :  { %7325 = vmatprep.subr.bf16.mxu0 %v9748_v22  ;;  %v9771_v22 = vpack.c.bf16 %v3389_v36, %v3385_v16  ;;  %v9785_v16 = vpack.c.bf16 %v3399_v54, %v3395_v53  ;;  %v3401_v36 = vld [vmem:[#allocation7 + $0xc8] sm:$0xff]  ;;  %v3400_v54 = vld [vmem:[#allocation7 + $0xc0] sm:$0xff] }
 0xbb7   :  { %11256 = vst [vmem:[#allocation31_spill] sm:$0xff] %v9773_v14  ;;  %v3404_v53 = vld [vmem:[#allocation7 + $0xe0] sm:$0xff]  ;;  %v9797_v13 = vpack.c.bf16 %v3405_v39, %v3401_v36 }
 0xbb8   :  { %11260 = vst [vmem:[#allocation35_spill] sm:$0xff] %v9785_v16 }
 0xbb9   :  { %7327 = vmatpush1.bf16.msra.mxu0 %v9753_v52  ;;  %11263 = vst [vmem:[#allocation38_spill] sm:$0xff] %v9797_v13 }
 0xbba   :  { %7361 = vmatprep.subr.bf16.mxu0 %v9760_v40  ;;  %v3388_v40 = vld [vmem:[#allocation7 + $0x60] sm:$0xff] }
 0xc6f   :  { %v3130_v56 = vpop.f32.mrb[24].mxu0 }
 0xc70   :  { %v3131_v48 = vadd.f32 %v3130_v56, %v3063_v41  ;;  %v6398_v49 = vpop.f32.mrb[25].mxu0  ;;  %v9777_v41 = vpack.c.bf16 %v3388_v40, %v3384_v4  ;;  %v3394_v56 = vld [vmem:[#allocation7 + $0x90] sm:$0xff]  ;;  %v9791_v4 = vpack.c.bf16 %v3396_v43, %v3392_v3  ;;  %v9803_v3 = vpack.c.bf16 %v3404_v53, %v3400_v54 }
 0xc71   :  { %v3406_v40 = vld [vmem:[#allocation7 + $0xf0] sm:$0xff]  ;;  %v3409_v49 = vld [vmem:[#allocation7 + $0x108] sm:$0xff] }
 0xc72   :  { %v3134_v52 = vmax.f32 %v3131_v48, 0.0  ;;  %11257 = vst [vmem:[#allocation32_spill] sm:$0xff] %v9777_v41  ;;  %v3407_v48 = vld [vmem:[#allocation7 + $0xf8] sm:$0xff]  ;;  %11261 = vst [vmem:[#allocation36_spill] sm:$0xff] %v9791_v4  ;;  %v9805_v43 = vpack.c.bf16 %v3406_v40, %v3402_v46  ;;  %v3416_v46 = vld [vmem:[#allocation7 + $0x140] sm:$0xff] }
 0xc73   :  { %v9799_v63 = vpack.c.bf16 %v3407_v48, %v3403_v62  ;;  %11265 = vst [vmem:[#allocation40_spill] sm:$0xff] %v9803_v3  ;;  %v3410_v62 = vld [vmem:[#allocation7 + $0x110] sm:$0xff]  ;;  %v3420_v40 = vld [vmem:[#allocation7 + $0x160] sm:$0xff] }
 0xc74   :  { %3269 = vmatmul.mubr.f32.vlgmr.msra.gmra.mrb[24].mxu1 %v3134_v52  ;;  %3340 = vmatmul.mubr.f32.vlgmr.msra.gmra.mrb[26].mxu0 %v3134_v52  ;;  %v3398_v52 = vld [vmem:[#allocation7 + $0xb0] sm:$0xff]  ;;  %11266 = vst [vmem:[#allocation41_spill] sm:$0xff] %v9805_v43 }
 0xc75   :  { %7331 = vmatpush1.bf16.msra.mxu1 %v9767_v21  ;;  %7363 = vmatpush1.bf16.msra.mxu0 %v9769_v12  ;;  %v9793_v51 = vpack.c.bf16 %v3398_v52, %v3394_v56  ;;  %11264 = vst [vmem:[#allocation39_spill] sm:$0xff] %v9799_v63  ;;  %v3408_v56 = vld [vmem:[#allocation7 + $0x100] sm:$0xff]  ;;  %v3414_v48 = vld [vmem:[#allocation7 + $0x130] sm:$0xff] }
 0xc76   :  { %7333 = vmatprep.subr.bf16.mxu1 %v9771_v22  ;;  %7365 = vmatprep.subr.bf16.mxu0 %v9773_v14  ;;  %v3411_v14 = vld [vmem:[#allocation7 + $0x118] sm:$0xff]  ;;  %v3412_v52 = vld [vmem:[#allocation7 + $0x120] sm:$0xff]  ;;  %v9817_v53 = vpack.c.bf16 %v3414_v48, %v3410_v62  ;;  %v3426_v62 = vld [vmem:[#allocation7 + $0x190] sm:$0xff] }
 0xc77   :  { %3504 = vmatprep.mubr.f32.mxu1 %v11097_v35  ;;  %3575 = vmatprep.mubr.f32.mxu0 %v11097_v35  ;;  %11262 = vst [vmem:[#allocation37_spill] sm:$0xff] %v9793_v51  ;;  %v9815_v54 = vpack.c.bf16 %v3412_v52, %v3408_v56  ;;  %v9829_v56 = vpack.c.bf16 %v3420_v40, %v3416_v46  ;;  %v3430_v48 = vld [vmem:[#allocation7 + $0x1b0] sm:$0xff]  ;;  %v3439_v46 = vld [vmem:[#allocation7 + $0x1f8] sm:$0xff] }
 0xc78   :  { %11269 = vst [vmem:[#allocation44_spill] sm:$0xff] %v9817_v53 }
 0xc79   :  { %7335 = vmatpush1.bf16.msra.mxu1 %v9777_v41  ;;  %7367 = vmatpush1.bf16.msra.mxu0 %v9779_v6  ;;  %v3413_v41 = vld [vmem:[#allocation7 + $0x128] sm:$0xff]  ;;  %v3415_v6 = vld [vmem:[#allocation7 + $0x138] sm:$0xff]  ;;  %11268 = vst [vmem:[#allocation43_spill] sm:$0xff] %v9815_v54 }
 0xc7a   :  { %7337 = vmatprep.subr.bf16.mxu1 %v9783_v10  ;;  %7369 = vmatprep.subr.bf16.mxu0 %v9785_v16  ;;  %v9809_v36 = vpack.c.bf16 %v3413_v41, %v3409_v49  ;;  %v9811_v39 = vpack.c.bf16 %v3415_v6, %v3411_v14  ;;  %v3417_v16 = vld [vmem:[#allocation7 + $0x148] sm:$0xff]  ;;  %v3419_v10 = vld [vmem:[#allocation7 + $0x158] sm:$0xff]  ;;  %v3418_v6 = vld [vmem:[#allocation7 + $0x150] sm:$0xff] }
 0xc7b   :  { %v3422_v49 = vld [vmem:[#allocation7 + $0x170] sm:$0xff] }
 0xc7c   :  { %11267 = vst [vmem:[#allocation42_spill] sm:$0xff] %v9811_v39  ;;  %v9831_v52 = vpack.c.bf16 %v3422_v49, %v3418_v6  ;;  %v9843_v6 = vpack.c.bf16 %v3430_v48, %v3426_v62  ;;  %v3432_v49 = vld [vmem:[#allocation7 + $0x1c0] sm:$0xff]  ;;  %v3646_v62 = vld [vmem:[%s10915_s8 + $0x48] sm:$0xff]  ;;  %v3648_v48 = vld [vmem:[%s10915_s8 + $0x58] sm:$0xff] }
 0xc7d   :  { %7339 = vmatpush1.bf16.msra.mxu1 %v9791_v4  ;;  %7371 = vmatpush1.bf16.msra.mxu0 %v9793_v51  ;;  %v3421_v4 = vld [vmem:[#allocation7 + $0x168] sm:$0xff]  ;;  %v3423_v51 = vld [vmem:[#allocation7 + $0x178] sm:$0xff] }
 0xc7e   :  { %7341 = vmatprep.subr.bf16.mxu1 %v9797_v13  ;;  %7373 = vmatprep.subr.bf16.mxu0 %v9799_v63  ;;  %v9821_v14 = vpack.c.bf16 %v3421_v4, %v3417_v16  ;;  %v9823_v41 = vpack.c.bf16 %v3423_v51, %v3419_v10  ;;  %v3425_v63 = vld [vmem:[#allocation7 + $0x188] sm:$0xff]  ;;  %v3427_v13 = vld [vmem:[#allocation7 + $0x198] sm:$0xff]  ;;  %v3424_v16 = vld [vmem:[#allocation7 + $0x180] sm:$0xff] }
 0xc7f   :  { %v3428_v4 = vld [vmem:[#allocation7 + $0x1a0] sm:$0xff] }
 0xc80   :  { %11270 = vst [vmem:[#allocation45_spill] sm:$0xff] %v9823_v41  ;;  %v9841_v40 = vpack.c.bf16 %v3428_v4, %v3424_v16 }
 0xc81   :  { %7343 = vmatpush1.bf16.msra.mxu1 %v9803_v3  ;;  %7375 = vmatpush1.bf16.msra.mxu0 %v9805_v43  ;;  %v3429_v3 = vld [vmem:[#allocation7 + $0x1a8] sm:$0xff]  ;;  %v3431_v43 = vld [vmem:[#allocation7 + $0x1b8] sm:$0xff] }
 0xc82   :  { %7345 = vmatprep.subr.bf16.mxu1 %v9809_v36  ;;  %7377 = vmatprep.subr.bf16.mxu0 %v9811_v39  ;;  %v9835_v10 = vpack.c.bf16 %v3429_v3, %v3425_v63  ;;  %v9837_v51 = vpack.c.bf16 %v3431_v43, %v3427_v13  ;;  %v3433_v39 = vld [vmem:[#allocation7 + $0x1c8] sm:$0xff]  ;;  %v3436_v3 = vld [vmem:[#allocation7 + $0x1e0] sm:$0xff]  ;;  %v3434_v43 = vld [vmem:[#allocation7 + $0x1d0] sm:$0xff] }
 0xc83   :  { %v9854_v16 = vpack.c.bf16 %v3436_v3, %v3432_v49  ;;  %v3645_v49 = vld [vmem:[%s10915_s8 + $0x40] sm:$0xff]  ;;  %v3647_v3 = vld [vmem:[%s10915_s8 + $0x50] sm:$0xff] }
 0xc85   :  { %7347 = vmatpush1.bf16.msra.mxu1 %v9815_v54  ;;  %7379 = vmatpush1.bf16.msra.mxu0 %v9817_v53  ;;  %v3437_v54 = vld [vmem:[#allocation7 + $0x1e8] sm:$0xff]  ;;  %v3435_v53 = vld [vmem:[#allocation7 + $0x1d8] sm:$0xff] }
 0xc86   :  { %7349 = vmatprep.subr.bf16.mxu1 %v9821_v14  ;;  %7381 = vmatprep.subr.bf16.mxu0 %v9823_v41  ;;  %v9847_v13 = vpack.c.bf16 %v3437_v54, %v3433_v39  ;;  %v9849_v63 = vpack.c.bf16 %v3439_v46, %v3435_v53  ;;  %v3438_v41 = vld [vmem:[#allocation7 + $0x1f0] sm:$0xff]  ;;  %v9860_v39 = vstv %s3046_s28  ;;  %v9928_v46 = vpack.c.bf16 %v3648_v48, %v3646_v62 }
 0xc87   :  { %v9856_v4 = vpack.c.bf16 %v3438_v41, %v3434_v43  ;;  %v3136_v54 = vmul.f32 %v9860_v39, %v9662_v29  ;;  %v3641_v29 = vld [vmem:[%s10915_s8 + $0x20] sm:$0xff]  ;;  %v3643_v53 = vld [vmem:[%s10915_s8 + $0x30] sm:$0xff]  ;;  %v9936_v43 = vpack.c.bf16 %v3647_v3, %v3645_v49  ;;  %v3658_v49 = vld [vmem:[%s10915_s8 + $0xa8] sm:$0xff] }
 0xc88   :  { %v9918_v41 = vpack.c.bf16 %v3643_v53, %v3641_v29  ;;  %11274 = vst [vmem:[#allocation49_spill] sm:$0xff] %v9928_v46  ;;  %v3656_v29 = vld [vmem:[%s10915_s8 + $0x98] sm:$0xff]  ;;  %v3653_v53 = vld [vmem:[%s10915_s8 + $0x80] sm:$0xff]  ;;  %v3655_v48 = vld [vmem:[%s10915_s8 + $0x90] sm:$0xff] }
 0xc89   :  { %7351 = vmatpush1.bf16.msra.mxu1 %v9829_v56  ;;  %7383 = vmatpush1.bf16.msra.mxu0 %v9831_v52  ;;  %11275 = vst [vmem:[#allocation50_spill] sm:$0xff] %v9936_v43  ;;  %v3660_v3 = vld [vmem:[%s10915_s8 + $0xb8] sm:$0xff] }
 0xc8a   :  { %7353 = vmatprep.subr.bf16.mxu1 %v9835_v10  ;;  %7385 = vmatprep.subr.bf16.mxu0 %v9837_v51  ;;  %11273 = vst [vmem:[#allocation48_spill] sm:$0xff] %v9918_v41 }
 0xc8d   :  { %7355 = vmatpush1.bf16.msra.mxu1 %v9841_v40  ;;  %7387 = vmatpush1.bf16.msra.mxu0 %v9843_v6 }
 0xc8e   :  { %7357 = vmatprep.subr.bf16.mxu1 %v9847_v13  ;;  %7389 = vmatprep.subr.bf16.mxu0 %v9849_v63 }
 0xc91   :  { %7359 = vmatpush1.bf16.msra.mxu1 %v9854_v16  ;;  %7391 = vmatpush1.bf16.msra.mxu0 %v9856_v4 }
 0xc92   :  { %7424 = vmatprep.subr.bf16.mxu0 %v11147_v11 }
 0xc94   :  { %3505 = vmatmul.mubr.f32.vlgmr.msra.gmra.mrb[26].mxu1 %v3136_v54  ;;  %3576 = vmatmul.mubr.f32.vlgmr.msra.gmra.mrb[28].mxu0 %v3136_v54  ;;  %v3650_v54 = vld [vmem:[%s10915_s8 + $0x68] sm:$0xff] }
 0xc95   :  { %3745 = vmatprep.mubr.f32.mxu1 %v11097_v35  ;;  %7426 = vmatpush3.bf16.msra.mxu0 %v9559_v8  ;;  %v3638_v8 = vld [vmem:[%s10915_s8 + $0x8] sm:$0xff] }
 0xc96   :  { %7427 = vmatprep.subr.bf16.mxu0 %v11147_v11  ;;  %6431 = vmatprep.mubr.msk.f32.mxu0 %vm8243_vm0, %v11097_v35 }
 0xc99   :  { %7429 = vmatpush3.bf16.msra.mxu0 %v9565_v17  ;;  %v3640_v17 = vld [vmem:[%s10915_s8 + $0x18] sm:$0xff] }
 0xc9a   :  { %7430 = vmatprep.subr.bf16.mxu0 %v11147_v11 }
 0xc9d   :  { %7432 = vmatpush3.bf16.msra.mxu0 %v9575_v45  ;;  %v9892_v45 = vpack.c.bf16 %v3640_v17, %v3638_v8  ;;  %v3652_v8 = vld [vmem:[%s10915_s8 + $0x78] sm:$0xff] }
 0xc9e   :  { %7433 = vmatprep.subr.bf16.mxu0 %v11147_v11  ;;  %v9946_v17 = vpack.c.bf16 %v3652_v8, %v3650_v54  ;;  %v9978_v54 = vpack.c.bf16 %v3655_v48, %v3653_v53  ;;  %v9980_v8 = vpack.c.bf16 %v3660_v3, %v3658_v49  ;;  %v3661_v49 = vld [vmem:[%s10915_s8 + $0xc0] sm:$0xff]  ;;  %v3663_v3 = vld [vmem:[%s10915_s8 + $0xd0] sm:$0xff] }
 0xc9f   :  { %7393 = vmatprep.subr.bf16.mxu1 %v9892_v45 }
 0xca0   :  { %11276 = vst [vmem:[#allocation51_spill] sm:$0xff] %v9946_v17  ;;  %11279 = vst [vmem:[#allocation54_spill] sm:$0xff] %v9978_v54 }
 0xca1   :  { %7435 = vmatpush3.bf16.msra.mxu0 %v9585_v61  ;;  %v3637_v61 = vld [vmem:[%s10915_s8] sm:$0xff]  ;;  %11280 = vst [vmem:[#allocation55_spill] sm:$0xff] %v9980_v8 }
 0xca2   :  { %7436 = vmatprep.subr.bf16.mxu0 %v11147_v11 }
 0xca5   :  { %7438 = vmatpush3.bf16.msra.mxu0 %v9595_v33  ;;  %v3639_v33 = vld [vmem:[%s10915_s8 + $0x10] sm:$0xff] }
 0xca6   :  { %7439 = vmatprep.subr.bf16.mxu0 %v11147_v11 }
 0xca9   :  { %7441 = vmatpush3.bf16.msra.mxu0 %v9605_v27  ;;  %v9900_v27 = vpack.c.bf16 %v3639_v33, %v3637_v61  ;;  %v3649_v61 = vld [vmem:[%s10915_s8 + $0x60] sm:$0xff]  ;;  %v3651_v33 = vld [vmem:[%s10915_s8 + $0x70] sm:$0xff] }
 0xcaa   :  { %7442 = vmatprep.subr.bf16.mxu0 %v11147_v11 }
 0xcab   :  { %11271 = vst [vmem:[#allocation46_spill] sm:$0xff] %v9900_v27  ;;  %7395 = vmatpush1.bf16.msra.mxu1 %v9900_v27 }
 0xcad   :  { %7444 = vmatpush3.bf16.msra.mxu0 %v9615_v23  ;;  %v3642_v23 = vld [vmem:[%s10915_s8 + $0x28] sm:$0xff] }
 0xcae   :  { %7445 = vmatprep.subr.bf16.mxu0 %v11147_v11 }
 0xcb1   :  { %7447 = vmatpush3.bf16.msra.mxu0 %v9641_v2  ;;  %v3644_v2 = vld [vmem:[%s10915_s8 + $0x38] sm:$0xff] }
 0xcb2   :  { %7481 = vmatprep.subr.bf16.mxu0 %v9651_v28  ;;  %v9910_v28 = vpack.c.bf16 %v3644_v2, %v3642_v23  ;;  %v9954_v23 = vpack.c.bf16 %v3651_v33, %v3649_v61  ;;  %v3654_v2 = vld [vmem:[%s10915_s8 + $0x88] sm:$0xff]  ;;  %v3657_v61 = vld [vmem:[%s10915_s8 + $0xa0] sm:$0xff]  ;;  %v3659_v33 = vld [vmem:[%s10915_s8 + $0xb0] sm:$0xff] }
 0xcb3   :  { %v9967_v62 = vpack.c.bf16 %v3656_v29, %v3654_v2  ;;  %v3662_v2 = vld [vmem:[%s10915_s8 + $0xc8] sm:$0xff]  ;;  %v3664_v29 = vld [vmem:[%s10915_s8 + $0xd8] sm:$0xff]  ;;  %v9996_v53 = vpack.c.bf16 %v3659_v33, %v3657_v61  ;;  %v10014_v33 = vpack.c.bf16 %v3663_v3, %v3661_v49 }
 0xcb4   :  { %11272 = vst [vmem:[#allocation47_spill] sm:$0xff] %v9910_v28  ;;  %7397 = vmatprep.subr.bf16.mxu1 %v9910_v28  ;;  %11277 = vst [vmem:[#allocation52_spill] sm:$0xff] %v9954_v23  ;;  %v9999_v48 = vpack.c.bf16 %v3664_v29, %v3662_v2  ;;  %v3668_v61 = vld [vmem:[%s10915_s8 + $0xf8] sm:$0xff]  ;;  %v3665_v29 = vld [vmem:[%s10915_s8 + $0xe0] sm:$0xff] }
 0xcb5   :  { %7399 = vmatpush1.bf16.msra.mxu1 %v9918_v41  ;;  %11278 = vst [vmem:[#allocation53_spill] sm:$0xff] %v9967_v62  ;;  %11281 = vst [vmem:[#allocation56_spill] sm:$0xff] %v9996_v53 }
 0xcb6   :  { %7401 = vmatprep.subr.bf16.mxu1 %v9928_v46  ;;  %11282 = vst [vmem:[#allocation57_spill] sm:$0xff] %v9999_v48  ;;  %11283 = vst [vmem:[#allocation58_spill] sm:$0xff] %v10014_v33 }
 0xcb9   :  { %7403 = vmatpush1.bf16.msra.mxu1 %v9936_v43 }
 0xcba   :  { %7405 = vmatprep.subr.bf16.mxu1 %v9946_v17 }
 0xcbd   :  { %7407 = vmatpush1.bf16.msra.mxu1 %v9954_v23 }
 0xcbe   :  { %7409 = vmatprep.subr.bf16.mxu1 %v9967_v62  ;;  %v3666_v62 = vld [vmem:[%s10915_s8 + $0xe8] sm:$0xff] }
 0xcbf   :  { %v10017_v2 = vpack.c.bf16 %v3668_v61, %v3666_v62 }
 0xcc1   :  { %7411 = vmatpush1.bf16.msra.mxu1 %v9978_v54  ;;  %11284 = vst [vmem:[#allocation59_spill] sm:$0xff] %v10017_v2 }
 0xcc2   :  { %7413 = vmatprep.subr.bf16.mxu1 %v9980_v8  ;;  %v3667_v8 = vld [vmem:[%s10915_s8 + $0xf0] sm:$0xff] }
 0xcc3   :  { %v10026_v54 = vpack.c.bf16 %v3667_v8, %v3665_v29 }
 0xcc5   :  { %7415 = vmatpush1.bf16.msra.mxu1 %v9996_v53  ;;  %11285 = vst [vmem:[#allocation61_spill] sm:$0xff] %v10026_v54 }
 0xcc6   :  { %7417 = vmatprep.subr.bf16.mxu1 %v9999_v48 }
 0xcc9   :  { %7419 = vmatpush1.bf16.msra.mxu1 %v10014_v33 }
 0xcca   :  { %7421 = vmatprep.subr.bf16.mxu1 %v10017_v2 }
 0xccd   :  { %7423 = vmatpush1.bf16.msra.mxu1 %v10026_v54 }
 0xcce   :  { %7449 = vmatprep.subr.bf16.mxu1 %v9648_v37 }
 0xd47   :  { %v3270_v62 = vpop.f32.mrb[24].mxu1  ;;  %v3341_v49 = vpop.f32.mrb[26].mxu0 }
 0xd48   :  { %v3272_v3 = vpop.f32.mrb[25].mxu1  ;;  %v3343_v61 = vpop.f32.mrb[27].mxu0 }
 0xd49   :  { %v3350_v48 = vcombine.low %v3270_v62, %v3272_v3  ;;  %v3351_v53 = vcombine.low %v3341_v49, %v3343_v61  ;;  %v6081_v62 = vld [vmem:[%s10908_s1 + $0x4] ss:$8 sm:$0xf] }
 0xd4b   :  { %v3358_v23 = vrot.slane %v3350_v48, %v8809_v7  ;;  %v3365_v17 = vrot.slane %v3351_v53, %v8809_v7 }
 0xd4d   :  { %v3366_v43 = vcombine.low %v3358_v23, %v3365_v17 }
 0xd4f   :  { %v3373_v54 = vrot.slane %v3366_v43, %v8809_v7 }
 0xd51   :  { %v3375_v49 = vadd.f32 %v6081_v62, %v3373_v54 }
 0xd67   :  { %v3506_v33 = vpop.f32.mrb[26].mxu1  ;;  %v3577_v8 = vpop.f32.mrb[28].mxu0 }
 0xd68   :  { %v3508_v29 = vpop.f32.mrb[27].mxu1  ;;  %v3579_v46 = vpop.f32.mrb[29].mxu0 }
 0xd69   :  { %v3586_v2 = vcombine.low %v3506_v33, %v3508_v29  ;;  %v3587_v41 = vcombine.low %v3577_v8, %v3579_v46 }
 0xd6b   :  { %v3594_v37 = vrot.slane %v3586_v2, %v8809_v7  ;;  %v3601_v28 = vrot.slane %v3587_v41, %v8809_v7 }
 0xd6d   :  { %v3602_v48 = vcombine.low %v3594_v37, %v3601_v28  ;;  %v3137_v28 = vmul.f32 %v9860_v39, %v9631_v19  ;;  %v3669_v19 = vld [vmem:[%s10916_s9] sm:$0x3] }
 0xd6f   :  { %v3609_v17 = vrot.slane %v3602_v48, %v8809_v7 }
 0xd71   :  { %v3611_v23 = vadd.f32 %v3609_v17, %v3375_v49 }
 0xd73   :  { %v3612_v53 = vmul.f32 0.5, %v3611_v23  ;;  %v3617_v3 = vrot.slane %v3611_v23, 1  ;;  %v3623_v46 = vrot.slane %v3611_v23, 2  ;;  %v3626_v43 = vrot.slane %v3611_v23, 3 }
 0xd75   :  { %8033 = vtanh.f32 %v3612_v53  ;;  %v3619_v33 = vmul.f32 0.5, %v3617_v3  ;;  %v3628_v2 = vmul.f32 0.5, %v3626_v43  ;;  %v11298_v43 = vld [vmem:[#allocation32_spill] sm:$0xff] }
 0xd77   :  { %8035 = vtanh.f32 %v3619_v33 }
 0xd78   :  { %8037 = vtanh.f32 %v3623_v46  ;;  %v11297_v46 = vld [vmem:[#allocation31_spill] sm:$0xff] }
 0xd79   :  { %8039 = vtanh.f32 %v3628_v2  ;;  %v11299_v2 = vld [vmem:[#allocation33_spill] sm:$0xff] }
 0xd7f   :  { %v8034_v61 = vpop.eup %8033 }
 0xd80   :  { %v3614_v41 = vadd.f32 1.0, %v8034_v61  ;;  %v11300_v61 = vld [vmem:[#allocation34_spill] sm:$0xff] }
 0xd81   :  { %v8036_v8 = vpop.eup %8035 }
 0xd82   :  { %v3615_v29 = vmul.f32 0.5, %v3614_v41  ;;  %v3621_v27 = vadd.f32 1.0, %v8036_v8  ;;  %v8038_v37 = vpop.eup %8037  ;;  %v11301_v41 = vld [vmem:[#allocation35_spill] sm:$0xff]  ;;  %v11302_v8 = vld [vmem:[#allocation36_spill] sm:$0xff] }
 0xd83   :  { %v8040_v17 = vpop.eup %8039 }
 0xd84   :  { %v3622_v54 = vmul.f32 0.5, %v3621_v27  ;;  %v3633_v62 = vmul.f32 %v8038_v37, %v3615_v29  ;;  %v3630_v23 = vadd.f32 1.0, %v8040_v17  ;;  %v11306_v29 = vld [vmem:[#allocation40_spill] sm:$0xff]  ;;  %v11309_v37 = vld [vmem:[#allocation43_spill] sm:$0xff]  ;;  %v11323_v17 = vld [vmem:[#allocation57_spill] sm:$0xff] }
 0xd86   :  { %v3632_v48 = vmul.f32 %v3622_v54, %v3137_v28  ;;  %v3631_v53 = vmul.f32 0.5, %v3630_v23  ;;  %v11307_v28 = vld [vmem:[#allocation41_spill] sm:$0xff]  ;;  %v11308_v54 = vld [vmem:[#allocation42_spill] sm:$0xff] }
 0xd87   :  { %v11324_v23 = vld [vmem:[#allocation58_spill] sm:$0xff] }
 0xd88   :  { %v10042_v49 = vadd.f32 %v3633_v62, %v3632_v48  ;;  %v11310_v62 = vld [vmem:[#allocation44_spill] sm:$0xff]  ;;  %v11311_v48 = vld [vmem:[#allocation45_spill] sm:$0xff] }
 0xd8a   :  { %8041 = vtanh.f32 %v10042_v49 }
 0xd94   :  { %v8042_v3 = vpop.eup %8041 }
 0xd95   :  { %v3636_v33 = vmul.f32 %v8042_v3, %v3631_v53  ;;  %v11325_v53 = vld [vmem:[#allocation59_spill] sm:$0xff]  ;;  %v11326_v3 = vld [vmem:[#allocation61_spill] sm:$0xff] }
 0xd97   :  { %3746 = vmatmul.mubr.f32.vlgmr.msra.gmra.mrb[28].mxu1 %v3636_v33  ;;  %v4527_v33 = vld [vmem:[%s10911_s4] sm:$0xff] }
 0xd98   :  { %7451 = vmatpush1.bf16.msra.mxu1 %v9653_v59  ;;  %4008 = vmatprep.mubr.f32.mxu1 %v11097_v35  ;;  %v3674_v59 = vrot.slane %v3669_v19, %v8845_v18 }
 0xd99   :  { %7453 = vmatprep.subr.bf16.mxu1 %v9660_v38  ;;  %v3678_v38 = vrot.slane %v3669_v19, %v8851_v25  ;;  %v4528_v19 = vld [vmem:[%s10911_s4 + $0x8] sm:$0xff] }
 0xd9c   :  { %7455 = vmatpush1.bf16.msra.mxu1 %v9666_v34 }
 0xd9d   :  { %7457 = vmatprep.subr.bf16.mxu1 %v9671_v55 }
 0xda0   :  { %7459 = vmatpush1.bf16.msra.mxu1 %v9681_v15 }
 0xda1   :  { %7461 = vmatprep.subr.bf16.mxu1 %v9687_v20 }
 0xda4   :  { %7463 = vmatpush1.bf16.msra.mxu1 %v9697_v9 }
 0xda5   :  { %7465 = vmatprep.subr.bf16.mxu1 %v9703_v32 }
 0xda8   :  { %7467 = vmatpush1.bf16.msra.mxu1 %v9710_v31 }
 0xda9   :  { %7469 = vmatprep.subr.bf16.mxu1 %v9716_v58  ;;  %v11289_v58 = vld [vmem:[#allocation23_spill] sm:$0xff] }
 0xdac   :  { %7471 = vmatpush1.bf16.msra.mxu1 %v9722_v60  ;;  %v11290_v60 = vld [vmem:[#allocation24_spill] sm:$0xff] }
 0xdad   :  { %7473 = vmatprep.subr.bf16.mxu1 %v9728_v30  ;;  %v11293_v30 = vld [vmem:[#allocation27_spill] sm:$0xff] }
 0xdb0   :  { %7475 = vmatpush1.bf16.msra.mxu1 %v9734_v1  ;;  %v11294_v1 = vld [vmem:[#allocation28_spill] sm:$0xff] }
 0xdb1   :  { %7477 = vmatprep.subr.bf16.mxu1 %v9746_v5  ;;  %v3803_v5 = vld [vmem:[%s10912_s5] sm:$0x1] }
 0xdb4   :  { %7479 = vmatpush1.bf16.msra.mxu1 %v9750_v50 }
 0xdb5   :  { %7513 = vmatprep.subr.bf16.mxu1 %v9758_v42 }
 0xe6a   :  { %v3747_v34 = vpop.f32.mrb[28].mxu1 }
 0xe6b   :  { %v10067_v55 = vadd.f32 %v3747_v34, %v3674_v59  ;;  %v3749_v15 = vpop.f32.mrb[29].mxu1  ;;  %v4529_v59 = vld [vmem:[%s10911_s4 + $0x10] sm:$0xff]  ;;  %v4530_v34 = vld [vmem:[%s10911_s4 + $0x18] sm:$0xff] }
 0xe6c   :  { %v10069_v20 = vadd.f32 %v3749_v15, %v3678_v38  ;;  %v10164_v38 = vpack.c.bf16 %v4528_v19, %v4527_v33  ;;  %v4531_v15 = vld [vmem:[%s10911_s4 + $0x20] sm:$0xff] }
 0xe6d   :  { %3782 = vst [vmem:[#allocation9 + $0x4] sm:$0x1] %v10067_v55  ;;  %6432 = vmatmul.mubr.f32.vlgmr.msra.gmra.mrb[30].mxu0 %v10067_v55 }
 0xe6e   :  { %11286 = vst [vmem:[#allocation62_spill] sm:$0xff] %v10069_v20  ;;  %v3753_v9 = vrot.slane %v10069_v20, 7  ;;  %7483 = vmatpush1.bf16.msra.mxu0 %v9658_v26  ;;  %4079 = vmatprep.mubr.f32.mxu0 %v11097_v35  ;;  %v3757_v32 = vrot.slane %v10069_v20, 6  ;;  %v3761_v31 = vrot.slane %v10069_v20, 5  ;;  %v11287_v26 = vld [vmem:[#allocation21_spill] sm:$0xff] }
 0xe6f   :  { %7485 = vmatprep.subr.bf16.mxu0 %v9664_v44  ;;  %v11288_v44 = vld [vmem:[#allocation22_spill] sm:$0xff]  ;;  %v4864_v20 = vld [vmem:[#allocation7 + $0x40] sm:$0xff] }
 0xe70   :  { %3754 = vrot.lane.b32.xlu0 %v3753_v9, %s8247_s27  ;;  %v4532_v9 = vld [vmem:[%s10911_s4 + $0x28] sm:$0xff] }
 0xe72   :  { %7487 = vmatpush1.bf16.msra.mxu0 %v9679_v0  ;;  %v11291_v0 = vld [vmem:[#allocation25_spill] sm:$0xff] }
 0xe73   :  { %7489 = vmatprep.subr.bf16.mxu0 %v9685_v24  ;;  %v11292_v24 = vld [vmem:[#allocation26_spill] sm:$0xff] }
 0xe74   :  { %3758 = vrot.lane.b32.xlu0 %v3757_v32, %s8248_s14  ;;  %v10180_v32 = vpack.c.bf16 %v4532_v9, %v4531_v15 }
 0xe76   :  { %7491 = vmatpush1.bf16.msra.mxu0 %v9695_v57  ;;  %v11295_v57 = vld [vmem:[#allocation29_spill] sm:$0xff] }
 0xe77   :  { %7493 = vmatprep.subr.bf16.mxu0 %v9701_v47  ;;  %v11296_v47 = vld [vmem:[#allocation30_spill] sm:$0xff] }
 0xe78   :  { %3762 = vrot.lane.b32.xlu0 %v3761_v31, %s8246_s6  ;;  %v4533_v31 = vld [vmem:[%s10911_s4 + $0x30] sm:$0xff] }
 0xe7a   :  { %7495 = vmatpush1.bf16.msra.mxu0 %v11287_v26  ;;  %v4534_v26 = vld [vmem:[%s10911_s4 + $0x38] sm:$0xff] }
 0xe7b   :  { %7497 = vmatprep.subr.bf16.mxu0 %v11288_v44  ;;  %v10190_v44 = vpack.c.bf16 %v4534_v26, %v4533_v31 }
 0xe7e   :  { %7499 = vmatpush1.bf16.msra.mxu0 %v11289_v58  ;;  %v4535_v58 = vld [vmem:[%s10911_s4 + $0x40] sm:$0xff] }
 0xe7f   :  { %7501 = vmatprep.subr.bf16.mxu0 %v11290_v60  ;;  %v4536_v60 = vld [vmem:[%s10911_s4 + $0x48] sm:$0xff] }
 0xe82   :  { %7503 = vmatpush1.bf16.msra.mxu0 %v11291_v0  ;;  %v10200_v0 = vpack.c.bf16 %v4536_v60, %v4535_v58 }
 0xe83   :  { %7505 = vmatprep.subr.bf16.mxu0 %v11292_v24  ;;  %v4537_v24 = vld [vmem:[%s10911_s4 + $0x50] sm:$0xff] }
 0xe86   :  { %7507 = vmatpush1.bf16.msra.mxu0 %v11293_v30  ;;  %v4538_v30 = vld [vmem:[%s10911_s4 + $0x58] sm:$0xff] }
 0xe87   :  { %7509 = vmatprep.subr.bf16.mxu0 %v11294_v1  ;;  %v10210_v1 = vpack.c.bf16 %v4538_v30, %v4537_v24  ;;  %v4409_v30 = vld [vmem:[%s10916_s9] sm:$0x3] }
 0xe8a   :  { %7511 = vmatpush1.bf16.msra.mxu0 %v11295_v57  ;;  %v4539_v57 = vld [vmem:[%s10911_s4 + $0x60] sm:$0xff] }
 0xe8b   :  { %7545 = vmatprep.subr.bf16.mxu0 %v11296_v47  ;;  %v4540_v47 = vld [vmem:[%s10911_s4 + $0x68] sm:$0xff] }
 0xf40   :  { %v3870_v50 = vpop.f32.mrb[30].mxu0 }
 0xf41   :  { %v3871_v42 = vadd.f32 %v3870_v50, %v3803_v5  ;;  %v6433_v39 = vpop.f32.mrb[31].mxu0  ;;  %v10220_v5 = vpack.c.bf16 %v4540_v47, %v4539_v57  ;;  %v4414_v57 = vrot.slane %v4409_v30, %v8845_v18  ;;  %v4621_v47 = vld [vmem:[#allocation6 + $0x8] sm:$0xff] }
 0xf43   :  { %v3874_v27 = vmax.f32 %v3871_v42, 0.0 }
 0xf45   :  { %4009 = vmatmul.mubr.f32.vlgmr.msra.gmra.mrb[30].mxu1 %v3874_v27  ;;  %4080 = vmatmul.mubr.f32.vlgmr.msra.gmra.mrb[32].mxu0 %v3874_v27 }
 0xf46   :  { %7515 = vmatpush1.bf16.msra.mxu1 %v9767_v21  ;;  %7547 = vmatpush1.bf16.msra.mxu0 %v9769_v12  ;;  %v11303_v21 = vld [vmem:[#allocation37_spill] sm:$0xff]  ;;  %v11304_v12 = vld [vmem:[#allocation38_spill] sm:$0xff] }
 0xf47   :  { %7517 = vmatprep.subr.bf16.mxu1 %v9771_v22  ;;  %7549 = vmatprep.subr.bf16.mxu0 %v11297_v46  ;;  %v11305_v22 = vld [vmem:[#allocation39_spill] sm:$0xff] }
 0xf48   :  { %4244 = vmatprep.mubr.f32.mxu1 %v11097_v35  ;;  %4315 = vmatprep.mubr.f32.mxu0 %v11097_v35 }
 0xf4a   :  { %7519 = vmatpush1.bf16.msra.mxu1 %v11298_v43  ;;  %7551 = vmatpush1.bf16.msra.mxu0 %v11299_v2 }
 0xf4b   :  { %7521 = vmatprep.subr.bf16.mxu1 %v11300_v61  ;;  %7553 = vmatprep.subr.bf16.mxu0 %v11301_v41 }
 0xf4e   :  { %7523 = vmatpush1.bf16.msra.mxu1 %v11302_v8  ;;  %7555 = vmatpush1.bf16.msra.mxu0 %v11303_v21 }
 0xf4f   :  { %7525 = vmatprep.subr.bf16.mxu1 %v11304_v12  ;;  %7557 = vmatprep.subr.bf16.mxu0 %v11305_v22 }
 0xf52   :  { %7527 = vmatpush1.bf16.msra.mxu1 %v11306_v29  ;;  %7559 = vmatpush1.bf16.msra.mxu0 %v11307_v28 }
 0xf53   :  { %7529 = vmatprep.subr.bf16.mxu1 %v9809_v36  ;;  %7561 = vmatprep.subr.bf16.mxu0 %v11308_v54  ;;  %v10129_v36 = vstv %s3786_s18 }
 0xf56   :  { %7531 = vmatpush1.bf16.msra.mxu1 %v11309_v37  ;;  %7563 = vmatpush1.bf16.msra.mxu0 %v11310_v62 }
 0xf57   :  { %7533 = vmatprep.subr.bf16.mxu1 %v9821_v14  ;;  %7565 = vmatprep.subr.bf16.mxu0 %v11311_v48  ;;  %v3876_v14 = vmul.f32 %v10129_v36, %v10067_v55  ;;  %v10170_v55 = vpack.c.bf16 %v4530_v34, %v4529_v59  ;;  %v6083_v48 = vld [vmem:[%s10908_s1 + $0x5] ss:$8 sm:$0xf] }
 0xf5a   :  { %7535 = vmatpush1.bf16.msra.mxu1 %v9829_v56  ;;  %7567 = vmatpush1.bf16.msra.mxu0 %v9831_v52  ;;  %v11312_v56 = vld [vmem:[#allocation46_spill] sm:$0xff]  ;;  %v11313_v52 = vld [vmem:[#allocation47_spill] sm:$0xff] }
 0xf5b   :  { %7537 = vmatprep.subr.bf16.mxu1 %v9835_v10  ;;  %7569 = vmatprep.subr.bf16.mxu0 %v9837_v51  ;;  %v11314_v10 = vld [vmem:[#allocation48_spill] sm:$0xff]  ;;  %v11315_v51 = vld [vmem:[#allocation49_spill] sm:$0xff] }
 0xf5e   :  { %7539 = vmatpush1.bf16.msra.mxu1 %v9841_v40  ;;  %7571 = vmatpush1.bf16.msra.mxu0 %v9843_v6  ;;  %v11316_v40 = vld [vmem:[#allocation50_spill] sm:$0xff]  ;;  %v11317_v6 = vld [vmem:[#allocation51_spill] sm:$0xff] }
 0xf5f   :  { %7541 = vmatprep.subr.bf16.mxu1 %v9847_v13  ;;  %7573 = vmatprep.subr.bf16.mxu0 %v9849_v63  ;;  %v11318_v13 = vld [vmem:[#allocation52_spill] sm:$0xff]  ;;  %v11319_v63 = vld [vmem:[#allocation53_spill] sm:$0xff] }
 0xf62   :  { %7543 = vmatpush1.bf16.msra.mxu1 %v9854_v16  ;;  %7575 = vmatpush1.bf16.msra.mxu0 %v9856_v4  ;;  %v11320_v16 = vld [vmem:[#allocation54_spill] sm:$0xff]  ;;  %v11321_v4 = vld [vmem:[#allocation55_spill] sm:$0xff] }
 0xf63   :  { %7577 = vmatprep.subr.bf16.mxu1 %v9892_v45  ;;  %7608 = vmatprep.subr.bf16.mxu0 %v11147_v11  ;;  %v11322_v45 = vld [vmem:[#allocation56_spill] sm:$0xff] }
 0xf65   :  { %4245 = vmatmul.mubr.f32.vlgmr.msra.gmra.mrb[32].mxu1 %v3876_v14  ;;  %4316 = vmatmul.mubr.f32.vlgmr.msra.gmra.mrb[34].mxu0 %v3876_v14 }
 0xf66   :  { %7579 = vmatpush1.bf16.msra.mxu1 %v11312_v56  ;;  %4485 = vmatprep.mubr.f32.mxu1 %v11097_v35 }
 0xf67   :  { %7581 = vmatprep.subr.bf16.mxu1 %v11313_v52  ;;  %6466 = vmatprep.mubr.msk.f32.mxu0 %vm8243_vm0, %v11097_v35 }
 0xf68   :  { %7610 = vmatpush3.bf16.msra.mxu0 %v10164_v38 }
 0xf69   :  { %7611 = vmatprep.subr.bf16.mxu0 %v11147_v11 }
 0xf6a   :  { %7583 = vmatpush1.bf16.msra.mxu1 %v11314_v10 }
 0xf6b   :  { %7585 = vmatprep.subr.bf16.mxu1 %v11315_v51 }
 0xf6c   :  { %7613 = vmatpush3.bf16.msra.mxu0 %v10170_v55 }
 0xf6d   :  { %7614 = vmatprep.subr.bf16.mxu0 %v11147_v11 }
 0xf6e   :  { %7587 = vmatpush1.bf16.msra.mxu1 %v11316_v40 }
 0xf6f   :  { %7589 = vmatprep.subr.bf16.mxu1 %v11317_v6 }
 0xf70   :  { %7616 = vmatpush3.bf16.msra.mxu0 %v10180_v32 }
 0xf71   :  { %7617 = vmatprep.subr.bf16.mxu0 %v11147_v11 }
 0xf72   :  { %7591 = vmatpush1.bf16.msra.mxu1 %v11318_v13 }
 0xf73   :  { %7593 = vmatprep.subr.bf16.mxu1 %v11319_v63 }
 0xf74   :  { %7619 = vmatpush3.bf16.msra.mxu0 %v10190_v44 }
 0xf75   :  { %7620 = vmatprep.subr.bf16.mxu0 %v11147_v11 }
 0xf76   :  { %7595 = vmatpush1.bf16.msra.mxu1 %v11320_v16 }
 0xf77   :  { %7597 = vmatprep.subr.bf16.mxu1 %v11321_v4 }
 0xf78   :  { %7622 = vmatpush3.bf16.msra.mxu0 %v10200_v0 }
 0xf79   :  { %7623 = vmatprep.subr.bf16.mxu0 %v11147_v11 }
 0xf7a   :  { %7599 = vmatpush1.bf16.msra.mxu1 %v11322_v45 }
 0xf7b   :  { %7601 = vmatprep.subr.bf16.mxu1 %v11323_v17 }
 0xf7c   :  { %7625 = vmatpush3.bf16.msra.mxu0 %v10210_v1 }
 0xf7d   :  { %7626 = vmatprep.subr.bf16.mxu0 %v11147_v11 }
 0xf7e   :  { %7603 = vmatpush1.bf16.msra.mxu1 %v11324_v23 }
 0xf7f   :  { %7605 = vmatprep.subr.bf16.mxu1 %v11325_v53 }
 0xf80   :  { %7628 = vmatpush3.bf16.msra.mxu0 %v10220_v5 }
 0xf81   :  { %7629 = vmatprep.subr.bf16.mxu0 %v11147_v11 }
 0xf82   :  { %7607 = vmatpush1.bf16.msra.mxu1 %v11326_v3  ;;  %v3877_v3 = vmul.f32 %v10129_v36, %v10042_v49  ;;  %v4541_v49 = vld [vmem:[%s10911_s4 + $0x70] sm:$0xff]  ;;  %v4542_v36 = vld [vmem:[%s10911_s4 + $0x78] sm:$0xff] }
 0xf83   :  { %v10246_v24 = vpack.c.bf16 %v4542_v36, %v4541_v49  ;;  %v4651_v36 = vld [vmem:[#allocation6 + $0xf8] sm:$0xff] }
 0xf85   :  { %7631 = vmatpush3.bf16.msra.mxu0 %v10246_v24 }
0x1018   :  { %v4010_v50 = vpop.f32.mrb[30].mxu1  ;;  %v4081_v42 = vpop.f32.mrb[32].mxu0 }
0x1019   :  { %v4012_v39 = vpop.f32.mrb[31].mxu1  ;;  %v4083_v27 = vpop.f32.mrb[33].mxu0 }
0x101a   :  { %v4090_v46 = vcombine.low %v4010_v50, %v4012_v39  ;;  %v4091_v43 = vcombine.low %v4081_v42, %v4083_v27  ;;  %v4625_v50 = vld [vmem:[#allocation6 + $0x28] sm:$0xff]  ;;  %v4623_v42 = vld [vmem:[#allocation6 + $0x18] sm:$0xff]  ;;  %v4418_v39 = vrot.slane %v4409_v30, %v8851_v25  ;;  %v4644_v30 = vld [vmem:[#allocation6 + $0xc0] sm:$0xff] }
0x101b   :  { %v10254_v27 = vpack.c.bf16 %v4625_v50, %v4621_v47  ;;  %v4653_v47 = vld [vmem:[#allocation6 + $0x108] sm:$0xff] }
0x101c   :  { %v4098_v2 = vrot.slane %v4090_v46, %v8809_v7  ;;  %v4105_v61 = vrot.slane %v4091_v43, %v8809_v7  ;;  %v4627_v46 = vld [vmem:[#allocation6 + $0x38] sm:$0xff]  ;;  %v4620_v43 = vld [vmem:[#allocation6] sm:$0xff] }
0x101d   :  { %7633 = vmatprep.subr.bf16.mxu1 %v10254_v27 }
0x101e   :  { %v4106_v41 = vcombine.low %v4098_v2, %v4105_v61  ;;  %v4624_v2 = vld [vmem:[#allocation6 + $0x20] sm:$0xff]  ;;  %v10256_v61 = vpack.c.bf16 %v4627_v46, %v4623_v42 }
0x1020   :  { %v4113_v54 = vrot.slane %v4106_v41, %v8809_v7  ;;  %v10258_v41 = vpack.c.bf16 %v4624_v2, %v4620_v43  ;;  %7665 = vmatprep.subr.bf16.mxu0 %v10256_v61  ;;  %v4646_v2 = vld [vmem:[#allocation6 + $0xd0] sm:$0xff] }
0x1022   :  { %v4115_v56 = vadd.f32 %v6083_v48, %v4113_v54  ;;  %v4631_v54 = vld [vmem:[#allocation6 + $0x58] sm:$0xff] }
0x1038   :  { %v4246_v8 = vpop.f32.mrb[32].mxu1  ;;  %v4317_v21 = vpop.f32.mrb[34].mxu0 }
0x1039   :  { %v4248_v12 = vpop.f32.mrb[33].mxu1  ;;  %v4319_v22 = vpop.f32.mrb[35].mxu0 }
0x103a   :  { %v4326_v29 = vcombine.low %v4246_v8, %v4248_v12  ;;  %v4327_v28 = vcombine.low %v4317_v21, %v4319_v22  ;;  %v4622_v8 = vld [vmem:[#allocation6 + $0x10] sm:$0xff]  ;;  %v4629_v12 = vld [vmem:[#allocation6 + $0x48] sm:$0xff] }
0x103b   :  { %v4626_v21 = vld [vmem:[#allocation6 + $0x30] sm:$0xff] }
0x103c   :  { %v4334_v37 = vrot.slane %v4326_v29, %v8809_v7  ;;  %v4341_v62 = vrot.slane %v4327_v28, %v8809_v7  ;;  %v10261_v29 = vpack.c.bf16 %v4626_v21, %v4622_v8  ;;  %v4633_v28 = vld [vmem:[#allocation6 + $0x68] sm:$0xff]  ;;  %v4650_v8 = vld [vmem:[#allocation6 + $0xf0] sm:$0xff]  ;;  %v4655_v21 = vld [vmem:[#allocation6 + $0x118] sm:$0xff] }
0x103e   :  { %v4342_v14 = vcombine.low %v4334_v37, %v4341_v62  ;;  %v4635_v37 = vld [vmem:[#allocation6 + $0x78] sm:$0xff] }
0x1040   :  { %v4349_v52 = vrot.slane %v4342_v14, %v8809_v7  ;;  %v10267_v14 = vpack.c.bf16 %v4633_v28, %v4629_v12  ;;  %v4652_v28 = vld [vmem:[#allocation6 + $0x100] sm:$0xff] }
0x1042   :  { %v4351_v10 = vadd.f32 %v4349_v52, %v4115_v56  ;;  %v10269_v56 = vpack.c.bf16 %v4635_v37, %v4631_v54  ;;  %v4628_v52 = vld [vmem:[#allocation6 + $0x40] sm:$0xff]  ;;  %v4661_v37 = vld [vmem:[#allocation6 + $0x148] sm:$0xff] }
0x1043   :  { %v4656_v54 = vld [vmem:[#allocation6 + $0x120] sm:$0xff] }
0x1044   :  { %v4352_v51 = vmul.f32 0.5, %v4351_v10  ;;  %v4357_v40 = vrot.slane %v4351_v10, 1  ;;  %v4363_v13 = vrot.slane %v4351_v10, 2  ;;  %v4366_v63 = vrot.slane %v4351_v10, 3  ;;  %v4632_v10 = vld [vmem:[#allocation6 + $0x60] sm:$0xff] }
0x1046   :  { %8043 = vtanh.f32 %v4352_v51  ;;  %v4359_v6 = vmul.f32 0.5, %v4357_v40  ;;  %v4368_v16 = vmul.f32 0.5, %v4366_v63  ;;  %v4630_v51 = vld [vmem:[#allocation6 + $0x50] sm:$0xff]  ;;  %v4637_v63 = vld [vmem:[#allocation6 + $0x88] sm:$0xff] }
0x1048   :  { %8045 = vtanh.f32 %v4359_v6  ;;  %v10273_v6 = vpack.c.bf16 %v4632_v10, %v4628_v52  ;;  %v10312_v52 = vpack.c.bf16 %v4650_v8, %v4646_v2 }
0x1049   :  { %8047 = vtanh.f32 %v4363_v13  ;;  %v4634_v13 = vld [vmem:[#allocation6 + $0x70] sm:$0xff] }
0x104a   :  { %8049 = vtanh.f32 %v4368_v16  ;;  %v4641_v16 = vld [vmem:[#allocation6 + $0xa8] sm:$0xff]  ;;  %11328 = vst [vmem:[#allocation22_spill] sm:$0xff] %v10312_v52 }
0x1050   :  { %v8044_v4 = vpop.eup %8043 }
0x1051   :  { %v4354_v45 = vadd.f32 1.0, %v8044_v4  ;;  %v10278_v4 = vpack.c.bf16 %v4641_v16, %v4637_v63  ;;  %v4658_v63 = vld [vmem:[#allocation6 + $0x130] sm:$0xff]  ;;  %v4663_v16 = vld [vmem:[#allocation6 + $0x158] sm:$0xff] }
0x1052   :  { %v8046_v17 = vpop.eup %8045 }
0x1053   :  { %v4355_v23 = vmul.f32 0.5, %v4354_v45  ;;  %v4361_v53 = vadd.f32 1.0, %v8046_v17  ;;  %v8048_v19 = vpop.eup %8047  ;;  %v4639_v45 = vld [vmem:[#allocation6 + $0x98] sm:$0xff] }
0x1054   :  { %v8050_v9 = vpop.eup %8049  ;;  %v4643_v17 = vld [vmem:[#allocation6 + $0xb8] sm:$0xff] }
0x1055   :  { %v4362_v33 = vmul.f32 0.5, %v4361_v53  ;;  %v4373_v59 = vmul.f32 %v8048_v19, %v4355_v23  ;;  %v4370_v31 = vadd.f32 1.0, %v8050_v9  ;;  %v4636_v23 = vld [vmem:[#allocation6 + $0x80] sm:$0xff]  ;;  %v10288_v9 = vpack.c.bf16 %v4643_v17, %v4639_v45  ;;  %v4667_v17 = vld [vmem:[#allocation6 + $0x178] sm:$0xff] }
0x1056   :  { %v4640_v19 = vld [vmem:[#allocation6 + $0xa0] sm:$0xff] }
0x1057   :  { %v4372_v34 = vmul.f32 %v4362_v33, %v3877_v3  ;;  %v4371_v26 = vmul.f32 0.5, %v4370_v31  ;;  %v10283_v33 = vpack.c.bf16 %v4634_v13, %v4630_v51  ;;  %v10290_v31 = vpack.c.bf16 %v4640_v19, %v4636_v23  ;;  %v4654_v13 = vld [vmem:[#allocation6 + $0x110] sm:$0xff]  ;;  %v4660_v23 = vld [vmem:[#allocation6 + $0x140] sm:$0xff]  ;;  %v4673_v19 = vld [vmem:[#allocation6 + $0x1a8] sm:$0xff] }
0x1058   :  { %v10318_v51 = vpack.c.bf16 %v4656_v54, %v4652_v28  ;;  %v4677_v54 = vld [vmem:[#allocation6 + $0x1c8] sm:$0xff] }
0x1059   :  { %v10236_v15 = vadd.f32 %v4373_v59, %v4372_v34  ;;  %v4638_v59 = vld [vmem:[#allocation6 + $0x90] sm:$0xff] }
0x105a   :  { %v4642_v34 = vld [vmem:[#allocation6 + $0xb0] sm:$0xff] }
0x105b   :  { %8051 = vtanh.f32 %v10236_v15  ;;  %v10299_v42 = vpack.c.bf16 %v4642_v34, %v4638_v59  ;;  %v10324_v59 = vpack.c.bf16 %v4658_v63, %v4654_v13  ;;  %v10328_v34 = vpack.c.bf16 %v4667_v17, %v4663_v16  ;;  %v4683_v63 = vld [vmem:[#allocation6 + $0x1f8] sm:$0xff]  ;;  %v4676_v16 = vld [vmem:[#allocation6 + $0x1c0] sm:$0xff] }
0x105c   :  { %v4680_v17 = vld [vmem:[#allocation6 + $0x1e0] sm:$0xff] }
0x105d   :  { %11330 = vst [vmem:[#allocation24_spill] sm:$0xff] %v10324_v59  ;;  %11331 = vst [vmem:[#allocation25_spill] sm:$0xff] %v10328_v34 }
0x1065   :  { %v8052_v58 = vpop.eup %8051 }
0x1066   :  { %v4376_v60 = vmul.f32 %v8052_v58, %v4371_v26  ;;  %v4645_v26 = vld [vmem:[#allocation6 + $0xc8] sm:$0xff] }
0x1067   :  { %v4649_v58 = vld [vmem:[#allocation6 + $0xe8] sm:$0xff] }
0x1068   :  { %4486 = vmatmul.mubr.f32.vlgmr.msra.gmra.mrb[34].mxu1 %v4376_v60  ;;  %v4647_v60 = vld [vmem:[#allocation6 + $0xd8] sm:$0xff]  ;;  %v10294_v49 = vpack.c.bf16 %v4649_v58, %v4645_v26  ;;  %v4662_v58 = vld [vmem:[#allocation6 + $0x150] sm:$0xff] }
0x1069   :  { %4748 = vmatprep.mubr.f32.mxu1 %v11097_v35  ;;  %7635 = vmatpush1.bf16.msra.mxu1 %v10258_v41  ;;  %v10303_v46 = vpack.c.bf16 %v4651_v36, %v4647_v60  ;;  %v4666_v60 = vld [vmem:[#allocation6 + $0x170] sm:$0xff]  ;;  %v4671_v36 = vld [vmem:[#allocation6 + $0x198] sm:$0xff] }
0x106a   :  { %7637 = vmatprep.subr.bf16.mxu1 %v10267_v14 }
0x106d   :  { %7639 = vmatpush1.bf16.msra.mxu1 %v10273_v6 }
0x106e   :  { %7641 = vmatprep.subr.bf16.mxu1 %v10278_v4 }
0x1071   :  { %7643 = vmatpush1.bf16.msra.mxu1 %v10290_v31 }
0x1072   :  { %7645 = vmatprep.subr.bf16.mxu1 %v10294_v49 }
0x113b   :  { %v4487_v22 = vpop.f32.mrb[34].mxu1 }
0x113c   :  { %v10263_v62 = vadd.f32 %v4487_v22, %v4414_v57  ;;  %v4489_v48 = vpop.f32.mrb[35].mxu1  ;;  %v4648_v57 = vld [vmem:[#allocation6 + $0xe0] sm:$0xff]  ;;  %v4659_v22 = vld [vmem:[#allocation6 + $0x138] sm:$0xff] }
0x113d   :  { %v10271_v40 = vadd.f32 %v4489_v48, %v4418_v39  ;;  %v4657_v39 = vld [vmem:[#allocation6 + $0x128] sm:$0xff]  ;;  %v10305_v43 = vpack.c.bf16 %v4648_v57, %v4644_v30  ;;  %v10316_v10 = vpack.c.bf16 %v4659_v22, %v4655_v21  ;;  %v4675_v57 = vld [vmem:[#allocation6 + $0x1b8] sm:$0xff]  ;;  %v4670_v21 = vld [vmem:[#allocation6 + $0x190] sm:$0xff] }
0x113e   :  { %4522 = vst [vmem:[#allocation9 + $0x5] sm:$0x1] %v10263_v62  ;;  %6467 = vmatmul.mubr.f32.vlgmr.msra.gmra.mrb[36].mxu0 %v10263_v62  ;;  %v10309_v12 = vpack.c.bf16 %v4657_v39, %v4653_v47  ;;  %v4665_v48 = vld [vmem:[#allocation6 + $0x168] sm:$0xff]  ;;  %v4668_v47 = vld [vmem:[#allocation6 + $0x180] sm:$0xff]  ;;  %v10336_v39 = vpack.c.bf16 %v4666_v60, %v4662_v58  ;;  %v10340_v2 = vpack.c.bf16 %v4675_v57, %v4671_v36  ;;  %v4674_v22 = vld [vmem:[#allocation6 + $0x1b0] sm:$0xff] }
0x113f   :  { %11327 = vst [vmem:[#allocation21_spill] sm:$0xff] %v10271_v40  ;;  %v4501_v53 = vrot.slane %v10271_v40, 5  ;;  %v4493_v3 = vrot.slane %v10271_v40, 7  ;;  %7667 = vmatpush1.bf16.msra.mxu0 %v10261_v29  ;;  %4819 = vmatprep.mubr.f32.mxu0 %v11097_v35  ;;  %v4497_v50 = vrot.slane %v10271_v40, 6  ;;  %11329 = vst [vmem:[#allocation23_spill] sm:$0xff] %v10316_v10  ;;  %v10321_v45 = vpack.c.bf16 %v4665_v48, %v4661_v37  ;;  %v4681_v37 = vld [vmem:[#allocation6 + $0x1e8] sm:$0xff] }
0x1140   :  { %7669 = vmatprep.subr.bf16.mxu0 %v10269_v56  ;;  %7647 = vmatpush1.bf16.msra.mxu1 %v10305_v43  ;;  %11332 = vst [vmem:[#allocation26_spill] sm:$0xff] %v10336_v39  ;;  %11333 = vst [vmem:[#allocation27_spill] sm:$0xff] %v10340_v2  ;;  %v10346_v28 = vpack.c.bf16 %v4674_v22, %v4670_v21  ;;  %v4679_v48 = vld [vmem:[#allocation6 + $0x1d8] sm:$0xff]  ;;  %v10351_v13 = vpack.c.bf16 %v4681_v37, %v4677_v54  ;;  %v4857_v60 = vld [vmem:[#allocation7 + $0x8] sm:$0xff] }
0x1141   :  { %4502 = vrot.lane.b32.xlu1 %v4501_v53, %s8246_s6  ;;  %4494 = vrot.lane.b32.xlu0 %v4493_v3, %s8247_s27  ;;  %v4664_v53 = vld [vmem:[#allocation6 + $0x160] sm:$0xff]  ;;  %v4669_v3 = vld [vmem:[#allocation6 + $0x188] sm:$0xff]  ;;  %v4859_v57 = vld [vmem:[#allocation7 + $0x18] sm:$0xff] }
0x1142   :  { %7649 = vmatprep.subr.bf16.mxu1 %v10309_v12  ;;  %v10330_v26 = vpack.c.bf16 %v4664_v53, %v4660_v23  ;;  %v10333_v30 = vpack.c.bf16 %v4673_v19, %v4669_v3  ;;  %11334 = vst [vmem:[#allocation28_spill] sm:$0xff] %v10346_v28  ;;  %v10353_v23 = vpack.c.bf16 %v4683_v63, %v4679_v48  ;;  %v4678_v3 = vld [vmem:[#allocation6 + $0x1d0] sm:$0xff]  ;;  %v4861_v36 = vld [vmem:[#allocation7 + $0x28] sm:$0xff]  ;;  %v4543_v22 = vld [vmem:[%s10912_s5] sm:$0x1] }
0x1143   :  { %7671 = vmatpush1.bf16.msra.mxu0 %v10283_v33  ;;  %v10355_v53 = vpack.c.bf16 %v4680_v17, %v4676_v16  ;;  %v4682_v19 = vld [vmem:[#allocation6 + $0x1f0] sm:$0xff]  ;;  %v4856_v54 = vld [vmem:[#allocation7] sm:$0xff]  ;;  %v4865_v16 = vld [vmem:[#allocation7 + $0x48] sm:$0xff] }
0x1144   :  { %7673 = vmatprep.subr.bf16.mxu0 %v10288_v9  ;;  %7651 = vmatpush1.bf16.msra.mxu1 %v10318_v51  ;;  %11335 = vst [vmem:[#allocation29_spill] sm:$0xff] %v10353_v23  ;;  %v10358_v58 = vpack.c.bf16 %v4682_v19, %v4678_v3  ;;  %v4860_v37 = vld [vmem:[#allocation7 + $0x20] sm:$0xff]  ;;  %v4858_v48 = vld [vmem:[#allocation7 + $0x10] sm:$0xff]  ;;  %v4869_v3 = vld [vmem:[#allocation7 + $0x68] sm:$0xff] }
0x1145   :  { %4498 = vrot.lane.b32.xlu0 %v4497_v50, %s8248_s14  ;;  %7653 = vmatprep.subr.bf16.mxu1 %v10321_v45  ;;  %v4672_v50 = vld [vmem:[#allocation6 + $0x1a0] sm:$0xff]  ;;  %v4862_v63 = vld [vmem:[#allocation7 + $0x30] sm:$0xff]  ;;  %v4867_v19 = vld [vmem:[#allocation7 + $0x58] sm:$0xff] }
0x1146   :  { %v10342_v8 = vpack.c.bf16 %v4672_v50, %v4668_v47  ;;  %11336 = vst [vmem:[#allocation30_spill] sm:$0xff] %v10358_v58  ;;  %v10363_v47 = vpack.c.bf16 %v4861_v36, %v4857_v60  ;;  %v4863_v50 = vld [vmem:[#allocation7 + $0x38] sm:$0xff]  ;;  %v10374_v40 = vpack.c.bf16 %v4862_v63, %v4858_v48  ;;  %v4876_v48 = vld [vmem:[#allocation7 + $0xa0] sm:$0xff] }
0x1147   :  { %7675 = vmatpush1.bf16.msra.mxu0 %v10299_v42  ;;  %v10365_v21 = vpack.c.bf16 %v4863_v50, %v4859_v57  ;;  %v4871_v60 = vld [vmem:[#allocation7 + $0x78] sm:$0xff]  ;;  %v10372_v50 = vpack.c.bf16 %v4860_v37, %v4856_v54  ;;  %v4872_v37 = vld [vmem:[#allocation7 + $0x80] sm:$0xff] }
0x1148   :  { %7677 = vmatprep.subr.bf16.mxu0 %v10303_v46  ;;  %7655 = vmatpush1.bf16.msra.mxu1 %v10330_v26 }
0x1149   :  { %7657 = vmatprep.subr.bf16.mxu1 %v10333_v30  ;;  %11337 = vst [vmem:[#allocation31_spill] sm:$0xff] %v10365_v21 }
0x114b   :  { %7679 = vmatpush1.bf16.msra.mxu0 %v10312_v52  ;;  %v4879_v52 = vld [vmem:[#allocation7 + $0xb8] sm:$0xff] }
0x114c   :  { %7681 = vmatprep.subr.bf16.mxu0 %v10316_v10  ;;  %7659 = vmatpush1.bf16.msra.mxu1 %v10342_v8  ;;  %v4875_v10 = vld [vmem:[#allocation7 + $0x98] sm:$0xff] }
0x114d   :  { %7661 = vmatprep.subr.bf16.mxu1 %v10351_v13 }
0x114f   :  { %7683 = vmatpush1.bf16.msra.mxu0 %v10324_v59  ;;  %v4877_v59 = vld [vmem:[#allocation7 + $0xa8] sm:$0xff] }
0x1150   :  { %7685 = vmatprep.subr.bf16.mxu0 %v10328_v34  ;;  %7663 = vmatpush1.bf16.msra.mxu1 %v10355_v53  ;;  %v4873_v34 = vld [vmem:[#allocation7 + $0x88] sm:$0xff] }
0x1151   :  { %7697 = vmatprep.subr.bf16.mxu1 %v10363_v47  ;;  %v10388_v63 = vpack.c.bf16 %v4877_v59, %v4873_v34 }
0x1153   :  { %7687 = vmatpush1.bf16.msra.mxu0 %v10336_v39  ;;  %v4870_v39 = vld [vmem:[#allocation7 + $0x70] sm:$0xff]  ;;  %11341 = vst [vmem:[#allocation35_spill] sm:$0xff] %v10388_v63 }
0x1154   :  { %7689 = vmatprep.subr.bf16.mxu0 %v10340_v2  ;;  %v4866_v2 = vld [vmem:[#allocation7 + $0x50] sm:$0xff] }
0x1155   :  { %v10384_v54 = vpack.c.bf16 %v4870_v39, %v4866_v2  ;;  %v4882_v2 = vld [vmem:[#allocation7 + $0xd0] sm:$0xff] }
0x1157   :  { %7691 = vmatpush1.bf16.msra.mxu0 %v10346_v28  ;;  %v10378_v28 = vpack.c.bf16 %v4871_v60, %v4867_v19  ;;  %11340 = vst [vmem:[#allocation34_spill] sm:$0xff] %v10384_v54  ;;  %v4885_v19 = vld [vmem:[#allocation7 + $0xe8] sm:$0xff]  ;;  %v4883_v60 = vld [vmem:[#allocation7 + $0xd8] sm:$0xff] }
0x1158   :  { %7693 = vmatprep.subr.bf16.mxu0 %v10353_v23  ;;  %v10376_v23 = vpack.c.bf16 %v4869_v3, %v4865_v16  ;;  %v10390_v16 = vpack.c.bf16 %v4879_v52, %v4875_v10  ;;  %v4881_v3 = vld [vmem:[#allocation7 + $0xc8] sm:$0xff]  ;;  %v4880_v52 = vld [vmem:[#allocation7 + $0xc0] sm:$0xff] }
0x1159   :  { %11338 = vst [vmem:[#allocation32_spill] sm:$0xff] %v10378_v28  ;;  %v4884_v10 = vld [vmem:[#allocation7 + $0xe0] sm:$0xff]  ;;  %v10402_v34 = vpack.c.bf16 %v4885_v19, %v4881_v3 }
0x115a   :  { %11342 = vst [vmem:[#allocation36_spill] sm:$0xff] %v10390_v16 }
0x115b   :  { %7695 = vmatpush1.bf16.msra.mxu0 %v10358_v58  ;;  %11345 = vst [vmem:[#allocation39_spill] sm:$0xff] %v10402_v34 }
0x115c   :  { %7729 = vmatprep.subr.bf16.mxu0 %v10365_v21  ;;  %v4868_v21 = vld [vmem:[#allocation7 + $0x60] sm:$0xff] }
0x1211   :  { %v4610_v17 = vpop.f32.mrb[36].mxu0 }
0x1212   :  { %v4611_v36 = vadd.f32 %v4610_v17, %v4543_v22  ;;  %v6468_v57 = vpop.f32.mrb[37].mxu0  ;;  %v10382_v22 = vpack.c.bf16 %v4868_v21, %v4864_v20  ;;  %v4874_v17 = vld [vmem:[#allocation7 + $0x90] sm:$0xff]  ;;  %v10396_v20 = vpack.c.bf16 %v4876_v48, %v4872_v37  ;;  %v10408_v37 = vpack.c.bf16 %v4884_v10, %v4880_v52 }
0x1213   :  { %v4886_v21 = vld [vmem:[#allocation7 + $0xf0] sm:$0xff]  ;;  %v4889_v57 = vld [vmem:[#allocation7 + $0x108] sm:$0xff] }
0x1214   :  { %v4614_v58 = vmax.f32 %v4611_v36, 0.0  ;;  %11339 = vst [vmem:[#allocation33_spill] sm:$0xff] %v10382_v22  ;;  %v4887_v36 = vld [vmem:[#allocation7 + $0xf8] sm:$0xff]  ;;  %11343 = vst [vmem:[#allocation37_spill] sm:$0xff] %v10396_v20  ;;  %v10410_v48 = vpack.c.bf16 %v4886_v21, %v4882_v2  ;;  %v4896_v2 = vld [vmem:[#allocation7 + $0x140] sm:$0xff] }
0x1215   :  { %v10404_v39 = vpack.c.bf16 %v4887_v36, %v4883_v60  ;;  %11347 = vst [vmem:[#allocation41_spill] sm:$0xff] %v10408_v37  ;;  %v4890_v60 = vld [vmem:[#allocation7 + $0x110] sm:$0xff]  ;;  %v4900_v21 = vld [vmem:[#allocation7 + $0x160] sm:$0xff] }
0x1216   :  { %4749 = vmatmul.mubr.f32.vlgmr.msra.gmra.mrb[36].mxu1 %v4614_v58  ;;  %4820 = vmatmul.mubr.f32.vlgmr.msra.gmra.mrb[38].mxu0 %v4614_v58  ;;  %v4878_v58 = vld [vmem:[#allocation7 + $0xb0] sm:$0xff]  ;;  %11348 = vst [vmem:[#allocation42_spill] sm:$0xff] %v10410_v48 }
0x1217   :  { %7699 = vmatpush1.bf16.msra.mxu1 %v10372_v50  ;;  %7731 = vmatpush1.bf16.msra.mxu0 %v10374_v40  ;;  %v10398_v59 = vpack.c.bf16 %v4878_v58, %v4874_v17  ;;  %11346 = vst [vmem:[#allocation40_spill] sm:$0xff] %v10404_v39  ;;  %v4888_v17 = vld [vmem:[#allocation7 + $0x100] sm:$0xff]  ;;  %v4894_v36 = vld [vmem:[#allocation7 + $0x130] sm:$0xff] }
0x1218   :  { %7701 = vmatprep.subr.bf16.mxu1 %v10376_v23  ;;  %7733 = vmatprep.subr.bf16.mxu0 %v10378_v28  ;;  %v4891_v28 = vld [vmem:[#allocation7 + $0x118] sm:$0xff]  ;;  %v4892_v58 = vld [vmem:[#allocation7 + $0x120] sm:$0xff]  ;;  %v10422_v10 = vpack.c.bf16 %v4894_v36, %v4890_v60  ;;  %v4906_v60 = vld [vmem:[#allocation7 + $0x190] sm:$0xff] }
0x1219   :  { %4984 = vmatprep.mubr.f32.mxu1 %v11097_v35  ;;  %5055 = vmatprep.mubr.f32.mxu0 %v11097_v35  ;;  %11344 = vst [vmem:[#allocation38_spill] sm:$0xff] %v10398_v59  ;;  %v10420_v52 = vpack.c.bf16 %v4892_v58, %v4888_v17  ;;  %v10434_v17 = vpack.c.bf16 %v4900_v21, %v4896_v2  ;;  %v4910_v36 = vld [vmem:[#allocation7 + $0x1b0] sm:$0xff]  ;;  %v4919_v2 = vld [vmem:[#allocation7 + $0x1f8] sm:$0xff] }
0x121a   :  { %11351 = vst [vmem:[#allocation45_spill] sm:$0xff] %v10422_v10 }
0x121b   :  { %7703 = vmatpush1.bf16.msra.mxu1 %v10382_v22  ;;  %7735 = vmatpush1.bf16.msra.mxu0 %v10384_v54  ;;  %v4893_v22 = vld [vmem:[#allocation7 + $0x128] sm:$0xff]  ;;  %v4895_v54 = vld [vmem:[#allocation7 + $0x138] sm:$0xff]  ;;  %11350 = vst [vmem:[#allocation44_spill] sm:$0xff] %v10420_v52 }
0x121c   :  { %7705 = vmatprep.subr.bf16.mxu1 %v10388_v63  ;;  %7737 = vmatprep.subr.bf16.mxu0 %v10390_v16  ;;  %v10414_v3 = vpack.c.bf16 %v4893_v22, %v4889_v57  ;;  %v10416_v19 = vpack.c.bf16 %v4895_v54, %v4891_v28  ;;  %v4897_v16 = vld [vmem:[#allocation7 + $0x148] sm:$0xff]  ;;  %v4899_v63 = vld [vmem:[#allocation7 + $0x158] sm:$0xff]  ;;  %v4898_v54 = vld [vmem:[#allocation7 + $0x150] sm:$0xff] }
0x121d   :  { %v4902_v57 = vld [vmem:[#allocation7 + $0x170] sm:$0xff] }
0x121e   :  { %11349 = vst [vmem:[#allocation43_spill] sm:$0xff] %v10416_v19  ;;  %v10436_v58 = vpack.c.bf16 %v4902_v57, %v4898_v54  ;;  %v10448_v54 = vpack.c.bf16 %v4910_v36, %v4906_v60  ;;  %v4912_v57 = vld [vmem:[#allocation7 + $0x1c0] sm:$0xff]  ;;  %v5128_v60 = vld [vmem:[%s10915_s8 + $0x58] sm:$0xff] }
0x121f   :  { %7707 = vmatpush1.bf16.msra.mxu1 %v10396_v20  ;;  %7739 = vmatpush1.bf16.msra.mxu0 %v10398_v59  ;;  %v4901_v20 = vld [vmem:[#allocation7 + $0x168] sm:$0xff]  ;;  %v4903_v59 = vld [vmem:[#allocation7 + $0x178] sm:$0xff] }
0x1220   :  { %7709 = vmatprep.subr.bf16.mxu1 %v10402_v34  ;;  %7741 = vmatprep.subr.bf16.mxu0 %v10404_v39  ;;  %v10426_v28 = vpack.c.bf16 %v4901_v20, %v4897_v16  ;;  %v10428_v22 = vpack.c.bf16 %v4903_v59, %v4899_v63  ;;  %v4905_v39 = vld [vmem:[#allocation7 + $0x188] sm:$0xff]  ;;  %v4907_v34 = vld [vmem:[#allocation7 + $0x198] sm:$0xff]  ;;  %v4904_v16 = vld [vmem:[#allocation7 + $0x180] sm:$0xff] }
0x1221   :  { %v4908_v20 = vld [vmem:[#allocation7 + $0x1a0] sm:$0xff] }
0x1222   :  { %11352 = vst [vmem:[#allocation46_spill] sm:$0xff] %v10428_v22  ;;  %v10446_v21 = vpack.c.bf16 %v4908_v20, %v4904_v16 }
0x1223   :  { %7711 = vmatpush1.bf16.msra.mxu1 %v10408_v37  ;;  %7743 = vmatpush1.bf16.msra.mxu0 %v10410_v48  ;;  %v4909_v37 = vld [vmem:[#allocation7 + $0x1a8] sm:$0xff]  ;;  %v4911_v48 = vld [vmem:[#allocation7 + $0x1b8] sm:$0xff] }
0x1224   :  { %7713 = vmatprep.subr.bf16.mxu1 %v10414_v3  ;;  %7745 = vmatprep.subr.bf16.mxu0 %v10416_v19  ;;  %v10440_v63 = vpack.c.bf16 %v4909_v37, %v4905_v39  ;;  %v10442_v59 = vpack.c.bf16 %v4911_v48, %v4907_v34  ;;  %v4913_v19 = vld [vmem:[#allocation7 + $0x1c8] sm:$0xff]  ;;  %v4916_v37 = vld [vmem:[#allocation7 + $0x1e0] sm:$0xff]  ;;  %v4914_v48 = vld [vmem:[#allocation7 + $0x1d0] sm:$0xff] }
0x1225   :  { %v10459_v16 = vpack.c.bf16 %v4916_v37, %v4912_v57  ;;  %v5127_v57 = vld [vmem:[%s10915_s8 + $0x50] sm:$0xff] }
0x1227   :  { %7715 = vmatpush1.bf16.msra.mxu1 %v10420_v52  ;;  %7747 = vmatpush1.bf16.msra.mxu0 %v10422_v10  ;;  %v4917_v52 = vld [vmem:[#allocation7 + $0x1e8] sm:$0xff]  ;;  %v4915_v10 = vld [vmem:[#allocation7 + $0x1d8] sm:$0xff] }
0x1228   :  { %7717 = vmatprep.subr.bf16.mxu1 %v10426_v28  ;;  %7749 = vmatprep.subr.bf16.mxu0 %v10428_v22  ;;  %v10452_v34 = vpack.c.bf16 %v4917_v52, %v4913_v19  ;;  %v10454_v39 = vpack.c.bf16 %v4919_v2, %v4915_v10  ;;  %v4918_v22 = vld [vmem:[#allocation7 + $0x1f0] sm:$0xff]  ;;  %v10465_v19 = vstv %s4526_s17  ;;  %v5125_v2 = vld [vmem:[%s10915_s8 + $0x40] sm:$0xff] }
0x1229   :  { %v10461_v20 = vpack.c.bf16 %v4918_v22, %v4914_v48  ;;  %v4616_v52 = vmul.f32 %v10465_v19, %v10263_v62  ;;  %v5123_v62 = vld [vmem:[%s10915_s8 + $0x30] sm:$0xff]  ;;  %v5126_v22 = vld [vmem:[%s10915_s8 + $0x48] sm:$0xff]  ;;  %v10541_v37 = vpack.c.bf16 %v5127_v57, %v5125_v2  ;;  %v5140_v2 = vld [vmem:[%s10915_s8 + $0xb8] sm:$0xff] }
0x122a   :  { %v10533_v36 = vpack.c.bf16 %v5128_v60, %v5126_v22  ;;  %v5130_v48 = vld [vmem:[%s10915_s8 + $0x68] sm:$0xff]  ;;  %v5135_v22 = vld [vmem:[%s10915_s8 + $0x90] sm:$0xff] }
0x122b   :  { %7719 = vmatpush1.bf16.msra.mxu1 %v10434_v17  ;;  %7751 = vmatpush1.bf16.msra.mxu0 %v10436_v58  ;;  %11356 = vst [vmem:[#allocation50_spill] sm:$0xff] %v10541_v37  ;;  %v5138_v60 = vld [vmem:[%s10915_s8 + $0xa8] sm:$0xff] }
0x122c   :  { %7721 = vmatprep.subr.bf16.mxu1 %v10440_v63  ;;  %7753 = vmatprep.subr.bf16.mxu0 %v10442_v59  ;;  %11355 = vst [vmem:[#allocation49_spill] sm:$0xff] %v10533_v36 }
0x122f   :  { %7723 = vmatpush1.bf16.msra.mxu1 %v10446_v21  ;;  %7755 = vmatpush1.bf16.msra.mxu0 %v10448_v54 }
0x1230   :  { %7725 = vmatprep.subr.bf16.mxu1 %v10452_v34  ;;  %7757 = vmatprep.subr.bf16.mxu0 %v10454_v39 }
0x1233   :  { %7727 = vmatpush1.bf16.msra.mxu1 %v10459_v16  ;;  %7759 = vmatpush1.bf16.msra.mxu0 %v10461_v20 }
0x1234   :  { %7792 = vmatprep.subr.bf16.mxu0 %v11147_v11 }
0x1236   :  { %4985 = vmatmul.mubr.f32.vlgmr.msra.gmra.mrb[38].mxu1 %v4616_v52  ;;  %5056 = vmatmul.mubr.f32.vlgmr.msra.gmra.mrb[40].mxu0 %v4616_v52  ;;  %v5132_v52 = vld [vmem:[%s10915_s8 + $0x78] sm:$0xff] }
0x1237   :  { %5225 = vmatprep.mubr.f32.mxu1 %v11097_v35  ;;  %7794 = vmatpush3.bf16.msra.mxu0 %v10164_v38  ;;  %v5118_v38 = vld [vmem:[%s10915_s8 + $0x8] sm:$0xff] }
0x1238   :  { %7795 = vmatprep.subr.bf16.mxu0 %v11147_v11  ;;  %6501 = vmatprep.mubr.msk.f32.mxu0 %vm8243_vm0, %v11097_v35 }
0x123b   :  { %7797 = vmatpush3.bf16.msra.mxu0 %v10170_v55  ;;  %v5120_v55 = vld [vmem:[%s10915_s8 + $0x18] sm:$0xff] }
0x123c   :  { %7798 = vmatprep.subr.bf16.mxu0 %v11147_v11 }
0x123f   :  { %7800 = vmatpush3.bf16.msra.mxu0 %v10180_v32  ;;  %v10497_v32 = vpack.c.bf16 %v5120_v55, %v5118_v38  ;;  %v10551_v38 = vpack.c.bf16 %v5132_v52, %v5130_v48  ;;  %v5129_v55 = vld [vmem:[%s10915_s8 + $0x60] sm:$0xff]  ;;  %v10585_v48 = vpack.c.bf16 %v5140_v2, %v5138_v60  ;;  %v5143_v60 = vld [vmem:[%s10915_s8 + $0xd0] sm:$0xff]  ;;  %v5146_v2 = vld [vmem:[%s10915_s8 + $0xe8] sm:$0xff] }
0x1240   :  { %7801 = vmatprep.subr.bf16.mxu0 %v11147_v11  ;;  %v5137_v52 = vld [vmem:[%s10915_s8 + $0xa0] sm:$0xff] }
0x1241   :  { %7761 = vmatprep.subr.bf16.mxu1 %v10497_v32  ;;  %11357 = vst [vmem:[#allocation51_spill] sm:$0xff] %v10551_v38  ;;  %11361 = vst [vmem:[#allocation55_spill] sm:$0xff] %v10585_v48 }
0x1243   :  { %7803 = vmatpush3.bf16.msra.mxu0 %v10190_v44  ;;  %v5117_v44 = vld [vmem:[%s10915_s8] sm:$0xff] }
0x1244   :  { %7804 = vmatprep.subr.bf16.mxu0 %v11147_v11 }
0x1247   :  { %7806 = vmatpush3.bf16.msra.mxu0 %v10200_v0 }
0x1248   :  { %7807 = vmatprep.subr.bf16.mxu0 %v11147_v11 }
0x124b   :  { %7809 = vmatpush3.bf16.msra.mxu0 %v10210_v1  ;;  %v5122_v1 = vld [vmem:[%s10915_s8 + $0x28] sm:$0xff] }
0x124c   :  { %7810 = vmatprep.subr.bf16.mxu0 %v11147_v11 }
0x124f   :  { %7812 = vmatpush3.bf16.msra.mxu0 %v10220_v5  ;;  %v5124_v5 = vld [vmem:[%s10915_s8 + $0x38] sm:$0xff] }
0x1250   :  { %7813 = vmatprep.subr.bf16.mxu0 %v11147_v11  ;;  %v5119_v11 = vld [vmem:[%s10915_s8 + $0x10] sm:$0xff] }
0x1251   :  { %v10505_v0 = vpack.c.bf16 %v5119_v11, %v5117_v44  ;;  %v5131_v44 = vld [vmem:[%s10915_s8 + $0x70] sm:$0xff] }
0x1252   :  { %v10559_v11 = vpack.c.bf16 %v5131_v44, %v5129_v55  ;;  %v5139_v55 = vld [vmem:[%s10915_s8 + $0xb0] sm:$0xff]  ;;  %v5142_v44 = vld [vmem:[%s10915_s8 + $0xc8] sm:$0xff] }
0x1253   :  { %7815 = vmatpush3.bf16.msra.mxu0 %v10246_v24  ;;  %7763 = vmatpush1.bf16.msra.mxu1 %v10505_v0  ;;  %v10515_v24 = vpack.c.bf16 %v5124_v5, %v5122_v1  ;;  %v5134_v1 = vld [vmem:[%s10915_s8 + $0x88] sm:$0xff]  ;;  %v5136_v5 = vld [vmem:[%s10915_s8 + $0x98] sm:$0xff] }
0x1254   :  { %7849 = vmatprep.subr.bf16.mxu0 %v10256_v61  ;;  %v5121_v61 = vld [vmem:[%s10915_s8 + $0x20] sm:$0xff]  ;;  %11358 = vst [vmem:[#allocation52_spill] sm:$0xff] %v10559_v11 }
0x1255   :  { %11353 = vst [vmem:[#allocation47_spill] sm:$0xff] %v10515_v24  ;;  %v10523_v10 = vpack.c.bf16 %v5123_v62, %v5121_v61  ;;  %7765 = vmatprep.subr.bf16.mxu1 %v10515_v24  ;;  %v5133_v61 = vld [vmem:[%s10915_s8 + $0x80] sm:$0xff]  ;;  %v10572_v62 = vpack.c.bf16 %v5136_v5, %v5134_v1  ;;  %v5144_v1 = vld [vmem:[%s10915_s8 + $0xd8] sm:$0xff]  ;;  %v10601_v5 = vpack.c.bf16 %v5139_v55, %v5137_v52 }
0x1256   :  { %v10583_v57 = vpack.c.bf16 %v5135_v22, %v5133_v61  ;;  %v10604_v61 = vpack.c.bf16 %v5144_v1, %v5142_v44  ;;  %v5141_v22 = vld [vmem:[%s10915_s8 + $0xc0] sm:$0xff]  ;;  %v5148_v52 = vld [vmem:[%s10915_s8 + $0xf8] sm:$0xff] }
0x1257   :  { %11354 = vst [vmem:[#allocation48_spill] sm:$0xff] %v10523_v10  ;;  %7767 = vmatpush1.bf16.msra.mxu1 %v10523_v10  ;;  %11359 = vst [vmem:[#allocation53_spill] sm:$0xff] %v10572_v62  ;;  %v10619_v55 = vpack.c.bf16 %v5143_v60, %v5141_v22  ;;  %v10622_v44 = vpack.c.bf16 %v5148_v52, %v5146_v2  ;;  %v5145_v1 = vld [vmem:[%s10915_s8 + $0xe0] sm:$0xff] }
0x1258   :  { %7769 = vmatprep.subr.bf16.mxu1 %v10533_v36  ;;  %11360 = vst [vmem:[#allocation54_spill] sm:$0xff] %v10583_v57  ;;  %11362 = vst [vmem:[#allocation56_spill] sm:$0xff] %v10601_v5 }
0x1259   :  { %11363 = vst [vmem:[#allocation57_spill] sm:$0xff] %v10604_v61  ;;  %11364 = vst [vmem:[#allocation58_spill] sm:$0xff] %v10619_v55 }
0x125a   :  { %11365 = vst [vmem:[#allocation59_spill] sm:$0xff] %v10622_v44 }
0x125b   :  { %7771 = vmatpush1.bf16.msra.mxu1 %v10541_v37 }
0x125c   :  { %7773 = vmatprep.subr.bf16.mxu1 %v10551_v38 }
0x125f   :  { %7775 = vmatpush1.bf16.msra.mxu1 %v10559_v11 }
0x1260   :  { %7777 = vmatprep.subr.bf16.mxu1 %v10572_v62 }
0x1263   :  { %7779 = vmatpush1.bf16.msra.mxu1 %v10583_v57 }
0x1264   :  { %7781 = vmatprep.subr.bf16.mxu1 %v10585_v48  ;;  %v5147_v48 = vld [vmem:[%s10915_s8 + $0xf0] sm:$0xff] }
0x1265   :  { %v10631_v57 = vpack.c.bf16 %v5147_v48, %v5145_v1 }
0x1267   :  { %7783 = vmatpush1.bf16.msra.mxu1 %v10601_v5  ;;  %11366 = vst [vmem:[#allocation61_spill] sm:$0xff] %v10631_v57 }
0x1268   :  { %7785 = vmatprep.subr.bf16.mxu1 %v10604_v61 }
0x126b   :  { %7787 = vmatpush1.bf16.msra.mxu1 %v10619_v55 }
0x126c   :  { %7789 = vmatprep.subr.bf16.mxu1 %v10622_v44 }
0x126f   :  { %7791 = vmatpush1.bf16.msra.mxu1 %v10631_v57 }
0x1270   :  { %7817 = vmatprep.subr.bf16.mxu1 %v10254_v27 }
0x12e9   :  { %v4750_v22 = vpop.f32.mrb[36].mxu1  ;;  %v4821_v60 = vpop.f32.mrb[38].mxu0 }
0x12ea   :  { %v4752_v2 = vpop.f32.mrb[37].mxu1  ;;  %v4823_v52 = vpop.f32.mrb[39].mxu0 }
0x12eb   :  { %v4830_v61 = vcombine.low %v4750_v22, %v4752_v2  ;;  %v4831_v5 = vcombine.low %v4821_v60, %v4823_v52  ;;  %v6085_v22 = vld [vmem:[%s10908_s1 + $0x6] ss:$8 sm:$0xf] }
0x12ed   :  { %v4838_v62 = vrot.slane %v4830_v61, %v8809_v7  ;;  %v4845_v11 = vrot.slane %v4831_v5, %v8809_v7 }
0x12ef   :  { %v4846_v38 = vcombine.low %v4838_v62, %v4845_v11 }
0x12f1   :  { %v4853_v57 = vrot.slane %v4846_v38, %v8809_v7 }
0x12f3   :  { %v4855_v60 = vadd.f32 %v6085_v22, %v4853_v57 }
0x1309   :  { %v4986_v55 = vpop.f32.mrb[38].mxu1  ;;  %v5057_v48 = vpop.f32.mrb[40].mxu0 }
0x130a   :  { %v4988_v1 = vpop.f32.mrb[39].mxu1  ;;  %v5059_v37 = vpop.f32.mrb[41].mxu0 }
0x130b   :  { %v5066_v44 = vcombine.low %v4986_v55, %v4988_v1  ;;  %v5067_v36 = vcombine.low %v5057_v48, %v5059_v37 }
0x130d   :  { %v5074_v27 = vrot.slane %v5066_v44, %v8809_v7  ;;  %v5081_v10 = vrot.slane %v5067_v36, %v8809_v7 }
0x130f   :  { %v5082_v61 = vcombine.low %v5074_v27, %v5081_v10  ;;  %v4617_v10 = vmul.f32 %v10465_v19, %v10236_v15  ;;  %v5149_v15 = vld [vmem:[%s10916_s9] sm:$0x3] }
0x1311   :  { %v5089_v11 = vrot.slane %v5082_v61, %v8809_v7 }
0x1313   :  { %v5091_v62 = vadd.f32 %v5089_v11, %v4855_v60 }
0x1315   :  { %v5092_v5 = vmul.f32 0.5, %v5091_v62  ;;  %v5097_v2 = vrot.slane %v5091_v62, 1  ;;  %v5103_v37 = vrot.slane %v5091_v62, 2  ;;  %v5106_v38 = vrot.slane %v5091_v62, 3 }
0x1317   :  { %8053 = vtanh.f32 %v5092_v5  ;;  %v5099_v55 = vmul.f32 0.5, %v5097_v2  ;;  %v5108_v44 = vmul.f32 0.5, %v5106_v38  ;;  %v11379_v38 = vld [vmem:[#allocation34_spill] sm:$0xff] }
0x1319   :  { %8055 = vtanh.f32 %v5099_v55 }
0x131a   :  { %8057 = vtanh.f32 %v5103_v37  ;;  %v11378_v37 = vld [vmem:[#allocation33_spill] sm:$0xff] }
0x131b   :  { %8059 = vtanh.f32 %v5108_v44  ;;  %v11380_v44 = vld [vmem:[#allocation35_spill] sm:$0xff] }
0x1321   :  { %v8054_v52 = vpop.eup %8053 }
0x1322   :  { %v5094_v36 = vadd.f32 1.0, %v8054_v52  ;;  %v11381_v52 = vld [vmem:[#allocation36_spill] sm:$0xff] }
0x1323   :  { %v8056_v48 = vpop.eup %8055 }
0x1324   :  { %v5095_v1 = vmul.f32 0.5, %v5094_v36  ;;  %v5101_v24 = vadd.f32 1.0, %v8056_v48  ;;  %v8058_v27 = vpop.eup %8057  ;;  %v11382_v36 = vld [vmem:[#allocation37_spill] sm:$0xff] }
0x1325   :  { %v8060_v11 = vpop.eup %8059  ;;  %v11386_v48 = vld [vmem:[#allocation41_spill] sm:$0xff] }
0x1326   :  { %v5102_v57 = vmul.f32 0.5, %v5101_v24  ;;  %v5113_v22 = vmul.f32 %v8058_v27, %v5095_v1  ;;  %v5110_v62 = vadd.f32 1.0, %v8060_v11  ;;  %v11377_v24 = vld [vmem:[#allocation32_spill] sm:$0xff]  ;;  %v11387_v1 = vld [vmem:[#allocation42_spill] sm:$0xff]  ;;  %v11390_v27 = vld [vmem:[#allocation45_spill] sm:$0xff] }
0x1328   :  { %v5112_v61 = vmul.f32 %v5102_v57, %v4617_v10  ;;  %v5111_v5 = vmul.f32 0.5, %v5110_v62  ;;  %v11388_v10 = vld [vmem:[#allocation43_spill] sm:$0xff]  ;;  %v11389_v57 = vld [vmem:[#allocation44_spill] sm:$0xff] }
0x132a   :  { %v10647_v60 = vadd.f32 %v5113_v22, %v5112_v61  ;;  %v11391_v22 = vld [vmem:[#allocation46_spill] sm:$0xff]  ;;  %v11405_v61 = vld [vmem:[#allocation61_spill] sm:$0xff] }
0x132c   :  { %8061 = vtanh.f32 %v10647_v60 }
0x1336   :  { %v8062_v2 = vpop.eup %8061 }
0x1337   :  { %v5116_v55 = vmul.f32 %v8062_v2, %v5111_v5 }
0x1339   :  { %5226 = vmatmul.mubr.f32.vlgmr.msra.gmra.mrb[40].mxu1 %v5116_v55 }
0x133a   :  { %7819 = vmatpush1.bf16.msra.mxu1 %v10258_v41  ;;  %5488 = vmatprep.mubr.f32.mxu1 %v11097_v35  ;;  %v5154_v41 = vrot.slane %v5149_v15, %v8845_v18 }
0x133b   :  { %7821 = vmatprep.subr.bf16.mxu1 %v10267_v14  ;;  %v5158_v14 = vrot.slane %v5149_v15, %v8851_v25 }
0x133e   :  { %7823 = vmatpush1.bf16.msra.mxu1 %v10273_v6 }
0x133f   :  { %7825 = vmatprep.subr.bf16.mxu1 %v10278_v4 }
0x1342   :  { %7827 = vmatpush1.bf16.msra.mxu1 %v10290_v31 }
0x1343   :  { %7829 = vmatprep.subr.bf16.mxu1 %v10294_v49 }
0x1346   :  { %7831 = vmatpush1.bf16.msra.mxu1 %v10305_v43 }
0x1347   :  { %7833 = vmatprep.subr.bf16.mxu1 %v10309_v12 }
0x134a   :  { %7835 = vmatpush1.bf16.msra.mxu1 %v10318_v51  ;;  %v11367_v51 = vld [vmem:[#allocation22_spill] sm:$0xff] }
0x134b   :  { %7837 = vmatprep.subr.bf16.mxu1 %v10321_v45  ;;  %v11369_v45 = vld [vmem:[#allocation24_spill] sm:$0xff] }
0x134e   :  { %7839 = vmatpush1.bf16.msra.mxu1 %v10330_v26  ;;  %v11371_v26 = vld [vmem:[#allocation26_spill] sm:$0xff] }
0x134f   :  { %7841 = vmatprep.subr.bf16.mxu1 %v10333_v30  ;;  %v11372_v30 = vld [vmem:[#allocation27_spill] sm:$0xff] }
0x1352   :  { %7843 = vmatpush1.bf16.msra.mxu1 %v10342_v8  ;;  %v11375_v8 = vld [vmem:[#allocation30_spill] sm:$0xff] }
0x1353   :  { %7845 = vmatprep.subr.bf16.mxu1 %v10351_v13 }
0x1356   :  { %7847 = vmatpush1.bf16.msra.mxu1 %v10355_v53 }
0x1357   :  { %7881 = vmatprep.subr.bf16.mxu1 %v10363_v47 }
0x140c   :  { %v5227_v6 = vpop.f32.mrb[40].mxu1 }
0x140d   :  { %v10672_v4 = vadd.f32 %v5227_v6, %v5154_v41  ;;  %v5229_v31 = vpop.f32.mrb[41].mxu1 }
0x140e   :  { %v10674_v49 = vadd.f32 %v5229_v31, %v5158_v14 }
0x140f   :  { %5262 = vst [vmem:[#allocation9 + $0x6] sm:$0x1] %v10672_v4  ;;  %6502 = vmatmul.mubr.f32.vlgmr.msra.gmra.mrb[42].mxu0 %v10672_v4 }
0x1410   :  { %v5233_v43 = vrot.slane %v10674_v49, 7  ;;  %7851 = vmatpush1.bf16.msra.mxu0 %v10261_v29  ;;  %5559 = vmatprep.mubr.f32.mxu0 %v11097_v35  ;;  %v5237_v12 = vrot.slane %v10674_v49, 6  ;;  %v11368_v29 = vld [vmem:[#allocation23_spill] sm:$0xff] }
0x1411   :  { %7853 = vmatprep.subr.bf16.mxu0 %v10269_v56  ;;  %v11370_v56 = vld [vmem:[#allocation25_spill] sm:$0xff] }
0x1412   :  { %5234 = vrot.lane.b32.xlu0 %v5233_v43, %s8247_s27 }
0x1414   :  { %7855 = vmatpush1.bf16.msra.mxu0 %v10283_v33  ;;  %v11373_v33 = vld [vmem:[#allocation28_spill] sm:$0xff] }
0x1415   :  { %7857 = vmatprep.subr.bf16.mxu0 %v10288_v9  ;;  %v11374_v9 = vld [vmem:[#allocation29_spill] sm:$0xff] }
0x1416   :  { %5238 = vrot.lane.b32.xlu0 %v5237_v12, %s8248_s14 }
0x1418   :  { %7859 = vmatpush1.bf16.msra.mxu0 %v10299_v42  ;;  %v11376_v42 = vld [vmem:[#allocation31_spill] sm:$0xff] }
0x1419   :  { %7861 = vmatprep.subr.bf16.mxu0 %v10303_v46  ;;  %v5283_v46 = vld [vmem:[%s10912_s5] sm:$0x1]  ;;  %s6086_s5 = sld [smem:[#allocation2 + $0x7]] }
0x141c   :  { %7863 = vmatpush1.bf16.msra.mxu0 %v11367_v51 }
0x141d   :  { %7865 = vmatprep.subr.bf16.mxu0 %v11368_v29 }
0x141f   :  { %s5266_s25 = ssub.f32 1.0, %s6086_s5 }
0x1420   :  { %7867 = vmatpush1.bf16.msra.mxu0 %v11369_v45 }
0x1421   :  { %7869 = vmatprep.subr.bf16.mxu0 %v11370_v56 }
0x1424   :  { %7871 = vmatpush1.bf16.msra.mxu0 %v11371_v26 }
0x1425   :  { %7873 = vmatprep.subr.bf16.mxu0 %v11372_v30  ;;  %v6087_v30 = vld [vmem:[%s10908_s1 + $0x7] ss:$8 sm:$0xf] }
0x1428   :  { %7875 = vmatpush1.bf16.msra.mxu0 %v11373_v33 }
0x1429   :  { %7877 = vmatprep.subr.bf16.mxu0 %v11374_v9 }
0x142c   :  { %7879 = vmatpush1.bf16.msra.mxu0 %v11375_v8 }
0x142d   :  { %7913 = vmatprep.subr.bf16.mxu0 %v11376_v42 }
0x14e2   :  { %v5350_v13 = vpop.f32.mrb[42].mxu0 }
0x14e3   :  { %v5351_v53 = vadd.f32 %v5350_v13, %v5283_v46  ;;  %v6503_v47 = vpop.f32.mrb[43].mxu0 }
0x14e5   :  { %v5354_v19 = vmax.f32 %v5351_v53, 0.0 }
0x14e7   :  { %5489 = vmatmul.mubr.f32.vlgmr.msra.gmra.mrb[42].mxu1 %v5354_v19  ;;  %5560 = vmatmul.mubr.f32.vlgmr.msra.gmra.mrb[44].mxu0 %v5354_v19 }
0x14e8   :  { %7883 = vmatpush1.bf16.msra.mxu1 %v10372_v50  ;;  %7915 = vmatpush1.bf16.msra.mxu0 %v10374_v40  ;;  %v11383_v50 = vld [vmem:[#allocation38_spill] sm:$0xff]  ;;  %v11384_v40 = vld [vmem:[#allocation39_spill] sm:$0xff] }
0x14e9   :  { %7885 = vmatprep.subr.bf16.mxu1 %v10376_v23  ;;  %7917 = vmatprep.subr.bf16.mxu0 %v11377_v24  ;;  %v11385_v23 = vld [vmem:[#allocation40_spill] sm:$0xff] }
0x14ea   :  { %5724 = vmatprep.mubr.f32.mxu1 %v11097_v35  ;;  %5795 = vmatprep.mubr.f32.mxu0 %v11097_v35 }
0x14ec   :  { %7887 = vmatpush1.bf16.msra.mxu1 %v11378_v37  ;;  %7919 = vmatpush1.bf16.msra.mxu0 %v11379_v38 }
0x14ed   :  { %7889 = vmatprep.subr.bf16.mxu1 %v11380_v44  ;;  %7921 = vmatprep.subr.bf16.mxu0 %v11381_v52 }
0x14f0   :  { %7891 = vmatpush1.bf16.msra.mxu1 %v11382_v36  ;;  %7923 = vmatpush1.bf16.msra.mxu0 %v11383_v50 }
0x14f1   :  { %7893 = vmatprep.subr.bf16.mxu1 %v11384_v40  ;;  %7925 = vmatprep.subr.bf16.mxu0 %v11385_v23 }
0x14f4   :  { %7895 = vmatpush1.bf16.msra.mxu1 %v11386_v48  ;;  %7927 = vmatpush1.bf16.msra.mxu0 %v11387_v1 }
0x14f5   :  { %7897 = vmatprep.subr.bf16.mxu1 %v10414_v3  ;;  %7929 = vmatprep.subr.bf16.mxu0 %v11388_v10  ;;  %v5355_v3 = vstv %s5266_s25 }
0x14f6   :  { %v5357_v50 = vmul.f32 %v5355_v3, %v10647_v60 }
0x14f8   :  { %7899 = vmatpush1.bf16.msra.mxu1 %v11389_v57  ;;  %7931 = vmatpush1.bf16.msra.mxu0 %v11390_v27 }
0x14f9   :  { %7901 = vmatprep.subr.bf16.mxu1 %v10426_v28  ;;  %7933 = vmatprep.subr.bf16.mxu0 %v11391_v22  ;;  %v5356_v28 = vmul.f32 %v5355_v3, %v10672_v4 }
0x14fc   :  { %7903 = vmatpush1.bf16.msra.mxu1 %v10434_v17  ;;  %7935 = vmatpush1.bf16.msra.mxu0 %v10436_v58  ;;  %v11392_v17 = vld [vmem:[#allocation47_spill] sm:$0xff]  ;;  %v11393_v58 = vld [vmem:[#allocation48_spill] sm:$0xff] }
0x14fd   :  { %7905 = vmatprep.subr.bf16.mxu1 %v10440_v63  ;;  %7937 = vmatprep.subr.bf16.mxu0 %v10442_v59  ;;  %v11394_v63 = vld [vmem:[#allocation49_spill] sm:$0xff]  ;;  %v11395_v59 = vld [vmem:[#allocation50_spill] sm:$0xff] }
0x1500   :  { %7907 = vmatpush1.bf16.msra.mxu1 %v10446_v21  ;;  %7939 = vmatpush1.bf16.msra.mxu0 %v10448_v54  ;;  %v11396_v21 = vld [vmem:[#allocation51_spill] sm:$0xff]  ;;  %v11397_v54 = vld [vmem:[#allocation52_spill] sm:$0xff] }
0x1501   :  { %7909 = vmatprep.subr.bf16.mxu1 %v10452_v34  ;;  %7941 = vmatprep.subr.bf16.mxu0 %v10454_v39  ;;  %v11398_v34 = vld [vmem:[#allocation53_spill] sm:$0xff]  ;;  %v11399_v39 = vld [vmem:[#allocation54_spill] sm:$0xff] }
0x1504   :  { %7911 = vmatpush1.bf16.msra.mxu1 %v10459_v16  ;;  %7943 = vmatpush1.bf16.msra.mxu0 %v10461_v20  ;;  %v11400_v16 = vld [vmem:[#allocation55_spill] sm:$0xff]  ;;  %v11401_v20 = vld [vmem:[#allocation56_spill] sm:$0xff] }
0x1505   :  { %7945 = vmatprep.subr.bf16.mxu1 %v10497_v32  ;;  %v11403_v32 = vld [vmem:[#allocation58_spill] sm:$0xff] }
0x1507   :  { %5725 = vmatmul.mubr.f32.vlgmr.msra.gmra.mrb[44].mxu1 %v5356_v28  ;;  %5796 = vmatmul.mubr.f32.vlgmr.msra.gmra.mrb[46].mxu0 %v5356_v28 }
0x1508   :  { %7947 = vmatpush1.bf16.msra.mxu1 %v10505_v0  ;;  %5965 = vmatprep.mubr.f32.mxu1 %v11097_v35  ;;  %v11402_v35 = vld [vmem:[#allocation57_spill] sm:$0xff]  ;;  %v11404_v0 = vld [vmem:[#allocation59_spill] sm:$0xff] }
0x1509   :  { %7949 = vmatprep.subr.bf16.mxu1 %v11392_v17 }
0x150c   :  { %7951 = vmatpush1.bf16.msra.mxu1 %v11393_v58  ;;  %v5889_v58 = vld [vmem:[%s10916_s9] sm:$0x3]  ;;  %s8249_s9 = smov [#allocation9]  }
0x150d   :  { %7953 = vmatprep.subr.bf16.mxu1 %v11394_v63  ;;  %v1535_v63 = vpop.permute.xlu0 %1534  ;;  %v5898_v60 = vrot.slane %v5889_v58, %v8851_v25 }
0x1510   :  { %7955 = vmatpush1.bf16.msra.mxu1 %v11395_v59  ;;  %v5894_v59 = vrot.slane %v5889_v58, %v8845_v18  ;;  %v11406_v18 = vlaneseq }
0x1511   :  { %7957 = vmatprep.subr.bf16.mxu1 %v11396_v21  ;;  %v1539_v21 = vpop.permute.xlu0 %1538 }
0x1512   :  { %vm6025_vm5 = vcmp.lt.s32.totalorder %v11406_v18, 256 }
0x1514   :  { %7959 = vmatpush1.bf16.msra.mxu1 %v11397_v54 }
0x1515   :  { %7961 = vmatprep.subr.bf16.mxu1 %v11398_v34 }
0x1518   :  { %7963 = vmatpush1.bf16.msra.mxu1 %v11399_v39 }
0x1519   :  { %7965 = vmatprep.subr.bf16.mxu1 %v11400_v16 }
0x151c   :  { %7967 = vmatpush1.bf16.msra.mxu1 %v11401_v20 }
0x151d   :  { %7969 = vmatprep.subr.bf16.mxu1 %v11402_v35 }
0x1520   :  { %7971 = vmatpush1.bf16.msra.mxu1 %v11403_v32  ;;  %v2275_v32 = vpop.permute.xlu0 %2274 }
0x1521   :  { %7973 = vmatprep.subr.bf16.mxu1 %v11404_v0 }
0x1524   :  { %7975 = vmatpush1.bf16.msra.mxu1 %v11405_v61 }
0x15ba   :  { %v5490_v11 = vpop.f32.mrb[42].mxu1  ;;  %v5561_v62 = vpop.f32.mrb[44].mxu0 }
0x15bb   :  { %v5492_v5 = vpop.f32.mrb[43].mxu1  ;;  %v5563_v2 = vpop.f32.mrb[45].mxu0 }
0x15bc   :  { %v5570_v55 = vcombine.low %v5490_v11, %v5492_v5  ;;  %v5571_v15 = vcombine.low %v5561_v62, %v5563_v2  ;;  %v2279_v11 = vpop.permute.xlu0 %2278  ;;  %v5241_v62 = vrot.slane %v10674_v49, 5  ;;  %v811_v2 = vpop.xlane.xlu1 %810 }
0x15be   :  { %v5578_v41 = vrot.slane %v5570_v55, %v8809_v7  ;;  %v5585_v14 = vrot.slane %v5571_v15, %v8809_v7  ;;  %v11407_v15 = vld [vmem:[#allocation18_spill] sm:$0xff] }
0x15c0   :  { %v5586_v6 = vcombine.low %v5578_v41, %v5585_v14  ;;  %v2283_v5 = vpop.permute.xlu0 %2282  ;;  %v812_v41 = vsub.f32 %v11407_v15, %v811_v2 }
0x15c2   :  { %v5593_v45 = vrot.slane %v5586_v6, %v8809_v7  ;;  %v813_v6 = vmul.f32 1.442695, %v812_v41 }
0x15c4   :  { %v5595_v9 = vadd.f32 %v6087_v30, %v5593_v45  ;;  %v3015_v55 = vpop.permute.xlu0 %3014 }
0x15c8   :  { %v3755_v14 = vpop.permute.xlu0 %3754 }
0x15da   :  { %v5726_v4 = vpop.f32.mrb[44].mxu1  ;;  %v5797_v31 = vpop.f32.mrb[46].mxu0 }
0x15db   :  { %v5728_v43 = vpop.f32.mrb[45].mxu1  ;;  %v5799_v12 = vpop.f32.mrb[47].mxu0 }
0x15dc   :  { %v5806_v51 = vcombine.low %v5726_v4, %v5728_v43  ;;  %v5807_v29 = vcombine.low %v5797_v31, %v5799_v12  ;;  %v3759_v4 = vpop.permute.xlu0 %3758  ;;  %v1543_v12 = vpop.permute.xlu1 %1542 }
0x15de   :  { %v5814_v56 = vrot.slane %v5806_v51, %v8809_v7  ;;  %v5821_v26 = vrot.slane %v5807_v29, %v8809_v7 }
0x15e0   :  { %v5822_v33 = vcombine.low %v5814_v56, %v5821_v26  ;;  %v3763_v51 = vpop.permute.xlu0 %3762  ;;  %v3019_v45 = vpop.permute.xlu1 %3018  ;;  %v11409_v56 = vld [vmem:[#allocation62_spill] sm:$0xff] }
0x15e1   :  { %v3765_v26 = vsel %vm802_vm1, %v11409_v56, %v3755_v14 }
0x15e2   :  { %v5829_v8 = vrot.slane %v5822_v33, %v8809_v7  ;;  %v3766_v33 = vsel %vm804_vm2, %v3765_v26, %v3759_v4 }
0x15e4   :  { %v5831_v42 = vadd.f32 %v5829_v8, %v5595_v9  ;;  %v4495_v9 = vpop.permute.xlu0 %4494 }
0x15e6   :  { %v5832_v46 = vmul.f32 0.5, %v5831_v42  ;;  %v5837_v13 = vrot.slane %v5831_v42, 1  ;;  %v5843_v47 = vrot.slane %v5831_v42, 2  ;;  %v5846_v19 = vrot.slane %v5831_v42, 3 }
0x15e7   :  { %v3767_v42 = vsel %vm806_vm3, %v3766_v33, %v3763_v51 }
0x15e8   :  { %8063 = vtanh.f32 %v5832_v46  ;;  %v5839_v53 = vmul.f32 0.5, %v5837_v13  ;;  %v5848_v24 = vmul.f32 0.5, %v5846_v19  ;;  %v11410_v46 = vld [vmem:[#allocation60_spill] sm:$0xff] }
0x15e9   :  { %v2285_v13 = vsel %vm802_vm1, %v11410_v46, %v2275_v32  ;;  %v11411_v19 = vld [vmem:[#allocation20_spill] sm:$0xff] }
0x15ea   :  { %8065 = vtanh.f32 %v5839_v53  ;;  %v2286_v53 = vsel %vm804_vm2, %v2285_v13, %v2279_v11 }
0x15eb   :  { %8067 = vtanh.f32 %v5843_v47 }
0x15ec   :  { %8069 = vtanh.f32 %v5848_v24  ;;  %v3025_v24 = vsel %vm802_vm1, %v11411_v19, %v3015_v55 }
0x15f2   :  { %v8064_v37 = vpop.eup %8063 }
0x15f3   :  { %v5834_v38 = vadd.f32 1.0, %v8064_v37  ;;  %v3768_v37 = vsel %vm808_vm4, %v3767_v42, -inf }
0x15f4   :  { %v8066_v44 = vpop.eup %8065 }
0x15f5   :  { %v5835_v52 = vmul.f32 0.5, %v5834_v38  ;;  %v5841_v36 = vadd.f32 1.0, %v8066_v44  ;;  %v8068_v23 = vpop.eup %8067  ;;  %v2287_v38 = vsel %vm806_vm3, %v2286_v53, %v2283_v5  ;;  %v3023_v44 = vpop.permute.xlu1 %3022 }
0x15f6   :  { %v8070_v57 = vpop.eup %8069 }
0x15f7   :  { %v5842_v40 = vmul.f32 0.5, %v5841_v36  ;;  %v5853_v48 = vmul.f32 %v8068_v23, %v5835_v52  ;;  %v5850_v27 = vadd.f32 1.0, %v8070_v57  ;;  %v4499_v52 = vpop.permute.xlu0 %4498  ;;  %v2288_v36 = vsel %vm808_vm4, %v2287_v38, -inf }
0x15f9   :  { %v5852_v1 = vmul.f32 %v5842_v40, %v5357_v50  ;;  %v5851_v22 = vmul.f32 0.5, %v5850_v27  ;;  %v3026_v50 = vsel %vm804_vm2, %v3025_v24, %v3019_v45  ;;  %v11412_v40 = vld [vmem:[#allocation21_spill] sm:$0xff] }
0x15fa   :  { %v4505_v23 = vsel %vm802_vm1, %v11412_v40, %v4495_v9 }
0x15fb   :  { %v5854_v10 = vadd.f32 %v5853_v48, %v5852_v1  ;;  %v3027_v48 = vsel %vm806_vm3, %v3026_v50, %v3023_v44  ;;  %v4506_v1 = vsel %vm804_vm2, %v4505_v23, %v4499_v52 }
0x15fc   :  { %v3028_v57 = vsel %vm808_vm4, %v3027_v48, -inf }
0x15fd   :  { %8071 = vtanh.f32 %v5854_v10 }
0x15fe   :  { %8073 = vpow2.f32 %v813_v6 }
0x1607   :  { %v8072_v28 = vpop.eup %8071 }
0x1608   :  { %v5856_v17 = vmul.f32 %v8072_v28, %v5851_v22  ;;  %v10787_v30 = vpop.eup %8073  ;;  %v5235_v28 = vpop.permute.xlu0 %5234 }
0x1609   :  { %v815_v47 = vsel %vm808_vm4, %v10787_v30, 0.0 }
0x160a   :  { %5966 = vmatmul.mubr.f32.vlgmr.msra.gmra.mrb[46].mxu1 %v5856_v17 }
0x160c   :  { %v5239_v17 = vpop.permute.xlu0 %5238 }
0x16dd   :  { %v5967_v3 = vpop.f32.mrb[46].mxu1 }
0x16de   :  { %v5968_v54 = vadd.f32 %v5967_v3, %v5894_v59  ;;  %v5969_v34 = vpop.f32.mrb[47].mxu1 }
0x16df   :  { %v10767_v39 = vadd.f32 %v5969_v34, %v5898_v60 }
0x16e0   :  { %6002 = vst [vmem:[#allocation9 + $0x7] sm:$0x1] %v5968_v54  ;;  %v6007_v16 = vcombine.low %v5968_v54, %v5854_v10  ;;  %v4503_v10 = vpop.permute.xlu1 %4502  ;;  %v5245_v54 = vsel %vm802_vm1, %v10674_v49, %v5235_v28 }
0x16e1   :  { %v5981_v20 = vrot.slane %v10767_v39, 5  ;;  %v5973_v35 = vrot.slane %v10767_v39, 7  ;;  %v5977_v61 = vrot.slane %v10767_v39, 6  ;;  %v4507_v27 = vsel %vm806_vm3, %v4506_v1, %v4503_v10 }
0x16e2   :  { %v6014_v0 = vrot.slane %v6007_v16, %v8809_v7  ;;  %v4508_v22 = vsel %vm808_vm4, %v4507_v27, -inf  ;;  %v5246_v16 = vsel %vm804_vm2, %v5245_v54, %v5239_v17 }
0x16e3   :  { %5982 = vrot.lane.b32.xlu1 %v5981_v20, %s8246_s6  ;;  %5974 = vrot.lane.b32.xlu0 %v5973_v35, %s8247_s27 }
0x16e4   :  { %v6021_v25 = vrot.slane %v6014_v0, %v8809_v7  ;;  %v11408_v7 = vld [vmem:[#allocation19_spill] sm:$0xff] }
0x16e5   :  { %v1545_v31 = vsel %vm802_vm1, %v11408_v7, %v1535_v63 }
0x16e6   :  { %6027 = vst.msk [vmem:[#allocation12] sm:$0x3] %vm6025_vm5, %v6021_v25  ;;  %v1546_v43 = vsel %vm804_vm2, %v1545_v31, %v1539_v21 }
0x16e7   :  { %5978 = vrot.lane.b32.xlu0 %v5977_v61, %s8248_s14  ;;  %v1547_v29 = vsel %vm806_vm3, %v1546_v43, %v1543_v12 }
0x16e8   :  { %v1548_v8 = vsel %vm808_vm4, %v1547_v29, -inf }
0x16eb   :  { %5242 = vrot.lane.b32.xlu0 %v5241_v62, %s8246_s6  ;;  %s6034_s6 = sshll.u32 %s8249_s9, 4  ;;  %s6035_s6 = int_to_ptr.vmem [resolvable:$true] %s6034_s6 }
0x16ec   :  { %s8161_s27 = scalar_lea.vmem %s6035_s6, 128  ;;  %p8166_p8 = scmp.lt.s32.totalorder %s6035_s6, %s6035_s6 }
0x16ed   :  { %p8162_p7 = scmp.ne.s32.totalorder %s6035_s6, %s8161_s27  ;;  %p8167_p9 = scmp.lt.s32.totalorder %s8161_s27, %s8161_s27 }
0x16ef   :  { %p8168_p10 = por %p8167_p9, %p8166_p8 }
0x16f1   :  { %p8169_p11 = pnand %p8168_p10, %p8162_p7 }
0x1707   :  { %1549 = vmax.xlane.f32.xlu1 %v1548_v8 }
0x170a   :  { %816 = vadd.xlane.f32.xlu0 %v815_v47 }
0x170b   :  { %3769 = vmax.xlane.f32.xlu1 %v3768_v37 }
0x170e   :  { %2289 = vmax.xlane.f32.xlu0 %v2288_v36 }
0x1712   :  { %3029 = vmax.xlane.f32.xlu0 %v3028_v57 }
0x1716   :  { %4509 = vmax.xlane.f32.xlu0 %v4508_v22 }
0x1755   :  { %v5975_v58 = vpop.permute.xlu0 %5974  ;;  %v5983_v60 = vpop.permute.xlu1 %5982 }
0x1756   :  { %v5985_v63 = vsel %vm802_vm1, %v10767_v39, %v5975_v58 }
0x1759   :  { %v5979_v59 = vpop.permute.xlu0 %5978 }
0x175a   :  { %v5986_v3 = vsel %vm804_vm2, %v5985_v63, %v5979_v59 }
0x175b   :  { %v5987_v21 = vsel %vm806_vm3, %v5986_v3, %v5983_v60 }
0x175c   :  { %v5988_v34 = vsel %vm808_vm4, %v5987_v21, -inf }
0x175d   :  { %5989 = vmax.xlane.f32.xlu0 %v5988_v34  ;;  %v5243_v20 = vpop.permute.xlu0 %5242 }
0x175e   :  { %v5247_v35 = vsel %vm806_vm3, %v5246_v16, %v5243_v20 }
0x175f   :  { %v5248_v32 = vsel %vm808_vm4, %v5247_v35, -inf }
0x1760   :  { %5249 = vmax.xlane.f32.xlu1 %v5248_v32 }
0x1794   :  { %v1550_v39 = vpop.xlane.xlu1 %1549 }
0x1795   :  { %v1551_v0 = vsub.f32 %v1547_v29, %v1550_v39 }
0x1797   :  { %v1552_v18 = vmul.f32 1.442695, %v1551_v0  ;;  %v817_v25 = vpop.xlane.xlu0 %816 }
0x1798   :  { %8075 = vrcp.f32 %v817_v25  ;;  %v3770_v61 = vpop.xlane.xlu1 %3769 }
0x1799   :  { %8077 = vpow2.f32 %v1552_v18  ;;  %v3771_v11 = vsub.f32 %v3767_v42, %v3770_v61 }
0x179b   :  { %v2290_v49 = vpop.xlane.xlu0 %2289  ;;  %v3772_v5 = vmul.f32 1.442695, %v3771_v11 }
0x179c   :  { %v2291_v62 = vsub.f32 %v2287_v38, %v2290_v49 }
0x179e   :  { %v2292_v2 = vmul.f32 1.442695, %v2291_v62 }
0x179f   :  { %v3030_v55 = vpop.xlane.xlu0 %3029 }
0x17a0   :  { %8079 = vpow2.f32 %v2292_v2  ;;  %v3031_v15 = vsub.f32 %v3027_v48, %v3030_v55 }
0x17a1   :  { %8081 = vpow2.f32 %v3772_v5 }
0x17a2   :  { %v8076_v41 = vpop.eup %8075  ;;  %v3032_v14 = vmul.f32 1.442695, %v3031_v15 }
0x17a3   :  { %v10820_v6 = vpop.eup %8077  ;;  %v819_v4 = vmul.f32 %v8076_v41, %v817_v25  ;;  %v4510_v7 = vpop.xlane.xlu0 %4509 }
0x17a4   :  { %8083 = vpow2.f32 %v3032_v14  ;;  %v4511_v31 = vsub.f32 %v4507_v27, %v4510_v7  ;;  %v1554_v43 = vsel %vm808_vm4, %v10820_v6, 0.0 }
0x17a5   :  { %v820_v12 = vsub.f32 2.0, %v819_v4  ;;  %1555 = vadd.xlane.f32.xlu1 %v1554_v43 }
0x17a6   :  { %v4512_v51 = vmul.f32 1.442695, %v4511_v31 }
0x17a7   :  { %v821_v29 = vmul.f32 %v8076_v41, %v820_v12 }
0x17a8   :  { %8085 = vpow2.f32 %v4512_v51 }
0x17a9   :  { %v822_v45 = vmul.f32 %v10787_v30, %v821_v29 }
0x17aa   :  { %v10825_v56 = vpop.eup %8079 }
0x17ab   :  { %824 = vst.msk [vmem:[#allocation10] sm:$0xf] %vm808_vm4, %v822_v45  ;;  %v2294_v26 = vsel %vm808_vm4, %v10825_v56, 0.0  ;;  %v10830_v33 = vpop.eup %8081 }
0x17ac   :  { %2295 = vadd.xlane.f32.xlu0 %v2294_v26  ;;  %v3774_v8 = vsel %vm808_vm4, %v10830_v33, 0.0 }
0x17ae   :  { %v10832_v9 = vpop.eup %8083 }
0x17af   :  { %v3034_v42 = vsel %vm808_vm4, %v10832_v9, 0.0 }
0x17b0   :  { %3775 = vadd.xlane.f32.xlu0 %v3774_v8  ;;  %3035 = vadd.xlane.f32.xlu1 %v3034_v42 }
0x17b2   :  { %v10838_v30 = vpop.eup %8085 }
0x17b3   :  { %v4514_v46 = vsel %vm808_vm4, %v10838_v30, 0.0 }
0x17b4   :  { %4515 = vadd.xlane.f32.xlu1 %v4514_v46 }
0x17ea   :  { %v5990_v13 = vpop.xlane.xlu0 %5989 }
0x17eb   :  { %v5991_v53 = vsub.f32 %v5987_v21, %v5990_v13 }
0x17ed   :  { %v5992_v47 = vmul.f32 1.442695, %v5991_v53  ;;  %v5250_v19 = vpop.xlane.xlu1 %5249 }
0x17ee   :  { %v5251_v24 = vsub.f32 %v5247_v35, %v5250_v19 }
0x17ef   :  { %8087 = vpow2.f32 %v5992_v47 }
0x17f0   :  { %v5252_v37 = vmul.f32 1.442695, %v5251_v24 }
0x17f2   :  { %8089 = vpow2.f32 %v5252_v37 }
0x17f9   :  { %v10842_v38 = vpop.eup %8087 }
0x17fa   :  { %v5994_v44 = vsel %vm808_vm4, %v10842_v38, 0.0 }
0x17fb   :  { %5995 = vadd.xlane.f32.xlu1 %v5994_v44 }
0x17fc   :  { %v10846_v52 = vpop.eup %8089 }
0x17fd   :  { %v5254_v36 = vsel %vm808_vm4, %v10846_v52, 0.0 }
0x17fe   :  { %5255 = vadd.xlane.f32.xlu0 %v5254_v36 }
0x17ff   :  { %8172 = shalt.err (!%p8169_p11)
}
0x1800   :  { %s8173_s3 = scalar_lea.hbm %s10917_s10, 128 }
0x1801   :  { %p8174_p12 = scmp.ne.s32.totalorder %s10917_s10, %s8173_s3  ;;  %p8177_p13 = scmp.lt.u32.totalorder %s8173_s3, %s10917_s10 }
0x1803   :  { %p8179_p0 = pnand %p8177_p13, %p8174_p12 }
0x1805   :  { %8182 = shalt.err (!%p8179_p0)
}
0x1806   :  { %6037 = dma.vmem_to_hbm [thread:$0]  %s6035_s6, 128, %s10917_s10, [#allocation4]  }
0x1807   :  { %s8250_s10 = smov [#allocation10]   ;;  %s8251_s7 = smov [#allocation12]  }
0x1808   :  { %s6043_s20 = sshll.u32 %s8250_s10, 4  ;;  %s6056_s17 = sshll.u32 %s8251_s7, 4  ;;  %s6044_s20 = int_to_ptr.vmem [resolvable:$true] %s6043_s20  ;;  %s10875_s17 = int_to_ptr.vmem [resolvable:$true] %s6056_s17 }
0x1809   :  { %s8183_s18 = scalar_lea.vmem %s6044_s20, 512  ;;  %p8188_p2 = scmp.lt.s32.totalorder %s6044_s20, %s6044_s20 }
0x180a   :  { %p8184_p1 = scmp.ne.s32.totalorder %s6044_s20, %s8183_s18  ;;  %p8189_p3 = scmp.lt.s32.totalorder %s8183_s18, %s8183_s18 }
0x180c   :  { %p8190_p4 = por %p8189_p3, %p8188_p2 }
0x180e   :  { %p8191_p5 = pnand %p8190_p4, %p8184_p1 }
0x1832   :  { %v1556_v50 = vpop.xlane.xlu1 %1555 }
0x1833   :  { %8091 = vrcp.f32 %v1556_v50 }
0x1839   :  { %v2296_v40 = vpop.xlane.xlu0 %2295 }
0x183a   :  { %8093 = vrcp.f32 %v2296_v40 }
0x183d   :  { %v8092_v23 = vpop.eup %8091  ;;  %v3036_v48 = vpop.xlane.xlu1 %3035 }
0x183e   :  { %v3776_v1 = vpop.xlane.xlu0 %3775  ;;  %v1558_v10 = vmul.f32 %v8092_v23, %v1556_v50  ;;  %8095 = vrcp.f32 %v3036_v48 }
0x183f   :  { %8097 = vrcp.f32 %v3776_v1 }
0x1840   :  { %v1559_v57 = vsub.f32 2.0, %v1558_v10 }
0x1841   :  { %v4516_v27 = vpop.xlane.xlu1 %4515 }
0x1842   :  { %v1560_v22 = vmul.f32 %v8092_v23, %v1559_v57  ;;  %8099 = vrcp.f32 %v4516_v27 }
0x1844   :  { %v8094_v28 = vpop.eup %8093  ;;  %v1561_v17 = vmul.f32 %v10820_v6, %v1560_v22 }
0x1845   :  { %v2298_v58 = vmul.f32 %v8094_v28, %v2296_v40 }
0x1846   :  { %1564 = vst.msk [vmem:[#allocation10 + $0x4] sm:$0xf] %vm808_vm4, %v1561_v17 }
0x1847   :  { %v2299_v63 = vsub.f32 2.0, %v2298_v58 }
0x1848   :  { %v8096_v59 = vpop.eup %8095 }
0x1849   :  { %v8098_v60 = vpop.eup %8097  ;;  %v2300_v3 = vmul.f32 %v8094_v28, %v2299_v63  ;;  %v3038_v21 = vmul.f32 %v8096_v59, %v3036_v48 }
0x184a   :  { %v3778_v54 = vmul.f32 %v8098_v60, %v3776_v1 }
0x184b   :  { %v2301_v34 = vmul.f32 %v10825_v56, %v2300_v3  ;;  %v3039_v16 = vsub.f32 2.0, %v3038_v21 }
0x184c   :  { %v8100_v20 = vpop.eup %8099  ;;  %v3779_v35 = vsub.f32 2.0, %v3778_v54 }
0x184d   :  { %2304 = vst.msk [vmem:[#allocation10 + $0x8] sm:$0xf] %vm808_vm4, %v2301_v34  ;;  %v3040_v32 = vmul.f32 %v8096_v59, %v3039_v16  ;;  %v4518_v39 = vmul.f32 %v8100_v20, %v4516_v27 }
0x184e   :  { %v3780_v0 = vmul.f32 %v8098_v60, %v3779_v35 }
0x184f   :  { %v3041_v18 = vmul.f32 %v10832_v9, %v3040_v32  ;;  %v4519_v25 = vsub.f32 2.0, %v4518_v39 }
0x1850   :  { %v3781_v61 = vmul.f32 %v10830_v33, %v3780_v0 }
0x1851   :  { %3044 = vst.msk [vmem:[#allocation10 + $0xc] sm:$0xf] %vm808_vm4, %v3041_v18  ;;  %v4520_v11 = vmul.f32 %v8100_v20, %v4519_v25 }
0x1852   :  { %3784 = vst.msk [vmem:[#allocation10 + $0x10] sm:$0xf] %vm808_vm4, %v3781_v61 }
0x1853   :  { %v4521_v49 = vmul.f32 %v10838_v30, %v4520_v11 }
0x1855   :  { %4524 = vst.msk [vmem:[#allocation10 + $0x14] sm:$0xf] %vm808_vm4, %v4521_v49 }
0x1888   :  { %v5996_v62 = vpop.xlane.xlu1 %5995 }
0x1889   :  { %8101 = vrcp.f32 %v5996_v62 }
0x188b   :  { %v5256_v5 = vpop.xlane.xlu0 %5255 }
0x188c   :  { %8103 = vrcp.f32 %v5256_v5 }
0x1893   :  { %v8102_v2 = vpop.eup %8101 }
0x1894   :  { %v5998_v55 = vmul.f32 %v8102_v2, %v5996_v62 }
0x1896   :  { %v8104_v15 = vpop.eup %8103  ;;  %v5999_v41 = vsub.f32 2.0, %v5998_v55 }
0x1897   :  { %v5258_v14 = vmul.f32 %v8104_v15, %v5256_v5 }
0x1898   :  { %v6000_v6 = vmul.f32 %v8102_v2, %v5999_v41 }
0x1899   :  { %v5259_v4 = vsub.f32 2.0, %v5258_v14 }
0x189a   :  { %v6001_v7 = vmul.f32 %v10842_v38, %v6000_v6 }
0x189b   :  { %v5260_v31 = vmul.f32 %v8104_v15, %v5259_v4 }
0x189c   :  { %6004 = vst.msk [vmem:[#allocation10 + $0x1c] sm:$0xf] %vm808_vm4, %v6001_v7 }
0x189d   :  { %v5261_v43 = vmul.f32 %v10846_v52, %v5260_v31 }
0x189f   :  { %5264 = vst.msk [vmem:[#allocation10 + $0x18] sm:$0xf] %vm808_vm4, %v5261_v43 }
0x18a0   :  { %8194 = shalt.err (!%p8191_p5)
}
0x18a1   :  { %s8195_s22 = scalar_lea.hbm %s10918_s11, 512 }
0x18a2   :  { %p8196_p6 = scmp.ne.s32.totalorder %s10918_s11, %s8195_s22  ;;  %p8199_p7 = scmp.lt.u32.totalorder %s8195_s22, %s10918_s11 }
0x18a4   :  { %p8201_p8 = pnand %p8199_p7, %p8196_p6 }
0x18a6   :  { %8204 = shalt.err (!%p8201_p8)
}
0x18a7   :  { %s8252_s25 = smov 64   ;;  %s8253_s26 = smov 4  }
0x18a8   :  { %6049 = dma.vmem_to_hbm [thread:$0]  %s6044_s20, 512, %s10918_s11, [#allocation11], %s8252_s25, %s8252_s25, %s8253_s26  }
0x18a9   :  { %s8205_s29 = scalar_lea.vmem %s10875_s17, 32  ;;  %p8210_p10 = scmp.lt.s32.totalorder %s10875_s17, %s10875_s17 }
0x18aa   :  { %p8206_p9 = scmp.ne.s32.totalorder %s10875_s17, %s8205_s29  ;;  %p8211_p11 = scmp.lt.s32.totalorder %s8205_s29, %s8205_s29 }
0x18ac   :  { %p8212_p12 = por %p8211_p11, %p8210_p10 }
0x18ae   :  { %p8213_p13 = pnand %p8212_p12, %p8206_p9 }
0x18b0   :  { %8216 = shalt.err (!%p8213_p13)
}
0x18b1   :  { %s8217_s27 = scalar_lea.hbm %s10919_s12, 32 }
0x18b2   :  { %p8218_p0 = scmp.ne.s32.totalorder %s10919_s12, %s8217_s27  ;;  %p8221_p1 = scmp.lt.u32.totalorder %s8217_s27, %s10919_s12 }
0x18b4   :  { %p8223_p2 = pnand %p8221_p1, %p8218_p0 }
0x18b6   :  { %8226 = shalt.err (!%p8223_p2)
}
0x18b7   :  { %6059 = dma.vmem_to_hbm [thread:$0]  %s10875_s17, 32, %s10919_s12, [#allocation11]  }
0x18b8   :  { %8233 = dma.done.wait [#allocation4], 128  }
0x18b9   :  { %8234 = vsyncadd [#allocation4], 4294967168 }
0x18ba   :  { %8235 = dma.done.wait [#allocation11], 544  }
0x18bb   :  { %8236 = vsyncadd [#allocation11], 4294966752 }
0x18bc   :  { %6069 = vsyncpa [#allocation3], 1 }
0x18bd   :  { %6070 = vsyncpa [#allocation8], 1 }
0x18be   :  { %6071 = vsyncpa [#allocation4], 1 }
0x18bf   :  { %6072 = vsyncpa [#allocation11], 1 }
0x18c0   :  { %6073 = vsyncpa [#allocation5], 1 }

</bundles_post_ra>
